<compile_context>
chip_gen: v7x
topology: tpu7x:2x2x1
jax: 0.10.0
libtpu: 0.0.40
codegen_flags: <defaults>
</compile_context>

<pallas_src>
import functools

import jax
import jax.numpy as jnp
from jax.experimental import pallas as pl
from jax.experimental.pallas import tpu as pltpu


def _round_up(x, n):
    return ((x + n - 1) // n) * n


def _vmem_budget_bytes():
    """~75% of this generation's per-core VMEM (48 MiB v7x, 96 MiB v5e/v6e)."""
    cap = 64 * 1024 * 1024  # conservative default = v7x-sized VMEM
    try:
        cap = int(getattr(pltpu.get_tpu_info(), "vmem_capacity_bytes", cap))
    except Exception:
        pass
    return (3 * cap) // 4


def _vmem_estimate(tile_m, tile_v, h, rows_per_core, hidden_resident):
    """Conservative in-VMEM bytes (all blocks counted double-buffered)."""
    lane = 128
    hid = 2 * (rows_per_core if hidden_resident else tile_m) * h * 2   # bf16
    w = 2 * h * tile_v * 2                                             # bf16
    tgt = 2 * rows_per_core * lane * 4                                 # int32, lane-padded
    bias = 2 * 8 * tile_v * 4
    out = 2 * tile_m * lane * 4
    acc = rows_per_core * lane * 4                                     # merged m/l/t scratch
    tmp = 3 * tile_m * tile_v * 4                                      # logits/exp temporaries
    return hid + w + tgt + bias + out + acc + tmp


def _make_kernel(tile_m, tile_v, hidden_resident):
    def kernel(h_ref, tgt_ref, w_ref, b_ref, out_ref, acc_ref):
        # h_ref:   (rows_per_core, H) bf16 resident  OR (TILE_M, H) streamed
        # tgt_ref: (rows_per_core, 1) int32 next-token ids (per-core resident)
        # w_ref:   (H, TILE_V)  bf16 LM-head weight slab (streamed once per core)
        # b_ref:   (1, TILE_V)  f32  bias slab
        # out_ref: (TILE_M, 1)  f32  per-row log prob of the target token
        # acc_ref: (num_m_in, TILE_M, 3) f32 merged online-LSE scratch
        #          lane 0 = running max, lane 1 = running sum, lane 2 = target logit
        v_idx = pl.program_id(1)            # vocab slab (reduction)
        m_idx = pl.program_id(2)            # row tile within this core's shard
        num_v = pl.num_programs(1)

        row0 = pl.multiple_of(m_idx * tile_m, tile_m)
        if hidden_resident:
            h = h_ref[pl.ds(row0, tile_m), :]
        else:
            h = h_ref[...]
        tgt = tgt_ref[pl.ds(row0, tile_m), :]                       # (TILE_M, 1)

        @pl.when(v_idx == 0)
        def _init():
            lane3 = jax.lax.broadcasted_iota(jnp.int32, (tile_m, 3), 1)
            acc_ref[m_idx] = jnp.where(lane3 == 0, -jnp.inf, 0.0).astype(jnp.float32)

        # bf16 x bf16 -> f32 on the MXU; bias added in f32.
        logits = jnp.dot(h, w_ref[...],
                         preferred_element_type=jnp.float32) + b_ref[...]

        acc = acc_ref[m_idx]                                        # (TILE_M, 3)
        m_prev = acc[:, 0:1]
        l_prev = acc[:, 1:2]
        t_prev = acc[:, 2:3]

        # Online log-sum-exp (f32 accumulators).
        # TODO(synk): on v6e/v7x the exp could run in bf16 on the EUP (halves
        # EUP work for small H); kept f32 for v5e compatibility / accuracy.
        m_new = jnp.maximum(m_prev, jnp.max(logits, axis=-1, keepdims=True))
        alpha = jnp.exp(m_prev - m_new)
        p_sum = jnp.sum(jnp.exp(logits - m_new), axis=-1, keepdims=True)
        l_new = alpha * l_prev + p_sum

        # Target gather: compare LOCAL lane ids against (tgt - v*TILE_V); the
        # match falls in exactly one vocab slab, every other slab adds 0.
        local_tgt = tgt - v_idx * tile_v                            # (TILE_M, 1)
        lane_ids = jax.lax.broadcasted_iota(jnp.int32, logits.shape, 1)
        t_new = t_prev + jnp.sum(
            jnp.where(lane_ids == local_tgt, logits, 0.0), axis=-1, keepdims=True)

        lane3 = jax.lax.broadcasted_iota(jnp.int32, (tile_m, 3), 1)
        acc_ref[m_idx] = jnp.where(lane3 == 0, m_new,
                                   jnp.where(lane3 == 1, l_new, t_new))

        # Running log-prob estimate: every HBM writeback of this block carries
        # defined data; the final vocab slab's value is the true answer.
        # TODO(synk): a lane-dense output slab would avoid masked vst.msk
        # stores; absolute bytes are tiny (M*4B) so left as-is.
        out_ref[...] = t_new - (m_new + jnp.log(l_new))

    return kernel


@functools.partial(jax.jit, static_argnums=(1,))
def actor_forward(sequences, num_actions, embed_table, w_head, b_head):
    """JAX/Pallas equivalent of Actor.forward (toy LM: embed + linear head).

    sequences: (B, S) int32 token ids
    returns:   (B, num_actions) float32 action log probs
    """
    B, S = sequences.shape
    V, H = embed_table.shape
    assert V % 128 == 0, "vocab must be lane-padded to a multiple of 128"
    M = B * (S - 1)

    # ---- tile / residency selection ------------------------------------
    if M >= 512:
        TILE_M = 512
    elif M >= 256:
        TILE_M = 256
    else:
        TILE_M = _round_up(M, 8)
    M_pad = _round_up(M, TILE_M)
    num_m = M_pad // TILE_M
    if num_m >= 2 and num_m % 2:           # make row-tile count even so the
        num_m += 1                         # 2-way core split divides it
        M_pad = num_m * TILE_M
    num_m_out = 2 if num_m % 2 == 0 else 1  # row-super axis -> v7x TensorCores
    num_m_in = num_m // num_m_out
    rows_per_core = num_m_in * TILE_M

    budget = _vmem_budget_bytes()
    TILE_V = hidden_resident = est = None
    for resident in (True, False):
        for tv in (1024, 512, 256, 128):
            if V % tv:
                continue
            e = _vmem_estimate(TILE_M, tv, H, rows_per_core, resident)
            if e <= budget:
                TILE_V, hidden_resident, est = tv, resident, e
                break
        if TILE_V is not None:
            break
    if TILE_V is None:                      # last resort: smallest tiles, streamed
        TILE_V, hidden_resident = 128, False
        est = _vmem_estimate(TILE_M, TILE_V, H, rows_per_core, False)
    num_v = V // TILE_V
    vmem_limit = int(min(budget, max(int(1.25 * est), 32 * 1024 * 1024)))

    # ---- glue (plain JAX, fused under this jit): bf16 embedding lookup,
    # flatten + pad rows.  Padded rows yield garbage log-probs, sliced off.
    hidden = embed_table.astype(jnp.bfloat16)[sequences[:, :-1]]    # (B, S-1, H)
    hidden = jnp.pad(hidden.reshape(M, H), ((0, M_pad - M), (0, 0)))
    targets = sequences[:, 1:].reshape(M, 1).astype(jnp.int32)
    targets = jnp.pad(targets, ((0, M_pad - M), (0, 0)))
    w_bf16 = w_head.astype(jnp.bfloat16)
    bias = b_head.reshape(1, V).astype(jnp.float32)

    if hidden_resident:
        # One DMA per core: this core's whole row shard stays in VMEM.
        hidden_spec = pl.BlockSpec((rows_per_core, H), lambda mo, v, mi: (mo, 0))
    else:
        # Streaming fallback for large M; extra buffer hides the small DMAs.
        hidden_spec = pl.BlockSpec((TILE_M, H),
                                   lambda mo, v, mi: (mo * num_m_in + mi, 0),
                                   pipeline_mode=pl.Buffered(3))

    cost = pl.CostEstimate(
        flops=2 * M_pad * H * V,
        transcendentals=M_pad * V,
        bytes_accessed=(num_m_out * H * V * 2                       # W once per core
                        + (M_pad * H * 2 if hidden_resident
                           else num_v * M_pad * H * 2)               # hidden
                        + M_pad * 4 + V * 4 + num_v * M_pad * 4),    # tgt/bias/out
    )

    out = pl.pallas_call(
        _make_kernel(TILE_M, TILE_V, hidden_resident),
        out_shape=jax.ShapeDtypeStruct((M_pad, 1), jnp.float32),
        grid_spec=pltpu.PrefetchScalarGridSpec(
            num_scalar_prefetch=0,
            grid=(num_m_out, num_v, num_m_in),      # rows-super | vocab | rows
            in_specs=[
                hidden_spec,
                pl.BlockSpec((rows_per_core, 1), lambda mo, v, mi: (mo, 0)),  # targets
                pl.BlockSpec((H, TILE_V), lambda mo, v, mi: (0, v)),          # W slab
                pl.BlockSpec((1, TILE_V), lambda mo, v, mi: (0, v)),          # bias slab
            ],
            out_specs=pl.BlockSpec(
                (TILE_M, 1), lambda mo, v, mi: (mo * num_m_in + mi, 0)),
            scratch_shapes=[pltpu.VMEM((num_m_in, TILE_M, 3), jnp.float32)],
        ),
        compiler_params=pltpu.CompilerParams(
            # Row-super axis sharded across v7x's two TensorCores; the vocab
            # reduction stays sequential so no cross-core LSE combine is needed.
            dimension_semantics=("parallel", "arbitrary", "arbitrary"),
            vmem_limit_bytes=vmem_limit,
        ),
        cost_estimate=cost,
    )(hidden, targets, w_bf16, bias)

    log_probs = out[:M, 0].reshape(B, S - 1)
    return log_probs[:, -num_actions:]


def actor_forward_ref(sequences, num_actions, embed_table, w_head, b_head):
    """Pure-JAX reference (same bf16 matmul operands, f32 softmax)."""
    hidden = embed_table.astype(jnp.bfloat16)[sequences[:, :-1]]    # (B, S-1, H)
    logits = jnp.einsum('bsh,hv->bsv', hidden, w_head.astype(jnp.bfloat16),
                        preferred_element_type=jnp.float32) + b_head
    logp = jax.nn.log_softmax(logits.astype(jnp.float32), axis=-1)
    tgt = sequences[:, 1:]
    gathered = jnp.take_along_axis(logp, tgt[..., None], axis=-1)[..., 0]
    return gathered[:, -num_actions:]


if __name__ == "__main__":
    key = jax.random.PRNGKey(0)
    # M = 2*129 = 258 rows -> 2 row tiles (one per shard of the outer parallel
    # axis), V = 2048 -> 2 vocab slabs: exercises the online LSE across slabs,
    # the per-core resident hidden/targets, and the row-super split.
    B, S, H, V = 2, 130, 128, 2048
    num_actions = 6

    k_seq, k_emb, k_w, k_b = jax.random.split(key, 4)
    sequences = jax.random.randint(k_seq, (B, S), 0, V, dtype=jnp.int32)
    embed_table = jax.random.normal(k_emb, (V, H), dtype=jnp.float32) * 0.1
    w_head = jax.random.normal(k_w, (H, V), dtype=jnp.float32) * 0.1
    b_head = jax.random.normal(k_b, (V,), dtype=jnp.float32) * 0.01

    out = actor_forward(sequences, num_actions, embed_table, w_head, b_head)
    out = jax.block_until_ready(out)

    ref = actor_forward_ref(sequences, num_actions, embed_table, w_head, b_head)
    assert out.shape == (B, num_actions), out.shape
    assert jnp.allclose(out, ref, atol=1e-2, rtol=1e-2), (out, ref)

    # TODO(synk): Actor.generate (autoregressive decoding + pad/eos mask logic)
    # is host-side control flow over the wrapped model, not a kernel hot path;
    # only forward() is implemented as a kernel.
    print("KERNEL_OK")
</pallas_src>

<mosaic_0001>
module attributes {stable_mosaic.version = 11 : i64} {
  func.func @kernel(%arg0: i32, %arg1: i32, %arg2: i32, %arg3: memref<256x128xbf16, #tpu.memory_space<vmem>>, %arg4: memref<256x1xi32, #tpu.memory_space<vmem>>, %arg5: memref<128x1024xbf16, #tpu.memory_space<vmem>>, %arg6: memref<1x1024xf32, #tpu.memory_space<vmem>>, %arg7: memref<256x1xf32, #tpu.memory_space<vmem>>, %arg8: memref<1x256x3xf32, #tpu.memory_space<vmem>>) attributes {dimension_semantics = [#tpu.dimension_semantics<parallel>, #tpu.dimension_semantics<arbitrary>, #tpu.dimension_semantics<arbitrary>], iteration_bounds = array<i64: 2, 2, 1>, scalar_prefetch = 0 : i64, scratch_operands = 1 : i64, tpu.core_type = #tpu.core_type<tc>, window_params = [{transform_indices = @transform_0, window_bounds = array<i64: 256, 128>}, {transform_indices = @transform_1, window_bounds = array<i64: 256, 1>}, {transform_indices = @transform_2, window_bounds = array<i64: 128, 1024>}, {transform_indices = @transform_3, window_bounds = array<i64: 1, 1024>}, {transform_indices = @transform_4, window_bounds = array<i64: 256, 1>}]} {
    %c256_i32 = arith.constant 256 : i32
    %0 = arith.muli %arg2, %c256_i32 : i32
    %1 = tpu.assume_multiple %0, 256 : i32
    %2 = arith.index_cast %1 : i32 to index
    %c0 = arith.constant 0 : index
    %3 = vector.load %arg3[%2, %c0] : memref<256x128xbf16, #tpu.memory_space<vmem>>, vector<256x128xbf16>
    %4 = arith.index_cast %1 : i32 to index
    %c0_0 = arith.constant 0 : index
    %5 = vector.load %arg4[%4, %c0_0] : memref<256x1xi32, #tpu.memory_space<vmem>>, vector<256x1xi32>
    %c0_i32 = arith.constant 0 : i32
    %6 = arith.cmpi eq, %arg1, %c0_i32 : i32
    %7 = arith.extui %6 : i1 to i32
    %c0_i32_1 = arith.constant 0 : i32
    %8 = arith.cmpi ne, %7, %c0_i32_1 : i32
    scf.if %8 {
      %64 = tpu.iota {dimensions = array<i32: 1>} : vector<256x3xi32>
      %c0_i32_17 = arith.constant 0 : i32
      %65 = vector.broadcast %c0_i32_17 : i32 to vector<256x3xi32>
      %66 = arith.cmpi eq, %64, %65 : vector<256x3xi32>
      %cst_18 = arith.constant 0xFF800000 : f32
      %cst_19 = arith.constant 0.000000e+00 : f32
      %67 = vector.broadcast %cst_18 : f32 to vector<256x3xf32>
      %68 = vector.broadcast %cst_19 : f32 to vector<256x3xf32>
      %69 = arith.select %66, %67, %68 : vector<256x3xi1>, vector<256x3xf32>
      %70 = arith.index_cast %arg2 : i32 to index
      %c0_20 = arith.constant 0 : index
      %c0_21 = arith.constant 0 : index
      %71 = vector.load %arg8[%70, %c0_20, %c0_21] : memref<1x256x3xf32, #tpu.memory_space<vmem>>, vector<1x256x3xf32>
      %72 = vector.shape_cast %71 : vector<1x256x3xf32> to vector<256x3xf32>
      %73 = vector.shape_cast %69 : vector<256x3xf32> to vector<1x256x3xf32>
      tpu.vector_store %arg8[%70, %c0_20, %c0_21], %73 {strides = array<i32>} : memref<1x256x3xf32, #tpu.memory_space<vmem>>, vector<1x256x3xf32>,
    } else {
    }
    %c0_2 = arith.constant 0 : index
    %c0_3 = arith.constant 0 : index
    %9 = vector.load %arg5[%c0_2, %c0_3] : memref<128x1024xbf16, #tpu.memory_space<vmem>>, vector<128x1024xbf16>
    %cst = arith.constant dense<0.000000e+00> : vector<256x1024xf32>
    %10 = tpu.matmul %3, %9, %cst {dimension_numbers = #tpu.dot_dimension_numbers<[1], [0], [0], [1], [0, 0, 1, 1], [], []>} : vector<256x128xbf16>, vector<128x1024xbf16>, vector<256x1024xf32> -> vector<256x1024xf32>
    %c0_4 = arith.constant 0 : index
    %c0_5 = arith.constant 0 : index
    %11 = vector.load %arg6[%c0_4, %c0_5] : memref<1x1024xf32, #tpu.memory_space<vmem>>, vector<1x1024xf32>
    %12 = vector.broadcast %11 : vector<1x1024xf32> to vector<256x1024xf32>
    %13 = arith.addf %10, %12 : vector<256x1024xf32>
    %14 = arith.index_cast %arg2 : i32 to index
    %c0_6 = arith.constant 0 : index
    %c0_7 = arith.constant 0 : index
    %15 = vector.load %arg8[%14, %c0_6, %c0_7] : memref<1x256x3xf32, #tpu.memory_space<vmem>>, vector<1x256x3xf32>
    %16 = vector.shape_cast %15 : vector<1x256x3xf32> to vector<256x3xf32>
    %17 = vector.extract_strided_slice %16 {offsets = [0, 0], sizes = [256, 1], strides = [1, 1]} : vector<256x3xf32> to vector<256x1xf32>
    %18 = vector.extract_strided_slice %16 {offsets = [0, 1], sizes = [256, 1], strides = [1, 1]} : vector<256x3xf32> to vector<256x1xf32>
    %19 = vector.extract_strided_slice %16 {offsets = [0, 2], sizes = [256, 1], strides = [1, 1]} : vector<256x3xf32> to vector<256x1xf32>
    %cst_8 = arith.constant dense<0xFF800000> : vector<256xf32>
    %20 = vector.multi_reduction <maximumf>, %13, %cst_8 [1] : vector<256x1024xf32> to vector<256xf32>
    %21 = vector.shape_cast %20 : vector<256xf32> to vector<256x1xf32>
    %22 = arith.maximumf %17, %21 : vector<256x1xf32>
    %23 = arith.subf %17, %22 : vector<256x1xf32>
    %24 = math.exp %23 : vector<256x1xf32>
    %25 = vector.broadcast %22 : vector<256x1xf32> to vector<256x1024xf32>
    %26 = arith.subf %13, %25 : vector<256x1024xf32>
    %27 = math.exp %26 : vector<256x1024xf32>
    %cst_9 = arith.constant dense<0.000000e+00> : vector<256xf32>
    %28 = vector.multi_reduction <add>, %27, %cst_9 [1] : vector<256x1024xf32> to vector<256xf32>
    %29 = vector.shape_cast %28 : vector<256xf32> to vector<256x1xf32>
    %30 = arith.mulf %24, %18 : vector<256x1xf32>
    %31 = arith.addf %30, %29 : vector<256x1xf32>
    %c1024_i32 = arith.constant 1024 : i32
    %32 = arith.muli %arg1, %c1024_i32 : i32
    %33 = vector.broadcast %32 : i32 to vector<256x1xi32>
    %34 = arith.subi %5, %33 : vector<256x1xi32>
    %35 = tpu.iota {dimensions = array<i32: 1>} : vector<256x1024xi32>
    %36 = vector.broadcast %34 : vector<256x1xi32> to vector<256x1024xi32>
    %37 = arith.cmpi eq, %35, %36 : vector<256x1024xi32>
    %cst_10 = arith.constant 0.000000e+00 : f32
    %38 = vector.broadcast %cst_10 : f32 to vector<256x1024xf32>
    %39 = arith.select %37, %13, %38 : vector<256x1024xi1>, vector<256x1024xf32>
    %cst_11 = arith.constant dense<0.000000e+00> : vector<256xf32>
    %40 = vector.multi_reduction <add>, %39, %cst_11 [1] : vector<256x1024xf32> to vector<256xf32>
    %41 = vector.shape_cast %40 : vector<256xf32> to vector<256x1xf32>
    %42 = arith.addf %19, %41 : vector<256x1xf32>
    %43 = tpu.iota {dimensions = array<i32: 1>} : vector<256x3xi32>
    %c0_i32_12 = arith.constant 0 : i32
    %44 = vector.broadcast %c0_i32_12 : i32 to vector<256x3xi32>
    %45 = arith.cmpi eq, %43, %44 : vector<256x3xi32>
    %c1_i32 = arith.constant 1 : i32
    %46 = vector.broadcast %c1_i32 : i32 to vector<256x3xi32>
    %47 = arith.cmpi eq, %43, %46 : vector<256x3xi32>
    %48 = vector.shape_cast %31 : vector<256x1xf32> to vector<256x1xf32>
    %49 = vector.broadcast %48 : vector<256x1xf32> to vector<256x3xf32>
    %50 = vector.shape_cast %42 : vector<256x1xf32> to vector<256x1xf32>
    %51 = vector.broadcast %50 : vector<256x1xf32> to vector<256x3xf32>
    %52 = arith.select %47, %49, %51 : vector<256x3xi1>, vector<256x3xf32>
    %53 = vector.shape_cast %22 : vector<256x1xf32> to vector<256x1xf32>
    %54 = vector.broadcast %53 : vector<256x1xf32> to vector<256x3xf32>
    %55 = arith.select %45, %54, %52 : vector<256x3xi1>, vector<256x3xf32>
    %56 = arith.index_cast %arg2 : i32 to index
    %c0_13 = arith.constant 0 : index
    %c0_14 = arith.constant 0 : index
    %57 = vector.load %arg8[%56, %c0_13, %c0_14] : memref<1x256x3xf32, #tpu.memory_space<vmem>>, vector<1x256x3xf32>
    %58 = vector.shape_cast %57 : vector<1x256x3xf32> to vector<256x3xf32>
    %59 = vector.shape_cast %55 : vector<256x3xf32> to vector<1x256x3xf32>
    tpu.vector_store %arg8[%56, %c0_13, %c0_14], %59 {strides = array<i32>} : memref<1x256x3xf32, #tpu.memory_space<vmem>>, vector<1x256x3xf32>,
    %60 = math.log %31 : vector<256x1xf32>
    %61 = arith.addf %22, %60 : vector<256x1xf32>
    %62 = arith.subf %42, %61 : vector<256x1xf32>
    %c0_15 = arith.constant 0 : index
    %c0_16 = arith.constant 0 : index
    %63 = vector.load %arg7[%c0_15, %c0_16] : memref<256x1xf32, #tpu.memory_space<vmem>>, vector<256x1xf32>
    tpu.vector_store %arg7[%c0_15, %c0_16], %62 {strides = array<i32>} : memref<256x1xf32, #tpu.memory_space<vmem>>, vector<256x1xf32>,
    return
  }
  func.func @transform_0(%arg0: i32, %arg1: i32, %arg2: i32) -> (i32, i32) {
    %c0_i32 = arith.constant 0 : i32
    %c0_i32_0 = arith.constant 0 : i32
    return %arg0, %c0_i32 : i32, i32
  }
  func.func @transform_1(%arg0: i32, %arg1: i32, %arg2: i32) -> (i32, i32) {
    %c0_i32 = arith.constant 0 : i32
    %c0_i32_0 = arith.constant 0 : i32
    return %arg0, %c0_i32 : i32, i32
  }
  func.func @transform_2(%arg0: i32, %arg1: i32, %arg2: i32) -> (i32, i32) {
    %c0_i32 = arith.constant 0 : i32
    %c0_i32_0 = arith.constant 0 : i32
    return %c0_i32, %arg1 : i32, i32
  }
  func.func @transform_3(%arg0: i32, %arg1: i32, %arg2: i32) -> (i32, i32) {
    %c0_i32 = arith.constant 0 : i32
    %c0_i32_0 = arith.constant 0 : i32
    return %c0_i32, %arg1 : i32, i32
  }
  func.func @transform_4(%arg0: i32, %arg1: i32, %arg2: i32) -> (i32, i32) {
    %c1_i32 = arith.constant 1 : i32
    %0 = arith.muli %arg0, %c1_i32 : i32
    %1 = arith.addi %0, %arg2 : i32
    %c0_i32 = arith.constant 0 : i32
    %c0_i32_0 = arith.constant 0 : i32
    return %1, %c0_i32 : i32, i32
  }
}

</mosaic_0001>

<bundles_post_ra>
// kernel: squeeze.1
= control target key start
LH: loop header
LB: loop body
LE: loop exit
PB: predicated region body
PF: predicated region fallthrough
CT: control target
= control target key end

     0   :  { %vm8_vm0 = vcmask 7168   ;;  %vm24_vm1 = vcmask 1048568   ;;  %vm31_vm2 = vcmask 1039360   ;;  %s67_s0 = inlined_call_operand.vmem [shape: f32[258], index: 0, kind: input, shape index: {}]   ;;  %s68_s1 = inlined_call_operand.vmem [shape: f32[2,129], index: 1, kind: output, shape index: {}]  }
   0x1   :  { %v4_v0 = vld [vmem:[%s67_s0] sm:$0xf]  ;;  %s47_s0 = smov 127  }
   0x2   :  { %5 = vst [vmem:[#allocation1] sm:$0xf] %v4_v0 }
   0x9   :  { %v14_v1 = vld [vmem:[#allocation1 + $0x2] sm:$0x1]   ;;  %v7_v3 = vld [vmem:[#allocation1 + $0x1] sm:$0x1]   ;;  %v11_v5 = vld [vmem:[#allocation1] sm:$0x1]  }
   0xa   :  { %v16_v2 = vld [vmem:[#allocation1 + $0x2] sm:$0x1]   ;;  %10 = vst.msk [vmem:[#allocation0 + $0x8] sm:$0x1] %vm8_vm0, %v7_v3   ;;  %12 = vst [vmem:[#allocation0] sm:$0x1] %v11_v5  }
   0xb   :  { %v18_v4 = vsel %vm8_vm0, %v16_v2, %v14_v1  ;;  %v28_v6 = vld [vmem:[#allocation1 + $0x1] sm:$0x1]  }
   0xc   :  { %19 = vrot.lane.b32.xlu0 %v18_v4, %s47_s0 }
  0x10   :  { %29 = vrot.lane.b32.xlu0 %v28_v6, %s47_s0 }
  0x7e   :  { %v20_v7 = vpop.permute.xlu0 %19  }
  0x7f   :  { %23 = vst.msk [vmem:[#allocation0 + $0x9] sm:$0x1] %vm8_vm0, %v20_v7  }
  0x80   :  { %26 = vst.msk [vmem:[#allocation0 + $0x1] sm:$0x1] %vm24_vm1, %v20_v7  }
  0x82   :  { %v30_v8 = vpop.permute.xlu0 %29  }
  0x83   :  { %33 = vst.msk [vmem:[#allocation0 + $0x1] sm:$0x1] %vm31_vm2, %v30_v8  }
  0x86   :  { %v41_v9 = vld [vmem:[#allocation0 + $0x8] sm:$0x3] }
  0x87   :  { %45 = vst [vmem:[%s68_s1 + $0x2] sm:$0x3] %v41_v9 }
  0x8a   :  { %v37_v10 = vld [vmem:[#allocation0] sm:$0x3] }
  0x8b   :  { %39 = vst [vmem:[%s68_s1] sm:$0x3] %v37_v10 }

// kernel: actor_forward.1
= control target key start
LH: loop header
LB: loop body
LE: loop exit
PB: predicated region body
PF: predicated region fallthrough
CT: control target
= control target key end

     0   :  { %s6639_s15 = smov 0   ;;  %s6641_s16 = smov 0   ;;  %s12336_s0 = inlined_call_operand.vmem [shape: bf16[512,128], index: 0, kind: input, shape index: {}]   ;;  %s12337_s1 = inlined_call_operand.vmem [shape: s32[512,1], index: 1, kind: input, shape index: {}]   ;;  %s12338_s2 = inlined_call_operand.vmem [shape: bf16[128,2048], index: 2, kind: input, shape index: {}]   ;;  %s12339_s3 = inlined_call_operand.vmem [shape: f32[1,2048], index: 3, kind: input, shape index: {}]   ;;  %s12340_s4 = inlined_call_operand.vmem [shape: f32[512,1], index: 4, kind: output, shape index: {}]  }
   0x1   :  { %s6643_s17 = smov 0   ;;  %s6645_s18 = smov 0  }
   0x2   :  { %s6647_s19 = smov 0   ;;  %s6649_s20 = smov 0  }
   0x3   :  { %s6651_s21 = smov 0  }
   0x4 LB: > { %s29_s22 = sadd.s32 1, %s6598_s19  ;;  %s33_s23 = sadd.s32 1, %s6602_s20  ;;  %s6606_s21 = sphi %s6651_s21, %s14_s21   ;;  %s6602_s20 = sphi %s6649_s20, %s13856_s20   ;;  %s6598_s19 = sphi %s6647_s19, %s13855_s19   ;;  %s6594_s18 = sphi %s6645_s18, %s13854_s18   ;;  %s6590_s17 = sphi %s6643_s17, %s13853_s17   ;;  %s6586_s16 = sphi %s6641_s16, %s13852_s16   ;;  %s6582_s15 = sphi %s6639_s15, %s13851_s15  }
   0x5   : > { %p31_p0 = scmp.ge.s32.totalorder %s29_s22, 2  ;;  %s92_s24 = sadd.s32 1, %s6586_s16 }
   0x6   : > { %p99_p1 = scmp.ne.s32.totalorder %s6586_s16, %s6582_s15  ;;  %p100_p2 = scmp.eq.s32.totalorder %s6606_s21, 0 }
   0x7   : > { %s13858_s22 = smov (%p31_p0, %s29_s22), 0  ;;  %s13860_s23 = smov (!%p31_p0, %s33_s23), %s6602_s20 }
   0x8   : > { %s89_s25 = ssub.s32 %s6598_s19, %s13858_s22  ;;  %p101_p3 = por %p100_p2, %p99_p1 }
   0x9   : > { %p35_p4 = scmp.ge.s32.totalorder %s13860_s23, 2  ;;  %p90_p5 = scmp.eq.s32.totalorder %s89_s25, 0 }
   0xa   : > { %p5628_p6 = scmp.ge.s32.totalorder %s6606_s21, 4 }
   0xb   : > { %s13862_s23 = smov (%p35_p4, %s13860_s23), 0 }
   0xc   : > { %s6688_s26 = scalar_select %p90_p5, %s6586_s16, %s92_s24  }
   0xd   : > { %179 = sbr.rel (%p5628_p6) target bundleno = 56 (0x38), region = 16 }
  0x14   : > { %200 = sbr.rel (!%p101_p3) target bundleno = 56 (0x38), region = 28  ;;  %s202_s27 = sand.u32 (%p101_p3), 1, %s6586_s16  }
  0x15   : > { %s5725_s28 = sshll.u32 (%p101_p3), %s6598_s19, 5  ;;  %s5629_s29 = sshll.u32 (%p101_p3), %s202_s27, 9 }
  0x16   : > { %s6696_s6 = scalar_lea.vmem (%p101_p3), %s12338_s2, %s5725_s28  ;;  %s6701_s7 = scalar_lea.vmem (%p101_p3), [#allocation3], %s5629_s29 }
  0x17   : > { %v220_v0 = vld [vmem:[%s6696_s6] sm:$0xff] (%p101_p3)  ;;  %v222_v1 = vld [vmem:[%s6696_s6 + $0x8] sm:$0xff] (%p101_p3)  ;;  %v224_v2 = vld [vmem:[%s6696_s6 + $0x10] sm:$0xff] (%p101_p3) }
  0x18   : > { %221 = vst [vmem:[%s6701_s7] sm:$0xff] (%p101_p3), %v220_v0  ;;  %223 = vst [vmem:[%s6701_s7 + $0x8] sm:$0xff] (%p101_p3), %v222_v1  ;;  %v226_v3 = vld [vmem:[%s6696_s6 + $0x18] sm:$0xff] (%p101_p3)  ;;  %v228_v4 = vld [vmem:[%s6696_s6 + $0x40] sm:$0xff] (%p101_p3) }
  0x19   : > { %225 = vst [vmem:[%s6701_s7 + $0x10] sm:$0xff] (%p101_p3), %v224_v2  ;;  %v230_v5 = vld [vmem:[%s6696_s6 + $0x48] sm:$0xff] (%p101_p3)  ;;  %227 = vst [vmem:[%s6701_s7 + $0x18] sm:$0xff] (%p101_p3), %v226_v3  ;;  %v232_v6 = vld [vmem:[%s6696_s6 + $0x50] sm:$0xff] (%p101_p3) }
  0x1a   : > { %229 = vst [vmem:[%s6701_s7 + $0x20] sm:$0xff] (%p101_p3), %v228_v4  ;;  %231 = vst [vmem:[%s6701_s7 + $0x28] sm:$0xff] (%p101_p3), %v230_v5  ;;  %v234_v7 = vld [vmem:[%s6696_s6 + $0x58] sm:$0xff] (%p101_p3)  ;;  %v236_v8 = vld [vmem:[%s6696_s6 + $0x80] sm:$0xff] (%p101_p3) }
  0x1b   : > { %233 = vst [vmem:[%s6701_s7 + $0x30] sm:$0xff] %v232_v6  ;;  %235 = vst [vmem:[%s6701_s7 + $0x38] sm:$0xff] %v234_v7  ;;  %v238_v9 = vld [vmem:[%s6696_s6 + $0x88] sm:$0xff]  ;;  %v240_v10 = vld [vmem:[%s6696_s6 + $0x90] sm:$0xff] }
  0x1c   : > { %237 = vst [vmem:[%s6701_s7 + $0x40] sm:$0xff] %v236_v8  ;;  %v242_v11 = vld [vmem:[%s6696_s6 + $0x98] sm:$0xff]  ;;  %239 = vst [vmem:[%s6701_s7 + $0x48] sm:$0xff] %v238_v9  ;;  %v244_v12 = vld [vmem:[%s6696_s6 + $0xc0] sm:$0xff] }
  0x1d   : > { %241 = vst [vmem:[%s6701_s7 + $0x50] sm:$0xff] %v240_v10  ;;  %243 = vst [vmem:[%s6701_s7 + $0x58] sm:$0xff] %v242_v11  ;;  %v246_v13 = vld [vmem:[%s6696_s6 + $0xc8] sm:$0xff]  ;;  %v248_v14 = vld [vmem:[%s6696_s6 + $0xd0] sm:$0xff] }
  0x1e   : > { %245 = vst [vmem:[%s6701_s7 + $0x60] sm:$0xff] %v244_v12  ;;  %247 = vst [vmem:[%s6701_s7 + $0x68] sm:$0xff] %v246_v13  ;;  %v250_v15 = vld [vmem:[%s6696_s6 + $0xd8] sm:$0xff]  ;;  %v252_v16 = vld [vmem:[%s6696_s6 + $0x100] sm:$0xff] }
  0x1f   : > { %249 = vst [vmem:[%s6701_s7 + $0x70] sm:$0xff] %v248_v14  ;;  %v254_v17 = vld [vmem:[%s6696_s6 + $0x108] sm:$0xff]  ;;  %251 = vst [vmem:[%s6701_s7 + $0x78] sm:$0xff] %v250_v15  ;;  %v256_v18 = vld [vmem:[%s6696_s6 + $0x110] sm:$0xff] }
  0x20   : > { %253 = vst [vmem:[%s6701_s7 + $0x80] sm:$0xff] %v252_v16  ;;  %255 = vst [vmem:[%s6701_s7 + $0x88] sm:$0xff] %v254_v17  ;;  %v258_v19 = vld [vmem:[%s6696_s6 + $0x118] sm:$0xff]  ;;  %v260_v20 = vld [vmem:[%s6696_s6 + $0x140] sm:$0xff] }
  0x21   : > { %257 = vst [vmem:[%s6701_s7 + $0x90] sm:$0xff] %v256_v18  ;;  %259 = vst [vmem:[%s6701_s7 + $0x98] sm:$0xff] %v258_v19  ;;  %v262_v21 = vld [vmem:[%s6696_s6 + $0x148] sm:$0xff]  ;;  %v264_v22 = vld [vmem:[%s6696_s6 + $0x150] sm:$0xff] }
  0x22   : > { %261 = vst [vmem:[%s6701_s7 + $0xa0] sm:$0xff] %v260_v20  ;;  %v266_v23 = vld [vmem:[%s6696_s6 + $0x158] sm:$0xff]  ;;  %263 = vst [vmem:[%s6701_s7 + $0xa8] sm:$0xff] %v262_v21  ;;  %v268_v24 = vld [vmem:[%s6696_s6 + $0x180] sm:$0xff] }
  0x23   : > { %265 = vst [vmem:[%s6701_s7 + $0xb0] sm:$0xff] %v264_v22  ;;  %267 = vst [vmem:[%s6701_s7 + $0xb8] sm:$0xff] %v266_v23  ;;  %v270_v25 = vld [vmem:[%s6696_s6 + $0x188] sm:$0xff]  ;;  %v272_v26 = vld [vmem:[%s6696_s6 + $0x190] sm:$0xff] }
  0x24   : > { %269 = vst [vmem:[%s6701_s7 + $0xc0] sm:$0xff] %v268_v24  ;;  %271 = vst [vmem:[%s6701_s7 + $0xc8] sm:$0xff] %v270_v25  ;;  %v274_v27 = vld [vmem:[%s6696_s6 + $0x198] sm:$0xff]  ;;  %v276_v28 = vld [vmem:[%s6696_s6 + $0x1c0] sm:$0xff] }
  0x25   : > { %273 = vst [vmem:[%s6701_s7 + $0xd0] sm:$0xff] %v272_v26  ;;  %v278_v29 = vld [vmem:[%s6696_s6 + $0x1c8] sm:$0xff]  ;;  %275 = vst [vmem:[%s6701_s7 + $0xd8] sm:$0xff] %v274_v27  ;;  %v280_v30 = vld [vmem:[%s6696_s6 + $0x1d0] sm:$0xff] }
  0x26   : > { %277 = vst [vmem:[%s6701_s7 + $0xe0] sm:$0xff] %v276_v28  ;;  %279 = vst [vmem:[%s6701_s7 + $0xe8] sm:$0xff] %v278_v29  ;;  %v282_v31 = vld [vmem:[%s6696_s6 + $0x1d8] sm:$0xff]  ;;  %v284_v32 = vld [vmem:[%s6696_s6 + $0x200] sm:$0xff] }
  0x27   : > { %281 = vst [vmem:[%s6701_s7 + $0xf0] sm:$0xff] %v280_v30  ;;  %283 = vst [vmem:[%s6701_s7 + $0xf8] sm:$0xff] %v282_v31  ;;  %v286_v33 = vld [vmem:[%s6696_s6 + $0x208] sm:$0xff]  ;;  %v288_v34 = vld [vmem:[%s6696_s6 + $0x210] sm:$0xff] }
  0x28   : > { %285 = vst [vmem:[%s6701_s7 + $0x100] sm:$0xff] %v284_v32  ;;  %v290_v35 = vld [vmem:[%s6696_s6 + $0x218] sm:$0xff]  ;;  %287 = vst [vmem:[%s6701_s7 + $0x108] sm:$0xff] %v286_v33  ;;  %v292_v36 = vld [vmem:[%s6696_s6 + $0x240] sm:$0xff] }
  0x29   : > { %289 = vst [vmem:[%s6701_s7 + $0x110] sm:$0xff] %v288_v34  ;;  %291 = vst [vmem:[%s6701_s7 + $0x118] sm:$0xff] %v290_v35  ;;  %v294_v37 = vld [vmem:[%s6696_s6 + $0x248] sm:$0xff]  ;;  %v296_v38 = vld [vmem:[%s6696_s6 + $0x250] sm:$0xff] }
  0x2a   : > { %293 = vst [vmem:[%s6701_s7 + $0x120] sm:$0xff] %v292_v36  ;;  %295 = vst [vmem:[%s6701_s7 + $0x128] sm:$0xff] %v294_v37  ;;  %v298_v39 = vld [vmem:[%s6696_s6 + $0x258] sm:$0xff]  ;;  %v300_v40 = vld [vmem:[%s6696_s6 + $0x280] sm:$0xff] }
  0x2b   : > { %297 = vst [vmem:[%s6701_s7 + $0x130] sm:$0xff] %v296_v38  ;;  %v302_v41 = vld [vmem:[%s6696_s6 + $0x288] sm:$0xff]  ;;  %299 = vst [vmem:[%s6701_s7 + $0x138] sm:$0xff] %v298_v39  ;;  %v304_v42 = vld [vmem:[%s6696_s6 + $0x290] sm:$0xff] }
  0x2c   : > { %301 = vst [vmem:[%s6701_s7 + $0x140] sm:$0xff] %v300_v40  ;;  %303 = vst [vmem:[%s6701_s7 + $0x148] sm:$0xff] %v302_v41  ;;  %v306_v43 = vld [vmem:[%s6696_s6 + $0x298] sm:$0xff]  ;;  %v308_v44 = vld [vmem:[%s6696_s6 + $0x2c0] sm:$0xff] }
  0x2d   : > { %305 = vst [vmem:[%s6701_s7 + $0x150] sm:$0xff] %v304_v42  ;;  %307 = vst [vmem:[%s6701_s7 + $0x158] sm:$0xff] %v306_v43  ;;  %v310_v45 = vld [vmem:[%s6696_s6 + $0x2c8] sm:$0xff]  ;;  %v312_v46 = vld [vmem:[%s6696_s6 + $0x2d0] sm:$0xff] }
  0x2e   : > { %309 = vst [vmem:[%s6701_s7 + $0x160] sm:$0xff] %v308_v44  ;;  %v314_v47 = vld [vmem:[%s6696_s6 + $0x2d8] sm:$0xff]  ;;  %311 = vst [vmem:[%s6701_s7 + $0x168] sm:$0xff] %v310_v45  ;;  %v316_v48 = vld [vmem:[%s6696_s6 + $0x300] sm:$0xff] }
  0x2f   : > { %313 = vst [vmem:[%s6701_s7 + $0x170] sm:$0xff] %v312_v46  ;;  %315 = vst [vmem:[%s6701_s7 + $0x178] sm:$0xff] %v314_v47  ;;  %v318_v49 = vld [vmem:[%s6696_s6 + $0x308] sm:$0xff]  ;;  %v320_v50 = vld [vmem:[%s6696_s6 + $0x310] sm:$0xff] }
  0x30   : > { %317 = vst [vmem:[%s6701_s7 + $0x180] sm:$0xff] %v316_v48  ;;  %319 = vst [vmem:[%s6701_s7 + $0x188] sm:$0xff] %v318_v49  ;;  %v322_v51 = vld [vmem:[%s6696_s6 + $0x318] sm:$0xff]  ;;  %v324_v52 = vld [vmem:[%s6696_s6 + $0x340] sm:$0xff] }
  0x31   : > { %321 = vst [vmem:[%s6701_s7 + $0x190] sm:$0xff] %v320_v50  ;;  %v326_v53 = vld [vmem:[%s6696_s6 + $0x348] sm:$0xff]  ;;  %323 = vst [vmem:[%s6701_s7 + $0x198] sm:$0xff] %v322_v51  ;;  %v328_v54 = vld [vmem:[%s6696_s6 + $0x350] sm:$0xff] }
  0x32   : > { %325 = vst [vmem:[%s6701_s7 + $0x1a0] sm:$0xff] %v324_v52  ;;  %327 = vst [vmem:[%s6701_s7 + $0x1a8] sm:$0xff] %v326_v53  ;;  %v330_v55 = vld [vmem:[%s6696_s6 + $0x358] sm:$0xff]  ;;  %v332_v56 = vld [vmem:[%s6696_s6 + $0x380] sm:$0xff] }
  0x33   : > { %329 = vst [vmem:[%s6701_s7 + $0x1b0] sm:$0xff] %v328_v54  ;;  %331 = vst [vmem:[%s6701_s7 + $0x1b8] sm:$0xff] %v330_v55  ;;  %v334_v57 = vld [vmem:[%s6696_s6 + $0x388] sm:$0xff]  ;;  %v336_v58 = vld [vmem:[%s6696_s6 + $0x390] sm:$0xff] }
  0x34   : > { %333 = vst [vmem:[%s6701_s7 + $0x1c0] sm:$0xff] %v332_v56  ;;  %v338_v59 = vld [vmem:[%s6696_s6 + $0x398] sm:$0xff]  ;;  %335 = vst [vmem:[%s6701_s7 + $0x1c8] sm:$0xff] %v334_v57  ;;  %v340_v60 = vld [vmem:[%s6696_s6 + $0x3c0] sm:$0xff] }
  0x35   : > { %337 = vst [vmem:[%s6701_s7 + $0x1d0] sm:$0xff] %v336_v58  ;;  %339 = vst [vmem:[%s6701_s7 + $0x1d8] sm:$0xff] %v338_v59  ;;  %v342_v61 = vld [vmem:[%s6696_s6 + $0x3c8] sm:$0xff]  ;;  %v344_v62 = vld [vmem:[%s6696_s6 + $0x3d0] sm:$0xff] }
  0x36   : > { %341 = vst [vmem:[%s6701_s7 + $0x1e0] sm:$0xff] %v340_v60  ;;  %343 = vst [vmem:[%s6701_s7 + $0x1e8] sm:$0xff] %v342_v61  ;;  %v346_v63 = vld [vmem:[%s6696_s6 + $0x3d8] sm:$0xff] }
  0x37   : > { %345 = vst [vmem:[%s6701_s7 + $0x1f0] sm:$0xff] %v344_v62  ;;  %347 = vst [vmem:[%s6701_s7 + $0x1f8] sm:$0xff] %v346_v63 }
  0x38 PF: > { %p5632_p7 = scmp.ge.s32.totalorder %s6606_s21, 1  ;;  %p360_p8 = scmp.lt.s32.totalorder %s6606_s21, 5 }
  0x3a   : > { %p361_p9 = pnand %p5632_p7, %p360_p8 }
  0x3c   : > { %364 = sbr.rel (%p361_p9) target bundleno = 1527 (0x5f7), region = 55 }
  0x43   : > { %s367_s8 = sand.u32 1, %s6582_s15   ;;  %s5634_s9 = sshll.u32 %s6594_s18, 5 }
  0x44   : > { %s6832_s10 = sshll.u32 %s367_s8, 9  ;;  %p408_p10 = scmp.lt.s32.totalorder %s5634_s9, 63 }
  0x45   : > { %s5638_s11 = sshll.u32 %s6590_s17, 3  ;;  %s7049_s8 = scalar_lea.vmem [#allocation3], %s6832_s10 }
  0x46   : > { %s13864_s9 = smov (!%p408_p10, %s5634_s9), 63  ;;  %p421_p11 = scmp.lt.s32.totalorder %s5638_s11, 15 }
  0x47   : > { %s5635_s12 = sshll.u32 %s13864_s9, 2  ;;  %s5637_s13 = sshll.u32 %s13864_s9, 3 }
  0x48   : > { %s6838_s25 = scalar_lea.vmem %s12336_s0, %s5635_s12  ;;  %s6843_s15 = scalar_lea.vmem %s12337_s1, %s5637_s13 }
  0x49   : > { %s13866_s11 = smov (!%p421_p11, %s5638_s11), 15  ;;  %v6848_v0 = vld [vmem:[%s6838_s25] sm:$0xf]  ;;  %v6851_v1 = vld [vmem:[%s6838_s25 + $0x4] sm:$0xf]  ;;  %s6859_s30 = scalar_lea.vmem %s12340_s4, %s5637_s13  ;;  %v6956_v33 = vld [vmem:[%s6843_s15 + $0x8] sm:$0xff] }
  0x4a   : > { %v6854_v2 = vld [vmem:[%s6843_s15] sm:$0xff]  ;;  %v6862_v3 = vld [vmem:[%s6838_s25 + $0x8] sm:$0xf]  ;;  %v6865_v4 = vld [vmem:[%s6838_s25 + $0xc] sm:$0xf]  ;;  %s423_s7 = scalar_lea.vmem %s12339_s3, %s13866_s11  ;;  %p5641_p12 = scmp.ne.s32.totalorder %s6590_s17, 0 }
  0x4b   : > { %v6868_v5 = vld [vmem:[%s6838_s25 + $0x10] sm:$0xf]  ;;  %v6875_v6 = vld [vmem:[%s6838_s25 + $0x14] sm:$0xf]  ;;  %v6878_v7 = vld [vmem:[%s6838_s25 + $0x18] sm:$0xf] }
  0x4c   : > { %v6881_v8 = vld [vmem:[%s6838_s25 + $0x1c] sm:$0xf]  ;;  %v6884_v9 = vld [vmem:[%s6838_s25 + $0x20] sm:$0xf]  ;;  %v6887_v10 = vld [vmem:[%s6838_s25 + $0x24] sm:$0xf] }
  0x4d   : > { %v6890_v11 = vld [vmem:[%s6838_s25 + $0x28] sm:$0xf]  ;;  %v6893_v12 = vld [vmem:[%s6838_s25 + $0x2c] sm:$0xf]  ;;  %v6896_v13 = vld [vmem:[%s6838_s25 + $0x30] sm:$0xf] }
  0x4e   : > { %v6899_v14 = vld [vmem:[%s6838_s25 + $0x34] sm:$0xf]  ;;  %v6902_v15 = vld [vmem:[%s6838_s25 + $0x38] sm:$0xf]  ;;  %v6905_v16 = vld [vmem:[%s6838_s25 + $0x3c] sm:$0xf] }
  0x4f   : > { %v6908_v17 = vld [vmem:[%s6838_s25 + $0x40] sm:$0xf]  ;;  %v6911_v18 = vld [vmem:[%s6838_s25 + $0x44] sm:$0xf]  ;;  %v6914_v19 = vld [vmem:[%s6838_s25 + $0x48] sm:$0xf] }
  0x50   : > { %v6917_v20 = vld [vmem:[%s6838_s25 + $0x4c] sm:$0xf]  ;;  %v6920_v21 = vld [vmem:[%s6838_s25 + $0x50] sm:$0xf]  ;;  %v6923_v22 = vld [vmem:[%s6838_s25 + $0x54] sm:$0xf] }
  0x51   : > { %v6926_v23 = vld [vmem:[%s6838_s25 + $0x58] sm:$0xf]  ;;  %v6929_v24 = vld [vmem:[%s6838_s25 + $0x5c] sm:$0xf]  ;;  %v6932_v25 = vld [vmem:[%s6838_s25 + $0x60] sm:$0xf] }
  0x52   : > { %12811 = vst [vmem:[#allocation4_spill] sm:$0xff] %v6926_v23  ;;  %12812 = vst [vmem:[#allocation5_spill] sm:$0xff] %v6929_v24  ;;  %v6935_v26 = vld [vmem:[%s6838_s25 + $0x64] sm:$0xf]  ;;  %v6938_v27 = vld [vmem:[%s6838_s25 + $0x68] sm:$0xf] }
  0x53   : > { %12813 = vst [vmem:[#allocation6_spill] sm:$0xff] %v6932_v25  ;;  %12814 = vst [vmem:[#allocation7_spill] sm:$0xff] %v6935_v26  ;;  %v6941_v28 = vld [vmem:[%s6838_s25 + $0x6c] sm:$0xf]  ;;  %v6944_v29 = vld [vmem:[%s6838_s25 + $0x70] sm:$0xf] }
  0x54   : > { %12815 = vst [vmem:[#allocation8_spill] sm:$0xff] %v6938_v27  ;;  %12816 = vst [vmem:[#allocation9_spill] sm:$0xff] %v6941_v28  ;;  %v6947_v30 = vld [vmem:[%s6838_s25 + $0x74] sm:$0xf]  ;;  %v6950_v31 = vld [vmem:[%s6838_s25 + $0x78] sm:$0xf] }
  0x55   : > { %12817 = vst [vmem:[#allocation10_spill] sm:$0xff] %v6944_v29  ;;  %12818 = vst [vmem:[#allocation11_spill] sm:$0xff] %v6947_v30  ;;  %v6953_v32 = vld [vmem:[%s6838_s25 + $0x7c] sm:$0xf]  ;;  %v6959_v34 = vld [vmem:[%s6843_s15 + $0x10] sm:$0xff]  ;;  %vm513_vm0 = vcmask (!%p5641_p12), 23552  }
  0x56   : > { %12819 = vst [vmem:[#allocation12_spill] sm:$0xff] %v6950_v31  ;;  %12820 = vst [vmem:[#allocation13_spill] sm:$0xff] %v6953_v32  ;;  %v6962_v35 = vld [vmem:[%s6843_s15 + $0x18] sm:$0xff]  ;;  %v6965_v36 = vld [vmem:[%s6843_s15 + $0x20] sm:$0xff]  ;;  %v508_v31 = vlaneseq (!%p5641_p12)  ;;  %v6608_v29 = vmov (!%p5641_p12), 0.0  }
  0x57   : > { %v6968_v37 = vld [vmem:[%s6843_s15 + $0x28] sm:$0xff]  ;;  %v6971_v38 = vld [vmem:[%s6843_s15 + $0x30] sm:$0xff]  ;;  %v6974_v39 = vld [vmem:[%s6843_s15 + $0x38] sm:$0xff] }
  0x58   : > { %v6977_v40 = vld [vmem:[%s6843_s15 + $0x40] sm:$0xff]  ;;  %v6980_v41 = vld [vmem:[%s6843_s15 + $0x48] sm:$0xff]  ;;  %v6983_v42 = vld [vmem:[%s6843_s15 + $0x50] sm:$0xff]  ;;  %v509_v32 = vand.u32 (!%p5641_p12), 127, %v508_v31 }
  0x59   : > { %v6986_v43 = vld [vmem:[%s6843_s15 + $0x58] sm:$0xff]  ;;  %v6989_v44 = vld [vmem:[%s6843_s15 + $0x60] sm:$0xff]  ;;  %v6992_v45 = vld [vmem:[%s6843_s15 + $0x68] sm:$0xff] }
  0x5a   : > { %v6995_v46 = vld [vmem:[%s6843_s15 + $0x70] sm:$0xff]  ;;  %v6998_v47 = vld [vmem:[%s6843_s15 + $0x78] sm:$0xff]  ;;  %v7001_v48 = vld [vmem:[%s6843_s15 + $0x80] sm:$0xff]  ;;  %vm510_vm1 = vcmp.eq.s32.totalorder (!%p5641_p12), %v509_v32, 0 }
  0x5b   : > { %v7004_v49 = vld [vmem:[%s6843_s15 + $0x88] sm:$0xff]  ;;  %v7007_v50 = vld [vmem:[%s6843_s15 + $0x90] sm:$0xff]  ;;  %v7010_v51 = vld [vmem:[%s6843_s15 + $0x98] sm:$0xff]  ;;  %v511_v30 = vsel (!%p5641_p12), %vm510_vm1, -inf, %v6608_v29 }
  0x5c   : > { %12821 = vst [vmem:[#allocation14_spill] sm:$0xff] %v7007_v50  ;;  %12822 = vst [vmem:[#allocation15_spill] sm:$0xff] %v7010_v51  ;;  %v7013_v52 = vld [vmem:[%s6843_s15 + $0xa0] sm:$0xff]  ;;  %v7016_v53 = vld [vmem:[%s6843_s15 + $0xa8] sm:$0xff]  ;;  %507 = sbr.rel (%p5641_p12) target bundleno = 115 (0x73), region = 63 }
  0x5d   : > { %12823 = vst [vmem:[#allocation16_spill] sm:$0xff] %v7013_v52  ;;  %12824 = vst [vmem:[#allocation17_spill] sm:$0xff] %v7016_v53  ;;  %v7019_v54 = vld [vmem:[%s6843_s15 + $0xb0] sm:$0xff]  ;;  %v7022_v55 = vld [vmem:[%s6843_s15 + $0xb8] sm:$0xff] }
  0x5e   : > { %12825 = vst [vmem:[#allocation18_spill] sm:$0xff] %v7019_v54  ;;  %12826 = vst [vmem:[#allocation19_spill] sm:$0xff] %v7022_v55  ;;  %v7025_v56 = vld [vmem:[%s6843_s15 + $0xc0] sm:$0xff]  ;;  %v7028_v57 = vld [vmem:[%s6843_s15 + $0xc8] sm:$0xff] }
  0x5f   : > { %12827 = vst [vmem:[#allocation20_spill] sm:$0xff] %v7025_v56  ;;  %12828 = vst [vmem:[#allocation21_spill] sm:$0xff] %v7028_v57  ;;  %v7031_v58 = vld [vmem:[%s6843_s15 + $0xd0] sm:$0xff]  ;;  %v7034_v59 = vld [vmem:[%s6843_s15 + $0xd8] sm:$0xff] }
  0x60   : > { %12829 = vst [vmem:[#allocation22_spill] sm:$0xff] %v7031_v58  ;;  %12830 = vst [vmem:[#allocation23_spill] sm:$0xff] %v7034_v59  ;;  %v7037_v60 = vld [vmem:[%s6843_s15 + $0xe0] sm:$0xff]  ;;  %v7040_v61 = vld [vmem:[%s6843_s15 + $0xe8] sm:$0xff] }
  0x61   : > { %12831 = vst [vmem:[#allocation24_spill] sm:$0xff] %v7037_v60  ;;  %12832 = vst [vmem:[#allocation25_spill] sm:$0xff] %v7040_v61  ;;  %v7043_v62 = vld [vmem:[%s6843_s15 + $0xf0] sm:$0xff]  ;;  %v7046_v63 = vld [vmem:[%s6843_s15 + $0xf8] sm:$0xff] }
  0x62   : > { %12833 = vst [vmem:[#allocation26_spill] sm:$0xff] %v7043_v62  ;;  %12834 = vst [vmem:[#allocation27_spill] sm:$0xff] %v7046_v63 }
  0x63   : > { %514 = vst.msk [vmem:[#allocation2] sm:$0xff] %vm513_vm0, %v511_v30  ;;  %515 = vst.msk [vmem:[#allocation2 + $0x8] sm:$0xff] %vm513_vm0, %v511_v30 }
  0x64   : > { %516 = vst.msk [vmem:[#allocation2 + $0x10] sm:$0xff] %vm513_vm0, %v511_v30  ;;  %517 = vst.msk [vmem:[#allocation2 + $0x18] sm:$0xff] %vm513_vm0, %v511_v30 }
  0x65   : > { %518 = vst.msk [vmem:[#allocation2 + $0x20] sm:$0xff] %vm513_vm0, %v511_v30  ;;  %519 = vst.msk [vmem:[#allocation2 + $0x28] sm:$0xff] %vm513_vm0, %v511_v30 }
  0x66   : > { %520 = vst.msk [vmem:[#allocation2 + $0x30] sm:$0xff] %vm513_vm0, %v511_v30  ;;  %521 = vst.msk [vmem:[#allocation2 + $0x38] sm:$0xff] %vm513_vm0, %v511_v30 }
  0x67   : > { %522 = vst.msk [vmem:[#allocation2 + $0x40] sm:$0xff] %vm513_vm0, %v511_v30  ;;  %523 = vst.msk [vmem:[#allocation2 + $0x48] sm:$0xff] %vm513_vm0, %v511_v30 }
  0x68   : > { %524 = vst.msk [vmem:[#allocation2 + $0x50] sm:$0xff] %vm513_vm0, %v511_v30  ;;  %525 = vst.msk [vmem:[#allocation2 + $0x58] sm:$0xff] %vm513_vm0, %v511_v30 }
  0x69   : > { %526 = vst.msk [vmem:[#allocation2 + $0x60] sm:$0xff] %vm513_vm0, %v511_v30  ;;  %527 = vst.msk [vmem:[#allocation2 + $0x68] sm:$0xff] %vm513_vm0, %v511_v30 }
  0x6a   : > { %528 = vst.msk [vmem:[#allocation2 + $0x70] sm:$0xff] %vm513_vm0, %v511_v30  ;;  %529 = vst.msk [vmem:[#allocation2 + $0x78] sm:$0xff] %vm513_vm0, %v511_v30 }
  0x6b   : > { %530 = vst.msk [vmem:[#allocation2 + $0x80] sm:$0xff] %vm513_vm0, %v511_v30  ;;  %531 = vst.msk [vmem:[#allocation2 + $0x88] sm:$0xff] %vm513_vm0, %v511_v30 }
  0x6c   : > { %532 = vst.msk [vmem:[#allocation2 + $0x90] sm:$0xff] %vm513_vm0, %v511_v30  ;;  %533 = vst.msk [vmem:[#allocation2 + $0x98] sm:$0xff] %vm513_vm0, %v511_v30 }
  0x6d   : > { %534 = vst.msk [vmem:[#allocation2 + $0xa0] sm:$0xff] %vm513_vm0, %v511_v30  ;;  %535 = vst.msk [vmem:[#allocation2 + $0xa8] sm:$0xff] %vm513_vm0, %v511_v30 }
  0x6e   : > { %536 = vst.msk [vmem:[#allocation2 + $0xb0] sm:$0xff] %vm513_vm0, %v511_v30  ;;  %537 = vst.msk [vmem:[#allocation2 + $0xb8] sm:$0xff] %vm513_vm0, %v511_v30 }
  0x6f   : > { %538 = vst.msk [vmem:[#allocation2 + $0xc0] sm:$0xff] %vm513_vm0, %v511_v30  ;;  %539 = vst.msk [vmem:[#allocation2 + $0xc8] sm:$0xff] %vm513_vm0, %v511_v30 }
  0x70   : > { %540 = vst.msk [vmem:[#allocation2 + $0xd0] sm:$0xff] %vm513_vm0, %v511_v30  ;;  %541 = vst.msk [vmem:[#allocation2 + $0xd8] sm:$0xff] %vm513_vm0, %v511_v30 }
  0x71   : > { %542 = vst.msk [vmem:[#allocation2 + $0xe0] sm:$0xff] %vm513_vm0, %v511_v30  ;;  %543 = vst.msk [vmem:[#allocation2 + $0xe8] sm:$0xff] %vm513_vm0, %v511_v30 }
  0x72   : > { %544 = vst.msk [vmem:[#allocation2 + $0xf0] sm:$0xff] %vm513_vm0, %v511_v30  ;;  %545 = vst.msk [vmem:[#allocation2 + $0xf8] sm:$0xff] %vm513_vm0, %v511_v30 }
  0x73 PF: > { %v546_v29 = vld [vmem:[%s7049_s8] sm:$0xff]  ;;  %v547_v32 = vld [vmem:[%s7049_s8 + $0x8] sm:$0xff]  ;;  %v12341_v28 = vmov 0   ;;  %v12835_v52 = vmov 0   ;;  %s6610_s9 = smov 127   ;;  %s5722_s10 = sshll.u32 %s6590_s17, 10 }
  0x74   : > { %v550_v31 = vld [vmem:[%s7049_s8 + $0x20] sm:$0xff]  ;;  %v551_v62 = vld [vmem:[%s7049_s8 + $0x28] sm:$0xff]  ;;  %1100 = vmatprep.mubr.bf16.mxu0 %v12341_v28  ;;  %1293 = vmatprep.mubr.bf16.mxu1 %v12341_v28  ;;  %s6612_s11 = smov 2   ;;  %s6613_s13 = smov 126  }
  0x75   : > { %v5659_v63 = vcombine.high %v546_v29, %v550_v31  ;;  %v5658_v61 = vcombine.low %v546_v29, %v550_v31  ;;  %v554_v27 = vld [vmem:[%s7049_s8 + $0x40] sm:$0xff]  ;;  %v5661_v60 = vcombine.high %v547_v32, %v551_v62  ;;  %v5660_v59 = vcombine.low %v547_v32, %v551_v62  ;;  %v555_v57 = vld [vmem:[%s7049_s8 + $0x48] sm:$0xff]  ;;  %5788 = vset.pattern.permute.xlu1 %v12341_v28 }
  0x76   : > { %v558_v30 = vld [vmem:[%s7049_s8 + $0x60] sm:$0xff]  ;;  %v559_v25 = vld [vmem:[%s7049_s8 + $0x68] sm:$0xff]  ;;  %5789 = vset.pattern.permute.xlu0 %v12835_v52 }
  0x77   : > { %v5667_v58 = vcombine.high %v554_v27, %v558_v30  ;;  %v562_v26 = vld [vmem:[%s7049_s8 + $0x80] sm:$0xff]  ;;  %1068 = vmatprep.subr.bf16.mxu0 %v5659_v63  ;;  %v5669_v29 = vcombine.high %v555_v57, %v559_v25  ;;  %v563_v56 = vld [vmem:[%s7049_s8 + $0x88] sm:$0xff]  ;;  %1261 = vmatprep.subr.bf16.mxu1 %v5661_v60  ;;  %v5666_v54 = vcombine.low %v554_v27, %v558_v30 }
  0x78   : > { %v566_v31 = vld [vmem:[%s7049_s8 + $0xa0] sm:$0xff]  ;;  %v567_v55 = vld [vmem:[%s7049_s8 + $0xa8] sm:$0xff]  ;;  %1069 = vmatpush1.bf16.msra.mxu0 %v5658_v61  ;;  %1262 = vmatpush1.bf16.msra.mxu1 %v5660_v59  ;;  %v5668_v62 = vcombine.low %v555_v57, %v559_v25 }
  0x79   : > { %1070 = vmatprep.subr.bf16.mxu0 %v5667_v58  ;;  %v5675_v32 = vcombine.high %v562_v26, %v566_v31  ;;  %1263 = vmatprep.subr.bf16.mxu1 %v5669_v29  ;;  %v5677_v53 = vcombine.high %v563_v56, %v567_v55  ;;  %v570_v28 = vld [vmem:[%s7049_s8 + $0xc0] sm:$0xff]  ;;  %v571_v23 = vld [vmem:[%s7049_s8 + $0xc8] sm:$0xff]  ;;  %v5674_v60 = vcombine.low %v562_v26, %v566_v31 }
  0x7a   : > { %v574_v63 = vld [vmem:[%s7049_s8 + $0xe0] sm:$0xff]  ;;  %v575_v24 = vld [vmem:[%s7049_s8 + $0xe8] sm:$0xff]  ;;  %v5676_v27 = vcombine.low %v563_v56, %v567_v55 }
  0x7b   : > { %v5683_v58 = vcombine.high %v570_v28, %v574_v63  ;;  %v5685_v25 = vcombine.high %v571_v23, %v575_v24  ;;  %v578_v57 = vld [vmem:[%s7049_s8 + $0x100] sm:$0xff]  ;;  %v579_v61 = vld [vmem:[%s7049_s8 + $0x108] sm:$0xff]  ;;  %v5682_v29 = vcombine.low %v570_v28, %v574_v63  ;;  %v1843_v28 = vld [vmem:[#allocation2 + $0x10] sm:$0xff] }
  0x7c   : > { %1071 = vmatpush1.bf16.msra.mxu0 %v5666_v54  ;;  %1264 = vmatpush1.bf16.msra.mxu1 %v5668_v62  ;;  %v582_v59 = vld [vmem:[%s7049_s8 + $0x120] sm:$0xff]  ;;  %v583_v30 = vld [vmem:[%s7049_s8 + $0x128] sm:$0xff]  ;;  %v5684_v54 = vcombine.low %v571_v23, %v575_v24  ;;  %v1844_v24 = vld [vmem:[#allocation2 + $0x18] sm:$0xff] }
  0x7d   : > { %1072 = vmatprep.subr.bf16.mxu0 %v5675_v32  ;;  %1265 = vmatprep.subr.bf16.mxu1 %v5677_v53  ;;  %v5691_v26 = vcombine.high %v578_v57, %v582_v59  ;;  %v1842_v31 = vld [vmem:[#allocation2 + $0x8] sm:$0xff]  ;;  %v1841_v62 = vld [vmem:[#allocation2] sm:$0xff]  ;;  %v5693_v55 = vcombine.high %v579_v61, %v583_v30  ;;  %v5690_v23 = vcombine.low %v578_v57, %v582_v59 }
  0x7e   : > { %v586_v53 = vld [vmem:[%s7049_s8 + $0x140] sm:$0xff]  ;;  %3539 = vrot.lane.b32.xlu1 %v1842_v31, %s6610_s9  ;;  %v587_v32 = vld [vmem:[%s7049_s8 + $0x148] sm:$0xff]  ;;  %3537 = vrot.lane.b32.xlu0 %v1841_v62, %s6610_s9  ;;  %v5692_v63 = vcombine.low %v579_v61, %v583_v30 }
  0x7f   : > { %v590_v56 = vld [vmem:[%s7049_s8 + $0x160] sm:$0xff]  ;;  %v591_v51 = vld [vmem:[%s7049_s8 + $0x168] sm:$0xff] }
  0x80   : > { %1073 = vmatpush1.bf16.msra.mxu0 %v5674_v60  ;;  %1266 = vmatpush1.bf16.msra.mxu1 %v5676_v27  ;;  %v5699_v60 = vcombine.high %v586_v53, %v590_v56  ;;  %v5701_v27 = vcombine.high %v587_v32, %v591_v51  ;;  %v595_v31 = vld [vmem:[%s7049_s8 + $0x188] sm:$0xff]  ;;  %v1845_v57 = vld [vmem:[#allocation2 + $0x20] sm:$0xff]  ;;  %v5698_v59 = vcombine.low %v586_v53, %v590_v56  ;;  %v1847_v53 = vld [vmem:[#allocation2 + $0x30] sm:$0xff] }
  0x81   : > { %1074 = vmatprep.subr.bf16.mxu0 %v5683_v58  ;;  %1267 = vmatprep.subr.bf16.mxu1 %v5685_v25  ;;  %v594_v58 = vld [vmem:[%s7049_s8 + $0x180] sm:$0xff]  ;;  %v599_v50 = vld [vmem:[%s7049_s8 + $0x1a8] sm:$0xff]  ;;  %v5700_v61 = vcombine.low %v587_v32, %v591_v51 }
  0x82   : > { %v598_v25 = vld [vmem:[%s7049_s8 + $0x1a0] sm:$0xff]  ;;  %3541 = vrot.lane.b32.xlu1 %v1843_v28, %s6610_s9  ;;  %3543 = vrot.lane.b32.xlu0 %v1844_v24, %s6610_s9  ;;  %v607_v28 = vld [vmem:[%s7049_s8 + $0x1e8] sm:$0xff]  ;;  %v5708_v51 = vcombine.low %v595_v31, %v599_v50 }
  0x83   : > { %v5707_v30 = vcombine.high %v594_v58, %v598_v25  ;;  %v606_v62 = vld [vmem:[%s7049_s8 + $0x1e0] sm:$0xff]  ;;  %v5706_v56 = vcombine.low %v594_v58, %v598_v25  ;;  %v1850_v25 = vld [vmem:[#allocation2 + $0x48] sm:$0xff] }
  0x84   : > { %1075 = vmatpush1.bf16.msra.mxu0 %v5682_v29  ;;  %1268 = vmatpush1.bf16.msra.mxu1 %v5684_v54  ;;  %v1846_v29 = vld [vmem:[#allocation2 + $0x28] sm:$0xff]  ;;  %v5709_v54 = vcombine.high %v595_v31, %v599_v50 }
  0x85   : > { %1076 = vmatprep.subr.bf16.mxu0 %v5691_v26  ;;  %1269 = vmatprep.subr.bf16.mxu1 %v5693_v55  ;;  %v602_v26 = vld [vmem:[%s7049_s8 + $0x1c0] sm:$0xff]  ;;  %v603_v55 = vld [vmem:[%s7049_s8 + $0x1c8] sm:$0xff] }
  0x86   : > { %3545 = vrot.lane.b32.xlu1 %v1845_v57, %s6610_s9  ;;  %3547 = vrot.lane.b32.xlu0 %v1846_v29, %s6610_s9  ;;  %v5715_v32 = vcombine.high %v602_v26, %v606_v62  ;;  %v5717_v24 = vcombine.high %v603_v55, %v607_v28  ;;  %v553_v57 = vld [vmem:[%s7049_s8 + $0x38] sm:$0xff]  ;;  %v1849_v29 = vld [vmem:[#allocation2 + $0x40] sm:$0xff]  ;;  %v5714_v58 = vcombine.low %v602_v26, %v606_v62  ;;  %v1851_v26 = vld [vmem:[#allocation2 + $0x50] sm:$0xff] }
  0x87   : > { %v5716_v50 = vcombine.low %v603_v55, %v607_v28  ;;  %v557_v55 = vld [vmem:[%s7049_s8 + $0x58] sm:$0xff] }
  0x88   : > { %1077 = vmatpush1.bf16.msra.mxu0 %v5690_v23  ;;  %1270 = vmatpush1.bf16.msra.mxu1 %v5692_v63  ;;  %v1848_v23 = vld [vmem:[#allocation2 + $0x38] sm:$0xff]  ;;  %v548_v63 = vld [vmem:[%s7049_s8 + $0x10] sm:$0xff] }
  0x89   : > { %1078 = vmatprep.subr.bf16.mxu0 %v5699_v60  ;;  %1271 = vmatprep.subr.bf16.mxu1 %v5701_v27  ;;  %v552_v60 = vld [vmem:[%s7049_s8 + $0x30] sm:$0xff]  ;;  %v549_v27 = vld [vmem:[%s7049_s8 + $0x18] sm:$0xff] }
  0x8a   : > { %3549 = vrot.lane.b32.xlu1 %v1847_v53, %s6610_s9  ;;  %3551 = vrot.lane.b32.xlu0 %v1848_v23, %s6610_s9  ;;  %v5663_v31 = vcombine.high %v548_v63, %v552_v60  ;;  %v5662_v62 = vcombine.low %v548_v63, %v552_v60  ;;  %v561_v28 = vld [vmem:[%s7049_s8 + $0x78] sm:$0xff]  ;;  %v1853_v60 = vld [vmem:[#allocation2 + $0x60] sm:$0xff] }
  0x8b   : > { %v1852_v53 = vld [vmem:[#allocation2 + $0x58] sm:$0xff] }
  0x8c   : > { %1079 = vmatpush1.bf16.msra.mxu0 %v5698_v59  ;;  %1272 = vmatpush1.bf16.msra.mxu1 %v5700_v61  ;;  %v5665_v59 = vcombine.high %v549_v27, %v553_v57  ;;  %v7135_v61 = vcombine.low %v6848_v0, %v6851_v1  ;;  %v564_v0 = vld [vmem:[%s7049_s8 + $0x90] sm:$0xff] }
  0x8d   : > { %1080 = vmatprep.subr.bf16.mxu0 %v5707_v30  ;;  %1273 = vmatprep.subr.bf16.mxu1 %v5709_v54  ;;  %v556_v30 = vld [vmem:[%s7049_s8 + $0x50] sm:$0xff] }
  0x8e   : > { %3553 = vrot.lane.b32.xlu1 %v1849_v29, %s6610_s9  ;;  %v560_v54 = vld [vmem:[%s7049_s8 + $0x70] sm:$0xff]  ;;  %3555 = vrot.lane.b32.xlu0 %v1850_v25, %s6610_s9  ;;  %v1854_v29 = vld [vmem:[#allocation2 + $0x68] sm:$0xff]  ;;  %v7154_v25 = vcombine.low %v6862_v3, %v6865_v4 }
  0x8f   : > { %v5671_v23 = vcombine.high %v556_v30, %v560_v54  ;;  %v568_v1 = vld [vmem:[%s7049_s8 + $0xb0] sm:$0xff]  ;;  %v5670_v63 = vcombine.low %v556_v30, %v560_v54  ;;  %v573_v30 = vld [vmem:[%s7049_s8 + $0xd8] sm:$0xff] }
  0x90   : > { %1081 = vmatpush1.bf16.msra.mxu0 %v5706_v56  ;;  %1274 = vmatpush1.bf16.msra.mxu1 %v5708_v51  ;;  %v5664_v56 = vcombine.low %v549_v27, %v553_v57  ;;  %v5673_v51 = vcombine.high %v557_v55, %v561_v28  ;;  %v5672_v27 = vcombine.low %v557_v55, %v561_v28  ;;  %v577_v54 = vld [vmem:[%s7049_s8 + $0xf8] sm:$0xff]  ;;  %v580_v55 = vld [vmem:[%s7049_s8 + $0x110] sm:$0xff] }
  0x91   : > { %1082 = vmatprep.subr.bf16.mxu0 %v5715_v32  ;;  %1275 = vmatprep.subr.bf16.mxu1 %v5717_v24  ;;  %v565_v32 = vld [vmem:[%s7049_s8 + $0x98] sm:$0xff]  ;;  %v5679_v57 = vcombine.high %v564_v0, %v568_v1  ;;  %v5689_v4 = vcombine.high %v573_v30, %v577_v54  ;;  %v584_v28 = vld [vmem:[%s7049_s8 + $0x130] sm:$0xff] }
  0x92   : > { %3557 = vrot.lane.b32.xlu1 %v1851_v26, %s6610_s9  ;;  %v569_v24 = vld [vmem:[%s7049_s8 + $0xb8] sm:$0xff]  ;;  %3559 = vrot.lane.b32.xlu0 %v1852_v53, %s6610_s9  ;;  %v5678_v26 = vcombine.low %v564_v0, %v568_v1  ;;  %v5688_v0 = vcombine.low %v573_v30, %v577_v54  ;;  %v5695_v1 = vcombine.high %v580_v55, %v584_v28  ;;  %v1861_v54 = vld [vmem:[#allocation2 + $0xa0] sm:$0xff] }
  0x93   : > { %v1856_v53 = vld [vmem:[#allocation2 + $0x78] sm:$0xff] }
  0x94   : > { %1083 = vmatpush1.bf16.msra.mxu0 %v5714_v58  ;;  %1276 = vmatpush1.bf16.msra.mxu1 %v5716_v50  ;;  %v5681_v58 = vcombine.high %v565_v32, %v569_v24  ;;  %v572_v50 = vld [vmem:[%s7049_s8 + $0xd0] sm:$0xff] }
  0x95   : > { %1454 = vmatprep.subr.bf16.mxu0 %v5663_v31  ;;  %1647 = vmatprep.subr.bf16.mxu1 %v5665_v59  ;;  %v576_v31 = vld [vmem:[%s7049_s8 + $0xf0] sm:$0xff] }
  0x96   : > { %3561 = vrot.lane.b32.xlu1 %v1853_v60, %s6610_s9  ;;  %3563 = vrot.lane.b32.xlu0 %v1854_v29, %s6610_s9  ;;  %v1855_v59 = vld [vmem:[#allocation2 + $0x70] sm:$0xff]  ;;  %v5687_v3 = vcombine.high %v572_v50, %v576_v31  ;;  %v593_v29 = vld [vmem:[%s7049_s8 + $0x178] sm:$0xff] }
  0x97   : > { %1101 = vmatmul.mubr.bf16.vlgmr.msra.gmra.mrb[0].mxu0 %v7135_v61  ;;  %1294 = vmatmul.mubr.bf16.vlgmr.msra.gmra.mrb[0].mxu1 %v7135_v61  ;;  %v588_v60 = vld [vmem:[%s7049_s8 + $0x150] sm:$0xff] }
  0x98   : > { %1455 = vmatpush1.bf16.msra.mxu0 %v5662_v62  ;;  %1648 = vmatpush1.bf16.msra.mxu1 %v5664_v56  ;;  %v5680_v62 = vcombine.low %v565_v32, %v569_v24  ;;  %v5686_v56 = vcombine.low %v572_v50, %v576_v31  ;;  %v581_v32 = vld [vmem:[%s7049_s8 + $0x118] sm:$0xff]  ;;  %v5694_v50 = vcombine.low %v580_v55, %v584_v28  ;;  %v1862_v55 = vld [vmem:[#allocation2 + $0xa8] sm:$0xff] }
  0x99   : > { %1110 = vmatprep.mubr.bf16.mxu0 %v12835_v52  ;;  %1303 = vmatprep.mubr.bf16.mxu1 %v12835_v52  ;;  %v585_v24 = vld [vmem:[%s7049_s8 + $0x138] sm:$0xff] }
  0x9a   : > { %1456 = vmatprep.subr.bf16.mxu0 %v5671_v23  ;;  %1649 = vmatprep.subr.bf16.mxu1 %v5673_v51  ;;  %v1857_v23 = vld [vmem:[#allocation2 + $0x80] sm:$0xff]  ;;  %v7171_v51 = vcombine.low %v6868_v5, %v6875_v6  ;;  %v5697_v31 = vcombine.high %v581_v32, %v585_v24  ;;  %v5696_v5 = vcombine.low %v581_v32, %v585_v24  ;;  %v1860_v6 = vld [vmem:[#allocation2 + $0x98] sm:$0xff] }
  0x9b   : > { %3565 = vrot.lane.b32.xlu1 %v1855_v59, %s6610_s9  ;;  %3567 = vrot.lane.b32.xlu0 %v1856_v53, %s6610_s9  ;;  %v597_v28 = vld [vmem:[%s7049_s8 + $0x198] sm:$0xff] }
  0x9c   : > { %1457 = vmatpush1.bf16.msra.mxu0 %v5670_v63  ;;  %1650 = vmatpush1.bf16.msra.mxu1 %v5672_v27  ;;  %v1858_v63 = vld [vmem:[#allocation2 + $0x88] sm:$0xff]  ;;  %v592_v27 = vld [vmem:[%s7049_s8 + $0x170] sm:$0xff]  ;;  %v601_v53 = vld [vmem:[%s7049_s8 + $0x1b8] sm:$0xff] }
  0x9d   : > { %1458 = vmatprep.subr.bf16.mxu0 %v5679_v57  ;;  %1651 = vmatprep.subr.bf16.mxu1 %v5681_v58  ;;  %v589_v57 = vld [vmem:[%s7049_s8 + $0x158] sm:$0xff]  ;;  %v1859_v58 = vld [vmem:[#allocation2 + $0x90] sm:$0xff]  ;;  %v5703_v59 = vcombine.high %v588_v60, %v592_v27  ;;  %v5713_v24 = vcombine.high %v597_v28, %v601_v53 }
  0x9e   : > { %v5705_v30 = vcombine.high %v589_v57, %v593_v29 }
  0x9f   : > { %1111 = vmatmul.mubr.bf16.gmra.mrb[4].mxu0 %v7154_v25  ;;  %1304 = vmatmul.mubr.bf16.gmra.mrb[4].mxu1 %v7154_v25 }
  0xa0   : > { %1120 = vmatprep.mubr.bf16.mxu0 %v12835_v52  ;;  %1313 = vmatprep.mubr.bf16.mxu1 %v12835_v52 }
  0xa1   : > { %1459 = vmatpush1.bf16.msra.mxu0 %v5678_v26  ;;  %1652 = vmatpush1.bf16.msra.mxu1 %v5680_v62  ;;  %v5702_v26 = vcombine.low %v588_v60, %v592_v27  ;;  %v7189_v62 = vcombine.low %v6878_v7, %v6881_v8  ;;  %v1864_v8 = vld [vmem:[#allocation2 + $0xb8] sm:$0xff]  ;;  %v1865_v60 = vld [vmem:[#allocation2 + $0xc0] sm:$0xff]  ;;  %v5712_v27 = vcombine.low %v597_v28, %v601_v53 }
  0xa2   : > { %1460 = vmatprep.subr.bf16.mxu0 %v5687_v3  ;;  %1653 = vmatprep.subr.bf16.mxu1 %v5689_v4  ;;  %v596_v3 = vld [vmem:[%s7049_s8 + $0x190] sm:$0xff] }
  0xa3   : > { %3569 = vrot.lane.b32.xlu1 %v1857_v23, %s6610_s9  ;;  %3571 = vrot.lane.b32.xlu0 %v1858_v63, %s6610_s9  ;;  %v600_v4 = vld [vmem:[%s7049_s8 + $0x1b0] sm:$0xff] }
  0xa4   : > { %v608_v23 = vld [vmem:[%s7049_s8 + $0x1f0] sm:$0xff]  ;;  %v5711_v32 = vcombine.high %v596_v3, %v600_v4  ;;  %v5710_v7 = vcombine.low %v596_v3, %v600_v4  ;;  %v7226_v3 = vstv %s5722_s10  ;;  %v7238_v4 = vcombine.low %v6896_v13, %v6899_v14 }
  0xa5   : > { %1461 = vmatpush1.bf16.msra.mxu0 %v5686_v56  ;;  %1654 = vmatpush1.bf16.msra.mxu1 %v5688_v0  ;;  %v604_v56 = vld [vmem:[%s7049_s8 + $0x1d0] sm:$0xff]  ;;  %v3701_v28 = vsub.s32 %v6959_v34, %v7226_v3  ;;  %v3702_v53 = vsub.s32 %v6962_v35, %v7226_v3  ;;  %v7255_v13 = vcombine.low %v6902_v15, %v6905_v16 }
  0xa6   : > { %1462 = vmatprep.subr.bf16.mxu0 %v5695_v1  ;;  %1655 = vmatprep.subr.bf16.mxu1 %v5697_v31  ;;  %v1863_v0 = vld [vmem:[#allocation2 + $0xb0] sm:$0xff]  ;;  %v5704_v1 = vcombine.low %v589_v57, %v593_v29  ;;  %v5719_v63 = vcombine.high %v604_v56, %v608_v23  ;;  %v7207_v57 = vcombine.low %v6884_v9, %v6887_v10  ;;  %v605_v29 = vld [vmem:[%s7049_s8 + $0x1d8] sm:$0xff] }
  0xa7   : > { %1121 = vmatmul.mubr.bf16.gmra.mrb[8].mxu0 %v7171_v51  ;;  %1314 = vmatmul.mubr.bf16.gmra.mrb[8].mxu1 %v7171_v51  ;;  %v1867_v31 = vld [vmem:[#allocation2 + $0xd0] sm:$0xff]  ;;  %v1868_v10 = vld [vmem:[#allocation2 + $0xd8] sm:$0xff]  ;;  %v3704_v14 = vsub.s32 %v6968_v37, %v7226_v3  ;;  %v3706_v34 = vsub.s32 %v6974_v39, %v7226_v3  ;;  %v3707_v15 = vsub.s32 %v6977_v40, %v7226_v3 }
  0xa8   : > { %1130 = vmatprep.mubr.bf16.mxu0 %v12835_v52  ;;  %1323 = vmatprep.mubr.bf16.mxu1 %v12835_v52  ;;  %v7271_v16 = vcombine.low %v6908_v17, %v6911_v18  ;;  %v3708_v35 = vsub.s32 %v6980_v41, %v7226_v3  ;;  %v3710_v37 = vsub.s32 %v6986_v43, %v7226_v3 }
  0xa9   : > { %3573 = vrot.lane.b32.xlu1 %v1859_v58, %s6610_s9  ;;  %1463 = vmatpush1.bf16.msra.mxu0 %v5694_v50  ;;  %v609_v58 = vld [vmem:[%s7049_s8 + $0x1f8] sm:$0xff]  ;;  %v1866_v50 = vld [vmem:[#allocation2 + $0xc8] sm:$0xff]  ;;  %v3711_v17 = vsub.s32 %v6989_v44, %v7226_v3  ;;  %v7287_v18 = vcombine.low %v6914_v19, %v6917_v20  ;;  %v3713_v39 = vsub.s32 %v6995_v46, %v7226_v3 }
  0xaa   : > { %3575 = vrot.lane.b32.xlu0 %v1860_v6, %s6610_s9  ;;  %1656 = vmatpush1.bf16.msra.mxu1 %v5696_v5  ;;  %v5718_v5 = vcombine.low %v604_v56, %v608_v23  ;;  %v5721_v6 = vcombine.high %v605_v29, %v609_v58  ;;  %v5720_v9 = vcombine.low %v605_v29, %v609_v58  ;;  %v12837_v44 = vld [vmem:[#allocation15_spill] sm:$0xff]  ;;  %v12839_v46 = vld [vmem:[#allocation5_spill] sm:$0xff]  ;;  %v12842_v23 = vld [vmem:[#allocation18_spill] sm:$0xff] }
  0xab   : > { %1464 = vmatprep.subr.bf16.mxu0 %v5703_v59  ;;  %1657 = vmatprep.subr.bf16.mxu1 %v5705_v30  ;;  %v1869_v59 = vld [vmem:[#allocation2 + $0xe0] sm:$0xff]  ;;  %v7221_v30 = vcombine.low %v6890_v11, %v6893_v12  ;;  %v1872_v11 = vld [vmem:[#allocation2 + $0xf8] sm:$0xff]  ;;  %v3699_v12 = vsub.s32 %v6854_v2, %v7226_v3  ;;  %v3703_v2 = vsub.s32 %v6965_v36, %v7226_v3  ;;  %v12848_v58 = vld [vmem:[#allocation22_spill] sm:$0xff] }
  0xac   : > { %v3709_v36 = vsub.s32 %v6983_v42, %v7226_v3  ;;  %v3714_v40 = vsub.s32 %v6998_v47, %v7226_v3  ;;  %v3715_v19 = vsub.s32 %v7001_v48, %v7226_v3  ;;  %v7303_v20 = vcombine.low %v6920_v21, %v6923_v22  ;;  %v12836_v42 = vld [vmem:[#allocation14_spill] sm:$0xff]  ;;  %v12838_v21 = vld [vmem:[#allocation16_spill] sm:$0xff] }
  0xad   : > { %3577 = vrot.lane.b32.xlu1 %v1861_v54, %s6610_s9  ;;  %1465 = vmatpush1.bf16.msra.mxu0 %v5702_v26  ;;  %v1870_v54 = vld [vmem:[#allocation2 + $0xe8] sm:$0xff]  ;;  %v1871_v26 = vld [vmem:[#allocation2 + $0xf0] sm:$0xff]  ;;  %v3716_v41 = vsub.s32 %v7004_v49, %v7226_v3  ;;  %v3717_v43 = vsub.s32 %v12836_v42, %v7226_v3  ;;  %v3719_v22 = vsub.s32 %v12838_v21, %v7226_v3  ;;  %v12840_v47 = vld [vmem:[#allocation4_spill] sm:$0xff] }
  0xae   : > { %3579 = vrot.lane.b32.xlu0 %v1862_v55, %s6610_s9  ;;  %1658 = vmatpush1.bf16.msra.mxu1 %v5704_v1  ;;  %v3700_v55 = vsub.s32 %v6956_v33, %v7226_v3  ;;  %v3705_v33 = vsub.s32 %v6971_v38, %v7226_v3  ;;  %v3712_v38 = vsub.s32 %v6992_v45, %v7226_v3  ;;  %v12841_v49 = vld [vmem:[#allocation17_spill] sm:$0xff]  ;;  %v12843_v1 = vld [vmem:[#allocation19_spill] sm:$0xff] }
  0xaf   : > { %1131 = vmatmul.mubr.bf16.gmra.mrb[12].mxu0 %v7189_v62  ;;  %1324 = vmatmul.mubr.bf16.gmra.mrb[12].mxu1 %v7189_v62  ;;  %v3718_v45 = vsub.s32 %v12837_v44, %v7226_v3  ;;  %v7319_v48 = vcombine.low %v12840_v47, %v12839_v46  ;;  %v3720_v56 = vsub.s32 %v12841_v49, %v7226_v3 }
  0xb0   : > { %1140 = vmatprep.mubr.bf16.mxu0 %v12835_v52  ;;  %1333 = vmatprep.mubr.bf16.mxu1 %v12835_v52 }
  0xb1   : > { %3581 = vrot.lane.b32.xlu1 %v1863_v0, %s6610_s9  ;;  %1466 = vmatprep.subr.bf16.mxu0 %v5711_v32  ;;  %v3721_v0 = vsub.s32 %v12842_v23, %v7226_v3  ;;  %v3722_v32 = vsub.s32 %v12843_v1, %v7226_v3 }
  0xb2   : > { %3583 = vrot.lane.b32.xlu0 %v1864_v8, %s6610_s9  ;;  %1467 = vmatpush1.bf16.msra.mxu0 %v5710_v7  ;;  %v12844_v7 = vld [vmem:[#allocation20_spill] sm:$0xff] }
  0xb3   : > { %1659 = vmatprep.subr.bf16.mxu1 %v5713_v24  ;;  %1468 = vmatprep.subr.bf16.mxu0 %v5719_v63  ;;  %v3723_v8 = vsub.s32 %v12844_v7, %v7226_v3  ;;  %v12845_v24 = vld [vmem:[#allocation7_spill] sm:$0xff]  ;;  %v12846_v63 = vld [vmem:[#allocation6_spill] sm:$0xff] }
  0xb4   : > { %1660 = vmatpush1.bf16.msra.mxu1 %v5712_v27  ;;  %v12847_v27 = vld [vmem:[#allocation21_spill] sm:$0xff] }
  0xb5   : > { %3585 = vrot.lane.b32.xlu1 %v1865_v60, %s6610_s9  ;;  %1661 = vmatprep.subr.bf16.mxu1 %v5721_v6  ;;  %v7335_v60 = vcombine.low %v12846_v63, %v12845_v24  ;;  %v3724_v29 = vsub.s32 %v12847_v27, %v7226_v3  ;;  %v12850_v6 = vld [vmem:[#allocation24_spill] sm:$0xff] }
  0xb6   : > { %3587 = vrot.lane.b32.xlu0 %v1866_v50, %s6610_s9  ;;  %1469 = vmatpush1.bf16.msra.mxu0 %v5718_v5  ;;  %v3725_v50 = vsub.s32 %v12848_v58, %v7226_v3 }
  0xb7   : > { %1141 = vmatmul.mubr.bf16.gmra.mrb[16].mxu0 %v7207_v57  ;;  %1334 = vmatmul.mubr.bf16.gmra.mrb[16].mxu1 %v7207_v57 }
  0xb8   : > { %1150 = vmatprep.mubr.bf16.mxu0 %v12835_v52  ;;  %1343 = vmatprep.mubr.bf16.mxu1 %v12835_v52 }
  0xb9   : > { %3589 = vrot.lane.b32.xlu1 %v1867_v31, %s6610_s9  ;;  %1662 = vmatpush1.bf16.msra.mxu1 %v5720_v9  ;;  %v12849_v31 = vld [vmem:[#allocation23_spill] sm:$0xff]  ;;  %v3727_v9 = vsub.s32 %v12850_v6, %v7226_v3 }
  0xba   : > { %3591 = vrot.lane.b32.xlu0 %v1868_v10, %s6610_s9  ;;  %v3726_v5 = vsub.s32 %v12849_v31, %v7226_v3  ;;  %v12851_v10 = vld [vmem:[#allocation9_spill] sm:$0xff] }
  0xbd   : > { %3593 = vrot.lane.b32.xlu1 %v1869_v59, %s6610_s9  ;;  %v12852_v59 = vld [vmem:[#allocation8_spill] sm:$0xff] }
  0xbe   : > { %3595 = vrot.lane.b32.xlu0 %v1870_v54, %s6610_s9  ;;  %v7351_v54 = vcombine.low %v12852_v59, %v12851_v10  ;;  %v7512_v10 = vld [vmem:[%s423_s7] sm:$0xff] }
  0xbf   : > { %1151 = vmatmul.mubr.bf16.gmra.mrb[20].mxu0 %v7221_v30  ;;  %1344 = vmatmul.mubr.bf16.gmra.mrb[20].mxu1 %v7221_v30 }
  0xc0   : > { %1160 = vmatprep.mubr.bf16.mxu0 %v12835_v52  ;;  %1353 = vmatprep.mubr.bf16.mxu1 %v12835_v52 }
  0xc1   : > { %3597 = vrot.lane.b32.xlu1 %v1871_v26, %s6610_s9  ;;  %v12853_v26 = vld [vmem:[#allocation25_spill] sm:$0xff] }
  0xc2   : > { %3599 = vrot.lane.b32.xlu0 %v1872_v11, %s6610_s9  ;;  %v3728_v11 = vsub.s32 %v12853_v26, %v7226_v3 }
  0xc5   : > { %3741 = vperm.xlu1 %5788, %v3699_v12   ;;  %v12854_v12 = vld [vmem:[#allocation26_spill] sm:$0xff] }
  0xc6   : > { %3744 = vperm.xlu0 %5789, %v3700_v55   ;;  %v3729_v55 = vsub.s32 %v12854_v12, %v7226_v3 }
  0xc7   : > { %1161 = vmatmul.mubr.bf16.gmra.mrb[24].mxu0 %v7238_v4  ;;  %1354 = vmatmul.mubr.bf16.gmra.mrb[24].mxu1 %v7238_v4 }
  0xc8   : > { %1170 = vmatprep.mubr.bf16.mxu0 %v12835_v52  ;;  %1363 = vmatprep.mubr.bf16.mxu1 %v12835_v52 }
  0xc9   : > { %3747 = vperm.xlu1 %5788, %v3701_v28   ;;  %v12855_v28 = vld [vmem:[#allocation27_spill] sm:$0xff] }
  0xca   : > { %3750 = vperm.xlu0 %5789, %v3702_v53   ;;  %v3730_v53 = vsub.s32 %v12855_v28, %v7226_v3  ;;  %v12858_v3 = vld [vmem:[#allocation13_spill] sm:$0xff] }
  0xcd   : > { %3753 = vperm.xlu1 %5788, %v3703_v2   ;;  %v12856_v2 = vld [vmem:[#allocation11_spill] sm:$0xff] }
  0xce   : > { %3756 = vperm.xlu0 %5789, %v3704_v14   ;;  %v12857_v14 = vld [vmem:[#allocation10_spill] sm:$0xff] }
  0xcf   : > { %1171 = vmatmul.mubr.bf16.gmra.mrb[28].mxu0 %v7255_v13  ;;  %1364 = vmatmul.mubr.bf16.gmra.mrb[28].mxu1 %v7255_v13 }
  0xd0   : > { %1180 = vmatprep.mubr.bf16.mxu0 %v12835_v52  ;;  %1373 = vmatprep.mubr.bf16.mxu1 %v12835_v52 }
  0xd1   : > { %3759 = vperm.xlu1 %5788, %v3705_v33   ;;  %v7365_v33 = vcombine.low %v12857_v14, %v12856_v2 }
  0xd2   : > { %3762 = vperm.xlu0 %5789, %v3706_v34   ;;  %v12859_v34 = vld [vmem:[#allocation12_spill] sm:$0xff] }
  0xd5   : > { %3765 = vperm.xlu1 %5788, %v3707_v15   ;;  %v7373_v15 = vcombine.low %v12859_v34, %v12858_v3 }
  0xd6   : > { %3768 = vperm.xlu0 %5789, %v3708_v35  }
  0xd7   : > { %1181 = vmatmul.mubr.bf16.gmra.mrb[32].mxu0 %v7271_v16  ;;  %1374 = vmatmul.mubr.bf16.gmra.mrb[32].mxu1 %v7271_v16 }
  0xd8   : > { %1190 = vmatprep.mubr.bf16.mxu0 %v12835_v52  ;;  %1383 = vmatprep.mubr.bf16.mxu1 %v12835_v52 }
  0xd9   : > { %3771 = vperm.xlu1 %5788, %v3709_v36  }
  0xda   : > { %3774 = vperm.xlu0 %5789, %v3710_v37  }
  0xdd   : > { %3777 = vperm.xlu1 %5788, %v3711_v17  }
  0xde   : > { %3780 = vperm.xlu0 %5789, %v3712_v38  }
  0xdf   : > { %1191 = vmatmul.mubr.bf16.gmra.mrb[36].mxu0 %v7287_v18  ;;  %1384 = vmatmul.mubr.bf16.gmra.mrb[36].mxu1 %v7287_v18 }
  0xe0   : > { %1200 = vmatprep.mubr.bf16.mxu0 %v12835_v52  ;;  %1393 = vmatprep.mubr.bf16.mxu1 %v12835_v52 }
  0xe1   : > { %3783 = vperm.xlu1 %5788, %v3713_v39  }
  0xe2   : > { %3786 = vperm.xlu0 %5789, %v3714_v40  }
  0xe5   : > { %3789 = vperm.xlu1 %5788, %v3715_v19  }
  0xe6   : > { %3792 = vperm.xlu0 %5789, %v3716_v41  }
  0xe7   : > { %1201 = vmatmul.mubr.bf16.gmra.mrb[40].mxu0 %v7303_v20  ;;  %1394 = vmatmul.mubr.bf16.gmra.mrb[40].mxu1 %v7303_v20 }
  0xe8   : > { %1210 = vmatprep.mubr.bf16.mxu0 %v12835_v52  ;;  %1403 = vmatprep.mubr.bf16.mxu1 %v12835_v52 }
  0xe9   : > { %3795 = vperm.xlu1 %5788, %v3717_v43  }
  0xea   : > { %3798 = vperm.xlu0 %5789, %v3718_v45  }
  0xed   : > { %3801 = vperm.xlu1 %5788, %v3719_v22  }
  0xee   : > { %3804 = vperm.xlu0 %5789, %v3720_v56  }
  0xef   : > { %1211 = vmatmul.mubr.bf16.gmra.mrb[44].mxu0 %v7319_v48  ;;  %1404 = vmatmul.mubr.bf16.gmra.mrb[44].mxu1 %v7319_v48 }
  0xf0   : > { %1220 = vmatprep.mubr.bf16.mxu0 %v12835_v52  ;;  %1413 = vmatprep.mubr.bf16.mxu1 %v12835_v52  ;;  %v7378_v35 = vpop.permute.xlu1 %3539  ;;  %v7381_v36 = vpop.permute.xlu0 %3537 }
  0xf1   : > { %3807 = vperm.xlu1 %5788, %v3721_v0   ;;  %12860 = vst [vmem:[#allocation14_spill] sm:$0xff] %v7378_v35  ;;  %12861 = vst [vmem:[#allocation15_spill] sm:$0xff] %v7381_v36 }
  0xf2   : > { %3810 = vperm.xlu0 %5789, %v3722_v32  }
  0xf4   : > { %v7383_v37 = vpop.permute.xlu1 %3541  ;;  %v7389_v17 = vpop.permute.xlu0 %3543 }
  0xf5   : > { %3813 = vperm.xlu1 %5788, %v3723_v8   ;;  %12862 = vst [vmem:[#allocation16_spill] sm:$0xff] %v7383_v37  ;;  %12863 = vst [vmem:[#allocation5_spill] sm:$0xff] %v7389_v17 }
  0xf6   : > { %3816 = vperm.xlu0 %5789, %v3724_v29  }
  0xf7   : > { %1221 = vmatmul.mubr.bf16.gmra.mrb[48].mxu0 %v7335_v60  ;;  %1414 = vmatmul.mubr.bf16.gmra.mrb[48].mxu1 %v7335_v60 }
  0xf8   : > { %1230 = vmatprep.mubr.bf16.mxu0 %v12835_v52  ;;  %1423 = vmatprep.mubr.bf16.mxu1 %v12835_v52  ;;  %v7391_v38 = vpop.permute.xlu1 %3545  ;;  %v7397_v39 = vpop.permute.xlu0 %3547 }
  0xf9   : > { %3819 = vperm.xlu1 %5788, %v3725_v50   ;;  %12864 = vst [vmem:[#allocation4_spill] sm:$0xff] %v7391_v38  ;;  %12865 = vst [vmem:[#allocation17_spill] sm:$0xff] %v7397_v39 }
  0xfa   : > { %3822 = vperm.xlu0 %5789, %v3726_v5  }
  0xfc   : > { %v7399_v40 = vpop.permute.xlu1 %3549 }
  0xfd   : > { %3825 = vperm.xlu1 %5788, %v3727_v9   ;;  %12866 = vst [vmem:[#allocation18_spill] sm:$0xff] %v7399_v40 }
  0xfe   : > { %3828 = vperm.xlu0 %5789, %v3728_v11  }
  0xff   : > { %1231 = vmatmul.mubr.bf16.gmra.mrb[52].mxu0 %v7351_v54  ;;  %1424 = vmatmul.mubr.bf16.gmra.mrb[52].mxu1 %v7351_v54 }
 0x100   : > { %1240 = vmatprep.mubr.bf16.mxu0 %v12835_v52  ;;  %1433 = vmatprep.mubr.bf16.mxu1 %v12835_v52  ;;  %v7406_v19 = vpop.permute.xlu1 %3553 }
 0x101   : > { %3831 = vperm.xlu1 %5788, %v3729_v55   ;;  %12868 = vst [vmem:[#allocation20_spill] sm:$0xff] %v7406_v19 }
 0x102   : > { %3834 = vperm.xlu0 %5789, %v3730_v53  }
 0x104   : > { %v7411_v41 = vpop.permute.xlu1 %3557 }
 0x105   : > { %12870 = vst [vmem:[#allocation6_spill] sm:$0xff] %v7411_v41 }
 0x107   : > { %1241 = vmatmul.mubr.bf16.gmra.mrb[56].mxu0 %v7365_v33  ;;  %1434 = vmatmul.mubr.bf16.gmra.mrb[56].mxu1 %v7365_v33 }
 0x108   : > { %1250 = vmatprep.mubr.bf16.mxu0 %v12835_v52  ;;  %1443 = vmatprep.mubr.bf16.mxu1 %v12835_v52 }
 0x10f   : > { %1251 = vmatmul.mubr.bf16.gmra.mrb[60].mxu0 %v7373_v15  ;;  %1444 = vmatmul.mubr.bf16.gmra.mrb[60].mxu1 %v7373_v15 }
 0x110   : > { %1486 = vmatprep.mubr.bf16.mxu0 %v12835_v52  ;;  %1679 = vmatprep.mubr.bf16.mxu1 %v12835_v52 }
 0x117   : > { %1487 = vmatmul.mubr.bf16.vlgmr.msra.gmra.mrb[64].mxu0 %v7135_v61  ;;  %1680 = vmatmul.mubr.bf16.vlgmr.msra.gmra.mrb[64].mxu1 %v7135_v61  ;;  %v7402_v61 = vpop.permute.xlu0 %3551 }
 0x118   : > { %1496 = vmatprep.mubr.bf16.mxu0 %v12835_v52  ;;  %1689 = vmatprep.mubr.bf16.mxu1 %v12835_v52  ;;  %12867 = vst [vmem:[#allocation19_spill] sm:$0xff] %v7402_v61 }
 0x11f   : > { %1497 = vmatmul.mubr.bf16.gmra.mrb[68].mxu0 %v7154_v25  ;;  %1690 = vmatmul.mubr.bf16.gmra.mrb[68].mxu1 %v7154_v25  ;;  %v7409_v25 = vpop.permute.xlu0 %3555 }
 0x120   : > { %1506 = vmatprep.mubr.bf16.mxu0 %v12835_v52  ;;  %1699 = vmatprep.mubr.bf16.mxu1 %v12835_v52  ;;  %12869 = vst [vmem:[#allocation7_spill] sm:$0xff] %v7409_v25 }
 0x123   : > { %v7417_v42 = vpop.permute.xlu0 %3559 }
 0x124   : > { %12871 = vst [vmem:[#allocation21_spill] sm:$0xff] %v7417_v42 }
 0x127   : > { %1507 = vmatmul.mubr.bf16.gmra.mrb[72].mxu0 %v7171_v51  ;;  %1700 = vmatmul.mubr.bf16.gmra.mrb[72].mxu1 %v7171_v51  ;;  %v7419_v51 = vpop.permute.xlu1 %3561  ;;  %v7425_v43 = vpop.permute.xlu0 %3563 }
 0x128   : > { %1516 = vmatprep.mubr.bf16.mxu0 %v12835_v52  ;;  %1709 = vmatprep.mubr.bf16.mxu1 %v12835_v52  ;;  %12872 = vst [vmem:[#allocation22_spill] sm:$0xff] %v7419_v51  ;;  %12873 = vst [vmem:[#allocation23_spill] sm:$0xff] %v7425_v43 }
 0x12b   : > { %v7427_v44 = vpop.permute.xlu1 %3565 }
 0x12c   : > { %12874 = vst [vmem:[#allocation24_spill] sm:$0xff] %v7427_v44 }
 0x12f   : > { %1517 = vmatmul.mubr.bf16.gmra.mrb[76].mxu0 %v7189_v62  ;;  %1710 = vmatmul.mubr.bf16.gmra.mrb[76].mxu1 %v7189_v62  ;;  %v7430_v62 = vpop.permute.xlu0 %3567  ;;  %v7434_v45 = vpop.permute.xlu1 %3569 }
 0x130   : > { %1526 = vmatprep.mubr.bf16.mxu0 %v12835_v52  ;;  %1719 = vmatprep.mubr.bf16.mxu1 %v12835_v52  ;;  %12875 = vst [vmem:[#allocation9_spill] sm:$0xff] %v7430_v62  ;;  %12876 = vst [vmem:[#allocation8_spill] sm:$0xff] %v7434_v45 }
 0x133   : > { %v7439_v21 = vpop.permute.xlu1 %3573 }
 0x134   : > { %12878 = vst [vmem:[#allocation26_spill] sm:$0xff] %v7439_v21 }
 0x137   : > { %1527 = vmatmul.mubr.bf16.gmra.mrb[80].mxu0 %v7207_v57  ;;  %1720 = vmatmul.mubr.bf16.gmra.mrb[80].mxu1 %v7207_v57  ;;  %v7437_v57 = vpop.permute.xlu0 %3571 }
 0x138   : > { %1536 = vmatprep.mubr.bf16.mxu0 %v12835_v52  ;;  %1729 = vmatprep.mubr.bf16.mxu1 %v12835_v52  ;;  %12877 = vst [vmem:[#allocation25_spill] sm:$0xff] %v7437_v57 }
 0x13b   : > { %v7445_v22 = vpop.permute.xlu0 %3575 }
 0x13c   : > { %12879 = vst [vmem:[#allocation27_spill] sm:$0xff] %v7445_v22 }
 0x13f   : > { %1537 = vmatmul.mubr.bf16.gmra.mrb[84].mxu0 %v7221_v30  ;;  %1730 = vmatmul.mubr.bf16.gmra.mrb[84].mxu1 %v7221_v30  ;;  %v7447_v30 = vpop.permute.xlu1 %3577  ;;  %v7452_v46 = vpop.permute.xlu0 %3579 }
 0x140   : > { %1546 = vmatprep.mubr.bf16.mxu0 %v12835_v52  ;;  %1739 = vmatprep.mubr.bf16.mxu1 %v12835_v52  ;;  %12880 = vst [vmem:[#allocation11_spill] sm:$0xff] %v7447_v30  ;;  %12881 = vst [vmem:[#allocation10_spill] sm:$0xff] %v7452_v46 }
 0x143   : > { %v7455_v47 = vpop.permute.xlu1 %3581 }
 0x144   : > { %12882 = vst [vmem:[#allocation13_spill] sm:$0xff] %v7455_v47 }
 0x147   : > { %1547 = vmatmul.mubr.bf16.gmra.mrb[88].mxu0 %v7238_v4  ;;  %1740 = vmatmul.mubr.bf16.gmra.mrb[88].mxu1 %v7238_v4  ;;  %v7458_v4 = vpop.permute.xlu0 %3583  ;;  %v7461_v49 = vpop.permute.xlu1 %3585 }
 0x148   : > { %1556 = vmatprep.mubr.bf16.mxu0 %v12835_v52  ;;  %1749 = vmatprep.mubr.bf16.mxu1 %v12835_v52  ;;  %12883 = vst [vmem:[#allocation12_spill] sm:$0xff] %v7458_v4  ;;  %12884 = vst [vmem:[#allocation28_spill] sm:$0xff] %v7461_v49 }
 0x14b   : > { %v7467_v56 = vpop.permute.xlu1 %3589 }
 0x14c   : > { %12886 = vst [vmem:[#allocation30_spill] sm:$0xff] %v7467_v56 }
 0x14f   : > { %1557 = vmatmul.mubr.bf16.gmra.mrb[92].mxu0 %v7255_v13  ;;  %1750 = vmatmul.mubr.bf16.gmra.mrb[92].mxu1 %v7255_v13  ;;  %v7465_v13 = vpop.permute.xlu0 %3587 }
 0x150   : > { %1566 = vmatprep.mubr.bf16.mxu0 %v12835_v52  ;;  %1759 = vmatprep.mubr.bf16.mxu1 %v12835_v52  ;;  %12885 = vst [vmem:[#allocation29_spill] sm:$0xff] %v7465_v13 }
 0x153   : > { %v7473_v23 = vpop.permute.xlu0 %3591 }
 0x154   : > { %12887 = vst [vmem:[#allocation31_spill] sm:$0xff] %v7473_v23 }
 0x157   : > { %1567 = vmatmul.mubr.bf16.gmra.mrb[96].mxu0 %v7271_v16  ;;  %1760 = vmatmul.mubr.bf16.gmra.mrb[96].mxu1 %v7271_v16  ;;  %v7475_v16 = vpop.permute.xlu1 %3593  ;;  %v7480_v0 = vpop.permute.xlu0 %3595 }
 0x158   : > { %1576 = vmatprep.mubr.bf16.mxu0 %v12835_v52  ;;  %1769 = vmatprep.mubr.bf16.mxu1 %v12835_v52  ;;  %12888 = vst [vmem:[#allocation32_spill] sm:$0xff] %v7475_v16  ;;  %12889 = vst [vmem:[#allocation33_spill] sm:$0xff] %v7480_v0 }
 0x15b   : > { %v7483_v1 = vpop.permute.xlu1 %3597  ;;  %v7496_v50 = vpop.permute.xlu0 %3599 }
 0x15c   : > { %12890 = vst [vmem:[#allocation34_spill] sm:$0xff] %v7483_v1  ;;  %12891 = vst [vmem:[#allocation35_spill] sm:$0xff] %v7496_v50 }
 0x15f   : > { %1577 = vmatmul.mubr.bf16.gmra.mrb[100].mxu0 %v7287_v18  ;;  %1770 = vmatmul.mubr.bf16.gmra.mrb[100].mxu1 %v7287_v18  ;;  %v612_v18 = vlaneseq  ;;  %v7503_v6 = vpop.permute.xlu1 %3741  ;;  %v7535_v3 = vpop.permute.xlu0 %3744 }
 0x160   : > { %1586 = vmatprep.mubr.bf16.mxu0 %v12835_v52  ;;  %1779 = vmatprep.mubr.bf16.mxu1 %v12835_v52 }
 0x161   : > { %v7514_v59 = vand.u32 127, %v612_v18 }
 0x163   : > { %12892 = vst [vmem:[#allocation36_spill] sm:$0xff] %v7514_v59  ;;  %v7543_v1 = vadd.s32 256, %v7514_v59  ;;  %v7564_v56 = vpop.permute.xlu0 %3750  ;;  %vm3836_vm2 = vcmp.eq.s32.totalorder %v7514_v59, %v7503_v6  ;;  %vm3844_vm5 = vcmp.eq.s32.totalorder %v7514_v59, %v7535_v3  ;;  %v7631_v57 = vadd.s32 512, %v7514_v59 }
 0x164   : > { %vm3860_vm11 = vcmp.eq.s32.totalorder %v7514_v59, %v7564_v56  ;;  %v7634_v44 = vadd.s32 640, %v7514_v59  ;;  %v7647_v41 = vadd.s32 896, %v7514_v59 }
 0x165   : > { %vm3838_vm4 = vcmp.eq.s32.totalorder %v7543_v1, %v7503_v6  ;;  %vm3846_vm8 = vcmp.eq.s32.totalorder %v7543_v1, %v7535_v3  ;;  %vm3862_vm15 = vcmp.eq.s32.totalorder %v7543_v1, %v7564_v56 }
 0x166   : > { %12901 = vst [vmem:[#allocation45_spill] sm:$0xff] %v7647_v41 }
 0x167   : > { %1587 = vmatmul.mubr.bf16.gmra.mrb[104].mxu0 %v7303_v20  ;;  %1780 = vmatmul.mubr.bf16.gmra.mrb[104].mxu1 %v7303_v20  ;;  %v7491_v20 = vshrl.u32 %v612_v18, 7  ;;  %v7540_v18 = vadd.s32 128, %v7514_v59  ;;  %v7639_v62 = vpop.permute.xlu0 %3756 }
 0x168   : > { %1596 = vmatprep.mubr.bf16.mxu0 %v12835_v52  ;;  %1789 = vmatprep.mubr.bf16.mxu1 %v12835_v52  ;;  %12900 = vst [vmem:[#allocation44_spill] sm:$0xff] %v7639_v62 }
 0x169   : > { %v614_v31 = vsub.s32 0, %v7491_v20  ;;  %v618_v5 = vsub.s32 1, %v7491_v20  ;;  %v622_v14 = vsub.s32 2, %v7491_v20  ;;  %v626_v50 = vsub.s32 3, %v7491_v20 }
 0x16a   : > { %v1102_v32 = vpop.f32.mrb[0].mxu0  ;;  %v7485_v8 = vpop.f32.mrb[0].mxu1  ;;  %vm3837_vm3 = vcmp.eq.s32.totalorder %v7540_v18, %v7503_v6  ;;  %vm3845_vm6 = vcmp.eq.s32.totalorder %v7540_v18, %v7535_v3  ;;  %vm3861_vm12 = vcmp.eq.s32.totalorder %v7540_v18, %v7564_v56  ;;  %v638_v51 = vsub.s32 6, %v7491_v20 }
 0x16b   : > { %v1104_v7 = vpop.f32.mrb[1].mxu0  ;;  %v7487_v63 = vpop.f32.mrb[1].mxu1  ;;  %v7529_v53 = vrot.slane %v7512_v10, %v614_v31  ;;  %v7532_v2 = vrot.slane %v7512_v10, %v618_v5  ;;  %v7548_v31 = vadd.s32 384, %v7514_v59  ;;  %v7562_v23 = vrot.slane %v7512_v10, %v622_v14 }
 0x16c   : > { %v1106_v24 = vpop.f32.mrb[2].mxu0  ;;  %v7489_v29 = vpop.f32.mrb[2].mxu1  ;;  %v634_v43 = vsub.s32 5, %v7491_v20  ;;  %v7719_v35 = vrot.slane %v7512_v10, %v638_v51 }
 0x16d   : > { %v1108_v27 = vpop.f32.mrb[3].mxu0  ;;  %v7493_v58 = vpop.f32.mrb[3].mxu1  ;;  %v7556_v16 = vadd.f32 %v1102_v32, %v7529_v53  ;;  %v7559_v0 = vadd.f32 %v1104_v7, %v7532_v2  ;;  %vm3839_vm7 = vcmp.eq.s32.totalorder %v7548_v31, %v7503_v6  ;;  %v7606_v47 = vadd.f32 %v1106_v24, %v7529_v53 }
 0x16e   : > { %v7552_v5 = vpop.permute.xlu1 %3747  ;;  %v7617_v22 = vadd.f32 %v1108_v27, %v7532_v2  ;;  %vm3847_vm13 = vcmp.eq.s32.totalorder %v7548_v31, %v7535_v3  ;;  %v7625_v24 = vadd.f32 %v7485_v8, %v7562_v23  ;;  %v7637_v27 = vadd.s32 768, %v7514_v59  ;;  %12908 = vst [vmem:[#allocation52_spill] sm:$0xff] %v7719_v35 }
 0x16f   : > { %1597 = vmatmul.mubr.bf16.gmra.mrb[108].mxu0 %v7319_v48  ;;  %1790 = vmatmul.mubr.bf16.gmra.mrb[108].mxu1 %v7319_v48  ;;  %12893 = vst [vmem:[#allocation37_spill] sm:$0xff] %v7552_v5  ;;  %12894 = vst [vmem:[#allocation38_spill] sm:$0xff] %v7556_v16  ;;  %vm3852_vm9 = vcmp.eq.s32.totalorder %v7514_v59, %v7552_v5  ;;  %vm3853_vm10 = vcmp.eq.s32.totalorder %v7540_v18, %v7552_v5  ;;  %v4092_v46 = vsel %vm3836_vm2, %v7556_v16, 0.0 }
 0x170   : > { %1606 = vmatprep.mubr.bf16.mxu0 %v12835_v52  ;;  %1799 = vmatprep.mubr.bf16.mxu1 %v12835_v52  ;;  %12895 = vst [vmem:[#allocation39_spill] sm:$0xff] %v7559_v0  ;;  %12896 = vst [vmem:[#allocation40_spill] sm:$0xff] %v7606_v47  ;;  %v4093_v30 = vsel %vm3837_vm3, %v7559_v0, 0.0  ;;  %v630_v8 = vsub.s32 4, %v7491_v20  ;;  %v1873_v42 = vmax.f32 %v7556_v16, %v7559_v0  ;;  %v4094_v40 = vsel %vm3838_vm4, %v7625_v24, 0.0 }
 0x171   : > { %12897 = vst [vmem:[#allocation41_spill] sm:$0xff] %v7617_v22  ;;  %12898 = vst [vmem:[#allocation42_spill] sm:$0xff] %v7625_v24  ;;  %v4348_v19 = vadd.f32 %v4093_v30, %v4092_v46  ;;  %vm3854_vm14 = vcmp.eq.s32.totalorder %v7543_v1, %v7552_v5  ;;  %v1882_v61 = vmax.f32 %v7606_v47, %v7617_v22  ;;  %v4100_v30 = vsel %vm3844_vm5, %v7606_v47, 0.0 }
 0x172   : > { %v7505_v9 = vpop.f32.mrb[4].mxu0  ;;  %v7518_v26 = vpop.f32.mrb[4].mxu1  ;;  %v4101_v46 = vsel %vm3845_vm6, %v7617_v22, 0.0  ;;  %vm3876_vm2 = vcmp.eq.s32.totalorder %v7514_v59, %v7639_v62  ;;  %vm3877_vm3 = vcmp.eq.s32.totalorder %v7540_v18, %v7639_v62  ;;  %vm3855_vm4 = vcmp.eq.s32.totalorder %v7548_v31, %v7552_v5 }
 0x173   : > { %v7516_v48 = vpop.f32.mrb[5].mxu0  ;;  %v7522_v12 = vpop.f32.mrb[5].mxu1  ;;  %v7687_v39 = vadd.f32 %v7505_v9, %v7529_v53  ;;  %v7716_v17 = vrot.slane %v7512_v10, %v630_v8  ;;  %v7722_v0 = vrot.slane %v7512_v10, %v634_v43  ;;  %v7725_v16 = vmax.f32 %v1873_v42, %v7625_v24 }
 0x174   : > { %v7520_v11 = vpop.f32.mrb[6].mxu0  ;;  %v7526_v28 = vpop.f32.mrb[6].mxu1  ;;  %v4349_v43 = vadd.f32 %v4348_v19, %v4094_v40  ;;  %v7757_v40 = vadd.f32 %v7518_v26, %v7562_v23  ;;  %vm3863_vm6 = vcmp.eq.s32.totalorder %v7548_v31, %v7564_v56 }
 0x175   : > { %v7524_v55 = vpop.f32.mrb[7].mxu0  ;;  %v7537_v34 = vpop.f32.mrb[7].mxu1  ;;  %12904 = vst [vmem:[#allocation48_spill] sm:$0xff] %v7687_v39  ;;  %v7695_v36 = vadd.f32 %v7520_v11, %v7529_v53  ;;  %12909 = vst [vmem:[#allocation53_spill] sm:$0xff] %v7722_v0  ;;  %v4108_v19 = vsel %vm3852_vm9, %v7687_v39, 0.0  ;;  %vm3879_vm9 = vcmp.eq.s32.totalorder %v7548_v31, %v7639_v62 }
 0x176   : > { %v7627_v45 = vpop.permute.xlu1 %3753  ;;  %v7707_v9 = vadd.f32 %v7524_v55, %v7532_v2  ;;  %12910 = vst [vmem:[#allocation54_spill] sm:$0xff] %v7725_v16  ;;  %v4357_v55 = vadd.f32 %v4101_v46, %v4100_v30  ;;  %12915 = vst [vmem:[#allocation59_spill] sm:$0xff] %v7757_v40 }
 0x177   : > { %1607 = vmatmul.mubr.bf16.gmra.mrb[112].mxu0 %v7335_v60  ;;  %1800 = vmatmul.mubr.bf16.gmra.mrb[112].mxu1 %v7335_v60  ;;  %v7575_v60 = vrot.slane %v7512_v10, %v626_v50  ;;  %12899 = vst [vmem:[#allocation43_spill] sm:$0xff] %v7627_v45  ;;  %vm3868_vm0 = vcmp.eq.s32.totalorder %v7514_v59, %v7627_v45  ;;  %12906 = vst [vmem:[#allocation50_spill] sm:$0xff] %v7695_v36 }
 0x178   : > { %1616 = vmatprep.mubr.bf16.mxu0 %v12835_v52  ;;  %1809 = vmatprep.mubr.bf16.mxu1 %v12835_v52  ;;  %vm3869_vm1 = vcmp.eq.s32.totalorder %v7540_v18, %v7627_v45  ;;  %12907 = vst [vmem:[#allocation51_spill] sm:$0xff] %v7707_v9  ;;  %vm3870_vm5 = vcmp.eq.s32.totalorder %v7543_v1, %v7627_v45  ;;  %v4117_v26 = vsel %vm3861_vm12, %v7707_v9, 0.0 }
 0x179   : > { %v7653_v25 = vadd.f32 %v7487_v63, %v7575_v60  ;;  %v7673_v63 = vadd.f32 %v7489_v29, %v7562_v23  ;;  %v7691_v29 = vadd.f32 %v7516_v48, %v7532_v2  ;;  %v7729_v22 = vadd.f32 %v7493_v58, %v7575_v60 }
 0x17a   : > { %v7566_v13 = vpop.f32.mrb[8].mxu0  ;;  %v7579_v7 = vpop.f32.mrb[8].mxu1 }
 0x17b   : > { %v7577_v32 = vpop.f32.mrb[9].mxu0  ;;  %v7591_v50 = vpop.f32.mrb[9].mxu1  ;;  %12902 = vst [vmem:[#allocation46_spill] sm:$0xff] %v7653_v25  ;;  %12903 = vst [vmem:[#allocation47_spill] sm:$0xff] %v7673_v63  ;;  %v4095_v42 = vsel %vm3839_vm7, %v7653_v25, 0.0  ;;  %v7745_v30 = vmax.f32 %v1882_v61, %v7673_v63  ;;  %v4102_v58 = vsel %vm3846_vm8, %v7673_v63, 0.0  ;;  %vm3878_vm7 = vcmp.eq.s32.totalorder %v7543_v1, %v7639_v62 }
 0x17c   : > { %v7589_v14 = vpop.f32.mrb[10].mxu0  ;;  %v7603_v4 = vpop.f32.mrb[10].mxu1  ;;  %12905 = vst [vmem:[#allocation49_spill] sm:$0xff] %v7691_v29  ;;  %12911 = vst [vmem:[#allocation55_spill] sm:$0xff] %v7729_v22  ;;  %v4109_v61 = vsel %vm3853_vm10, %v7691_v29, 0.0  ;;  %v7786_v63 = vadd.f32 %v7566_v13, %v7529_v53  ;;  %v4358_v41 = vadd.f32 %v4357_v55, %v4102_v58  ;;  %v1891_v13 = vmax.f32 %v7687_v39, %v7691_v29 }
 0x17d   : > { %v7601_v49 = vpop.f32.mrb[11].mxu0  ;;  %v7621_v21 = vpop.f32.mrb[11].mxu1  ;;  %12913 = vst [vmem:[#allocation57_spill] sm:$0xff] %v7745_v30  ;;  %vm3871_vm8 = vcmp.eq.s32.totalorder %v7548_v31, %v7627_v45  ;;  %v7813_v58 = vadd.f32 %v7589_v14, %v7529_v53  ;;  %v4366_v25 = vadd.f32 %v4109_v61, %v4108_v19  ;;  %v7827_v55 = vadd.f32 %v7522_v12, %v7575_v60 }
 0x17e   : > { %v7751_v46 = vpop.permute.xlu1 %3759  ;;  %12917 = vst [vmem:[#allocation61_spill] sm:$0xff] %v7786_v63  ;;  %v7817_v35 = vadd.f32 %v7601_v49, %v7532_v2  ;;  %v4110_v19 = vsel %vm3854_vm14, %v7757_v40, 0.0  ;;  %v7917_v5 = vadd.f32 %v7591_v50, %v7575_v60 }
 0x17f   : > { %1617 = vmatmul.mubr.bf16.gmra.mrb[116].mxu0 %v7351_v54  ;;  %1810 = vmatmul.mubr.bf16.gmra.mrb[116].mxu1 %v7351_v54  ;;  %v642_v54 = vsub.s32 7, %v7491_v20  ;;  %12914 = vst [vmem:[#allocation58_spill] sm:$0xff] %v7751_v46  ;;  %12921 = vst [vmem:[#allocation65_spill] sm:$0xff] %v7813_v58  ;;  %vm3884_vm10 = vcmp.eq.s32.totalorder %v7514_v59, %v7751_v46  ;;  %vm3886_vm14 = vcmp.eq.s32.totalorder %v7543_v1, %v7751_v46 }
 0x180   : > { %1626 = vmatprep.mubr.bf16.mxu0 %v12835_v52  ;;  %1819 = vmatprep.mubr.bf16.mxu1 %v12835_v52  ;;  %12922 = vst [vmem:[#allocation66_spill] sm:$0xff] %v7817_v35  ;;  %12924 = vst [vmem:[#allocation68_spill] sm:$0xff] %v7827_v55 }
 0x181   : > { %v7738_v51 = vrot.slane %v7512_v10, %v642_v54  ;;  %v4116_v10 = vsel %vm3860_vm11, %v7695_v36, 0.0  ;;  %v7782_v54 = vadd.f32 %v7526_v28, %v7562_v23  ;;  %v4103_v28 = vsel %vm3847_vm13, %v7729_v22, 0.0  ;;  %12932 = vst [vmem:[#allocation76_spill] sm:$0xff] %v7917_v5 }
 0x182   : > { %v7679_v20 = vpop.f32.mrb[12].mxu0  ;;  %v7703_v37 = vpop.f32.mrb[12].mxu1  ;;  %vm3885_vm11 = vcmp.eq.s32.totalorder %v7540_v18, %v7751_v46 }
 0x183   : > { %v7701_v38 = vpop.f32.mrb[13].mxu0  ;;  %v7713_v11 = vpop.f32.mrb[13].mxu1  ;;  %12912 = vst [vmem:[#allocation56_spill] sm:$0xff] %v7738_v51  ;;  %12916 = vst [vmem:[#allocation60_spill] sm:$0xff] %v7782_v54  ;;  %v7790_v51 = vadd.f32 %v7577_v32, %v7532_v2  ;;  %v4118_v12 = vsel %vm3862_vm15, %v7782_v54, 0.0  ;;  %vm3887_vm15 = vcmp.eq.s32.totalorder %v7548_v31, %v7751_v46 }
 0x184   : > { %v7711_v48 = vpop.f32.mrb[14].mxu0  ;;  %v7735_v8 = vpop.f32.mrb[14].mxu1  ;;  %v7934_v50 = vadd.f32 %v7701_v38, %v7532_v2 }
 0x185   : > { %v7733_v47 = vpop.f32.mrb[15].mxu0  ;;  %v7753_v24 = vpop.f32.mrb[15].mxu1  ;;  %12918 = vst [vmem:[#allocation62_spill] sm:$0xff] %v7790_v51  ;;  %v1909_v61 = vmax.f32 %v7786_v63, %v7790_v51  ;;  %v4125_v22 = vsel %vm3869_vm1, %v7790_v51, 0.0  ;;  %v7892_v51 = vadd.f32 %v7603_v4, %v7562_v23 }
 0x186   : > { %v7804_v32 = vpop.permute.xlu0 %3762  ;;  %v7821_v39 = vpop.permute.xlu1 %3765  ;;  %12934 = vst [vmem:[#allocation78_spill] sm:$0xff] %v7934_v50 }
 0x187   : > { %1627 = vmatmul.mubr.bf16.gmra.mrb[120].mxu0 %v7365_v33  ;;  %1820 = vmatmul.mubr.bf16.gmra.mrb[120].mxu1 %v7365_v33  ;;  %12919 = vst [vmem:[#allocation63_spill] sm:$0xff] %v7804_v32  ;;  %v7807_v33 = vadd.f32 %v4349_v43, %v4095_v42  ;;  %12923 = vst [vmem:[#allocation67_spill] sm:$0xff] %v7821_v39  ;;  %v1900_v43 = vmax.f32 %v7695_v36, %v7707_v9  ;;  %v4134_v38 = vsel %vm3878_vm7, %v7892_v51, 0.0 }
 0x188   : > { %1636 = vmatprep.mubr.bf16.mxu0 %v12835_v52  ;;  %1829 = vmatprep.mubr.bf16.mxu1 %v12835_v52  ;;  %v4375_v42 = vadd.f32 %v4117_v26, %v4116_v10  ;;  %v7851_v10 = vadd.f32 %v7579_v7, %v7562_v23  ;;  %vm3892_vm12 = vcmp.eq.s32.totalorder %v7514_v59, %v7804_v32  ;;  %v4124_v7 = vsel %vm3868_vm0, %v7786_v63, 0.0 }
 0x189   : > { %12920 = vst [vmem:[#allocation64_spill] sm:$0xff] %v7807_v33  ;;  %vm3893_vm13 = vcmp.eq.s32.totalorder %v7540_v18, %v7804_v32  ;;  %v7861_v36 = vadd.f32 %v4358_v41, %v4103_v28  ;;  %v7864_v52 = vmax.f32 %v1891_v13, %v7757_v40  ;;  %v7880_v41 = vadd.f32 %v7537_v34, %v7575_v60 }
 0x18a   : > { %v7819_v29 = vpop.f32.mrb[16].mxu0  ;;  %v7837_v14 = vpop.f32.mrb[16].mxu1  ;;  %12925 = vst [vmem:[#allocation69_spill] sm:$0xff] %v7851_v10  ;;  %v4132_v28 = vsel %vm3876_vm2, %v7813_v58, 0.0  ;;  %v4133_v13 = vsel %vm3877_vm3, %v7817_v35, 0.0  ;;  %12928 = vst [vmem:[#allocation72_spill] sm:$0xff] %v7892_v51  ;;  %v4367_v34 = vadd.f32 %v4366_v25, %v4110_v19  ;;  %v7903_v16 = vmax.f32 %v1900_v43, %v7782_v54 }
 0x18b   : > { %v7835_v49 = vpop.f32.mrb[17].mxu0  ;;  %v7859_v9 = vpop.f32.mrb[17].mxu1  ;;  %12926 = vst [vmem:[#allocation70_spill] sm:$0xff] %v7861_v36  ;;  %12927 = vst [vmem:[#allocation71_spill] sm:$0xff] %v7880_v41  ;;  %v4111_v36 = vsel %vm3855_vm4, %v7827_v55, 0.0  ;;  %v4376_v0 = vadd.f32 %v4375_v42, %v4118_v12  ;;  %v7909_v4 = vmax.f32 %v1909_v61, %v7851_v10  ;;  %v4126_v25 = vsel %vm3870_vm5, %v7851_v10, 0.0 }
 0x18c   : > { %v7857_v26 = vpop.f32.mrb[18].mxu0  ;;  %v7876_v33 = vpop.f32.mrb[18].mxu1  ;;  %12930 = vst [vmem:[#allocation74_spill] sm:$0xff] %v7903_v16  ;;  %v4384_v19 = vadd.f32 %v4125_v22, %v4124_v7  ;;  %vm3894_vm0 = vcmp.eq.s32.totalorder %v7543_v1, %v7804_v32  ;;  %vm3900_vm1 = vcmp.eq.s32.totalorder %v7514_v59, %v7821_v39  ;;  %v1918_v43 = vmax.f32 %v7813_v58, %v7817_v35 }
 0x18d   : > { %v7874_v30 = vpop.f32.mrb[19].mxu0  ;;  %v7894_v63 = vpop.permute.xlu0 %3768  ;;  %12931 = vst [vmem:[#allocation75_spill] sm:$0xff] %v7909_v4  ;;  %v4393_v42 = vadd.f32 %v4133_v13, %v4132_v28  ;;  %v7930_v22 = vadd.f32 %v7679_v20, %v7529_v53  ;;  %vm3901_vm2 = vcmp.eq.s32.totalorder %v7540_v18, %v7821_v39  ;;  %v4119_v20 = vsel %vm3863_vm6, %v7880_v41, 0.0 }
 0x18e   : > { %12929 = vst [vmem:[#allocation73_spill] sm:$0xff] %v7894_v63  ;;  %v7896_v40 = vpop.f32.mrb[19].mxu1  ;;  %vm3908_vm3 = vcmp.eq.s32.totalorder %v7514_v59, %v7894_v63  ;;  %vm3909_vm4 = vcmp.eq.s32.totalorder %v7540_v18, %v7894_v63  ;;  %v7954_v12 = vadd.f32 %v7621_v21, %v7575_v60  ;;  %v7958_v7 = vpop.permute.xlu1 %3771  ;;  %v7960_v28 = vadd.f32 %v4367_v34, %v4111_v36 }
 0x18f   : > { %1637 = vmatmul.mubr.bf16.gmra.mrb[124].mxu0 %v7373_v15  ;;  %1830 = vmatmul.mubr.bf16.gmra.mrb[124].mxu1 %v7373_v15  ;;  %12933 = vst [vmem:[#allocation77_spill] sm:$0xff] %v7930_v22  ;;  %12936 = vst [vmem:[#allocation80_spill] sm:$0xff] %v7958_v7  ;;  %v7966_v15 = vadd.f32 %v7711_v48, %v7529_v53  ;;  %v7970_v35 = vadd.f32 %v7733_v47, %v7532_v2  ;;  %v4127_v48 = vsel %vm3871_vm8, %v7917_v5, 0.0 }
 0x190   : > { %12935 = vst [vmem:[#allocation79_spill] sm:$0xff] %v7954_v12  ;;  %12937 = vst [vmem:[#allocation81_spill] sm:$0xff] %v7960_v28  ;;  %vm3895_vm5 = vcmp.eq.s32.totalorder %v7548_v31, %v7804_v32  ;;  %v7978_v36 = vadd.f32 %v4376_v0, %v4119_v20  ;;  %v4385_v34 = vadd.f32 %v4384_v19, %v4126_v25 }
 0x191   : > { %12938 = vst [vmem:[#allocation82_spill] sm:$0xff] %v7966_v15  ;;  %12939 = vst [vmem:[#allocation83_spill] sm:$0xff] %v7970_v35  ;;  %v7991_v10 = vmax.f32 %v1918_v43, %v7892_v51  ;;  %v4394_v41 = vadd.f32 %v4393_v42, %v4134_v38  ;;  %v1927_v0 = vmax.f32 %v7930_v22, %v7934_v50  ;;  %v4135_v43 = vsel %vm3879_vm9, %v7954_v12, 0.0  ;;  %v8027_v13 = vpop.permute.xlu0 %3774 }
 0x192   : > { %v7956_v61 = vpop.f32.mrb[20].mxu0  ;;  %v7976_v58 = vpop.f32.mrb[20].mxu1  ;;  %12940 = vst [vmem:[#allocation84_spill] sm:$0xff] %v7978_v36  ;;  %v7997_v25 = vadd.f32 %v7703_v37, %v7562_v23  ;;  %vm3902_vm6 = vcmp.eq.s32.totalorder %v7543_v1, %v7821_v39  ;;  %vm3910_vm7 = vcmp.eq.s32.totalorder %v7543_v1, %v7894_v63  ;;  %v4140_v37 = vsel %vm3884_vm10, %v7930_v22, 0.0  ;;  %12944 = vst [vmem:[#allocation88_spill] sm:$0xff] %v8027_v13 }
 0x193   : > { %v7974_v21 = vpop.f32.mrb[21].mxu0  ;;  %v7988_v54 = vpop.f32.mrb[21].mxu1  ;;  %12941 = vst [vmem:[#allocation85_spill] sm:$0xff] %v7991_v10  ;;  %v4141_v42 = vsel %vm3885_vm11, %v7934_v50, 0.0  ;;  %v8021_v38 = vadd.f32 %v7713_v11, %v7575_v60  ;;  %vm3916_vm8 = vcmp.eq.s32.totalorder %v7514_v59, %v7958_v7  ;;  %vm3917_vm9 = vcmp.eq.s32.totalorder %v7540_v18, %v7958_v7 }
 0x194   : > { %v7986_v47 = vpop.f32.mrb[22].mxu0  ;;  %12942 = vst [vmem:[#allocation86_spill] sm:$0xff] %v7997_v25  ;;  %v8005_v20 = vpop.f32.mrb[22].mxu1  ;;  %v4148_v22 = vsel %vm3892_vm12, %v7966_v15, 0.0  ;;  %v4149_v11 = vsel %vm3893_vm13, %v7970_v35, 0.0  ;;  %v8041_v50 = vadd.f32 %v7735_v8, %v7562_v23  ;;  %v8045_v5 = vadd.f32 %v7819_v29, %v7529_v53 }
 0x195   : > { %v8003_v19 = vpop.f32.mrb[23].mxu0  ;;  %12943 = vst [vmem:[#allocation87_spill] sm:$0xff] %v8021_v38  ;;  %v8029_v51 = vpop.f32.mrb[23].mxu1  ;;  %v8047_v4 = vadd.f32 %v4385_v34, %v4127_v48  ;;  %v8051_v36 = vadd.f32 %v7835_v49, %v7532_v2  ;;  %v8055_v62 = vadd.f32 %v7857_v26, %v7529_v53  ;;  %v8059_v45 = vadd.f32 %v7874_v30, %v7532_v2 }
 0x196   : > { %12945 = vst [vmem:[#allocation89_spill] sm:$0xff] %v8041_v50  ;;  %12946 = vst [vmem:[#allocation90_spill] sm:$0xff] %v8045_v5  ;;  %v8063_v16 = vadd.f32 %v4394_v41, %v4135_v43  ;;  %v8066_v29 = vmax.f32 %v1927_v0, %v7997_v25  ;;  %v4402_v34 = vadd.f32 %v4141_v42, %v4140_v37  ;;  %v8072_v49 = vpop.permute.xlu1 %3777  ;;  %v4142_v30 = vsel %vm3886_vm14, %v7997_v25, 0.0  ;;  %v8090_v43 = vpop.permute.xlu0 %3780 }
 0x197   : > { %12947 = vst [vmem:[#allocation91_spill] sm:$0xff] %v8047_v4  ;;  %12948 = vst [vmem:[#allocation92_spill] sm:$0xff] %v8051_v36  ;;  %vm3903_vm10 = vcmp.eq.s32.totalorder %v7548_v31, %v7821_v39  ;;  %vm3918_vm11 = vcmp.eq.s32.totalorder %v7543_v1, %v7958_v7  ;;  %v1936_v26 = vmax.f32 %v7966_v15, %v7970_v35  ;;  %v4143_v37 = vsel %vm3887_vm15, %v8021_v38, 0.0 }
 0x198   : > { %12949 = vst [vmem:[#allocation93_spill] sm:$0xff] %v8055_v62  ;;  %12950 = vst [vmem:[#allocation94_spill] sm:$0xff] %v8059_v45  ;;  %v4411_v41 = vadd.f32 %v4149_v11, %v4148_v22  ;;  %v8082_v48 = vadd.f32 %v7753_v24, %v7575_v60  ;;  %vm3924_vm12 = vcmp.eq.s32.totalorder %v7514_v59, %v8027_v13  ;;  %v4150_v24 = vsel %vm3894_vm0, %v8041_v50, 0.0 }
 0x199   : > { %12951 = vst [vmem:[#allocation95_spill] sm:$0xff] %v8063_v16  ;;  %12952 = vst [vmem:[#allocation96_spill] sm:$0xff] %v8066_v29  ;;  %vm3925_vm13 = vcmp.eq.s32.totalorder %v7540_v18, %v8027_v13  ;;  %v8102_v22 = vadd.f32 %v7837_v14, %v7562_v23  ;;  %v4156_v42 = vsel %vm3900_vm1, %v8045_v5, 0.0  ;;  %vm3911_vm14 = vcmp.eq.s32.totalorder %v7548_v31, %v7894_v63 }
 0x19a   : > { %12953 = vst [vmem:[#allocation97_spill] sm:$0xff] %v8072_v49  ;;  %12954 = vst [vmem:[#allocation98_spill] sm:$0xff] %v8082_v48  ;;  %v8088_v0 = vpop.f32.mrb[24].mxu0  ;;  %v8112_v8 = vpop.f32.mrb[24].mxu1  ;;  %v4157_v35 = vsel %vm3901_vm2, %v8051_v36, 0.0  ;;  %v4164_v14 = vsel %vm3908_vm3, %v8055_v62, 0.0  ;;  %v8128_v25 = vadd.f32 %v7876_v33, %v7562_v23  ;;  %v4403_v4 = vadd.f32 %v4402_v34, %v4142_v30 }
 0x19b   : > { %12955 = vst [vmem:[#allocation99_spill] sm:$0xff] %v8102_v22  ;;  %v8110_v11 = vpop.f32.mrb[25].mxu0  ;;  %v4165_v15 = vsel %vm3909_vm4, %v8059_v45, 0.0  ;;  %v8132_v46 = vpop.f32.mrb[25].mxu1  ;;  %v8138_v10 = vadd.f32 %v7956_v61, %v7529_v53  ;;  %v8142_v28 = vadd.f32 %v7974_v21, %v7532_v2  ;;  %vm3919_vm15 = vcmp.eq.s32.totalorder %v7548_v31, %v7958_v7 }
 0x19c   : > { %12956 = vst [vmem:[#allocation100_spill] sm:$0xff] %v8128_v25  ;;  %v8130_v16 = vpop.f32.mrb[26].mxu0  ;;  %v8148_v55 = vpop.f32.mrb[26].mxu1  ;;  %v8151_v34 = vmax.f32 %v1936_v26, %v8041_v50  ;;  %v4412_v30 = vadd.f32 %v4411_v41, %v4150_v24  ;;  %v4151_v61 = vsel %vm3895_vm5, %v8082_v48, 0.0  ;;  %v1945_v21 = vmax.f32 %v8045_v5, %v8051_v36 }
 0x19d   : > { %12957 = vst [vmem:[#allocation101_spill] sm:$0xff] %v8138_v10  ;;  %12958 = vst [vmem:[#allocation102_spill] sm:$0xff] %v8142_v28  ;;  %v8146_v33 = vpop.f32.mrb[27].mxu0  ;;  %vm3926_vm0 = vcmp.eq.s32.totalorder %v7543_v1, %v8027_v13  ;;  %v8161_v12 = vpop.f32.mrb[27].mxu1  ;;  %v4420_v38 = vadd.f32 %v4157_v35, %v4156_v42  ;;  %v1954_v29 = vmax.f32 %v8055_v62, %v8059_v45  ;;  %v4158_v24 = vsel %vm3902_vm6, %v8102_v22, 0.0 }
 0x19e   : > { %12959 = vst [vmem:[#allocation103_spill] sm:$0xff] %v8151_v34  ;;  %v4429_v26 = vadd.f32 %v4165_v15, %v4164_v14  ;;  %v8167_v41 = vadd.f32 %v7859_v9, %v7575_v60  ;;  %vm3932_vm1 = vcmp.eq.s32.totalorder %v7514_v59, %v8072_v49  ;;  %vm3933_vm2 = vcmp.eq.s32.totalorder %v7540_v18, %v8072_v49  ;;  %v8189_v42 = vpop.permute.xlu1 %3783 }
 0x19f   : > { %v4166_v35 = vsel %vm3910_vm7, %v8128_v25, 0.0  ;;  %v8183_v9 = vadd.f32 %v7986_v47, %v7529_v53  ;;  %v8187_v15 = vadd.f32 %v7976_v58, %v7562_v23  ;;  %12963 = vst [vmem:[#allocation107_spill] sm:$0xff] %v8189_v42  ;;  %v1963_v14 = vmax.f32 %v8138_v10, %v8142_v28  ;;  %v8207_v58 = vpop.permute.xlu0 %3786 }
 0x1a0   : > { %12960 = vst [vmem:[#allocation104_spill] sm:$0xff] %v8167_v41  ;;  %v4172_v45 = vsel %vm3916_vm8, %v8138_v10, 0.0  ;;  %v4173_v47 = vsel %vm3917_vm9, %v8142_v28, 0.0  ;;  %v8203_v62 = vadd.f32 %v8003_v19, %v7532_v2  ;;  %vm3927_vm3 = vcmp.eq.s32.totalorder %v7548_v31, %v8027_v13  ;;  %12965 = vst [vmem:[#allocation109_spill] sm:$0xff] %v8207_v58 }
 0x1a1   : > { %12961 = vst [vmem:[#allocation105_spill] sm:$0xff] %v8183_v9  ;;  %12962 = vst [vmem:[#allocation106_spill] sm:$0xff] %v8187_v15  ;;  %v8209_v50 = vadd.f32 %v4403_v4, %v4143_v37  ;;  %v8214_v10 = vmax.f32 %v1945_v21, %v8102_v22  ;;  %v8218_v28 = vadd.f32 %v7896_v40, %v7575_v60 }
 0x1a2   : > { %12964 = vst [vmem:[#allocation108_spill] sm:$0xff] %v8203_v62  ;;  %vm3940_vm4 = vcmp.eq.s32.totalorder %v7514_v59, %v8090_v43  ;;  %vm3941_vm5 = vcmp.eq.s32.totalorder %v7540_v18, %v8090_v43  ;;  %v1172_v19 = vpop.f32.mrb[28].mxu0  ;;  %v8224_v5 = vadd.f32 %v4412_v30, %v4151_v61  ;;  %v4421_v4 = vadd.f32 %v4420_v38, %v4158_v24  ;;  %v8231_v40 = vpop.f32.mrb[28].mxu1 }
 0x1a3   : > { %12966 = vst [vmem:[#allocation110_spill] sm:$0xff] %v8209_v50  ;;  %12967 = vst [vmem:[#allocation111_spill] sm:$0xff] %v8214_v10  ;;  %v8227_v37 = vmax.f32 %v1954_v29, %v8128_v25  ;;  %v4430_v36 = vadd.f32 %v4429_v26, %v4166_v35  ;;  %vm3934_vm6 = vcmp.eq.s32.totalorder %v7543_v1, %v8072_v49  ;;  %v1174_v21 = vpop.f32.mrb[29].mxu0  ;;  %v4159_v30 = vsel %vm3903_vm10, %v8167_v41, 0.0  ;;  %v8253_v24 = vpop.f32.mrb[29].mxu1 }
 0x1a4   : > { %12968 = vst [vmem:[#allocation112_spill] sm:$0xff] %v8218_v28  ;;  %12969 = vst [vmem:[#allocation113_spill] sm:$0xff] %v8224_v5  ;;  %vm3948_vm7 = vcmp.eq.s32.totalorder %v7514_v59, %v8189_v42  ;;  %v4174_v38 = vsel %vm3918_vm11, %v8187_v15, 0.0  ;;  %v4438_v29 = vadd.f32 %v4173_v47, %v4172_v45  ;;  %v8245_v61 = vadd.f32 %v7988_v54, %v7575_v60  ;;  %v1176_v26 = vpop.f32.mrb[30].mxu0 }
 0x1a5   : > { %12970 = vst [vmem:[#allocation114_spill] sm:$0xff] %v8227_v37  ;;  %vm3949_vm8 = vcmp.eq.s32.totalorder %v7540_v18, %v8189_v42  ;;  %vm3956_vm9 = vcmp.eq.s32.totalorder %v7514_v59, %v8207_v58  ;;  %vm3957_vm10 = vcmp.eq.s32.totalorder %v7540_v18, %v8207_v58  ;;  %v8256_v35 = vmax.f32 %v1963_v14, %v8187_v15  ;;  %v1178_v25 = vpop.f32.mrb[31].mxu0  ;;  %v1369_v14 = vpop.f32.mrb[30].mxu1 }
 0x1a6   : > { %12971 = vst [vmem:[#allocation115_spill] sm:$0xff] %v8245_v61  ;;  %v4180_v45 = vsel %vm3924_vm12, %v8183_v9, 0.0  ;;  %v4181_v54 = vsel %vm3925_vm13, %v8203_v62, 0.0  ;;  %v8268_v47 = vadd.f32 %v8005_v20, %v7562_v23  ;;  %vm3935_vm11 = vcmp.eq.s32.totalorder %v7548_v31, %v8072_v49  ;;  %v8288_v5 = vpop.f32.mrb[31].mxu1 }
 0x1a7   : > { %12972 = vst [vmem:[#allocation116_spill] sm:$0xff] %v8256_v35  ;;  %v4167_v22 = vsel %vm3911_vm14, %v8218_v28, 0.0  ;;  %v8280_v39 = vadd.f32 %v8088_v0, %v7529_v53  ;;  %v8284_v20 = vadd.f32 %v8110_v11, %v7532_v2  ;;  %vm3942_vm12 = vcmp.eq.s32.totalorder %v7543_v1, %v8090_v43 }
 0x1a8   : > { %12973 = vst [vmem:[#allocation117_spill] sm:$0xff] %v8268_v47  ;;  %v8290_v50 = vadd.f32 %v4421_v4, %v4159_v30  ;;  %v8294_v63 = vadd.f32 %v4430_v36, %v4167_v22  ;;  %v1972_v0 = vmax.f32 %v8183_v9, %v8203_v62  ;;  %v4439_v41 = vadd.f32 %v4438_v29, %v4174_v38  ;;  %v8324_v30 = vpop.permute.xlu1 %3789 }
 0x1a9   : > { %12974 = vst [vmem:[#allocation118_spill] sm:$0xff] %v8280_v39  ;;  %12975 = vst [vmem:[#allocation119_spill] sm:$0xff] %v8284_v20  ;;  %v4447_v10 = vadd.f32 %v4181_v54, %v4180_v45  ;;  %v4175_v11 = vsel %vm3919_vm15, %v8245_v61, 0.0  ;;  %v8304_v48 = vadd.f32 %v8029_v51, %v7575_v60  ;;  %vm3950_vm13 = vcmp.eq.s32.totalorder %v7543_v1, %v8189_v42  ;;  %v8343_v54 = vpop.permute.xlu0 %3792 }
 0x1aa   : > { %12976 = vst [vmem:[#allocation120_spill] sm:$0xff] %v8290_v50  ;;  %12977 = vst [vmem:[#allocation121_spill] sm:$0xff] %v8294_v63  ;;  %vm3958_vm14 = vcmp.eq.s32.totalorder %v7543_v1, %v8207_v58  ;;  %v4182_v22 = vsel %vm3926_vm0, %v8268_v47, 0.0  ;;  %v8318_v4 = vadd.f32 %v8130_v16, %v7529_v53  ;;  %v8322_v51 = vadd.f32 %v8146_v33, %v7532_v2  ;;  %v1182_v45 = vpop.f32.mrb[32].mxu0  ;;  %v8357_v61 = vpop.f32.mrb[32].mxu1 }
 0x1ab   : > { %12978 = vst [vmem:[#allocation122_spill] sm:$0xff] %v8304_v48  ;;  %12981 = vst [vmem:[#allocation125_spill] sm:$0xff] %v8324_v30  ;;  %v8328_v38 = vadd.f32 %v8112_v8, %v7562_v23  ;;  %v4188_v29 = vsel %vm3932_vm1, %v8280_v39, 0.0  ;;  %v4189_v16 = vsel %vm3933_vm2, %v8284_v20, 0.0  ;;  %vm3943_vm15 = vcmp.eq.s32.totalorder %v7548_v31, %v8090_v43  ;;  %v1184_v9 = vpop.f32.mrb[33].mxu0 }
 0x1ac   : > { %12979 = vst [vmem:[#allocation123_spill] sm:$0xff] %v8318_v4  ;;  %12980 = vst [vmem:[#allocation124_spill] sm:$0xff] %v8322_v51  ;;  %v8341_v33 = vadd.f32 %v1172_v19, %v7529_v53  ;;  %v8346_v8 = vmax.f32 %v1972_v0, %v8268_v47  ;;  %v8349_v36 = vadd.f32 %v1174_v21, %v7532_v2  ;;  %v4183_v0 = vsel %vm3927_vm3, %v8304_v48, 0.0  ;;  %v8375_v47 = vpop.f32.mrb[33].mxu1  ;;  %v8415_v7 = vpop.permute.xlu1 %3795 }
 0x1ad   : > { %12982 = vst [vmem:[#allocation126_spill] sm:$0xff] %v8328_v38  ;;  %12984 = vst [vmem:[#allocation128_spill] sm:$0xff] %v8343_v54  ;;  %v8352_v15 = vadd.f32 %v1176_v26, %v7529_v53  ;;  %v8355_v62 = vadd.f32 %v1178_v25, %v7532_v2  ;;  %v8359_v19 = vadd.f32 %v4439_v41, %v4175_v11  ;;  %v8373_v25 = vpop.f32.mrb[34].mxu0  ;;  %v4196_v11 = vsel %vm3940_vm4, %v8318_v4, 0.0 }
 0x1ae   : > { %12983 = vst [vmem:[#allocation127_spill] sm:$0xff] %v8341_v33  ;;  %12985 = vst [vmem:[#allocation129_spill] sm:$0xff] %v8346_v8  ;;  %v1981_v21 = vmax.f32 %v8280_v39, %v8284_v20  ;;  %v8369_v26 = vadd.f32 %v8132_v46, %v7575_v60  ;;  %vm3951_vm0 = vcmp.eq.s32.totalorder %v7548_v31, %v8189_v42  ;;  %v4197_v20 = vsel %vm3941_vm5, %v8322_v51, 0.0  ;;  %v8391_v39 = vpop.f32.mrb[35].mxu0 }
 0x1af   : > { %12986 = vst [vmem:[#allocation130_spill] sm:$0xff] %v8349_v36  ;;  %12987 = vst [vmem:[#allocation131_spill] sm:$0xff] %v8352_v15  ;;  %v4456_v41 = vadd.f32 %v4189_v16, %v4188_v29  ;;  %v8387_v46 = vadd.f32 %v8148_v55, %v7562_v23  ;;  %vm3959_vm1 = vcmp.eq.s32.totalorder %v7548_v31, %v8207_v58  ;;  %v8393_v29 = vpop.f32.mrb[34].mxu1  ;;  %v4190_v16 = vsel %vm3934_vm6, %v8328_v38, 0.0 }
 0x1b0   : > { %12988 = vst [vmem:[#allocation132_spill] sm:$0xff] %v8355_v62  ;;  %12989 = vst [vmem:[#allocation133_spill] sm:$0xff] %v8359_v19  ;;  %v1990_v19 = vmax.f32 %v8318_v4, %v8322_v51  ;;  %v8403_v35 = vadd.f32 %v8231_v40, %v7562_v23  ;;  %v4204_v55 = vsel %vm3948_vm7, %v8341_v33, 0.0  ;;  %vm3964_vm2 = vcmp.eq.s32.totalorder %v7514_v59, %v8324_v30  ;;  %v8413_v13 = vpop.f32.mrb[35].mxu1 }
 0x1b1   : > { %12990 = vst [vmem:[#allocation134_spill] sm:$0xff] %v8369_v26  ;;  %12991 = vst [vmem:[#allocation135_spill] sm:$0xff] %v8387_v46  ;;  %vm3965_vm3 = vcmp.eq.s32.totalorder %v7540_v18, %v8324_v30  ;;  %v4205_v40 = vsel %vm3949_vm8, %v8349_v36, 0.0  ;;  %v4212_v51 = vsel %vm3956_vm9, %v8352_v15, 0.0  ;;  %v4213_v4 = vsel %vm3957_vm10, %v8355_v62, 0.0 }
 0x1b2   : > { %12992 = vst [vmem:[#allocation136_spill] sm:$0xff] %v8403_v35  ;;  %12993 = vst [vmem:[#allocation137_spill] sm:$0xff] %v8415_v7  ;;  %v8430_v63 = vadd.f32 %v1369_v14, %v7562_v23  ;;  %v4448_v50 = vadd.f32 %v4447_v10, %v4182_v22  ;;  %v4465_v37 = vadd.f32 %v4197_v20, %v4196_v11  ;;  %v4191_v34 = vsel %vm3935_vm11, %v8369_v26, 0.0  ;;  %v8455_v22 = vpop.permute.xlu0 %3798  ;;  %v1192_v28 = vpop.f32.mrb[36].mxu0 }
 0x1b3   : > { %vm3972_vm4 = vcmp.eq.s32.totalorder %v7514_v59, %v8343_v54  ;;  %vm3973_vm5 = vcmp.eq.s32.totalorder %v7540_v18, %v8343_v54  ;;  %v8443_v32 = vmax.f32 %v1981_v21, %v8328_v38  ;;  %v4457_v14 = vadd.f32 %v4456_v41, %v4190_v16  ;;  %12996 = vst [vmem:[#allocation140_spill] sm:$0xff] %v8455_v22 }
 0x1b4   : > { %12994 = vst [vmem:[#allocation138_spill] sm:$0xff] %v8430_v63  ;;  %v4198_v10 = vsel %vm3942_vm12, %v8387_v46, 0.0  ;;  %v8451_v20 = vadd.f32 %v8161_v12, %v7575_v60  ;;  %vm3966_vm6 = vcmp.eq.s32.totalorder %v7543_v1, %v8324_v30  ;;  %v1999_v11 = vmax.f32 %v8341_v33, %v8349_v36  ;;  %v8465_v12 = vpop.permute.xlu1 %3801  ;;  %v1385_v36 = vpop.f32.mrb[36].mxu1 }
 0x1b5   : > { %v4474_v21 = vadd.f32 %v4205_v40, %v4204_v55  ;;  %v2008_v41 = vmax.f32 %v8352_v15, %v8355_v62  ;;  %v4483_v16 = vadd.f32 %v4213_v4, %v4212_v51  ;;  %vm3980_vm7 = vcmp.eq.s32.totalorder %v7514_v59, %v8415_v7  ;;  %12997 = vst [vmem:[#allocation141_spill] sm:$0xff] %v8465_v12  ;;  %v1194_v40 = vpop.f32.mrb[37].mxu0 }
 0x1b6   : > { %12995 = vst [vmem:[#allocation139_spill] sm:$0xff] %v8451_v20  ;;  %vm3981_vm8 = vcmp.eq.s32.totalorder %v7540_v18, %v8415_v7  ;;  %v8468_v38 = vmax.f32 %v1990_v19, %v8387_v46  ;;  %v4206_v55 = vsel %vm3950_vm13, %v8403_v35, 0.0  ;;  %v8476_v4 = vadd.f32 %v8253_v24, %v7575_v60  ;;  %v1196_v24 = vpop.f32.mrb[38].mxu0  ;;  %v8496_v46 = vpop.f32.mrb[37].mxu1 }
 0x1b7   : > { %v4214_v51 = vsel %vm3958_vm14, %v8430_v63, 0.0  ;;  %v4466_v33 = vadd.f32 %v4465_v37, %v4198_v10  ;;  %v8484_v19 = vadd.f32 %v8288_v5, %v7575_v60  ;;  %v8487_v62 = vadd.f32 %v1182_v45, %v7529_v53  ;;  %v1198_v45 = vpop.f32.mrb[39].mxu0  ;;  %v8508_v49 = vpop.f32.mrb[38].mxu1 }
 0x1b8   : > { %12998 = vst [vmem:[#allocation142_spill] sm:$0xff] %v8476_v4  ;;  %v8490_v15 = vadd.f32 %v1184_v9, %v7532_v2  ;;  %vm3967_vm9 = vcmp.eq.s32.totalorder %v7548_v31, %v8324_v30  ;;  %vm3974_vm10 = vcmp.eq.s32.totalorder %v7543_v1, %v8343_v54  ;;  %v8498_v37 = vadd.f32 %v4448_v50, %v4183_v0 }
 0x1b9   : > { %12999 = vst [vmem:[#allocation143_spill] sm:$0xff] %v8484_v19  ;;  %13000 = vst [vmem:[#allocation144_spill] sm:$0xff] %v8487_v62  ;;  %v8502_v10 = vadd.f32 %v4457_v14, %v4191_v34  ;;  %v4199_v9 = vsel %vm3943_vm15, %v8451_v20, 0.0  ;;  %v8511_v48 = vmax.f32 %v1999_v11, %v8403_v35  ;;  %v4475_v8 = vadd.f32 %v4474_v21, %v4206_v55  ;;  %v8522_v34 = vpop.f32.mrb[39].mxu1 }
 0x1ba   : > { %13001 = vst [vmem:[#allocation145_spill] sm:$0xff] %v8490_v15  ;;  %v8514_v50 = vmax.f32 %v2008_v41, %v8430_v63  ;;  %v4484_v0 = vadd.f32 %v4483_v16, %v4214_v51  ;;  %vm3982_vm11 = vcmp.eq.s32.totalorder %v7543_v1, %v8415_v7  ;;  %vm3988_vm12 = vcmp.eq.s32.totalorder %v7514_v59, %v8455_v22  ;;  %v1395_v35 = vpop.f32.mrb[40].mxu1 }
 0x1bb   : > { %13002 = vst [vmem:[#allocation146_spill] sm:$0xff] %v8502_v10  ;;  %13003 = vst [vmem:[#allocation147_spill] sm:$0xff] %v8511_v48  ;;  %vm3989_vm13 = vcmp.eq.s32.totalorder %v7540_v18, %v8455_v22  ;;  %v4207_v11 = vsel %vm3951_vm0, %v8476_v4, 0.0  ;;  %v8532_v21 = vadd.f32 %v8373_v25, %v7529_v53  ;;  %v8536_v41 = vadd.f32 %v8391_v39, %v7532_v2  ;;  %v8646_v48 = vpop.permute.xlu1 %3807 }
 0x1bc   : > { %13004 = vst [vmem:[#allocation148_spill] sm:$0xff] %v8514_v50  ;;  %vm3975_vm14 = vcmp.eq.s32.totalorder %v7548_v31, %v8343_v54  ;;  %v8540_v16 = vadd.f32 %v4466_v33, %v4199_v9  ;;  %v4215_v55 = vsel %vm3959_vm1, %v8484_v19, 0.0  ;;  %v2017_v51 = vmax.f32 %v8487_v62, %v8490_v15 }
 0x1bd   : > { %13005 = vst [vmem:[#allocation149_spill] sm:$0xff] %v8532_v21  ;;  %13006 = vst [vmem:[#allocation150_spill] sm:$0xff] %v8536_v41  ;;  %v8550_v25 = vadd.f32 %v8357_v61, %v7562_v23  ;;  %vm3996_vm15 = vcmp.eq.s32.totalorder %v7514_v59, %v8465_v12  ;;  %vm3997_vm0 = vcmp.eq.s32.totalorder %v7540_v18, %v8465_v12  ;;  %v4220_v39 = vsel %vm3964_vm2, %v8487_v62, 0.0 }
 0x1be   : > { %13007 = vst [vmem:[#allocation151_spill] sm:$0xff] %v8540_v16  ;;  %v4221_v33 = vsel %vm3965_vm3, %v8490_v15, 0.0  ;;  %v8565_v9 = vadd.f32 %v1192_v28, %v7529_v53  ;;  %v8568_v61 = vadd.f32 %v1194_v40, %v7532_v2  ;;  %v8572_v5 = vadd.f32 %v4475_v8, %v4207_v11  ;;  %v1202_v28 = vpop.f32.mrb[40].mxu0  ;;  %v8582_v15 = vpop.permute.xlu0 %3804 }
 0x1bf   : > { %13008 = vst [vmem:[#allocation152_spill] sm:$0xff] %v8550_v25  ;;  %v8576_v62 = vadd.f32 %v4484_v0, %v4215_v55  ;;  %vm3983_vm1 = vcmp.eq.s32.totalorder %v7548_v31, %v8415_v7  ;;  %vm3990_vm2 = vcmp.eq.s32.totalorder %v7543_v1, %v8455_v22  ;;  %13013 = vst [vmem:[#allocation157_spill] sm:$0xff] %v8582_v15  ;;  %v4228_v8 = vsel %vm3972_vm4, %v8532_v21, 0.0  ;;  %v1204_v55 = vpop.f32.mrb[41].mxu0 }
 0x1c0   : > { %13009 = vst [vmem:[#allocation153_spill] sm:$0xff] %v8565_v9  ;;  %13010 = vst [vmem:[#allocation154_spill] sm:$0xff] %v8568_v61  ;;  %v4229_v40 = vsel %vm3973_vm5, %v8536_v41, 0.0  ;;  %v8594_v0 = vadd.f32 %v8375_v47, %v7575_v60  ;;  %v8598_v11 = vadd.f32 %v8393_v29, %v7562_v23  ;;  %v8601_v14 = vmax.f32 %v2017_v51, %v8550_v25  ;;  %v1206_v47 = vpop.f32.mrb[42].mxu0  ;;  %v8612_v29 = vpop.f32.mrb[41].mxu1 }
 0x1c1   : > { %13011 = vst [vmem:[#allocation155_spill] sm:$0xff] %v8572_v5  ;;  %13012 = vst [vmem:[#allocation156_spill] sm:$0xff] %v8576_v62  ;;  %v4222_v63 = vsel %vm3966_vm6, %v8550_v25, 0.0  ;;  %v4492_v62 = vadd.f32 %v4221_v33, %v4220_v39  ;;  %v8608_v58 = vadd.f32 %v1385_v36, %v7562_v23  ;;  %vm3998_vm3 = vcmp.eq.s32.totalorder %v7543_v1, %v8465_v12  ;;  %v1208_v33 = vpop.f32.mrb[43].mxu0 }
 0x1c2   : > { %13014 = vst [vmem:[#allocation158_spill] sm:$0xff] %v8594_v0  ;;  %13015 = vst [vmem:[#allocation159_spill] sm:$0xff] %v8598_v11  ;;  %v8615_v19 = vadd.f32 %v1196_v24, %v7529_v53  ;;  %v4236_v51 = vsel %vm3980_vm7, %v8565_v9, 0.0  ;;  %v4237_v36 = vsel %vm3981_vm8, %v8568_v61, 0.0  ;;  %v8626_v39 = vadd.f32 %v1198_v45, %v7532_v2  ;;  %v8632_v24 = vpop.f32.mrb[42].mxu1 }
 0x1c3   : > { %13016 = vst [vmem:[#allocation160_spill] sm:$0xff] %v8601_v14  ;;  %13017 = vst [vmem:[#allocation161_spill] sm:$0xff] %v8608_v58  ;;  %vm3991_vm4 = vcmp.eq.s32.totalorder %v7548_v31, %v8455_v22  ;;  %vm4004_vm5 = vcmp.eq.s32.totalorder %v7514_v59, %v8582_v15  ;;  %v2026_v25 = vmax.f32 %v8532_v21, %v8536_v41  ;;  %v8644_v4 = vpop.f32.mrb[43].mxu1  ;;  %v4223_v41 = vsel %vm3967_vm9, %v8594_v0, 0.0  ;;  %v1212_v14 = vpop.f32.mrb[44].mxu0 }
 0x1c4   : > { %13018 = vst [vmem:[#allocation162_spill] sm:$0xff] %v8615_v19  ;;  %13019 = vst [vmem:[#allocation163_spill] sm:$0xff] %v8626_v39  ;;  %v4501_v50 = vadd.f32 %v4229_v40, %v4228_v8  ;;  %v8638_v5 = vadd.f32 %v8413_v13, %v7575_v60  ;;  %v2035_v45 = vmax.f32 %v8565_v9, %v8568_v61  ;;  %v4230_v13 = vsel %vm3974_vm10, %v8598_v11, 0.0 }
 0x1c5   : > { %vm4005_vm6 = vcmp.eq.s32.totalorder %v7540_v18, %v8582_v15  ;;  %v8657_v8 = vadd.f32 %v1202_v28, %v7529_v53  ;;  %v8660_v40 = vadd.f32 %v1204_v55, %v7532_v2  ;;  %v4493_v61 = vadd.f32 %v4492_v62, %v4222_v63  ;;  %v8686_v55 = vpop.permute.xlu0 %3810 }
 0x1c6   : > { %13020 = vst [vmem:[#allocation164_spill] sm:$0xff] %v8638_v5  ;;  %v4510_v21 = vadd.f32 %v4237_v36, %v4236_v51  ;;  %v8666_v30 = vadd.f32 %v8496_v46, %v7575_v60  ;;  %vm3999_vm7 = vcmp.eq.s32.totalorder %v7548_v31, %v8465_v12  ;;  %v4238_v28 = vsel %vm3982_vm11, %v8608_v58, 0.0  ;;  %13025 = vst [vmem:[#allocation169_spill] sm:$0xff] %v8686_v55 }
 0x1c7   : > { %13021 = vst [vmem:[#allocation165_spill] sm:$0xff] %v8657_v8  ;;  %13022 = vst [vmem:[#allocation166_spill] sm:$0xff] %v8660_v40  ;;  %v4244_v62 = vsel %vm3988_vm12, %v8615_v19, 0.0  ;;  %v4245_v63 = vsel %vm3989_vm13, %v8626_v39, 0.0  ;;  %v8684_v46 = vadd.f32 %v8508_v49, %v7562_v23  ;;  %v8689_v51 = vmax.f32 %v2026_v25, %v8598_v11  ;;  %v8704_v49 = vpop.permute.xlu1 %3813  ;;  %v1405_v11 = vpop.f32.mrb[44].mxu1 }
 0x1c8   : > { %13023 = vst [vmem:[#allocation167_spill] sm:$0xff] %v8666_v30  ;;  %v4502_v36 = vadd.f32 %v4501_v50, %v4230_v13  ;;  %v4231_v9 = vsel %vm3975_vm14, %v8638_v5, 0.0  ;;  %v8696_v0 = vmax.f32 %v2035_v45, %v8608_v58  ;;  %vm4006_vm8 = vcmp.eq.s32.totalorder %v7543_v1, %v8582_v15  ;;  %13027 = vst [vmem:[#allocation171_spill] sm:$0xff] %v8704_v49  ;;  %v1214_v58 = vpop.f32.mrb[45].mxu0  ;;  %v8732_v16 = vpop.f32.mrb[45].mxu1 }
 0x1c9   : > { %13024 = vst [vmem:[#allocation168_spill] sm:$0xff] %v8684_v46  ;;  %vm4012_vm9 = vcmp.eq.s32.totalorder %v7514_v59, %v8646_v48  ;;  %vm4013_vm10 = vcmp.eq.s32.totalorder %v7540_v18, %v8646_v48  ;;  %v2044_v50 = vmax.f32 %v8615_v19, %v8626_v39  ;;  %v8709_v25 = vadd.f32 %v1395_v35, %v7562_v23  ;;  %v1216_v42 = vpop.f32.mrb[46].mxu0 }
 0x1ca   : > { %13026 = vst [vmem:[#allocation170_spill] sm:$0xff] %v8696_v0  ;;  %v4252_v45 = vsel %vm3996_vm15, %v8657_v8, 0.0  ;;  %v4253_v13 = vsel %vm3997_vm0, %v8660_v40, 0.0  ;;  %vm4007_vm11 = vcmp.eq.s32.totalorder %v7548_v31, %v8582_v15  ;;  %v4511_v54 = vadd.f32 %v4510_v21, %v4238_v28  ;;  %v1218_v28 = vpop.f32.mrb[47].mxu0 }
 0x1cb   : > { %13028 = vst [vmem:[#allocation172_spill] sm:$0xff] %v8709_v25  ;;  %v4519_v39 = vadd.f32 %v4245_v63, %v4244_v62  ;;  %v8723_v35 = vadd.f32 %v8522_v34, %v7575_v60  ;;  %v8726_v19 = vadd.f32 %v1206_v47, %v7529_v53  ;;  %vm4020_vm12 = vcmp.eq.s32.totalorder %v7514_v59, %v8686_v55  ;;  %v8747_v62 = vpop.f32.mrb[46].mxu1 }
 0x1cc   : > { %vm4021_vm13 = vcmp.eq.s32.totalorder %v7540_v18, %v8686_v55  ;;  %v8734_v10 = vadd.f32 %v4493_v61, %v4223_v41  ;;  %v4239_v34 = vsel %vm3983_vm1, %v8666_v30, 0.0  ;;  %v4246_v21 = vsel %vm3990_vm2, %v8684_v46, 0.0 }
 0x1cd   : > { %13029 = vst [vmem:[#allocation173_spill] sm:$0xff] %v8723_v35  ;;  %13030 = vst [vmem:[#allocation174_spill] sm:$0xff] %v8726_v19  ;;  %v8745_v47 = vadd.f32 %v1208_v33, %v7532_v2  ;;  %vm4028_vm14 = vcmp.eq.s32.totalorder %v7514_v59, %v8704_v49  ;;  %vm4029_vm15 = vcmp.eq.s32.totalorder %v7540_v18, %v8704_v49  ;;  %v8761_v33 = vpop.f32.mrb[47].mxu1 }
 0x1ce   : > { %13031 = vst [vmem:[#allocation175_spill] sm:$0xff] %v8734_v10  ;;  %v8755_v61 = vadd.f32 %v4502_v36, %v4231_v9  ;;  %v2053_v63 = vmax.f32 %v8657_v8, %v8660_v40  ;;  %v4528_v7 = vadd.f32 %v4253_v13, %v4252_v45  ;;  %vm4014_vm0 = vcmp.eq.s32.totalorder %v7543_v1, %v8646_v48  ;;  %v8776_v45 = vpop.permute.xlu0 %3816 }
 0x1cf   : > { %13032 = vst [vmem:[#allocation176_spill] sm:$0xff] %v8745_v47  ;;  %v8766_v20 = vmax.f32 %v2044_v50, %v8684_v46  ;;  %v4254_v9 = vsel %vm3998_vm3, %v8709_v25, 0.0  ;;  %v8774_v36 = vadd.f32 %v8612_v29, %v7575_v60  ;;  %13036 = vst [vmem:[#allocation180_spill] sm:$0xff] %v8776_v45  ;;  %v8778_v13 = vadd.f32 %v4511_v54, %v4239_v34  ;;  %v1222_v46 = vpop.f32.mrb[48].mxu0 }
 0x1d0   : > { %13033 = vst [vmem:[#allocation177_spill] sm:$0xff] %v8755_v61  ;;  %v4520_v41 = vadd.f32 %v4519_v39, %v4246_v21  ;;  %v4247_v50 = vsel %vm3991_vm4, %v8723_v35, 0.0  ;;  %v4260_v10 = vsel %vm4004_vm5, %v8726_v19, 0.0  ;;  %vm4022_vm1 = vcmp.eq.s32.totalorder %v7543_v1, %v8686_v55 }
 0x1d1   : > { %13034 = vst [vmem:[#allocation178_spill] sm:$0xff] %v8766_v20  ;;  %13035 = vst [vmem:[#allocation179_spill] sm:$0xff] %v8774_v36  ;;  %v4261_v54 = vsel %vm4005_vm6, %v8745_v47, 0.0  ;;  %v8796_v29 = vadd.f32 %v8632_v24, %v7562_v23  ;;  %v8799_v39 = vadd.f32 %v1212_v14, %v7529_v53  ;;  %v8802_v34 = vadd.f32 %v1214_v58, %v7532_v2  ;;  %v8819_v58 = vpop.permute.xlu1 %3819 }
 0x1d2   : > { %13037 = vst [vmem:[#allocation181_spill] sm:$0xff] %v8778_v13  ;;  %vm4030_vm2 = vcmp.eq.s32.totalorder %v7543_v1, %v8704_v49  ;;  %v8807_v21 = vmax.f32 %v2053_v63, %v8709_v25  ;;  %v4529_v40 = vadd.f32 %v4528_v7, %v4254_v9  ;;  %v2062_v8 = vmax.f32 %v8726_v19, %v8745_v47  ;;  %v1224_v9 = vpop.f32.mrb[49].mxu0  ;;  %v1415_v25 = vpop.f32.mrb[48].mxu1 }
 0x1d3   : > { %13038 = vst [vmem:[#allocation182_spill] sm:$0xff] %v8796_v29  ;;  %13039 = vst [vmem:[#allocation183_spill] sm:$0xff] %v8799_v39  ;;  %v8813_v24 = vadd.f32 %v8644_v4, %v7575_v60  ;;  %vm4036_vm3 = vcmp.eq.s32.totalorder %v7514_v59, %v8776_v45  ;;  %vm4037_vm4 = vcmp.eq.s32.totalorder %v7540_v18, %v8776_v45  ;;  %v4255_v7 = vsel %vm3999_vm7, %v8774_v36, 0.0  ;;  %v1226_v35 = vpop.f32.mrb[50].mxu0  ;;  %v8875_v13 = vpop.permute.xlu0 %3822 }
 0x1d4   : > { %13040 = vst [vmem:[#allocation184_spill] sm:$0xff] %v8802_v34  ;;  %13041 = vst [vmem:[#allocation185_spill] sm:$0xff] %v8807_v21  ;;  %v8828_v4 = vadd.f32 %v1216_v42, %v7529_v53  ;;  %v8831_v63 = vadd.f32 %v1218_v28, %v7532_v2  ;;  %vm4015_vm5 = vcmp.eq.s32.totalorder %v7548_v31, %v8646_v48  ;;  %v1417_v42 = vpop.f32.mrb[49].mxu1  ;;  %v4262_v28 = vsel %vm4006_vm8, %v8796_v29, 0.0 }
 0x1d5   : > { %13042 = vst [vmem:[#allocation186_spill] sm:$0xff] %v8813_v24  ;;  %13043 = vst [vmem:[#allocation187_spill] sm:$0xff] %v8819_v58  ;;  %v8835_v47 = vadd.f32 %v4520_v41, %v4247_v50  ;;  %v4537_v19 = vadd.f32 %v4261_v54, %v4260_v10  ;;  %v8838_v14 = vadd.f32 %v1222_v46, %v7529_v53  ;;  %v4268_v10 = vsel %vm4012_vm9, %v8799_v39, 0.0  ;;  %v1228_v41 = vpop.f32.mrb[51].mxu0  ;;  %v1419_v50 = vpop.f32.mrb[50].mxu1 }
 0x1d6   : > { %13044 = vst [vmem:[#allocation188_spill] sm:$0xff] %v8828_v4  ;;  %13045 = vst [vmem:[#allocation189_spill] sm:$0xff] %v8831_v63  ;;  %v8841_v12 = vadd.f32 %v1224_v9, %v7532_v2  ;;  %v8848_v20 = vadd.f32 %v1405_v11, %v7562_v23  ;;  %v4269_v46 = vsel %vm4013_vm10, %v8802_v34, 0.0  ;;  %vm4031_vm6 = vcmp.eq.s32.totalorder %v7548_v31, %v8704_v49  ;;  %v1421_v22 = vpop.f32.mrb[51].mxu1 }
 0x1d7   : > { %13046 = vst [vmem:[#allocation190_spill] sm:$0xff] %v8835_v47  ;;  %13047 = vst [vmem:[#allocation191_spill] sm:$0xff] %v8838_v14  ;;  %v8862_v11 = vadd.f32 %v4529_v40, %v4255_v7  ;;  %v8865_v9 = vmax.f32 %v2062_v8, %v8796_v29  ;;  %v4263_v47 = vsel %vm4007_vm11, %v8813_v24, 0.0  ;;  %vm4023_vm7 = vcmp.eq.s32.totalorder %v7548_v31, %v8686_v55  ;;  %v8928_v21 = vpop.permute.xlu0 %3828 }
 0x1d8   : > { %13048 = vst [vmem:[#allocation192_spill] sm:$0xff] %v8841_v12  ;;  %13049 = vst [vmem:[#allocation193_spill] sm:$0xff] %v8848_v20  ;;  %vm4038_vm8 = vcmp.eq.s32.totalorder %v7543_v1, %v8776_v45  ;;  %v2071_v40 = vmax.f32 %v8799_v39, %v8802_v34  ;;  %v4276_v8 = vsel %vm4020_vm12, %v8828_v4, 0.0  ;;  %v4277_v7 = vsel %vm4021_vm13, %v8831_v63, 0.0 }
 0x1d9   : > { %13050 = vst [vmem:[#allocation194_spill] sm:$0xff] %v8862_v11  ;;  %13051 = vst [vmem:[#allocation195_spill] sm:$0xff] %v8865_v9  ;;  %v8889_v54 = vadd.f32 %v8747_v62, %v7562_v23  ;;  %v4546_v29 = vadd.f32 %v4269_v46, %v4268_v10  ;;  %v8892_v15 = vadd.f32 %v1415_v25, %v7562_v23  ;;  %v4284_v34 = vsel %vm4028_vm14, %v8838_v14, 0.0  ;;  %v8918_v46 = vpop.permute.xlu1 %3825 }
 0x1da   : > { %13052 = vst [vmem:[#allocation196_spill] sm:$0xff] %v8875_v13  ;;  %v4285_v39 = vsel %vm4029_vm15, %v8841_v12, 0.0  ;;  %vm4039_vm9 = vcmp.eq.s32.totalorder %v7548_v31, %v8776_v45  ;;  %v4538_v11 = vadd.f32 %v4537_v19, %v4262_v28  ;;  %v4270_v25 = vsel %vm4014_vm0, %v8848_v20, 0.0  ;;  %13057 = vst [vmem:[#allocation201_spill] sm:$0xff] %v8918_v46 }
 0x1db   : > { %13053 = vst [vmem:[#allocation197_spill] sm:$0xff] %v8889_v54  ;;  %13054 = vst [vmem:[#allocation198_spill] sm:$0xff] %v8892_v15  ;;  %v8909_v62 = vadd.f32 %v1226_v35, %v7529_v53  ;;  %v8912_v10 = vadd.f32 %v1228_v41, %v7532_v2  ;;  %vm4044_vm10 = vcmp.eq.s32.totalorder %v7514_v59, %v8819_v58  ;;  %v1232_v41 = vpop.f32.mrb[52].mxu0  ;;  %v4278_v0 = vsel %vm4022_vm1, %v8889_v54, 0.0 }
 0x1dc   : > { %vm4045_vm11 = vcmp.eq.s32.totalorder %v7540_v18, %v8819_v58  ;;  %v2080_v28 = vmax.f32 %v8828_v4, %v8831_v63  ;;  %v4555_v36 = vadd.f32 %v4277_v7, %v4276_v8  ;;  %v8926_v35 = vadd.f32 %v8732_v16, %v7575_v60  ;;  %13059 = vst [vmem:[#allocation203_spill] sm:$0xff] %v8928_v21  ;;  %v1234_v8 = vpop.f32.mrb[53].mxu0  ;;  %v8939_v7 = vpop.f32.mrb[52].mxu1 }
 0x1dd   : > { %13055 = vst [vmem:[#allocation199_spill] sm:$0xff] %v8909_v62  ;;  %13056 = vst [vmem:[#allocation200_spill] sm:$0xff] %v8912_v10  ;;  %v8931_v30 = vmax.f32 %v2071_v40, %v8848_v20  ;;  %v2089_v19 = vmax.f32 %v8838_v14, %v8841_v12  ;;  %v4564_v63 = vadd.f32 %v4285_v39, %v4284_v34  ;;  %v4286_v12 = vsel %vm4030_vm2, %v8892_v15, 0.0  ;;  %v1236_v34 = vpop.f32.mrb[54].mxu0  ;;  %v8956_v14 = vpop.f32.mrb[53].mxu1 }
 0x1de   : > { %13058 = vst [vmem:[#allocation202_spill] sm:$0xff] %v8926_v35  ;;  %vm4052_vm12 = vcmp.eq.s32.totalorder %v7514_v59, %v8875_v13  ;;  %vm4053_vm13 = vcmp.eq.s32.totalorder %v7540_v18, %v8875_v13  ;;  %v4547_v16 = vadd.f32 %v4546_v29, %v4270_v25  ;;  %v8947_v40 = vadd.f32 %v8761_v33, %v7575_v60  ;;  %v1238_v20 = vpop.f32.mrb[55].mxu0  ;;  %v1429_v4 = vpop.f32.mrb[54].mxu1 }
 0x1df   : > { %v8954_v39 = vadd.f32 %v1417_v42, %v7575_v60  ;;  %vm4060_vm14 = vcmp.eq.s32.totalorder %v7514_v59, %v8918_v46  ;;  %vm4061_vm15 = vcmp.eq.s32.totalorder %v7540_v18, %v8918_v46  ;;  %v2098_v33 = vmax.f32 %v8909_v62, %v8912_v10  ;;  %v8990_v9 = vpop.f32.mrb[55].mxu1 }
 0x1e0   : > { %13060 = vst [vmem:[#allocation204_spill] sm:$0xff] %v8947_v40  ;;  %v4292_v29 = vsel %vm4036_vm3, %v8909_v62, 0.0  ;;  %v4293_v42 = vsel %vm4037_vm4, %v8912_v10, 0.0  ;;  %v8973_v25 = vadd.f32 %v1419_v50, %v7562_v23  ;;  %vm4068_vm0 = vcmp.eq.s32.totalorder %v7514_v59, %v8928_v21 }
 0x1e1   : > { %13061 = vst [vmem:[#allocation205_spill] sm:$0xff] %v8954_v39  ;;  %vm4069_vm1 = vcmp.eq.s32.totalorder %v7540_v18, %v8928_v21  ;;  %v8979_v24 = vadd.f32 %v4538_v11, %v4263_v47  ;;  %v4271_v62 = vsel %vm4015_vm5, %v8926_v35, 0.0  ;;  %v8986_v10 = vmax.f32 %v2080_v28, %v8889_v54 }
 0x1e2   : > { %13062 = vst [vmem:[#allocation206_spill] sm:$0xff] %v8973_v25  ;;  %v4556_v50 = vadd.f32 %v4555_v36, %v4278_v0  ;;  %vm4046_vm2 = vcmp.eq.s32.totalorder %v7543_v1, %v8819_v58  ;;  %v8995_v47 = vmax.f32 %v2089_v19, %v8892_v15  ;;  %v4565_v11 = vadd.f32 %v4564_v63, %v4286_v12 }
 0x1e3   : > { %13063 = vst [vmem:[#allocation207_spill] sm:$0xff] %v8979_v24  ;;  %13064 = vst [vmem:[#allocation208_spill] sm:$0xff] %v8986_v10  ;;  %v8998_v24 = vadd.f32 %v1421_v22, %v7575_v60  ;;  %vm4054_vm3 = vcmp.eq.s32.totalorder %v7543_v1, %v8875_v13  ;;  %v4573_v28 = vadd.f32 %v4293_v42, %v4292_v29  ;;  %v4287_v0 = vsel %vm4031_vm6, %v8954_v39, 0.0  ;;  %v9041_v29 = vpop.permute.xlu1 %3831 }
 0x1e4   : > { %13065 = vst [vmem:[#allocation209_spill] sm:$0xff] %v8995_v47  ;;  %v9007_v36 = vadd.f32 %v1232_v41, %v7529_v53  ;;  %v9010_v61 = vadd.f32 %v1234_v8, %v7532_v2  ;;  %vm4062_vm4 = vcmp.eq.s32.totalorder %v7543_v1, %v8918_v46  ;;  %v9014_v22 = vadd.f32 %v4547_v16, %v4271_v62 }
 0x1e5   : > { %13066 = vst [vmem:[#allocation210_spill] sm:$0xff] %v8998_v24  ;;  %v4279_v12 = vsel %vm4023_vm7, %v8947_v40, 0.0  ;;  %v9021_v63 = vmax.f32 %v2098_v33, %v8973_v25  ;;  %v4294_v19 = vsel %vm4038_vm8, %v8973_v25, 0.0  ;;  %vm4070_vm5 = vcmp.eq.s32.totalorder %v7543_v1, %v8928_v21  ;;  %v1242_v33 = vpop.f32.mrb[56].mxu0  ;;  %13074 = vst [vmem:[#allocation218_spill] sm:$0xff] %v9041_v29 }
 0x1e6   : > { %13067 = vst [vmem:[#allocation211_spill] sm:$0xff] %v9007_v36  ;;  %13068 = vst [vmem:[#allocation212_spill] sm:$0xff] %v9010_v61  ;;  %v9031_v41 = vadd.f32 %v4556_v50, %v4279_v12  ;;  %v9034_v8 = vadd.f32 %v1236_v34, %v7529_v53  ;;  %v9037_v16 = vadd.f32 %v1238_v20, %v7532_v2  ;;  %v4295_v34 = vsel %vm4039_vm9, %v8998_v24, 0.0  ;;  %v1244_v20 = vpop.f32.mrb[57].mxu0  ;;  %v1435_v12 = vpop.f32.mrb[56].mxu1 }
 0x1e7   : > { %13069 = vst [vmem:[#allocation213_spill] sm:$0xff] %v9014_v22  ;;  %13070 = vst [vmem:[#allocation214_spill] sm:$0xff] %v9021_v63  ;;  %vm4047_vm6 = vcmp.eq.s32.totalorder %v7548_v31, %v8819_v58  ;;  %v9045_v15 = vadd.f32 %v4565_v11, %v4287_v0  ;;  %v9052_v50 = vadd.f32 %v1242_v33, %v7529_v53  ;;  %v4300_v25 = vsel %vm4044_vm10, %v9007_v36, 0.0  ;;  %v1246_v33 = vpop.f32.mrb[58].mxu0  ;;  %v1437_v42 = vpop.f32.mrb[57].mxu1  ;;  %v13280_v58 = vld [vmem:[#allocation178_spill] sm:$0xff] }
 0x1e8   : > { %13071 = vst [vmem:[#allocation215_spill] sm:$0xff] %v9031_v41  ;;  %13072 = vst [vmem:[#allocation216_spill] sm:$0xff] %v9034_v8  ;;  %v4574_v62 = vadd.f32 %v4573_v28, %v4294_v19  ;;  %v4301_v11 = vsel %vm4045_vm11, %v9010_v61, 0.0  ;;  %vm4055_vm7 = vcmp.eq.s32.totalorder %v7548_v31, %v8875_v13  ;;  %v9065_v0 = vadd.f32 %v1244_v20, %v7532_v2  ;;  %v1248_v20 = vpop.f32.mrb[59].mxu0 }
 0x1e9   : > { %13073 = vst [vmem:[#allocation217_spill] sm:$0xff] %v9037_v16  ;;  %13075 = vst [vmem:[#allocation219_spill] sm:$0xff] %v9045_v15  ;;  %vm4063_vm8 = vcmp.eq.s32.totalorder %v7548_v31, %v8918_v46  ;;  %v2107_v19 = vmax.f32 %v9007_v36, %v9010_v61  ;;  %v9075_v54 = vadd.f32 %v8939_v7, %v7562_v23  ;;  %v1439_v15 = vpop.f32.mrb[58].mxu1  ;;  %v4308_v39 = vsel %vm4052_vm12, %v9034_v8, 0.0  ;;  %v9098_v36 = vpop.permute.xlu0 %3834 }
 0x1ea   : > { %13076 = vst [vmem:[#allocation220_spill] sm:$0xff] %v9052_v50  ;;  %13077 = vst [vmem:[#allocation221_spill] sm:$0xff] %v9065_v0  ;;  %v9078_v45 = vadd.f32 %v1246_v33, %v7529_v53  ;;  %v4309_v28 = vsel %vm4053_vm13, %v9037_v16, 0.0  ;;  %v9089_v61 = vadd.f32 %v1429_v4, %v7562_v23  ;;  %v9092_v7 = vadd.f32 %v1248_v20, %v7532_v2  ;;  %v1441_v33 = vpop.f32.mrb[59].mxu1 }
 0x1eb   : > { %13078 = vst [vmem:[#allocation222_spill] sm:$0xff] %v9075_v54  ;;  %vm4076_vm9 = vcmp.eq.s32.totalorder %v7514_v59, %v9041_v29  ;;  %vm4077_vm10 = vcmp.eq.s32.totalorder %v7540_v18, %v9041_v29  ;;  %13082 = vst [vmem:[#allocation226_spill] sm:$0xff] %v9098_v36  ;;  %v4582_v24 = vadd.f32 %v4301_v11, %v4300_v25  ;;  %v4316_v4 = vsel %vm4060_vm14, %v9052_v50, 0.0 }
 0x1ec   : > { %13079 = vst [vmem:[#allocation223_spill] sm:$0xff] %v9078_v45  ;;  %13080 = vst [vmem:[#allocation224_spill] sm:$0xff] %v9089_v61  ;;  %v9101_v63 = vadd.f32 %v1435_v12, %v7562_v23  ;;  %v4317_v20 = vsel %vm4061_vm15, %v9065_v0, 0.0  ;;  %vm4071_vm11 = vcmp.eq.s32.totalorder %v7548_v31, %v8928_v21  ;;  %v2116_v47 = vmax.f32 %v9034_v8, %v9037_v16  ;;  %v13112_v21 = vld [vmem:[#allocation45_spill] sm:$0xff] }
 0x1ed   : > { %13081 = vst [vmem:[#allocation225_spill] sm:$0xff] %v9092_v7  ;;  %v4324_v25 = vsel %vm4068_vm0, %v9078_v45, 0.0  ;;  %v4325_v12 = vsel %vm4069_vm1, %v9092_v7, 0.0  ;;  %v9124_v11 = vadd.f32 %v1439_v15, %v7562_v23  ;;  %v9127_v49 = vmax.f32 %v2107_v19, %v9075_v54 }
 0x1ee   : > { %13083 = vst [vmem:[#allocation227_spill] sm:$0xff] %v9101_v63  ;;  %v4302_v16 = vsel %vm4046_vm2, %v9075_v54, 0.0  ;;  %v4591_v8 = vadd.f32 %v4309_v28, %v4308_v39  ;;  %v9135_v41 = vadd.f32 %v8956_v14, %v7575_v60  ;;  %vm4078_vm12 = vcmp.eq.s32.totalorder %v7543_v1, %v9041_v29  ;;  %v1252_v14 = vpop.f32.mrb[60].mxu0 }
 0x1ef   : > { %13084 = vst [vmem:[#allocation228_spill] sm:$0xff] %v9124_v11  ;;  %13085 = vst [vmem:[#allocation229_spill] sm:$0xff] %v9127_v49  ;;  %vm4084_vm13 = vcmp.eq.s32.totalorder %v7514_v59, %v9098_v36  ;;  %v4310_v15 = vsel %vm4054_vm3, %v9089_v61, 0.0  ;;  %v2125_v19 = vmax.f32 %v9052_v50, %v9065_v0  ;;  %v4600_v54 = vadd.f32 %v4317_v20, %v4316_v4  ;;  %v1254_v4 = vpop.f32.mrb[61].mxu0  ;;  %v1445_v20 = vpop.f32.mrb[60].mxu1  ;;  %v13110_v59 = vld [vmem:[#allocation46_spill] sm:$0xff] }
 0x1f0   : > { %13086 = vst [vmem:[#allocation230_spill] sm:$0xff] %v9135_v41  ;;  %v2134_v39 = vmax.f32 %v9078_v45, %v9092_v7  ;;  %vm4079_vm14 = vcmp.eq.s32.totalorder %v7548_v31, %v9041_v29  ;;  %v9153_v28 = vadd.f32 %v8990_v9, %v7575_v60  ;;  %v4318_v40 = vsel %vm4062_vm4, %v9101_v63, 0.0  ;;  %v1256_v55 = vpop.f32.mrb[62].mxu0  ;;  %v1447_v22 = vpop.f32.mrb[61].mxu1  ;;  %v13113_v29 = vld [vmem:[#allocation64_spill] sm:$0xff] }
 0x1f1   : > { %v4609_v10 = vadd.f32 %v4325_v12, %v4324_v25  ;;  %v9160_v0 = vadd.f32 %v1437_v42, %v7575_v60  ;;  %v9162_v50 = vadd.f32 %v4574_v62, %v4295_v34  ;;  %v4583_v7 = vadd.f32 %v4582_v24, %v4302_v16  ;;  %v1258_v16 = vpop.f32.mrb[63].mxu0  ;;  %v1449_v34 = vpop.f32.mrb[62].mxu1 }
 0x1f2   : > { %13087 = vst [vmem:[#allocation231_spill] sm:$0xff] %v9153_v28  ;;  %v9165_v45 = vmax.f32 %v2116_v47, %v9089_v61  ;;  %v4326_v9 = vsel %vm4070_vm5, %v9124_v11, 0.0  ;;  %vm3840_vm15 = vcmp.eq.s32.totalorder %v7631_v57, %v7503_v6  ;;  %v4303_v62 = vsel %vm4047_vm6, %v9135_v41, 0.0 }
 0x1f3   : > { %13088 = vst [vmem:[#allocation232_spill] sm:$0xff] %v9160_v0  ;;  %13089 = vst [vmem:[#allocation233_spill] sm:$0xff] %v9162_v50  ;;  %v4592_v42 = vadd.f32 %v4591_v8, %v4310_v15  ;;  %v9178_v24 = vadd.f32 %v1252_v14, %v7529_v53  ;;  %v9181_v47 = vadd.f32 %v1254_v4, %v7532_v2  ;;  %v1451_v14 = vpop.f32.mrb[63].mxu1  ;;  %v4311_v61 = vsel %vm4055_vm7, %v9153_v28, 0.0 }
 0x1f4   : > { %13090 = vst [vmem:[#allocation234_spill] sm:$0xff] %v9165_v45  ;;  %vm4085_vm0 = vcmp.eq.s32.totalorder %v7540_v18, %v9098_v36  ;;  %vm3841_vm1 = vcmp.eq.s32.totalorder %v7634_v44, %v7503_v6  ;;  %vm3848_vm2 = vcmp.eq.s32.totalorder %v7631_v57, %v7535_v3  ;;  %v9190_v25 = vmax.f32 %v2125_v19, %v9101_v63 }
 0x1f5   : > { %13091 = vst [vmem:[#allocation235_spill] sm:$0xff] %v9178_v24  ;;  %13092 = vst [vmem:[#allocation236_spill] sm:$0xff] %v9181_v47  ;;  %v4601_v8 = vadd.f32 %v4600_v54, %v4318_v40  ;;  %v9193_v12 = vmax.f32 %v2134_v39, %v9124_v11  ;;  %v9196_v15 = vadd.f32 %v1441_v33, %v7575_v60  ;;  %v4319_v54 = vsel %vm4063_vm8, %v9160_v0, 0.0 }
 0x1f6   : > { %13093 = vst [vmem:[#allocation237_spill] sm:$0xff] %v9190_v25  ;;  %v4610_v40 = vadd.f32 %v4609_v10, %v4326_v9  ;;  %vm3849_vm3 = vcmp.eq.s32.totalorder %v7634_v44, %v7535_v3  ;;  %v9210_v33 = vadd.f32 %v4583_v7, %v4303_v62  ;;  %v9215_v39 = vadd.f32 %v1256_v55, %v7529_v53  ;;  %v1488_v62 = vpop.f32.mrb[64].mxu0  ;;  %v13120_v25 = vld [vmem:[#allocation57_spill] sm:$0xff] }
 0x1f7   : > { %13094 = vst [vmem:[#allocation238_spill] sm:$0xff] %v9193_v12  ;;  %13095 = vst [vmem:[#allocation239_spill] sm:$0xff] %v9196_v15  ;;  %v9218_v4 = vadd.f32 %v1445_v20, %v7562_v23  ;;  %v9220_v63 = vadd.f32 %v4592_v42, %v4311_v61  ;;  %v4332_v10 = vsel %vm4076_vm9, %v9178_v24, 0.0  ;;  %v4333_v7 = vsel %vm4077_vm10, %v9181_v47, 0.0  ;;  %v1681_v61 = vpop.f32.mrb[64].mxu1  ;;  %v1490_v53 = vpop.f32.mrb[65].mxu0 }
 0x1f8   : > { %13096 = vst [vmem:[#allocation240_spill] sm:$0xff] %v9210_v33  ;;  %13097 = vst [vmem:[#allocation241_spill] sm:$0xff] %v9215_v39  ;;  %v9231_v9 = vadd.f32 %v1447_v22, %v7575_v60  ;;  %v9235_v55 = vadd.f32 %v4601_v8, %v4319_v54  ;;  %v4327_v20 = vsel %vm4071_vm11, %v9196_v15, 0.0  ;;  %vm3842_vm4 = vcmp.eq.s32.totalorder %v7637_v27, %v7503_v6 }
 0x1f9   : > { %13098 = vst [vmem:[#allocation242_spill] sm:$0xff] %v9218_v4  ;;  %13099 = vst [vmem:[#allocation243_spill] sm:$0xff] %v9220_v63  ;;  %v9245_v42 = vadd.f32 %v4610_v40, %v4327_v20  ;;  %v2143_v22 = vmax.f32 %v9178_v24, %v9181_v47  ;;  %v9250_v8 = vadd.f32 %v1258_v16, %v7532_v2  ;;  %v4334_v19 = vsel %vm4078_vm12, %v9218_v4, 0.0  ;;  %v13105_v20 = vld [vmem:[#allocation53_spill] sm:$0xff]  ;;  %v1683_v2 = vpop.f32.mrb[65].mxu1  ;;  %v1492_v16 = vpop.f32.mrb[66].mxu0 }
 0x1fa   : > { %13100 = vst [vmem:[#allocation244_spill] sm:$0xff] %v9231_v9  ;;  %13101 = vst [vmem:[#allocation245_spill] sm:$0xff] %v9235_v55  ;;  %v9253_v54 = vadd.f32 %v1488_v62, %v7716_v17  ;;  %v4618_v11 = vadd.f32 %v4333_v7, %v4332_v10  ;;  %v4340_v40 = vsel %vm4084_vm13, %v9215_v39, 0.0  ;;  %v9264_v47 = vadd.f32 %v1490_v53, %v13105_v20  ;;  %v13107_v62 = vld [vmem:[#allocation37_spill] sm:$0xff]  ;;  %v13109_v7 = vld [vmem:[#allocation54_spill] sm:$0xff]  ;;  %v1494_v12 = vpop.f32.mrb[67].mxu0 }
 0x1fb   : > { %13102 = vst [vmem:[#allocation246_spill] sm:$0xff] %v9245_v42  ;;  %13103 = vst [vmem:[#allocation247_spill] sm:$0xff] %v9250_v8  ;;  %vm3856_vm5 = vcmp.eq.s32.totalorder %v7631_v57, %v13107_v62  ;;  %v9272_v24 = vsel %vm4079_vm14, %v9231_v9, 0.0  ;;  %v9275_v10 = vadd.f32 %v1449_v34, %v7562_v23  ;;  %v13111_v42 = vmax.f32 %v13109_v7, %v13110_v59  ;;  %v1685_v55 = vpop.f32.mrb[66].mxu1 }
 0x1fc   : > { %13104 = vst [vmem:[#allocation248_spill] sm:$0xff] %v9253_v54  ;;  %13106 = vst [vmem:[#allocation53_spill] sm:$0xff] %v9264_v47  ;;  %v4096_v15 = vsel %vm3840_vm15, %v9253_v54, 0.0  ;;  %vm3843_vm6 = vcmp.eq.s32.totalorder %v13112_v21, %v7503_v6  ;;  %v4097_v23 = vsel %vm3841_vm1, %v9264_v47, 0.0  ;;  %v9293_v34 = vadd.f32 %v1492_v16, %v7716_v17  ;;  %v1687_v7 = vpop.f32.mrb[67].mxu1 }
 0x1fd   : > { %13108 = vst [vmem:[#allocation37_spill] sm:$0xff] %v9275_v10  ;;  %v1876_v53 = vmax.f32 %v13111_v42, %v9253_v54  ;;  %v4351_v46 = vadd.f32 %v13113_v29, %v4096_v15  ;;  %v9296_v42 = vadd.f32 %v1494_v12, %v13105_v20  ;;  %vm3857_vm7 = vcmp.eq.s32.totalorder %v7634_v44, %v13107_v62  ;;  %v13117_v15 = vld [vmem:[#allocation52_spill] sm:$0xff] }
 0x1fe   : > { %13114 = vst [vmem:[#allocation54_spill] sm:$0xff] %v9293_v34  ;;  %v9301_v54 = vmax.f32 %v2143_v22, %v9218_v4  ;;  %v9306_v59 = vadd.f32 %v1681_v61, %v13117_v15  ;;  %v4341_v12 = vsel %vm4085_vm0, %v9250_v8, 0.0  ;;  %v9314_v16 = vadd.f32 %v1451_v14, %v7575_v60  ;;  %v13121_v22 = vld [vmem:[#allocation55_spill] sm:$0xff]  ;;  %v13123_v29 = vld [vmem:[#allocation56_spill] sm:$0xff] }
 0x1ff   : > { %13115 = vst [vmem:[#allocation45_spill] sm:$0xff] %v9296_v42  ;;  %v1877_v0 = vmax.f32 %v1876_v53, %v9264_v47  ;;  %v13122_v4 = vmax.f32 %v13120_v25, %v13121_v22  ;;  %v4104_v61 = vsel %vm3848_vm2, %v9293_v34, 0.0  ;;  %v9325_v53 = vadd.f32 %v1683_v2, %v13123_v29  ;;  %v13125_v47 = vld [vmem:[#allocation70_spill] sm:$0xff]  ;;  %v1498_v2 = vpop.f32.mrb[68].mxu0 }
 0x200   : > { %13116 = vst [vmem:[#allocation64_spill] sm:$0xff] %v9301_v54  ;;  %13118 = vst [vmem:[#allocation52_spill] sm:$0xff] %v9306_v59  ;;  %v4360_v28 = vadd.f32 %v13125_v47, %v4104_v61  ;;  %vm3864_vm8 = vcmp.eq.s32.totalorder %v7631_v57, %v7564_v56  ;;  %v4352_v60 = vadd.f32 %v4351_v46, %v4097_v23 }
 0x201   : > { %13119 = vst [vmem:[#allocation249_spill] sm:$0xff] %v9314_v16  ;;  %v1885_v63 = vmax.f32 %v13122_v4, %v9293_v34  ;;  %13124 = vst [vmem:[#allocation57_spill] sm:$0xff] %v9325_v53  ;;  %v1878_v18 = vmax.f32 %v1877_v0, %v9306_v59  ;;  %v9331_v14 = vadd.f32 %v4618_v11, %v4334_v19  ;;  %v4105_v4 = vsel %vm3849_vm3, %v9296_v42, 0.0  ;;  %v1691_v0 = vpop.f32.mrb[68].mxu1  ;;  %v1500_v11 = vpop.f32.mrb[69].mxu0 }
 0x202   : > { %vm4086_vm9 = vcmp.eq.s32.totalorder %v7543_v1, %v9098_v36  ;;  %v9341_v47 = vadd.f32 %v1685_v55, %v13117_v15  ;;  %v9343_v61 = vadd.f32 %v4341_v12, %v4340_v40  ;;  %v9346_v46 = vadd.f32 %v1498_v2, %v7716_v17  ;;  %v1693_v55 = vpop.f32.mrb[69].mxu1  ;;  %v13129_v12 = vld [vmem:[#allocation68_spill] sm:$0xff] }
 0x203   : > { %v1886_v25 = vmax.f32 %v1885_v63, %v9296_v42  ;;  %v1879_v19 = vmax.f32 %v1878_v18, %v9325_v53  ;;  %v4098_v63 = vsel %vm3842_vm4, %v9306_v59, 0.0  ;;  %v9354_v23 = vadd.f32 %v1500_v11, %v13105_v20  ;;  %v1502_v42 = vpop.f32.mrb[70].mxu0  ;;  %v1695_v22 = vpop.f32.mrb[70].mxu1 }
 0x204   : > { %13126 = vst [vmem:[#allocation56_spill] sm:$0xff] %v9341_v47  ;;  %13127 = vst [vmem:[#allocation70_spill] sm:$0xff] %v9346_v46  ;;  %v4353_v34 = vadd.f32 %v4352_v60, %v4098_v63  ;;  %vm3850_vm10 = vcmp.eq.s32.totalorder %v7637_v27, %v7535_v3  ;;  %v13130_v18 = vmax.f32 %v7864_v52, %v13129_v12  ;;  %v4112_v59 = vsel %vm3856_vm5, %v9346_v46, 0.0  ;;  %v1504_v60 = vpop.f32.mrb[71].mxu0  ;;  %v13133_v63 = vld [vmem:[#allocation81_spill] sm:$0xff] }
 0x205   : > { %13128 = vst [vmem:[#allocation250_spill] sm:$0xff] %v9354_v23  ;;  %v1887_v40 = vmax.f32 %v1886_v25, %v9341_v47  ;;  %v9368_v11 = vadd.f32 %v1502_v42, %v7716_v17  ;;  %vm3865_vm11 = vcmp.eq.s32.totalorder %v7634_v44, %v7564_v56  ;;  %1880 = vmax.xlane.f32.xlu0 %v1879_v19  ;;  %v1697_v42 = vpop.f32.mrb[71].mxu1  ;;  %v4099_v12 = vsel %vm3843_vm6, %v9325_v53, 0.0  ;;  %v13140_v53 = vld [vmem:[#allocation43_spill] sm:$0xff] }
 0x206   : > { %v1894_v2 = vmax.f32 %v13130_v18, %v9346_v46  ;;  %v4361_v25 = vadd.f32 %v4360_v28, %v4105_v4  ;;  %vm4087_vm12 = vcmp.eq.s32.totalorder %v7548_v31, %v9098_v36  ;;  %v9375_v52 = vadd.f32 %v1687_v7, %v13123_v29  ;;  %v13137_v4 = vld [vmem:[#allocation71_spill] sm:$0xff] }
 0x207   : > { %13131 = vst [vmem:[#allocation251_spill] sm:$0xff] %v9368_v11  ;;  %v4369_v18 = vadd.f32 %v13133_v63, %v4112_v59  ;;  %v9379_v46 = vadd.f32 %v1504_v60, %v13105_v20  ;;  %v9386_v19 = vadd.f32 %v1691_v0, %v13117_v15  ;;  %v4113_v7 = vsel %vm3857_vm7, %v9354_v23, 0.0  ;;  %v13136_v59 = vld [vmem:[#allocation74_spill] sm:$0xff]  ;;  %v13164_v31 = vld [vmem:[#allocation91_spill] sm:$0xff] }
 0x208   : > { %13132 = vst [vmem:[#allocation252_spill] sm:$0xff] %v9375_v52  ;;  %v1895_v28 = vmax.f32 %v1894_v2, %v9354_v23  ;;  %v13138_v60 = vmax.f32 %v13136_v59, %v13137_v4  ;;  %v4354_v45 = vadd.f32 %v4353_v34, %v4099_v12  ;;  %v1888_v33 = vmax.f32 %v1887_v40, %v9375_v52 }
 0x209   : > { %13134 = vst [vmem:[#allocation81_spill] sm:$0xff] %v9379_v46  ;;  %13135 = vst [vmem:[#allocation253_spill] sm:$0xff] %v9386_v19  ;;  %vm3851_vm13 = vcmp.eq.s32.totalorder %v13112_v21, %v7535_v3  ;;  %v4106_v6 = vsel %vm3850_vm10, %v9341_v47, 0.0  ;;  %v9405_v0 = vadd.f32 %v1693_v55, %v13123_v29  ;;  %vm3872_vm14 = vcmp.eq.s32.totalorder %v7631_v57, %v13140_v53  ;;  %v1508_v55 = vpop.f32.mrb[72].mxu0  ;;  %v13145_v47 = vld [vmem:[#allocation84_spill] sm:$0xff]  ;;  %v13146_v3 = vld [vmem:[#allocation75_spill] sm:$0xff] }
 0x20a   : > { %v1903_v63 = vmax.f32 %v13138_v60, %v9368_v11  ;;  %v1896_v34 = vmax.f32 %v1895_v28, %v9386_v19  ;;  %v4362_v12 = vadd.f32 %v4361_v25, %v4106_v6  ;;  %v4120_v40 = vsel %vm3864_vm8, %v9368_v11, 0.0  ;;  %4355 = vadd.xlane.f32.xlu1 %v4354_v45  ;;  %1889 = vmax.xlane.f32.xlu0 %v1888_v33  ;;  %v13142_v60 = vld [vmem:[#allocation44_spill] sm:$0xff]  ;;  %v1701_v28 = vpop.f32.mrb[72].mxu1  ;;  %v1510_v6 = vpop.f32.mrb[73].mxu0 }
 0x20b   : > { %13139 = vst [vmem:[#allocation74_spill] sm:$0xff] %v9405_v0  ;;  %v9416_v59 = vadd.f32 %v1695_v22, %v13117_v15  ;;  %vm3880_vm15 = vcmp.eq.s32.totalorder %v7631_v57, %v13142_v60  ;;  %vm3858_vm0 = vcmp.eq.s32.totalorder %v7637_v27, %v13107_v62  ;;  %v9423_v25 = vadd.f32 %v1508_v55, %v7716_v17  ;;  %v1703_v4 = vpop.f32.mrb[73].mxu1  ;;  %v1512_v23 = vpop.f32.mrb[74].mxu0 }
 0x20c   : > { %v1904_v2 = vmax.f32 %v1903_v63, %v9379_v46  ;;  %v4370_v63 = vadd.f32 %v4369_v18, %v4113_v7  ;;  %v1897_v11 = vmax.f32 %v1896_v34, %v9405_v0  ;;  %v4107_v45 = vsel %vm3851_vm13, %v9375_v52, 0.0  ;;  %v13147_v52 = vld [vmem:[#allocation76_spill] sm:$0xff] }
 0x20d   : > { %13141 = vst [vmem:[#allocation43_spill] sm:$0xff] %v9416_v59  ;;  %13143 = vst [vmem:[#allocation44_spill] sm:$0xff] %v9423_v25  ;;  %v4114_v33 = vsel %vm3858_vm0, %v9386_v19, 0.0  ;;  %v9432_v22 = vadd.f32 %v1510_v6, %v13105_v20  ;;  %v4363_v18 = vadd.f32 %v4362_v12, %v4107_v45  ;;  %v4342_v34 = vsel %vm4086_vm9, %v9275_v10, 0.0 }
 0x20e   : > { %v1905_v7 = vmax.f32 %v1904_v2, %v9416_v59  ;;  %v4371_v55 = vadd.f32 %v4370_v63, %v4114_v33  ;;  %v4378_v13 = vadd.f32 %v13145_v47, %v4120_v40  ;;  %v13148_v19 = vmax.f32 %v13146_v3, %v13147_v52  ;;  %v1705_v2 = vpop.f32.mrb[74].mxu1  ;;  %v1514_v63 = vpop.f32.mrb[75].mxu0  ;;  %1898 = vmax.xlane.f32.xlu1 %v1897_v11 }
 0x20f   : > { %13144 = vst [vmem:[#allocation254_spill] sm:$0xff] %v9432_v22  ;;  %vm3873_vm1 = vcmp.eq.s32.totalorder %v7634_v44, %v13140_v53  ;;  %v9447_v12 = vadd.f32 %v1512_v23, %v7716_v17  ;;  %v4121_v1 = vsel %vm3865_vm11, %v9379_v46, 0.0  ;;  %v9456_v47 = vadd.f32 %v1697_v42, %v13123_v29  ;;  %4364 = vadd.xlane.f32.xlu0 %v4363_v18  ;;  %v13154_v42 = vld [vmem:[#allocation85_spill] sm:$0xff]  ;;  %v13155_v18 = vld [vmem:[#allocation79_spill] sm:$0xff] }
 0x210   : > { %v1912_v41 = vmax.f32 %v13148_v19, %v9423_v25  ;;  %v1707_v19 = vpop.f32.mrb[75].mxu1  ;;  %vm3859_vm2 = vcmp.eq.s32.totalorder %v13112_v21, %v13107_v62  ;;  %v13151_v23 = vmax.f32 %v9215_v39, %v9250_v8  ;;  %v9467_v45 = vadd.f32 %v1701_v28, %v13117_v15 }
 0x211   : > { %13149 = vst [vmem:[#allocation84_spill] sm:$0xff] %v9447_v12  ;;  %13150 = vst [vmem:[#allocation75_spill] sm:$0xff] %v9456_v47  ;;  %vm3881_vm3 = vcmp.eq.s32.totalorder %v7634_v44, %v13142_v60  ;;  %v4115_v11 = vsel %vm3859_vm2, %v9405_v0, 0.0  ;;  %v13156_v62 = vmax.f32 %v13154_v42, %v13155_v18  ;;  %v9478_v6 = vadd.f32 %v1514_v63, %v13105_v20 }
 0x212   : > { %v9464_v40 = vmax.f32 %v13151_v23, %v9275_v10  ;;  %13153 = vst [vmem:[#allocation256_spill] sm:$0xff] %v9467_v45  ;;  %v1913_v33 = vmax.f32 %v1912_v41, %v9432_v22  ;;  %v1906_v23 = vmax.f32 %v1905_v7, %v9456_v47  ;;  %v4372_v10 = vadd.f32 %v4371_v55, %v4115_v11 }
 0x213   : > { %v1921_v3 = vmax.f32 %v13156_v62, %v9447_v12  ;;  %13157 = vst [vmem:[#allocation85_spill] sm:$0xff] %v9478_v6  ;;  %v9483_v28 = vadd.f32 %v9331_v14, %v9272_v24  ;;  %v9486_v41 = vadd.f32 %v9343_v61, %v4342_v34  ;;  %v9492_v8 = vsel %vm4087_vm12, %v9314_v16, 0.0  ;;  %v1518_v24 = vpop.f32.mrb[76].mxu0 }
 0x214   : > { %13152 = vst [vmem:[#allocation255_spill] sm:$0xff] %v9464_v40  ;;  %13160 = vst [vmem:[#allocation259_spill] sm:$0xff] %v9492_v8  ;;  %v4379_v42 = vadd.f32 %v4378_v13, %v4121_v1  ;;  %v4128_v7 = vsel %vm3872_vm14, %v9423_v25, 0.0  ;;  %v9499_v55 = vadd.f32 %v1703_v4, %v13123_v29  ;;  %1907 = vmax.xlane.f32.xlu1 %v1906_v23  ;;  %4373 = vadd.xlane.f32.xlu0 %v4372_v10  ;;  %v1711_v4 = vpop.f32.mrb[76].mxu1  ;;  %v1520_v34 = vpop.f32.mrb[77].mxu0  ;;  %v13168_v25 = vld [vmem:[#allocation58_spill] sm:$0xff] }
 0x215   : > { %13158 = vst [vmem:[#allocation257_spill] sm:$0xff] %v9483_v28  ;;  %13159 = vst [vmem:[#allocation258_spill] sm:$0xff] %v9486_v41  ;;  %vm3866_vm4 = vcmp.eq.s32.totalorder %v7637_v27, %v7564_v56  ;;  %v1914_v14 = vmax.f32 %v1913_v33, %v9467_v45  ;;  %v4136_v13 = vsel %vm3880_vm15, %v9447_v12, 0.0  ;;  %v9511_v61 = vadd.f32 %v1518_v24, %v7716_v17  ;;  %v1713_v33 = vpop.f32.mrb[77].mxu1  ;;  %v1522_v11 = vpop.f32.mrb[78].mxu0  ;;  %v13165_v12 = vld [vmem:[#allocation96_spill] sm:$0xff] }
 0x216   : > { %13161 = vst [vmem:[#allocation260_spill] sm:$0xff] %v9499_v55  ;;  %v4122_v10 = vsel %vm3866_vm4, %v9416_v59, 0.0  ;;  %v1922_v63 = vmax.f32 %v1921_v3, %v9478_v6  ;;  %v9516_v1 = vadd.f32 %v1520_v34, %v13105_v20  ;;  %v4387_v39 = vadd.f32 %v13164_v31, %v4128_v7  ;;  %v13166_v24 = vld [vmem:[#allocation87_spill] sm:$0xff]  ;;  %v1715_v34 = vpop.f32.mrb[78].mxu1  ;;  %v1524_v59 = vpop.f32.mrb[79].mxu0 }
 0x217   : > { %13162 = vst [vmem:[#allocation261_spill] sm:$0xff] %v9511_v61  ;;  %v4380_v62 = vadd.f32 %v4379_v42, %v4122_v10  ;;  %v1915_v23 = vmax.f32 %v1914_v14, %v9499_v55  ;;  %v13167_v18 = vmax.f32 %v13165_v12, %v13166_v24  ;;  %vm3888_vm5 = vcmp.eq.s32.totalorder %v7631_v57, %v13168_v25  ;;  %v1717_v12 = vpop.f32.mrb[79].mxu1  ;;  %v13173_v10 = vld [vmem:[#allocation63_spill] sm:$0xff] }
 0x218   : > { %13163 = vst [vmem:[#allocation262_spill] sm:$0xff] %v9516_v1  ;;  %v9527_v3 = vadd.f32 %v1522_v11, %v7716_v17  ;;  %v4129_v42 = vsel %vm3873_vm1, %v9432_v22, 0.0  ;;  %v9534_v7 = vadd.f32 %v1705_v2, %v13117_v15  ;;  %vm3889_vm6 = vcmp.eq.s32.totalorder %v7634_v44, %v13168_v25 }
 0x219   : > { %v1930_v46 = vmax.f32 %v13167_v18, %v9511_v61  ;;  %vm3867_vm7 = vcmp.eq.s32.totalorder %v13112_v21, %v7564_v56  ;;  %1916 = vmax.xlane.f32.xlu0 %v1915_v23  ;;  %v13171_v18 = vld [vmem:[#allocation95_spill] sm:$0xff]  ;;  %v9542_v31 = vadd.f32 %v1707_v19, %v13123_v29  ;;  %vm3896_vm8 = vcmp.eq.s32.totalorder %v7631_v57, %v13173_v10  ;;  %v13175_v23 = vld [vmem:[#allocation98_spill] sm:$0xff] }
 0x21a   : > { %13169 = vst [vmem:[#allocation91_spill] sm:$0xff] %v9527_v3  ;;  %13170 = vst [vmem:[#allocation96_spill] sm:$0xff] %v9534_v7  ;;  %v4396_v14 = vadd.f32 %v13171_v18, %v4136_v13  ;;  %v4123_v11 = vsel %vm3867_vm7, %v9456_v47, 0.0  ;;  %v4137_v2 = vsel %vm3881_vm3, %v9478_v6, 0.0  ;;  %v1923_v56 = vmax.f32 %v1922_v63, %v9534_v7  ;;  %v13174_v13 = vld [vmem:[#allocation103_spill] sm:$0xff] }
 0x21b   : > { %13172 = vst [vmem:[#allocation58_spill] sm:$0xff] %v9542_v31  ;;  %v1931_v24 = vmax.f32 %v1930_v46, %v9516_v1  ;;  %v4381_v22 = vadd.f32 %v4380_v62, %v4123_v11  ;;  %v13176_v19 = vmax.f32 %v13174_v13, %v13175_v23  ;;  %v9558_v52 = vadd.f32 %v1524_v59, %v13105_v20  ;;  %v1528_v59 = vpop.f32.mrb[80].mxu0  ;;  %v1721_v13 = vpop.f32.mrb[80].mxu1 }
 0x21c   : > { %vm3874_vm9 = vcmp.eq.s32.totalorder %v7637_v27, %v13140_v53  ;;  %v4388_v47 = vadd.f32 %v4387_v39, %v4129_v42  ;;  %v4144_v46 = vsel %vm3888_vm5, %v9511_v61, 0.0  ;;  %v9567_v62 = vadd.f32 %v1711_v4, %v13117_v15  ;;  %v1723_v4 = vpop.f32.mrb[81].mxu1  ;;  %v13180_v61 = vld [vmem:[#allocation110_spill] sm:$0xff] }
 0x21d   : > { %v1939_v18 = vmax.f32 %v13176_v19, %v9527_v3  ;;  %13177 = vst [vmem:[#allocation95_spill] sm:$0xff] %v9558_v52  ;;  %4382 = vadd.xlane.f32.xlu1 %v4381_v22  ;;  %vm3875_vm10 = vcmp.eq.s32.totalorder %v13112_v21, %v13140_v53  ;;  %v4130_v63 = vsel %vm3874_vm9, %v9467_v45, 0.0  ;;  %v9573_v11 = vadd.f32 %v1713_v33, %v13123_v29  ;;  %v1530_v19 = vpop.f32.mrb[81].mxu0 }
 0x21e   : > { %13178 = vst [vmem:[#allocation63_spill] sm:$0xff] %v9567_v62  ;;  %vm3897_vm11 = vcmp.eq.s32.totalorder %v7634_v44, %v13173_v10  ;;  %v4131_v39 = vsel %vm3875_vm10, %v9499_v55, 0.0  ;;  %v4389_v42 = vadd.f32 %v4388_v47, %v4130_v63  ;;  %v4152_v22 = vsel %vm3896_vm8, %v9527_v3, 0.0  ;;  %v1532_v23 = vpop.f32.mrb[82].mxu0  ;;  %v1725_v47 = vpop.f32.mrb[82].mxu1 }
 0x21f   : > { %13179 = vst [vmem:[#allocation103_spill] sm:$0xff] %v9573_v11  ;;  %v1924_v53 = vmax.f32 %v1923_v56, %v9542_v31  ;;  %v4397_v6 = vadd.f32 %v4396_v14, %v4137_v2  ;;  %v1932_v33 = vmax.f32 %v1931_v24, %v9567_v62  ;;  %v4405_v45 = vadd.f32 %v13180_v61, %v4144_v46  ;;  %v1534_v63 = vpop.f32.mrb[83].mxu0  ;;  %v1727_v61 = vpop.f32.mrb[83].mxu1  ;;  %v13183_v2 = vld [vmem:[#allocation113_spill] sm:$0xff] }
 0x220   : > { %v1940_v0 = vmax.f32 %v1939_v18, %v9558_v52  ;;  %v4390_v55 = vadd.f32 %v4389_v42, %v4131_v39  ;;  %vm3882_vm12 = vcmp.eq.s32.totalorder %v7637_v27, %v13142_v60  ;;  %v4145_v56 = vsel %vm3889_vm6, %v9516_v1, 0.0 }
 0x221   : > { %v9593_v3 = vadd.f32 %v1715_v34, %v13117_v15  ;;  %1925 = vmax.xlane.f32.xlu1 %v1924_v53  ;;  %v9596_v24 = vadd.f32 %v1528_v59, %v7716_v17  ;;  %v4138_v14 = vsel %vm3882_vm12, %v9534_v7, 0.0  ;;  %v4414_v18 = vadd.f32 %v13183_v2, %v4152_v22  ;;  %v13186_v53 = vld [vmem:[#allocation67_spill] sm:$0xff]  ;;  %v13195_v7 = vld [vmem:[#allocation112_spill] sm:$0xff] }
 0x222   : > { %v9601_v46 = vadd.f32 %v1717_v12, %v13123_v29  ;;  %4391 = vadd.xlane.f32.xlu0 %v4390_v55  ;;  %vm3883_vm13 = vcmp.eq.s32.totalorder %v13112_v21, %v13142_v60  ;;  %v4398_v39 = vadd.f32 %v4397_v6, %v4138_v14  ;;  %v4153_v34 = vsel %vm3897_vm11, %v9558_v52, 0.0  ;;  %v13187_v55 = vld [vmem:[#allocation111_spill] sm:$0xff]  ;;  %v13188_v12 = vld [vmem:[#allocation104_spill] sm:$0xff]  ;;  %v13191_v52 = vld [vmem:[#allocation73_spill] sm:$0xff] }
 0x223   : > { %13181 = vst [vmem:[#allocation110_spill] sm:$0xff] %v9593_v3  ;;  %13182 = vst [vmem:[#allocation263_spill] sm:$0xff] %v9596_v24  ;;  %v9610_v59 = vadd.f32 %v1532_v23, %v7716_v17  ;;  %v4139_v42 = vsel %vm3883_vm13, %v9542_v31, 0.0  ;;  %v1933_v22 = vmax.f32 %v1932_v33, %v9573_v11  ;;  %vm3904_vm14 = vcmp.eq.s32.totalorder %v7631_v57, %v13186_v53  ;;  %v1538_v33 = vpop.f32.mrb[84].mxu0 }
 0x224   : > { %13184 = vst [vmem:[#allocation113_spill] sm:$0xff] %v9601_v46  ;;  %vm3905_vm15 = vcmp.eq.s32.totalorder %v7634_v44, %v13186_v53  ;;  %v4399_v60 = vadd.f32 %v4398_v39, %v4139_v42  ;;  %v1941_v6 = vmax.f32 %v1940_v0, %v9593_v3  ;;  %v13189_v14 = vmax.f32 %v13187_v55, %v13188_v12  ;;  %v1540_v42 = vpop.f32.mrb[85].mxu0 }
 0x225   : > { %13185 = vst [vmem:[#allocation264_spill] sm:$0xff] %v9610_v59  ;;  %v9624_v23 = vadd.f32 %v1530_v19, %v13105_v20  ;;  %vm3912_vm0 = vcmp.eq.s32.totalorder %v7631_v57, %v13191_v52  ;;  %vm3913_vm1 = vcmp.eq.s32.totalorder %v7634_v44, %v13191_v52  ;;  %v4160_v31 = vsel %vm3904_vm14, %v9596_v24, 0.0  ;;  %v1731_v19 = vpop.f32.mrb[84].mxu1 }
 0x226   : > { %v1948_v2 = vmax.f32 %v13189_v14, %v9596_v24  ;;  %v9632_v39 = vadd.f32 %v1721_v13, %v13117_v15  ;;  %4400 = vadd.xlane.f32.xlu1 %v4399_v60  ;;  %1934 = vmax.xlane.f32.xlu0 %v1933_v22  ;;  %vm3890_vm2 = vcmp.eq.s32.totalorder %v7637_v27, %v13168_v25  ;;  %v13194_v14 = vld [vmem:[#allocation114_spill] sm:$0xff]  ;;  %v1733_v22 = vpop.f32.mrb[85].mxu1  ;;  %v1542_v60 = vpop.f32.mrb[86].mxu0 }
 0x227   : > { %13190 = vst [vmem:[#allocation67_spill] sm:$0xff] %v9624_v23  ;;  %v4406_v0 = vadd.f32 %v4405_v45, %v4145_v56  ;;  %v9637_v55 = vadd.f32 %v1723_v4, %v13123_v29  ;;  %v13196_v12 = vmax.f32 %v13194_v14, %v13195_v7  ;;  %v9644_v24 = vadd.f32 %v1534_v63, %v13105_v20  ;;  %v1735_v14 = vpop.f32.mrb[86].mxu1  ;;  %v13198_v7 = vld [vmem:[#allocation120_spill] sm:$0xff] }
 0x228   : > { %13192 = vst [vmem:[#allocation111_spill] sm:$0xff] %v9632_v39  ;;  %v4146_v13 = vsel %vm3890_vm2, %v9567_v62, 0.0  ;;  %v4168_v45 = vsel %vm3912_vm0, %v9610_v59, 0.0  ;;  %v1942_v4 = vmax.f32 %v1941_v6, %v9601_v46  ;;  %vm3891_vm3 = vcmp.eq.s32.totalorder %v13112_v21, %v13168_v25  ;;  %v1737_v16 = vpop.f32.mrb[87].mxu1 }
 0x229   : > { %13193 = vst [vmem:[#allocation73_spill] sm:$0xff] %v9637_v55  ;;  %v1957_v1 = vmax.f32 %v13196_v12, %v9610_v59  ;;  %13197 = vst [vmem:[#allocation114_spill] sm:$0xff] %v9644_v24  ;;  %v4407_v56 = vadd.f32 %v4406_v0, %v4146_v13  ;;  %v1544_v12 = vpop.f32.mrb[87].mxu0  ;;  %v4423_v63 = vadd.f32 %v13198_v7, %v4160_v31  ;;  %v4147_v62 = vsel %vm3891_vm3, %v9573_v11, 0.0  ;;  %v13202_v31 = vld [vmem:[#allocation121_spill] sm:$0xff]  ;;  %v13203_v59 = vld [vmem:[#allocation80_spill] sm:$0xff] }
 0x22a   : > { %v1949_v41 = vmax.f32 %v1948_v2, %v9624_v23  ;;  %v9658_v8 = vadd.f32 %v1538_v33, %v7716_v17  ;;  %v4161_v6 = vsel %vm3905_vm15, %v9624_v23, 0.0  ;;  %v9665_v25 = vadd.f32 %v1725_v47, %v13117_v15  ;;  %1943 = vmax.xlane.f32.xlu1 %v1942_v4  ;;  %v13209_v4 = vld [vmem:[#allocation115_spill] sm:$0xff]  ;;  %v1741_v11 = vpop.f32.mrb[88].mxu1 }
 0x22b   : > { %v9668_v0 = vadd.f32 %v1727_v61, %v13123_v29  ;;  %v4408_v7 = vadd.f32 %v4407_v56, %v4147_v62  ;;  %v9671_v2 = vadd.f32 %v13202_v31, %v4168_v45  ;;  %v1958_v33 = vmax.f32 %v1957_v1, %v9644_v24  ;;  %v13207_v1 = vld [vmem:[#allocation88_spill] sm:$0xff] }
 0x22c   : > { %13199 = vst [vmem:[#allocation120_spill] sm:$0xff] %v9658_v8  ;;  %13200 = vst [vmem:[#allocation265_spill] sm:$0xff] %v9665_v25  ;;  %v9678_v13 = vsel %vm3913_vm1, %v9644_v24, 0.0  ;;  %vm3920_vm4 = vcmp.eq.s32.totalorder %v7631_v57, %v13203_v59  ;;  %v9683_v47 = vadd.f32 %v1731_v19, %v13117_v15  ;;  %v9686_v62 = vadd.f32 %v1540_v42, %v13105_v20  ;;  %v13208_v45 = vld [vmem:[#allocation116_spill] sm:$0xff]  ;;  %v1548_v24 = vpop.f32.mrb[88].mxu0 }
 0x22d   : > { %13201 = vst [vmem:[#allocation266_spill] sm:$0xff] %v9668_v0  ;;  %4409 = vadd.xlane.f32.xlu0 %v4408_v7  ;;  %v9689_v61 = vadd.f32 %v1542_v60, %v7716_v17  ;;  %vm3928_vm5 = vcmp.eq.s32.totalorder %v7631_v57, %v13207_v1  ;;  %v13210_v56 = vmax.f32 %v13208_v45, %v13209_v4  ;;  %v4176_v42 = vsel %vm3920_vm4, %v9658_v8, 0.0  ;;  %v1550_v40 = vpop.f32.mrb[89].mxu0  ;;  %v13212_v4 = vld [vmem:[#allocation122_spill] sm:$0xff] }
 0x22e   : > { %13204 = vst [vmem:[#allocation121_spill] sm:$0xff] %v9683_v47  ;;  %13205 = vst [vmem:[#allocation80_spill] sm:$0xff] %v9686_v62  ;;  %vm3898_vm6 = vcmp.eq.s32.totalorder %v7637_v27, %v13173_v10  ;;  %v4415_v7 = vadd.f32 %v4414_v18, %v4153_v34  ;;  %v1950_v19 = vmax.f32 %v1949_v41, %v9632_v39  ;;  %v9708_v41 = vpop.f32.mrb[89].mxu1  ;;  %v1552_v34 = vpop.f32.mrb[90].mxu0 }
 0x22f   : > { %13206 = vst [vmem:[#allocation267_spill] sm:$0xff] %v9689_v61  ;;  %v1966_v31 = vmax.f32 %v13210_v56, %v9658_v8  ;;  %v4154_v60 = vsel %vm3898_vm6, %v9593_v3, 0.0  ;;  %vm3906_vm7 = vcmp.eq.s32.totalorder %v7637_v27, %v13186_v53  ;;  %v4424_v23 = vadd.f32 %v4423_v63, %v4161_v6  ;;  %v13211_v8 = vld [vmem:[#allocation129_spill] sm:$0xff] }
 0x230   : > { %vm3899_vm8 = vcmp.eq.s32.totalorder %v13112_v21, %v13173_v10  ;;  %v4416_v45 = vadd.f32 %v4415_v7, %v4154_v60  ;;  %v1951_v56 = vmax.f32 %v1950_v19, %v9637_v55  ;;  %v4162_v18 = vsel %vm3906_vm7, %v9632_v39, 0.0  ;;  %v9720_v7 = vpop.f32.mrb[90].mxu1  ;;  %v1554_v19 = vpop.f32.mrb[91].mxu0 }
 0x231   : > { %v13213_v3 = vmax.f32 %v13211_v8, %v13212_v4  ;;  %v9717_v63 = vadd.f32 %v1544_v12, %v13105_v20  ;;  %v4155_v6 = vsel %vm3899_vm8, %v9601_v46, 0.0  ;;  %v4425_v10 = vadd.f32 %v4424_v23, %v4162_v18 }
 0x232   : > { %v4184_v60 = vsel %vm3928_vm5, %v9689_v61, 0.0  ;;  %v4417_v39 = vadd.f32 %v4416_v45, %v4155_v6  ;;  %1952 = vmax.xlane.f32.xlu0 %v1951_v56  ;;  %v1959_v8 = vmax.f32 %v1958_v33, %v9665_v25  ;;  %vm3907_vm9 = vcmp.eq.s32.totalorder %v13112_v21, %v13186_v53  ;;  %v13217_v45 = vld [vmem:[#allocation133_spill] sm:$0xff] }
 0x233   : > { %v9714_v36 = vmax.f32 %v13213_v3, %v9689_v61  ;;  %13214 = vst [vmem:[#allocation88_spill] sm:$0xff] %v9717_v63  ;;  %v9729_v3 = vpop.f32.mrb[91].mxu1  ;;  %vm3921_vm10 = vcmp.eq.s32.totalorder %v7634_v44, %v13203_v59  ;;  %v9734_v23 = vadd.f32 %v1733_v22, %v13123_v29  ;;  %v4163_v12 = vsel %vm3907_vm9, %v9637_v55, 0.0 }
 0x234   : > { %v9738_v18 = vadd.f32 %v1548_v24, %v7716_v17  ;;  %v4441_v56 = vadd.f32 %v13217_v45, %v4176_v42  ;;  %v1967_v33 = vmax.f32 %v1966_v31, %v9686_v62  ;;  %v4177_v6 = vsel %vm3921_vm10, %v9686_v62, 0.0  ;;  %4418 = vadd.xlane.f32.xlu1 %v4417_v39 }
 0x235   : > { %13215 = vst [vmem:[#allocation116_spill] sm:$0xff] %v9734_v23  ;;  %v4426_v53 = vadd.f32 %v4425_v10, %v4163_v12  ;;  %v9744_v61 = vadd.f32 %v8498_v37, %v4184_v60  ;;  %v9747_v4 = vadd.f32 %v1735_v14, %v13117_v15  ;;  %vm3929_vm11 = vcmp.eq.s32.totalorder %v7634_v44, %v13207_v1  ;;  %v13220_v37 = vld [vmem:[#allocation97_spill] sm:$0xff]  ;;  %v1558_v14 = vpop.f32.mrb[92].mxu0 }
 0x236   : > { %13216 = vst [vmem:[#allocation129_spill] sm:$0xff] %v9738_v18  ;;  %v9752_v24 = vadd.f32 %v1737_v16, %v13123_v29  ;;  %v1976_v22 = vmax.f32 %v9714_v36, %v9717_v63  ;;  %v9757_v31 = vsel %vm3929_vm11, %v9717_v63, 0.0  ;;  %v1960_v39 = vmax.f32 %v1959_v8, %v9668_v0  ;;  %v1751_v8 = vpop.f32.mrb[92].mxu1  ;;  %v1560_v12 = vpop.f32.mrb[93].mxu0  ;;  %v13225_v63 = vld [vmem:[#allocation139_spill] sm:$0xff] }
 0x237   : > { %13218 = vst [vmem:[#allocation133_spill] sm:$0xff] %v9747_v4  ;;  %4427 = vadd.xlane.f32.xlu0 %v4426_v53  ;;  %vm3936_vm12 = vcmp.eq.s32.totalorder %v7631_v57, %v13220_v37  ;;  %v13221_v42 = vmax.f32 %v8443_v32, %v8369_v26  ;;  %v9769_v16 = vadd.f32 %v1741_v11, %v13117_v15  ;;  %v9783_v53 = vpop.f32.mrb[93].mxu1 }
 0x238   : > { %13219 = vst [vmem:[#allocation268_spill] sm:$0xff] %v9752_v24  ;;  %v9772_v36 = vadd.f32 %v1550_v40, %v13105_v20  ;;  %v9775_v60 = vadd.f32 %v1552_v34, %v7716_v17  ;;  %1961 = vmax.xlane.f32.xlu1 %v1960_v39  ;;  %v4192_v45 = vsel %vm3936_vm12, %v9738_v18, 0.0  ;;  %vm3914_vm13 = vcmp.eq.s32.totalorder %v7637_v27, %v13191_v52  ;;  %v1562_v40 = vpop.f32.mrb[94].mxu0 }
 0x239   : > { %v9766_v10 = vmax.f32 %v13221_v42, %v9738_v18  ;;  %13222 = vst [vmem:[#allocation97_spill] sm:$0xff] %v9769_v16  ;;  %v4433_v32 = vadd.f32 %v9671_v2, %v9678_v13  ;;  %v1968_v11 = vmax.f32 %v1967_v33, %v9683_v47  ;;  %vm3944_vm14 = vcmp.eq.s32.totalorder %v7631_v57, %v8090_v43  ;;  %v9790_v42 = vpop.f32.mrb[94].mxu1  ;;  %v9792_v18 = vpop.f32.mrb[95].mxu0 }
 0x23a   : > { %13223 = vst [vmem:[#allocation269_spill] sm:$0xff] %v9772_v36  ;;  %13224 = vst [vmem:[#allocation270_spill] sm:$0xff] %v9775_v60  ;;  %v4170_v34 = vsel %vm3914_vm13, %v9665_v25, 0.0  ;;  %vm3922_vm15 = vcmp.eq.s32.totalorder %v7637_v27, %v13203_v59  ;;  %v4442_v39 = vadd.f32 %v4441_v56, %v4177_v6  ;;  %vm3915_vm0 = vcmp.eq.s32.totalorder %v13112_v21, %v13191_v52  ;;  %v9798_v26 = vpop.f32.mrb[95].mxu1 }
 0x23b   : > { %v4434_v2 = vadd.f32 %v4433_v32, %v4170_v34  ;;  %v1969_v13 = vmax.f32 %v1968_v11, %v9734_v23  ;;  %v4178_v33 = vsel %vm3922_vm15, %v9683_v47, 0.0  ;;  %v13226_v25 = vmax.f32 %v8468_v38, %v13225_v63  ;;  %v13230_v34 = vld [vmem:[#allocation146_spill] sm:$0xff] }
 0x23c   : > { %v9805_v56 = vadd.f32 %v1554_v19, %v13105_v20  ;;  %v4171_v6 = vsel %vm3915_vm0, %v9668_v0, 0.0  ;;  %v4443_v46 = vadd.f32 %v4442_v39, %v4178_v33  ;;  %v4200_v52 = vsel %vm3944_vm14, %v9775_v60, 0.0  ;;  %v13231_v33 = vld [vmem:[#allocation151_spill] sm:$0xff]  ;;  %v13256_v47 = vld [vmem:[#allocation158_spill] sm:$0xff] }
 0x23d   : > { %v1993_v62 = vmax.f32 %v13226_v25, %v9775_v60  ;;  %v4435_v32 = vadd.f32 %v4434_v2, %v4171_v6  ;;  %1970 = vmax.xlane.f32.xlu0 %v1969_v13  ;;  %v1977_v11 = vmax.f32 %v1976_v22, %v9747_v4  ;;  %vm3923_vm1 = vcmp.eq.s32.totalorder %v13112_v21, %v13203_v59  ;;  %v1568_v13 = vpop.f32.mrb[96].mxu0 }
 0x23e   : > { %13227 = vst [vmem:[#allocation271_spill] sm:$0xff] %v9805_v56  ;;  %vm3937_vm2 = vcmp.eq.s32.totalorder %v7634_v44, %v13220_v37  ;;  %v9816_v38 = vadd.f32 %v9708_v41, %v13123_v29  ;;  %v4179_v25 = vsel %vm3923_vm1, %v9734_v23, 0.0  ;;  %v9820_v19 = vadd.f32 %v1558_v14, %v7716_v17  ;;  %v13243_v23 = vld [vmem:[#allocation155_spill] sm:$0xff] }
 0x23f   : > { %v4459_v39 = vadd.f32 %v13230_v34, %v4192_v45  ;;  %v1985_v22 = vmax.f32 %v9766_v10, %v9772_v36  ;;  %v4193_v2 = vsel %vm3937_vm2, %v9772_v36, 0.0  ;;  %4436 = vadd.xlane.f32.xlu1 %v4435_v32  ;;  %v4444_v59 = vadd.f32 %v4443_v46, %v4179_v25  ;;  %v1761_v10 = vpop.f32.mrb[96].mxu1  ;;  %v1570_v45 = vpop.f32.mrb[97].mxu0  ;;  %v13234_v25 = vld [vmem:[#allocation107_spill] sm:$0xff] }
 0x240   : > { %13228 = vst [vmem:[#allocation272_spill] sm:$0xff] %v9816_v38  ;;  %13229 = vst [vmem:[#allocation273_spill] sm:$0xff] %v9820_v19  ;;  %v9827_v6 = vadd.f32 %v13231_v33, %v4200_v52  ;;  %v9831_v41 = vadd.f32 %v9720_v7, %v13117_v15  ;;  %vm3945_vm3 = vcmp.eq.s32.totalorder %v7634_v44, %v8090_v43  ;;  %v9846_v7 = vpop.f32.mrb[97].mxu1  ;;  %v9848_v34 = vpop.f32.mrb[98].mxu0  ;;  %v13236_v33 = vld [vmem:[#allocation142_spill] sm:$0xff] }
 0x241   : > { %v9837_v14 = vadd.f32 %v9729_v3, %v13123_v29  ;;  %v1994_v32 = vmax.f32 %v1993_v62, %v9805_v56  ;;  %v9841_v46 = vsel %vm3945_vm3, %v9805_v56, 0.0  ;;  %v1978_v52 = vmax.f32 %v1977_v11, %v9752_v24  ;;  %4445 = vadd.xlane.f32.xlu0 %v4444_v59  ;;  %v13235_v3 = vld [vmem:[#allocation147_spill] sm:$0xff]  ;;  %v9864_v11 = vpop.f32.mrb[98].mxu1  ;;  %v9866_v59 = vpop.f32.mrb[99].mxu0 }
 0x242   : > { %13232 = vst [vmem:[#allocation146_spill] sm:$0xff] %v9831_v41  ;;  %vm3952_vm4 = vcmp.eq.s32.totalorder %v7631_v57, %v13234_v25  ;;  %v13237_v36 = vmax.f32 %v13235_v3, %v13236_v33  ;;  %v9857_v62 = vadd.f32 %v1751_v8, %v13117_v15  ;;  %v9860_v56 = vadd.f32 %v1560_v12, %v13105_v20  ;;  %v9874_v12 = vpop.f32.mrb[99].mxu1 }
 0x243   : > { %13233 = vst [vmem:[#allocation151_spill] sm:$0xff] %v9837_v14  ;;  %vm3953_vm5 = vcmp.eq.s32.totalorder %v7634_v44, %v13234_v25  ;;  %1979 = vmax.xlane.f32.xlu1 %v1978_v52  ;;  %v4208_v63 = vsel %vm3952_vm4, %v9820_v19, 0.0  ;;  %vm3930_vm6 = vcmp.eq.s32.totalorder %v7637_v27, %v13207_v1  ;;  %v1986_v8 = vmax.f32 %v1985_v22, %v9769_v16 }
 0x244   : > { %v9854_v60 = vmax.f32 %v13237_v36, %v9820_v19  ;;  %13238 = vst [vmem:[#allocation107_spill] sm:$0xff] %v9857_v62  ;;  %13239 = vst [vmem:[#allocation147_spill] sm:$0xff] %v9860_v56  ;;  %v4451_v36 = vadd.f32 %v9744_v61, %v9757_v31  ;;  %v9877_v3 = vadd.f32 %v1562_v40, %v7716_v17  ;;  %v4186_v33 = vsel %vm3930_vm6, %v9747_v4, 0.0 }
 0x245   : > { %vm3938_vm7 = vcmp.eq.s32.totalorder %v7637_v27, %v13220_v37  ;;  %v4460_v52 = vadd.f32 %v4459_v39, %v4193_v2  ;;  %vm3931_vm8 = vcmp.eq.s32.totalorder %v13112_v21, %v13207_v1  ;;  %v1987_v0 = vmax.f32 %v1986_v8, %v9816_v38 }
 0x246   : > { %13240 = vst [vmem:[#allocation274_spill] sm:$0xff] %v9877_v3  ;;  %v4452_v19 = vadd.f32 %v4451_v36, %v4186_v33  ;;  %v4194_v61 = vsel %vm3938_vm7, %v9769_v16, 0.0  ;;  %v9888_v31 = vadd.f32 %v9783_v53, %v13123_v29  ;;  %v4187_v40 = vsel %vm3931_vm8, %v9752_v24, 0.0  ;;  %v1578_v33 = vpop.f32.mrb[100].mxu0  ;;  %v13244_v36 = vld [vmem:[#allocation148_spill] sm:$0xff]  ;;  %v13245_v53 = vld [vmem:[#allocation143_spill] sm:$0xff] }
 0x247   : > { %v4461_v22 = vadd.f32 %v4460_v52, %v4194_v61  ;;  %v9892_v4 = vadd.f32 %v1568_v13, %v7716_v17  ;;  %v4477_v39 = vadd.f32 %v13243_v23, %v4208_v63  ;;  %1988 = vmax.xlane.f32.xlu0 %v1987_v0  ;;  %v1995_v1 = vmax.f32 %v1994_v32, %v9831_v41  ;;  %v13247_v24 = vld [vmem:[#allocation109_spill] sm:$0xff]  ;;  %v9909_v63 = vpop.f32.mrb[100].mxu1  ;;  %v9911_v23 = vpop.f32.mrb[101].mxu0 }
 0x248   : > { %13241 = vst [vmem:[#allocation275_spill] sm:$0xff] %v9888_v31  ;;  %v4453_v2 = vadd.f32 %v4452_v19, %v4187_v40  ;;  %vm3939_vm9 = vcmp.eq.s32.totalorder %v13112_v21, %v13220_v37  ;;  %v13246_v8 = vmax.f32 %v13244_v36, %v13245_v53  ;;  %vm3960_vm10 = vcmp.eq.s32.totalorder %v7631_v57, %v13247_v24  ;;  %v13249_v52 = vld [vmem:[#allocation125_spill] sm:$0xff]  ;;  %v9922_v61 = vpop.f32.mrb[102].mxu0 }
 0x249   : > { %13242 = vst [vmem:[#allocation276_spill] sm:$0xff] %v9892_v4  ;;  %v9906_v13 = vadd.f32 %v9792_v18, %v13105_v20  ;;  %v4195_v0 = vsel %vm3939_vm9, %v9816_v38, 0.0  ;;  %v4209_v37 = vsel %vm3953_vm5, %v9860_v56, 0.0  ;;  %v4216_v19 = vsel %vm3960_vm10, %v9877_v3, 0.0  ;;  %v9920_v18 = vpop.f32.mrb[101].mxu1 }
 0x24a   : > { %v2011_v16 = vmax.f32 %v13246_v8, %v9877_v3  ;;  %4454 = vadd.xlane.f32.xlu1 %v4453_v2  ;;  %v4462_v32 = vadd.f32 %v4461_v22, %v4195_v0  ;;  %vm3968_vm11 = vcmp.eq.s32.totalorder %v7631_v57, %v13249_v52  ;;  %v2003_v40 = vmax.f32 %v9854_v60, %v9860_v56  ;;  %v9933_v2 = vpop.f32.mrb[102].mxu1  ;;  %v9935_v22 = vpop.f32.mrb[103].mxu0  ;;  %v13254_v56 = vld [vmem:[#allocation156_spill] sm:$0xff] }
 0x24b   : > { %13248 = vst [vmem:[#allocation155_spill] sm:$0xff] %v9906_v13  ;;  %v4224_v36 = vsel %vm3968_vm11, %v9892_v4, 0.0  ;;  %v9928_v8 = vadd.f32 %v1761_v10, %v13117_v15  ;;  %v9931_v53 = vadd.f32 %v1570_v45, %v13105_v20  ;;  %v9939_v0 = vadd.f32 %v9790_v42, %v13117_v15  ;;  %v9948_v45 = vpop.f32.mrb[103].mxu1 }
 0x24c   : > { %vm3961_vm12 = vcmp.eq.s32.totalorder %v7634_v44, %v13247_v24  ;;  %v9945_v60 = vadd.f32 %v9798_v26, %v13123_v29  ;;  %v1996_v10 = vmax.f32 %v1995_v1, %v9837_v14  ;;  %4463 = vadd.xlane.f32.xlu0 %v4462_v32  ;;  %v9951_v3 = vadd.f32 %v13254_v56, %v4216_v19  ;;  %v13255_v26 = vld [vmem:[#allocation160_spill] sm:$0xff]  ;;  %v13258_v32 = vld [vmem:[#allocation175_spill] sm:$0xff] }
 0x24d   : > { %13250 = vst [vmem:[#allocation148_spill] sm:$0xff] %v9928_v8  ;;  %13251 = vst [vmem:[#allocation109_spill] sm:$0xff] %v9931_v53  ;;  %v2012_v38 = vmax.f32 %v2011_v16, %v9906_v13  ;;  %v9955_v42 = vsel %vm3961_vm12, %v9906_v13, 0.0  ;;  %vm3970_vm13 = vcmp.eq.s32.totalorder %v7637_v27, %v13249_v52  ;;  %v13257_v55 = vmax.f32 %v13255_v26, %v13256_v47 }
 0x24e   : > { %13252 = vst [vmem:[#allocation125_spill] sm:$0xff] %v9939_v0  ;;  %13253 = vst [vmem:[#allocation277_spill] sm:$0xff] %v9945_v60  ;;  %1997 = vmax.xlane.f32.xlu1 %v1996_v10  ;;  %v4495_v28 = vadd.f32 %v13258_v32, %v4224_v36  ;;  %vm3969_vm14 = vcmp.eq.s32.totalorder %v7634_v44, %v13249_v52  ;;  %v9970_v16 = vadd.f32 %v9848_v34, %v7716_v17  ;;  %v13260_v10 = vld [vmem:[#allocation128_spill] sm:$0xff]  ;;  %v9988_v32 = vpop.f32.mrb[104].mxu0 }
 0x24f   : > { %v9963_v1 = vmax.f32 %v13257_v55, %v9892_v4  ;;  %v9973_v56 = vsel %vm3970_vm13, %v9928_v8, 0.0  ;;  %v4225_v19 = vsel %vm3969_vm14, %v9931_v53, 0.0  ;;  %vm3946_vm15 = vcmp.eq.s32.totalorder %v7637_v27, %v8090_v43  ;;  %v9996_v47 = vpop.f32.mrb[105].mxu0 }
 0x250   : > { %13259 = vst [vmem:[#allocation156_spill] sm:$0xff] %v9970_v16  ;;  %v4469_v55 = vadd.f32 %v9827_v6, %v9841_v46  ;;  %vm3976_vm0 = vcmp.eq.s32.totalorder %v7631_v57, %v13260_v10  ;;  %v9984_v36 = vadd.f32 %v9866_v59, %v13105_v20  ;;  %v4202_v34 = vsel %vm3946_vm15, %v9831_v41, 0.0  ;;  %v9994_v46 = vpop.f32.mrb[104].mxu1 }
 0x251   : > { %v2004_v26 = vmax.f32 %v2003_v40, %v9857_v62  ;;  %vm3947_vm1 = vcmp.eq.s32.totalorder %v13112_v21, %v8090_v43  ;;  %vm3954_vm2 = vcmp.eq.s32.totalorder %v7637_v27, %v13234_v25  ;;  %v4478_v6 = vadd.f32 %v4477_v39, %v4209_v37  ;;  %v10002_v9 = vpop.f32.mrb[105].mxu1  ;;  %v10004_v43 = vpop.f32.mrb[106].mxu0 }
 0x252   : > { %13261 = vst [vmem:[#allocation160_spill] sm:$0xff] %v9984_v36  ;;  %v4470_v4 = vadd.f32 %v4469_v55, %v4202_v34  ;;  %v4232_v59 = vsel %vm3976_vm0, %v9970_v16, 0.0  ;;  %v4203_v13 = vsel %vm3947_vm1, %v9837_v14, 0.0  ;;  %v4210_v41 = vsel %vm3954_vm2, %v9857_v62, 0.0  ;;  %v10010_v54 = vpop.f32.mrb[106].mxu1  ;;  %v10012_v49 = vpop.f32.mrb[107].mxu0 }
 0x253   : > { %v2005_v40 = vmax.f32 %v2004_v26, %v9888_v31  ;;  %v2013_v34 = vmax.f32 %v2012_v38, %v9939_v0  ;;  %v4479_v39 = vadd.f32 %v4478_v6, %v4210_v41  ;;  %v10008_v37 = vadd.f32 %v1578_v33, %v7716_v17  ;;  %v13267_v14 = vld [vmem:[#allocation137_spill] sm:$0xff] }
 0x254   : > { %v4471_v55 = vadd.f32 %v4470_v4, %v4203_v13  ;;  %v10016_v26 = vadd.f32 %v9846_v7, %v13123_v29  ;;  %v10020_v62 = vadd.f32 %v9864_v11, %v13117_v15  ;;  %vm3977_vm3 = vcmp.eq.s32.totalorder %v7634_v44, %v13260_v10  ;;  %v10026_v4 = vpop.f32.mrb[107].mxu1  ;;  %v13266_v7 = vld [vmem:[#allocation177_spill] sm:$0xff] }
 0x255   : > { %13262 = vst [vmem:[#allocation175_spill] sm:$0xff] %v10008_v37  ;;  %2006 = vmax.xlane.f32.xlu0 %v2005_v40  ;;  %vm3955_vm4 = vcmp.eq.s32.totalorder %v13112_v21, %v13234_v25  ;;  %v13265_v38 = vmax.f32 %v8689_v51, %v8638_v5  ;;  %v4504_v33 = vadd.f32 %v13266_v7, %v4232_v59  ;;  %v4233_v13 = vsel %vm3977_vm3, %v9984_v36, 0.0 }
 0x256   : > { %13263 = vst [vmem:[#allocation128_spill] sm:$0xff] %v10016_v26  ;;  %13264 = vst [vmem:[#allocation278_spill] sm:$0xff] %v10020_v62  ;;  %4472 = vadd.xlane.f32.xlu1 %v4471_v55  ;;  %v4211_v11 = vsel %vm3955_vm4, %v9888_v31, 0.0  ;;  %vm3984_vm5 = vcmp.eq.s32.totalorder %v7631_v57, %v13267_v14  ;;  %v10039_v25 = vadd.f32 %v9909_v63, %v13117_v15 }
 0x257   : > { %v2029_v41 = vmax.f32 %v13265_v38, %v9970_v16  ;;  %v4480_v6 = vadd.f32 %v4479_v39, %v4211_v11  ;;  %v10043_v40 = vadd.f32 %v9911_v23, %v13105_v20  ;;  %v2021_v51 = vmax.f32 %v9963_v1, %v9931_v53  ;;  %v10062_v1 = vpop.f32.mrb[108].mxu0 }
 0x258   : > { %13268 = vst [vmem:[#allocation177_spill] sm:$0xff] %v10039_v25  ;;  %vm3978_vm6 = vcmp.eq.s32.totalorder %v7637_v27, %v13260_v10  ;;  %v2014_v59 = vmax.f32 %v2013_v34, %v9945_v60  ;;  %v4240_v55 = vsel %vm3984_vm5, %v10008_v37, 0.0  ;;  %v4496_v39 = vadd.f32 %v4495_v28, %v4225_v19  ;;  %v10071_v28 = vpop.f32.mrb[108].mxu1  ;;  %v13273_v19 = vld [vmem:[#allocation167_spill] sm:$0xff] }
 0x259   : > { %13269 = vst [vmem:[#allocation137_spill] sm:$0xff] %v10043_v40  ;;  %v10052_v38 = vsel %vm3978_vm6, %v10020_v62, 0.0  ;;  %v10056_v63 = vadd.f32 %v9874_v12, %v13123_v29  ;;  %4481 = vadd.xlane.f32.xlu0 %v4480_v6  ;;  %v10060_v23 = vadd.f32 %v9922_v61, %v7716_v17  ;;  %v2030_v7 = vmax.f32 %v2029_v41, %v9984_v36  ;;  %v10073_v12 = vpop.f32.mrb[109].mxu0  ;;  %v13272_v61 = vld [vmem:[#allocation170_spill] sm:$0xff]  ;;  %v13275_v41 = vld [vmem:[#allocation181_spill] sm:$0xff]  ;;  %v10086_v53 = vpop.f32.mrb[109].mxu1 }
 0x25a   : > { %v10065_v34 = vadd.f32 %v4504_v33, %v4233_v13  ;;  %2015 = vmax.xlane.f32.xlu1 %v2014_v59  ;;  %vm3986_vm7 = vcmp.eq.s32.totalorder %v7637_v27, %v13267_v14  ;;  %vm3985_vm8 = vcmp.eq.s32.totalorder %v7634_v44, %v13267_v14  ;;  %v13274_v11 = vmax.f32 %v13272_v61, %v13273_v19  ;;  %v10088_v31 = vpop.f32.mrb[110].mxu0  ;;  %v13277_v36 = vld [vmem:[#allocation140_spill] sm:$0xff] }
 0x25b   : > { %13270 = vst [vmem:[#allocation279_spill] sm:$0xff] %v10056_v63  ;;  %13271 = vst [vmem:[#allocation280_spill] sm:$0xff] %v10060_v23  ;;  %v4513_v33 = vadd.f32 %v13275_v41, %v4240_v55  ;;  %v10083_v13 = vsel %vm3986_vm7, %v10039_v25, 0.0  ;;  %v4241_v59 = vsel %vm3985_vm8, %v10043_v40, 0.0  ;;  %vm3992_vm9 = vcmp.eq.s32.totalorder %v7631_v57, %v13277_v36  ;;  %v10099_v41 = vpop.f32.mrb[111].mxu0 }
 0x25c   : > { %v10079_v6 = vmax.f32 %v13274_v11, %v10008_v37  ;;  %13276 = vst [vmem:[#allocation170_spill] sm:$0xff] %v10086_v53  ;;  %vm3962_vm10 = vcmp.eq.s32.totalorder %v7637_v27, %v13247_v24  ;;  %v4487_v61 = vadd.f32 %v9951_v3, %v9955_v42  ;;  %v2022_v55 = vmax.f32 %v2021_v51, %v9928_v8  ;;  %v10097_v11 = vpop.f32.mrb[110].mxu1 }
 0x25d   : > { %v4248_v37 = vsel %vm3992_vm9, %v10060_v23, 0.0  ;;  %v10104_v19 = vadd.f32 %v9935_v22, %v13105_v20  ;;  %vm3963_vm11 = vcmp.eq.s32.totalorder %v13112_v21, %v13247_v24  ;;  %v4218_v16 = vsel %vm3962_vm10, %v9939_v0, 0.0  ;;  %v10109_v5 = vpop.f32.mrb[111].mxu1  ;;  %v13281_v22 = vld [vmem:[#allocation173_spill] sm:$0xff] }
 0x25e   : > { %v4488_v3 = vadd.f32 %v4487_v61, %v4218_v16  ;;  %v2023_v42 = vmax.f32 %v2022_v55, %v10016_v26  ;;  %v4497_v51 = vadd.f32 %v4496_v39, %v9973_v56  ;;  %v10115_v8 = vadd.f32 %v9988_v32, %v7716_v17  ;;  %v13284_v61 = vld [vmem:[#allocation190_spill] sm:$0xff]  ;;  %v13285_v55 = vld [vmem:[#allocation141_spill] sm:$0xff] }
 0x25f   : > { %13278 = vst [vmem:[#allocation181_spill] sm:$0xff] %v10104_v19  ;;  %v13282_v50 = vmax.f32 %v13280_v58, %v13281_v22  ;;  %v10123_v24 = vadd.f32 %v9933_v2, %v13117_v15  ;;  %vm3993_vm12 = vcmp.eq.s32.totalorder %v7634_v44, %v13277_v36  ;;  %v4219_v16 = vsel %vm3963_vm11, %v9945_v60, 0.0  ;;  %v13292_v60 = vld [vmem:[#allocation194_spill] sm:$0xff] }
 0x260   : > { %13279 = vst [vmem:[#allocation140_spill] sm:$0xff] %v10115_v8  ;;  %v4522_v56 = vadd.f32 %v13284_v61, %v4248_v37  ;;  %v4489_v39 = vadd.f32 %v4488_v3, %v4219_v16  ;;  %2024 = vmax.xlane.f32.xlu0 %v2023_v42  ;;  %v2031_v32 = vmax.f32 %v2030_v7, %v10020_v62 }
 0x261   : > { %v2047_v53 = vmax.f32 %v13282_v50, %v10060_v23  ;;  %13283 = vst [vmem:[#allocation178_spill] sm:$0xff] %v10123_v24  ;;  %vm3971_vm13 = vcmp.eq.s32.totalorder %v13112_v21, %v13249_v52  ;;  %v2039_v58 = vmax.f32 %v10079_v6, %v10043_v40  ;;  %v4249_v50 = vsel %vm3993_vm12, %v10104_v19, 0.0  ;;  %v10138_v23 = vpop.f32.mrb[112].mxu0  ;;  %v10147_v6 = vpop.f32.mrb[112].mxu1 }
 0x262   : > { %v4227_v2 = vsel %vm3971_vm13, %v10016_v26, 0.0  ;;  %vm4000_vm14 = vcmp.eq.s32.totalorder %v7631_v57, %v13285_v55  ;;  %v10142_v37 = vadd.f32 %v9920_v18, %v13123_v29  ;;  %vm3994_vm15 = vcmp.eq.s32.totalorder %v7637_v27, %v13277_v36  ;;  %4490 = vadd.xlane.f32.xlu1 %v4489_v39  ;;  %v10149_v3 = vpop.f32.mrb[113].mxu0  ;;  %v10162_v39 = vpop.f32.mrb[113].mxu1  ;;  %v13290_v26 = vld [vmem:[#allocation179_spill] sm:$0xff] }
 0x263   : > { %v4498_v52 = vadd.f32 %v4497_v51, %v4227_v2  ;;  %v4256_v7 = vsel %vm4000_vm14, %v10115_v8, 0.0  ;;  %v4514_v42 = vadd.f32 %v4513_v33, %v4241_v59  ;;  %v10152_v16 = vsel %vm3994_vm15, %v10123_v24, 0.0  ;;  %v10164_v51 = vpop.f32.mrb[114].mxu0  ;;  %v13289_v59 = vld [vmem:[#allocation185_spill] sm:$0xff]  ;;  %v10176_v62 = vpop.f32.mrb[114].mxu1 }
 0x264   : > { %13286 = vst [vmem:[#allocation190_spill] sm:$0xff] %v10142_v37  ;;  %v10156_v61 = vadd.f32 %v9948_v45, %v13123_v29  ;;  %v10160_v18 = vadd.f32 %v10004_v43, %v7716_v17  ;;  %v2048_v2 = vmax.f32 %v2047_v53, %v10104_v19  ;;  %v10167_v40 = vadd.f32 %v4522_v56, %v4249_v50  ;;  %v10178_v43 = vpop.f32.mrb[115].mxu0 }
 0x265   : > { %v2032_v33 = vmax.f32 %v2031_v32, %v10056_v63  ;;  %4499 = vadd.xlane.f32.xlu0 %v4498_v52  ;;  %v13291_v45 = vmax.f32 %v13289_v59, %v13290_v26  ;;  %v4531_v0 = vadd.f32 %v13292_v60, %v4256_v7  ;;  %v10183_v53 = vadd.f32 %v9994_v46, %v13117_v15  ;;  %v10189_v32 = vpop.f32.mrb[115].mxu1  ;;  %v13295_v52 = vld [vmem:[#allocation157_spill] sm:$0xff] }
 0x266   : > { %13287 = vst [vmem:[#allocation141_spill] sm:$0xff] %v10156_v61  ;;  %13288 = vst [vmem:[#allocation281_spill] sm:$0xff] %v10160_v18  ;;  %vm3979_vm0 = vcmp.eq.s32.totalorder %v13112_v21, %v13260_v10  ;;  %v4506_v56 = vadd.f32 %v10065_v34, %v10052_v38  ;;  %v10193_v50 = vadd.f32 %v9996_v47, %v13105_v20 }
 0x267   : > { %v10174_v22 = vmax.f32 %v13291_v45, %v10115_v8  ;;  %13293 = vst [vmem:[#allocation185_spill] sm:$0xff] %v10183_v53  ;;  %2033 = vmax.xlane.f32.xlu1 %v2032_v33  ;;  %vm4008_vm1 = vcmp.eq.s32.totalorder %v7631_v57, %v13295_v52  ;;  %v4235_v60 = vsel %vm3979_vm0, %v10056_v63, 0.0  ;;  %v2040_v46 = vmax.f32 %v2039_v58, %v10039_v25  ;;  %v13300_v45 = vld [vmem:[#allocation186_spill] sm:$0xff] }
 0x268   : > { %13294 = vst [vmem:[#allocation194_spill] sm:$0xff] %v10193_v50  ;;  %vm4002_vm2 = vcmp.eq.s32.totalorder %v7637_v27, %v13285_v55  ;;  %v4264_v10 = vsel %vm4008_vm1, %v10160_v18, 0.0  ;;  %v10204_v38 = vadd.f32 %v10012_v49, %v13105_v20  ;;  %v4507_v34 = vadd.f32 %v4506_v56, %v4235_v60  ;;  %v13299_v49 = vld [vmem:[#allocation195_spill] sm:$0xff] }
 0x269   : > { %v2041_v47 = vmax.f32 %v2040_v46, %v10142_v37  ;;  %v2049_v7 = vmax.f32 %v2048_v2, %v10123_v24  ;;  %v4515_v33 = vadd.f32 %v4514_v42, %v10083_v13  ;;  %v10211_v59 = vadd.f32 %v10062_v1, %v7716_v17  ;;  %v10227_v13 = vpop.f32.mrb[116].mxu0  ;;  %v13303_v42 = vld [vmem:[#allocation207_spill] sm:$0xff] }
 0x26a   : > { %13296 = vst [vmem:[#allocation157_spill] sm:$0xff] %v10204_v38  ;;  %vm4001_vm3 = vcmp.eq.s32.totalorder %v7634_v44, %v13285_v55  ;;  %v10217_v58 = vadd.f32 %v10002_v9, %v13123_v29  ;;  %v13301_v56 = vmax.f32 %v13299_v49, %v13300_v45  ;;  %v10225_v2 = vadd.f32 %v10010_v54, %v13117_v15  ;;  %v10235_v9 = vpop.f32.mrb[116].mxu1  ;;  %v10237_v49 = vpop.f32.mrb[117].mxu0 }
 0x26b   : > { %13297 = vst [vmem:[#allocation282_spill] sm:$0xff] %v10211_v59  ;;  %v4257_v1 = vsel %vm4001_vm3, %v10193_v50, 0.0  ;;  %v4540_v46 = vadd.f32 %v13303_v42, %v4264_v10  ;;  %vm4009_vm4 = vcmp.eq.s32.totalorder %v7634_v44, %v13295_v52  ;;  %4508 = vadd.xlane.f32.xlu1 %v4507_v34  ;;  %2042 = vmax.xlane.f32.xlu0 %v2041_v47  ;;  %v4258_v54 = vsel %vm4002_vm2, %v10183_v53, 0.0  ;;  %v10247_v34 = vpop.f32.mrb[117].mxu1  ;;  %v10249_v47 = vpop.f32.mrb[118].mxu0 }
 0x26c   : > { %13298 = vst [vmem:[#allocation283_spill] sm:$0xff] %v10217_v58  ;;  %v2065_v60 = vmax.f32 %v13301_v56, %v10160_v18  ;;  %13302 = vst [vmem:[#allocation195_spill] sm:$0xff] %v10225_v2  ;;  %vm3987_vm5 = vcmp.eq.s32.totalorder %v13112_v21, %v13267_v14  ;;  %v4265_v56 = vsel %vm4009_vm4, %v10204_v38, 0.0  ;;  %vm4016_vm6 = vcmp.eq.s32.totalorder %v7631_v57, %v8646_v48  ;;  %v10255_v25 = vpop.f32.mrb[118].mxu1  ;;  %v10257_v18 = vpop.f32.mrb[119].mxu0 }
 0x26d   : > { %v4243_v10 = vsel %vm3987_vm5, %v10142_v37, 0.0  ;;  %v2057_v14 = vmax.f32 %v10174_v22, %v10193_v50  ;;  %v2050_v42 = vmax.f32 %v2049_v7, %v10156_v61  ;;  %v4272_v26 = vsel %vm4016_vm6, %v10211_v59, 0.0  ;;  %v10266_v22 = vpop.f32.mrb[119].mxu1 }
 0x26e   : > { %v4516_v8 = vadd.f32 %v4515_v33, %v4243_v10  ;;  %v4532_v37 = vadd.f32 %v4531_v0, %v4257_v1  ;;  %vm4010_vm7 = vcmp.eq.s32.totalorder %v7637_v27, %v13295_v52  ;;  %v2066_v45 = vmax.f32 %v2065_v60, %v10204_v38  ;;  %v13308_v1 = vld [vmem:[#allocation213_spill] sm:$0xff] }
 0x26f   : > { %v10264_v24 = vadd.f32 %v10088_v31, %v7716_v17  ;;  %v10269_v7 = vsel %vm4010_vm7, %v10225_v2, 0.0  ;;  %v10271_v33 = vadd.f32 %v4540_v46, %v4265_v56  ;;  %v10275_v10 = vadd.f32 %v10026_v4, %v13123_v29  ;;  %2051 = vmax.xlane.f32.xlu1 %v2050_v42  ;;  %v13310_v46 = vld [vmem:[#allocation169_spill] sm:$0xff]  ;;  %v10306_v42 = vpop.f32.mrb[120].mxu0 }
 0x270   : > { %4517 = vadd.xlane.f32.xlu0 %v4516_v8  ;;  %v10279_v0 = vadd.f32 %v10071_v28, %v13117_v15  ;;  %v13307_v31 = vmax.f32 %v8931_v30, %v8926_v35  ;;  %v4549_v50 = vadd.f32 %v13308_v1, %v4272_v26  ;;  %vm4018_vm8 = vcmp.eq.s32.totalorder %v7637_v27, %v8646_v48  ;;  %v13316_v35 = vld [vmem:[#allocation215_spill] sm:$0xff] }
 0x271   : > { %13304 = vst [vmem:[#allocation207_spill] sm:$0xff] %v10264_v24  ;;  %13305 = vst [vmem:[#allocation284_spill] sm:$0xff] %v10275_v10  ;;  %v10290_v4 = vadd.f32 %v10073_v12, %v13105_v20  ;;  %vm4024_vm9 = vcmp.eq.s32.totalorder %v7631_v57, %v13310_v46  ;;  %vm3995_vm10 = vcmp.eq.s32.totalorder %v13112_v21, %v13277_v36 }
 0x272   : > { %13306 = vst [vmem:[#allocation285_spill] sm:$0xff] %v10279_v0  ;;  %v2074_v60 = vmax.f32 %v13307_v31, %v10211_v59  ;;  %v4524_v8 = vadd.f32 %v10167_v40, %v10152_v16  ;;  %v2058_v30 = vmax.f32 %v2057_v14, %v10183_v53  ;;  %v4280_v26 = vsel %vm4024_vm9, %v10264_v24, 0.0  ;;  %v10313_v16 = vpop.f32.mrb[120].mxu1  ;;  %v10315_v14 = vpop.f32.mrb[121].mxu0 }
 0x273   : > { %13309 = vst [vmem:[#allocation213_spill] sm:$0xff] %v10290_v4  ;;  %v10302_v28 = vadd.f32 %v10099_v41, %v13105_v20  ;;  %v4251_v12 = vsel %vm3995_vm10, %v10156_v61, 0.0  ;;  %v2067_v56 = vmax.f32 %v2066_v45, %v10225_v2  ;;  %v4533_v1 = vadd.f32 %v4532_v37, %v4258_v54  ;;  %v13313_v45 = vld [vmem:[#allocation208_spill] sm:$0xff] }
 0x274   : > { %v4525_v31 = vadd.f32 %v4524_v8, %v4251_v12  ;;  %v2059_v36 = vmax.f32 %v2058_v30, %v10217_v58  ;;  %v10311_v40 = vadd.f32 %v10138_v23, %v7716_v17  ;;  %v4274_v41 = vsel %vm4018_vm8, %v10279_v0, 0.0  ;;  %v13314_v8 = vld [vmem:[#allocation204_spill] sm:$0xff]  ;;  %v10331_v30 = vpop.f32.mrb[121].mxu1  ;;  %v10333_v12 = vpop.f32.mrb[122].mxu0 }
 0x275   : > { %13311 = vst [vmem:[#allocation169_spill] sm:$0xff] %v10302_v28  ;;  %vm4017_vm11 = vcmp.eq.s32.totalorder %v7634_v44, %v8646_v48  ;;  %v13315_v37 = vmax.f32 %v13313_v45, %v13314_v8  ;;  %v10329_v23 = vadd.f32 %v10097_v11, %v13117_v15  ;;  %v4558_v53 = vadd.f32 %v13316_v35, %v4280_v26  ;;  %v10341_v45 = vpop.f32.mrb[122].mxu1  ;;  %v10343_v11 = vpop.f32.mrb[123].mxu0  ;;  %v13319_v26 = vld [vmem:[#allocation171_spill] sm:$0xff] }
 0x276   : > { %13312 = vst [vmem:[#allocation286_spill] sm:$0xff] %v10311_v40  ;;  %v4273_v59 = vsel %vm4017_vm11, %v10290_v4, 0.0  ;;  %vm4025_vm12 = vcmp.eq.s32.totalorder %v7634_v44, %v13310_v46  ;;  %4526 = vadd.xlane.f32.xlu1 %v4525_v31  ;;  %2060 = vmax.xlane.f32.xlu0 %v2059_v36  ;;  %vm4003_vm13 = vcmp.eq.s32.totalorder %v13112_v21, %v13285_v55  ;;  %v10353_v31 = vpop.f32.mrb[123].mxu1 }
 0x277   : > { %v2083_v54 = vmax.f32 %v13315_v37, %v10264_v24  ;;  %v13317_v37 = vld [vmem:[#allocation170_spill] sm:$0xff]  ;;  %v4281_v8 = vsel %vm4025_vm12, %v10302_v28, 0.0  ;;  %v4259_v35 = vsel %vm4003_vm13, %v10217_v58, 0.0  ;;  %vm4032_vm14 = vcmp.eq.s32.totalorder %v7631_v57, %v13319_v26 }
 0x278   : > { %v10347_v24 = vadd.f32 %v13317_v37, %v13123_v29  ;;  %v2075_v36 = vmax.f32 %v2074_v60, %v10290_v4  ;;  %v2068_v55 = vmax.f32 %v2067_v56, %v10275_v10  ;;  %v4534_v2 = vadd.f32 %v4533_v1, %v4259_v35  ;;  %v13324_v4 = vld [vmem:[#allocation219_spill] sm:$0xff] }
 0x279   : > { %v4288_v38 = vsel %vm4032_vm14, %v10311_v40, 0.0  ;;  %v4550_v61 = vadd.f32 %v4549_v50, %v4273_v59  ;;  %vm4026_vm15 = vcmp.eq.s32.totalorder %v7637_v27, %v13310_v46  ;;  %v10362_v37 = vadd.f32 %v10147_v6, %v13117_v15  ;;  %v13321_v59 = vld [vmem:[#allocation209_spill] sm:$0xff] }
 0x27a   : > { %13318 = vst [vmem:[#allocation208_spill] sm:$0xff] %v10347_v24  ;;  %v10366_v58 = vadd.f32 %v10164_v51, %v7716_v17  ;;  %v10369_v19 = vsel %vm4026_vm15, %v10329_v23, 0.0  ;;  %v2084_v60 = vmax.f32 %v2083_v54, %v10302_v28  ;;  %v4559_v56 = vadd.f32 %v4558_v53, %v4281_v8  ;;  %2069 = vmax.xlane.f32.xlu1 %v2068_v55  ;;  %v13322_v6 = vld [vmem:[#allocation205_spill] sm:$0xff]  ;;  %v10387_v53 = vpop.f32.mrb[124].mxu0 }
 0x27b   : > { %v10374_v50 = vadd.f32 %v10109_v5, %v13123_v29  ;;  %4535 = vadd.xlane.f32.xlu0 %v4534_v2  ;;  %v13323_v1 = vmax.f32 %v13321_v59, %v13322_v6  ;;  %v4567_v51 = vadd.f32 %v13324_v4, %v4288_v38  ;;  %vm4034_vm0 = vcmp.eq.s32.totalorder %v7637_v27, %v13319_v26  ;;  %v13326_v5 = vld [vmem:[#allocation180_spill] sm:$0xff]  ;;  %v10396_v4 = vpop.f32.mrb[124].mxu1  ;;  %v10398_v8 = vpop.f32.mrb[125].mxu0 }
 0x27c   : > { %13320 = vst [vmem:[#allocation215_spill] sm:$0xff] %v10366_v58  ;;  %v10385_v54 = vadd.f32 %v10149_v3, %v13105_v20  ;;  %vm4040_vm1 = vcmp.eq.s32.totalorder %v7631_v57, %v13326_v5  ;;  %vm4011_vm2 = vcmp.eq.s32.totalorder %v13112_v21, %v13295_v52  ;;  %v4542_v2 = vadd.f32 %v10271_v33, %v10269_v7  ;;  %v10407_v52 = vpop.f32.mrb[125].mxu1 }
 0x27d   : > { %v2092_v35 = vmax.f32 %v13323_v1, %v10311_v40  ;;  %v2076_v38 = vmax.f32 %v2075_v36, %v10279_v0  ;;  %v4290_v3 = vsel %vm4034_vm0, %v10362_v37, 0.0  ;;  %v4296_v55 = vsel %vm4040_vm1, %v10366_v58, 0.0  ;;  %13327 = vst [vmem:[#allocation171_spill] sm:$0xff] %v10407_v52  ;;  %v10409_v40 = vpop.f32.mrb[126].mxu0  ;;  %v10413_v0 = vpop.f32.mrb[126].mxu1 }
 0x27e   : > { %13325 = vst [vmem:[#allocation170_spill] sm:$0xff] %v10385_v54  ;;  %v10404_v59 = vadd.f32 %v10178_v43, %v13105_v20  ;;  %v4267_v1 = vsel %vm4011_vm2, %v10275_v10, 0.0  ;;  %v2085_v36 = vmax.f32 %v2084_v60, %v10329_v23  ;;  %v4551_v6 = vadd.f32 %v4550_v61, %v4274_v41  ;;  %v10415_v28 = vpop.f32.mrb[127].mxu0  ;;  %v13328_v43 = vld [vmem:[#allocation214_spill] sm:$0xff]  ;;  %v10429_v61 = vpop.f32.mrb[127].mxu1  ;;  %v13331_v60 = vld [vmem:[#allocation233_spill] sm:$0xff] }
 0x27f   : > { %v4543_v7 = vadd.f32 %v4542_v2, %v4267_v1  ;;  %v2077_v33 = vmax.f32 %v2076_v38, %v10347_v24  ;;  %vm4033_vm3 = vcmp.eq.s32.totalorder %v7634_v44, %v13319_v26  ;;  %v13329_v10 = vld [vmem:[#allocation210_spill] sm:$0xff]  ;;  %v10425_v2 = vadd.f32 %v10176_v62, %v13117_v15 }
 0x280   : > { %v13330_v63 = vmax.f32 %v13328_v43, %v13329_v10  ;;  %vm4041_vm4 = vcmp.eq.s32.totalorder %v7634_v44, %v13326_v5  ;;  %v4289_v41 = vsel %vm4033_vm3, %v10385_v54, 0.0  ;;  %v4576_v38 = vadd.f32 %v13331_v60, %v4296_v55 }
 0x281   : > { %4544 = vadd.xlane.f32.xlu1 %v4543_v7  ;;  %2078 = vmax.xlane.f32.xlu0 %v2077_v33  ;;  %vm4019_vm5 = vcmp.eq.s32.totalorder %v13112_v21, %v8646_v48  ;;  %v2093_v62 = vmax.f32 %v2092_v35, %v10385_v54  ;;  %v10442_v1 = vadd.f32 %v10162_v39, %v13123_v29  ;;  %v4297_v43 = vsel %vm4041_vm4, %v10404_v59, 0.0  ;;  %v13333_v33 = vld [vmem:[#allocation187_spill] sm:$0xff] }
 0x282   : > { %v2101_v52 = vmax.f32 %v13330_v63, %v10366_v58  ;;  %v10437_v63 = vadd.f32 %v10227_v13, %v7716_v17  ;;  %v4275_v58 = vsel %vm4019_vm5, %v10347_v24, 0.0  ;;  %vm4042_vm6 = vcmp.eq.s32.totalorder %v7637_v27, %v13326_v5  ;;  %v13338_v24 = vld [vmem:[#allocation196_spill] sm:$0xff] }
 0x283   : > { %v2086_v55 = vmax.f32 %v2085_v36, %v10374_v50  ;;  %v4552_v48 = vadd.f32 %v4551_v6, %v4275_v58  ;;  %v10451_v13 = vadd.f32 %v10249_v47, %v7716_v17  ;;  %v4568_v7 = vadd.f32 %v4567_v51, %v4289_v41  ;;  %v13335_v6 = vld [vmem:[#allocation229_spill] sm:$0xff]  ;;  %v13336_v51 = vld [vmem:[#allocation230_spill] sm:$0xff] }
 0x284   : > { %13332 = vst [vmem:[#allocation209_spill] sm:$0xff] %v10437_v63  ;;  %v4298_v35 = vsel %vm4042_vm6, %v10425_v2, 0.0  ;;  %v10456_v39 = vadd.f32 %v10189_v32, %v13123_v29  ;;  %vm4048_vm7 = vcmp.eq.s32.totalorder %v7631_v57, %v13333_v33  ;;  %v2102_v60 = vmax.f32 %v2101_v52, %v10404_v59 }
 0x285   : > { %v4577_v54 = vadd.f32 %v4576_v38, %v4297_v43  ;;  %2087 = vmax.xlane.f32.xlu1 %v2086_v55  ;;  %4553 = vadd.xlane.f32.xlu0 %v4552_v48  ;;  %v4304_v58 = vsel %vm4048_vm7, %v10437_v63, 0.0  ;;  %v10464_v47 = vadd.f32 %v10235_v9, %v13117_v15  ;;  %v13337_v36 = vmax.f32 %v13335_v6, %v13336_v51  ;;  %v13339_v55 = vld [vmem:[#allocation240_spill] sm:$0xff] }
 0x286   : > { %v10472_v41 = vadd.f32 %v10237_v49, %v13105_v20  ;;  %vm4056_vm8 = vcmp.eq.s32.totalorder %v7631_v57, %v13338_v24  ;;  %v10478_v52 = vadd.f32 %v10257_v18, %v13105_v20  ;;  %vm4027_vm9 = vcmp.eq.s32.totalorder %v13112_v21, %v13310_v46 }
 0x287   : > { %13334 = vst [vmem:[#allocation219_spill] sm:$0xff] %v10464_v47  ;;  %v2110_v32 = vmax.f32 %v13337_v36, %v10437_v63  ;;  %v4312_v38 = vsel %vm4056_vm8, %v10451_v13, 0.0  ;;  %v4560_v9 = vadd.f32 %v4559_v56, %v10369_v19  ;;  %v2094_v43 = vmax.f32 %v2093_v62, %v10362_v37  ;;  %v13340_v56 = vld [vmem:[#allocation234_spill] sm:$0xff]  ;;  %v13341_v62 = vld [vmem:[#allocation231_spill] sm:$0xff] }
 0x288   : > { %v4585_v48 = vadd.f32 %v13339_v55, %v4304_v58  ;;  %vm4050_vm10 = vcmp.eq.s32.totalorder %v7637_v27, %v13333_v33  ;;  %vm4049_vm11 = vcmp.eq.s32.totalorder %v7634_v44, %v13333_v33  ;;  %v4283_v18 = vsel %vm4027_vm9, %v10374_v50, 0.0  ;;  %v13343_v63 = vld [vmem:[#allocation243_spill] sm:$0xff] }
 0x289   : > { %v4561_v49 = vadd.f32 %v4560_v9, %v4283_v18  ;;  %v2095_v6 = vmax.f32 %v2094_v43, %v10442_v1  ;;  %v2103_v36 = vmax.f32 %v2102_v60, %v10425_v2  ;;  %v4569_v46 = vadd.f32 %v4568_v7, %v4290_v3 }
 0x28a   : > { %v4305_v19 = vsel %vm4049_vm11, %v10472_v41, 0.0  ;;  %v13342_v58 = vmax.f32 %v13340_v56, %v13341_v62  ;;  %v4594_v51 = vadd.f32 %v13343_v63, %v4312_v38  ;;  %vm4057_vm12 = vcmp.eq.s32.totalorder %v7634_v44, %v13338_v24  ;;  %v13348_v56 = vld [vmem:[#allocation201_spill] sm:$0xff] }
 0x28b   : > { %v10503_v9 = vadd.f32 %v10255_v25, %v13117_v15  ;;  %v4313_v43 = vsel %vm4057_vm12, %v10478_v52, 0.0  ;;  %4562 = vadd.xlane.f32.xlu1 %v4561_v49  ;;  %2096 = vmax.xlane.f32.xlu0 %v2095_v6  ;;  %vm4035_vm13 = vcmp.eq.s32.totalorder %v13112_v21, %v13319_v26  ;;  %v10510_v3 = vadd.f32 %v10306_v42, %v7716_v17 }
 0x28c   : > { %v2119_v55 = vmax.f32 %v13342_v58, %v10451_v13  ;;  %v4306_v63 = vsel %vm4050_vm10, %v10464_v47, 0.0  ;;  %v2111_v7 = vmax.f32 %v2110_v32, %v10472_v41  ;;  %v10519_v25 = vadd.f32 %v10247_v34, %v13123_v29  ;;  %v13350_v58 = vld [vmem:[#allocation203_spill] sm:$0xff] }
 0x28d   : > { %13344 = vst [vmem:[#allocation180_spill] sm:$0xff] %v10510_v3  ;;  %v4291_v60 = vsel %vm4035_vm13, %v10442_v1, 0.0  ;;  %v4586_v38 = vadd.f32 %v4585_v48, %v4305_v19  ;;  %vm4058_vm14 = vcmp.eq.s32.totalorder %v7637_v27, %v13338_v24  ;;  %v2104_v42 = vmax.f32 %v2103_v36, %v10456_v39  ;;  %v13345_v48 = vld [vmem:[#allocation237_spill] sm:$0xff]  ;;  %v13346_v19 = vld [vmem:[#allocation232_spill] sm:$0xff] }
 0x28e   : > { %v4570_v26 = vadd.f32 %v4569_v46, %v4291_v60  ;;  %v2120_v18 = vmax.f32 %v2119_v55, %v10478_v52  ;;  %v4595_v49 = vadd.f32 %v4594_v51, %v4313_v43  ;;  %v10528_v6 = vadd.f32 %v10266_v22, %v13123_v29 }
 0x28f   : > { %v10532_v34 = vadd.f32 %v10333_v12, %v7716_v17  ;;  %v4314_v32 = vsel %vm4058_vm14, %v10503_v9, 0.0  ;;  %2105 = vmax.xlane.f32.xlu1 %v2104_v42  ;;  %v13347_v36 = vmax.f32 %v13345_v48, %v13346_v19  ;;  %vm4064_vm15 = vcmp.eq.s32.totalorder %v7631_v57, %v13348_v56 }
 0x290   : > { %4571 = vadd.xlane.f32.xlu0 %v4570_v26  ;;  %v10543_v22 = vadd.f32 %v10313_v16, %v13117_v15  ;;  %v4320_v51 = vsel %vm4064_vm15, %v10510_v3, 0.0  ;;  %vm4066_vm0 = vcmp.eq.s32.totalorder %v7637_v27, %v13348_v56  ;;  %v10550_v12 = vadd.f32 %v10315_v14, %v13105_v20 }
 0x291   : > { %v2128_v46 = vmax.f32 %v13347_v36, %v10510_v3  ;;  %vm4072_vm1 = vcmp.eq.s32.totalorder %v7631_v57, %v13350_v58  ;;  %v10556_v55 = vadd.f32 %v10343_v11, %v13105_v20  ;;  %vm4043_vm2 = vcmp.eq.s32.totalorder %v13112_v21, %v13326_v5 }
 0x292   : > { %13349 = vst [vmem:[#allocation214_spill] sm:$0xff] %v10543_v22  ;;  %v4578_v16 = vadd.f32 %v4577_v54, %v4298_v35  ;;  %v2112_v43 = vmax.f32 %v2111_v7, %v10464_v47  ;;  %vm4065_vm3 = vcmp.eq.s32.totalorder %v7634_v44, %v13348_v56  ;;  %v4328_v60 = vsel %vm4072_vm1, %v10532_v34, 0.0  ;;  %v13352_v54 = vld [vmem:[#allocation245_spill] sm:$0xff]  ;;  %v13361_v47 = vld [vmem:[#allocation218_spill] sm:$0xff] }
 0x293   : > { %v4299_v14 = vsel %vm4043_vm2, %v10456_v39, 0.0  ;;  %v2121_v42 = vmax.f32 %v2120_v18, %v10503_v9  ;;  %v4587_v11 = vadd.f32 %v4586_v38, %v4306_v63  ;;  %v10569_v36 = vadd.f32 %v10387_v53, %v7716_v17  ;;  %v13354_v18 = vld [vmem:[#allocation238_spill] sm:$0xff] }
 0x294   : > { %v4579_v26 = vadd.f32 %v4578_v16, %v4299_v14  ;;  %v2113_v48 = vmax.f32 %v2112_v43, %v10519_v25  ;;  %v4603_v5 = vadd.f32 %v13352_v54, %v4320_v51  ;;  %v4321_v35 = vsel %vm4065_vm3, %v10550_v12, 0.0  ;;  %v13355_v16 = vld [vmem:[#allocation239_spill] sm:$0xff]  ;;  %v13357_v38 = vld [vmem:[#allocation246_spill] sm:$0xff]  ;;  %v13358_v51 = vld [vmem:[#allocation64_spill] sm:$0xff] }
 0x295   : > { %13351 = vst [vmem:[#allocation210_spill] sm:$0xff] %v10569_v36  ;;  %v10575_v7 = vadd.f32 %v10331_v30, %v13123_v29  ;;  %vm4073_vm4 = vcmp.eq.s32.totalorder %v7634_v44, %v13350_v58  ;;  %v13356_v43 = vmax.f32 %v13354_v18, %v13355_v16  ;;  %v4612_v14 = vadd.f32 %v13357_v38, %v4328_v60  ;;  %v13359_v54 = vld [vmem:[#allocation244_spill] sm:$0xff] }
 0x296   : > { %v4329_v53 = vsel %vm4073_vm4, %v10556_v55, 0.0  ;;  %4580 = vadd.xlane.f32.xlu1 %v4579_v26  ;;  %2114 = vmax.xlane.f32.xlu0 %v2113_v48  ;;  %vm4051_vm5 = vcmp.eq.s32.totalorder %v13112_v21, %v13333_v33  ;;  %v13360_v3 = vmax.f32 %v13358_v51, %v13359_v54  ;;  %vm4080_vm6 = vcmp.eq.s32.totalorder %v7631_v57, %v13361_v47 }
 0x297   : > { %13353 = vst [vmem:[#allocation233_spill] sm:$0xff] %v10575_v7  ;;  %v2137_v63 = vmax.f32 %v13356_v43, %v10532_v34  ;;  %v4307_v30 = vsel %vm4051_vm5, %v10519_v25, 0.0  ;;  %v10596_v60 = vadd.f32 %v10398_v8, %v13105_v20  ;;  %v2129_v26 = vmax.f32 %v2128_v46, %v10550_v12 }
 0x298   : > { %v2146_v19 = vmax.f32 %v13360_v3, %v10569_v36  ;;  %v2122_v48 = vmax.f32 %v2121_v42, %v10528_v6  ;;  %v4588_v18 = vadd.f32 %v4587_v11, %v4307_v30  ;;  %v4336_v33 = vsel %vm4080_vm6, %v10569_v36, 0.0  ;;  %v13367_v30 = vld [vmem:[#allocation249_spill] sm:$0xff] }
 0x299   : > { %13362 = vst [vmem:[#allocation187_spill] sm:$0xff] %v10596_v60  ;;  %v4604_v43 = vadd.f32 %v4603_v5, %v4321_v35  ;;  %v10603_v38 = vadd.f32 %v10341_v45, %v13117_v15  ;;  %vm4074_vm7 = vcmp.eq.s32.totalorder %v7637_v27, %v13350_v58  ;;  %v10609_v3 = vadd.f32 %v10409_v40, %v7716_v17  ;;  %v13363_v45 = vld [vmem:[#allocation257_spill] sm:$0xff]  ;;  %v13365_v35 = vld [vmem:[#allocation226_spill] sm:$0xff] }
 0x29a   : > { %v4322_v8 = vsel %vm4066_vm0, %v10543_v22, 0.0  ;;  %v2138_v46 = vmax.f32 %v2137_v63, %v10556_v55  ;;  %v4613_v42 = vadd.f32 %v4612_v14, %v4329_v53  ;;  %2123 = vmax.xlane.f32.xlu1 %v2122_v48  ;;  %4589 = vadd.xlane.f32.xlu0 %v4588_v18  ;;  %vm4081_vm8 = vcmp.eq.s32.totalorder %v7634_v44, %v13361_v47  ;;  %v13366_v53 = vld [vmem:[#allocation255_spill] sm:$0xff] }
 0x29b   : > { %v4621_v11 = vadd.f32 %v13363_v45, %v4336_v33  ;;  %v10621_v5 = vadd.f32 %v10396_v4, %v13117_v15  ;;  %v2147_v17 = vmax.f32 %v2146_v19, %v10596_v60  ;;  %v4337_v40 = vsel %vm4081_vm8, %v10596_v60, 0.0  ;;  %v13370_v45 = vld [vmem:[#allocation258_spill] sm:$0xff] }
 0x29c   : > { %vm4088_vm9 = vcmp.eq.s32.totalorder %v7631_v57, %v13365_v35  ;;  %vm4059_vm10 = vcmp.eq.s32.totalorder %v13112_v21, %v13338_v24  ;;  %v4596_v63 = vadd.f32 %v4595_v49, %v4314_v32  ;;  %v2130_v14 = vmax.f32 %v2129_v26, %v10543_v22  ;;  %v10640_v57 = vpop.xlane.xlu0 %1880  ;;  %v13369_v26 = vld [vmem:[#allocation259_spill] sm:$0xff] }
 0x29d   : > { %13364 = vst [vmem:[#allocation229_spill] sm:$0xff] %v10621_v5  ;;  %v13368_v51 = vmax.f32 %v13366_v53, %v13367_v30  ;;  %v4344_v4 = vsel %vm4088_vm9, %v10609_v3, 0.0  ;;  %v10637_v19 = vadd.f32 %v10415_v28, %v13105_v20  ;;  %v4315_v18 = vsel %vm4059_vm10, %v10528_v6, 0.0  ;;  %v13371_v28 = vld [vmem:[#allocation171_spill] sm:$0xff] }
 0x29e   : > { %v4597_v33 = vadd.f32 %v4596_v63, %v4315_v18  ;;  %v2131_v24 = vmax.f32 %v2130_v14, %v10575_v7  ;;  %v2139_v49 = vmax.f32 %v2138_v46, %v10603_v38  ;;  %v4605_v32 = vadd.f32 %v4604_v43, %v4322_v8 }
 0x29f   : > { %v2155_v48 = vmax.f32 %v13368_v51, %v10609_v3  ;;  %v4629_v53 = vadd.f32 %v13370_v45, %v13369_v26  ;;  %v4330_v51 = vsel %vm4074_vm7, %v10603_v38, 0.0  ;;  %v10652_v20 = vadd.f32 %v10353_v31, %v13123_v29  ;;  %v4356_v45 = vpop.xlane.xlu1 %4355 }
 0x2a0   : > { %v10656_v63 = vadd.f32 %v13371_v28, %v13123_v29  ;;  %4598 = vadd.xlane.f32.xlu1 %v4597_v33  ;;  %2132 = vmax.xlane.f32.xlu0 %v2131_v24  ;;  %vm4067_vm11 = vcmp.eq.s32.totalorder %v13112_v21, %v13348_v56  ;;  %v2148_v43 = vmax.f32 %v2147_v17, %v10621_v5  ;;  %v12689_v31 = vmov 2   ;;  %v1890_v56 = vpop.xlane.xlu0 %1889 }
 0x2a1   : > { %v4622_v8 = vadd.f32 %v4621_v11, %v4337_v40  ;;  %v4630_v46 = vadd.f32 %v4629_v53, %v4344_v4  ;;  %vm4089_vm12 = vcmp.eq.s32.totalorder %v7634_v44, %v13365_v35  ;;  %v4323_v14 = vsel %vm4067_vm11, %v10575_v7, 0.0  ;;  %5790 = vset.pattern.permute.xlu1 %v12689_v31 }
 0x2a2   : > { %13372 = vst [vmem:[#allocation196_spill] sm:$0xff] %v10656_v63  ;;  %v2156_v18 = vmax.f32 %v2155_v48, %v10637_v19  ;;  %v2140_v33 = vmax.f32 %v2139_v49, %v10652_v20  ;;  %v4606_v24 = vadd.f32 %v4605_v32, %v4323_v14  ;;  %v4614_v26 = vadd.f32 %v4613_v42, %v4330_v51 }
 0x2a3   : > { %vm4082_vm13 = vcmp.eq.s32.totalorder %v7637_v27, %v13361_v47  ;;  %v4345_v11 = vsel %vm4089_vm12, %v10637_v19, 0.0  ;;  %v10672_v44 = vadd.f32 %v10413_v0, %v13117_v15  ;;  %vm4075_vm14 = vcmp.eq.s32.totalorder %v13112_v21, %v13350_v58  ;;  %v1899_v53 = vpop.xlane.xlu1 %1898 }
 0x2a4   : > { %2141 = vmax.xlane.f32.xlu1 %v2140_v33  ;;  %4607 = vadd.xlane.f32.xlu0 %v4606_v24  ;;  %v2149_v17 = vmax.f32 %v2148_v43, %v10656_v63  ;;  %v4338_v42 = vsel %vm4082_vm13, %v10621_v5, 0.0  ;;  %v4331_v40 = vsel %vm4075_vm14, %v10652_v20, 0.0  ;;  %v4631_v48 = vadd.f32 %v4630_v46, %v4345_v11  ;;  %v4365_v51 = vpop.xlane.xlu0 %4364  ;;  %v6489_v11 = vld [vmem:[#allocation2] sm:$0xff] }
 0x2a5   : > { %v4615_v4 = vadd.f32 %v4614_v26, %v4331_v40  ;;  %v2157_v49 = vmax.f32 %v2156_v18, %v10672_v44  ;;  %v4623_v32 = vadd.f32 %v4622_v8, %v4338_v42  ;;  %vm4090_vm15 = vcmp.eq.s32.totalorder %v7637_v27, %v13365_v35  ;;  %v10707_v40 = vld [vmem:[#allocation2 + $0x8] sm:$0xff] }
 0x2a6   : > { %v10684_v15 = vadd.f32 %v10429_v61, %v13123_v29  ;;  %vm4083_vm0 = vcmp.eq.s32.totalorder %v13112_v21, %v13361_v47  ;;  %v4346_v0 = vsel %vm4090_vm15, %v10672_v44, 0.0  ;;  %vm4091_vm1 = vcmp.eq.s32.totalorder %v13112_v21, %v13365_v35 }
 0x2a7   : > { %v4339_v58 = vsel %vm4083_vm0, %v10656_v63, 0.0  ;;  %v4632_v8 = vadd.f32 %v4631_v48, %v4346_v0  ;;  %v1908_v27 = vpop.xlane.xlu1 %1907  ;;  %v10701_v42 = vmax.f32 %v6489_v11, %v10640_v57  ;;  %v10710_v48 = vadd.f32 %v10707_v40, %v4365_v51  ;;  %v6492_v0 = vld [vmem:[#allocation2 + $0x10] sm:$0xff] }
 0x2a8   : > { %4616 = vadd.xlane.f32.xlu1 %v4615_v4  ;;  %2150 = vmax.xlane.f32.xlu0 %v2149_v17  ;;  %v2158_v28 = vmax.f32 %v2157_v49, %v10684_v15  ;;  %v4624_v43 = vadd.f32 %v4623_v32, %v4339_v58  ;;  %v4374_v46 = vpop.xlane.xlu0 %4373  ;;  %v4347_v29 = vsel %vm4091_vm1, %v10684_v15, 0.0  ;;  %v10698_v17 = vadd.f32 %v6489_v11, %v4356_v45  ;;  %v6491_v49 = vld [vmem:[#allocation2 + $0x20] sm:$0xff]  ;;  %v6495_v11 = vld [vmem:[#allocation2 + $0x18] sm:$0xff] }
 0x2a9   : > { %v4633_v61 = vadd.f32 %v4632_v8, %v4347_v29  ;;  %13374 = vst [vmem:[#allocation234_spill] sm:$0xff] %v10701_v42  ;;  %13375 = vst [vmem:[#allocation231_spill] sm:$0xff] %v10710_v48  ;;  %v10713_v4 = vmax.f32 %v10707_v40, %v1890_v56  ;;  %v13377_v45 = vmov 0   ;;  %v10723_v58 = vmax.f32 %v6492_v0, %v1899_v53  ;;  %v10736_v53 = vld [vmem:[#allocation2 + $0x40] sm:$0xff] }
 0x2aa   : > { %13373 = vst [vmem:[#allocation240_spill] sm:$0xff] %v10698_v17  ;;  %v10731_v29 = vadd.f32 %v6492_v0, %v4374_v46  ;;  %v10750_v0 = vld [vmem:[#allocation2 + $0x48] sm:$0xff]  ;;  %vm5054_vm4 = vcmask 23552   ;;  %vm5471_vm5 = vcmask 7168  }
 0x2ab   : > { %v4383_v14 = vpop.xlane.xlu1 %4382  ;;  %13376 = vst [vmem:[#allocation243_spill] sm:$0xff] %v10713_v4  ;;  %13379 = vst [vmem:[#allocation201_spill] sm:$0xff] %v10723_v58 }
 0x2ac   : > { %2159 = vmax.xlane.f32.xlu1 %v2158_v28  ;;  %4625 = vadd.xlane.f32.xlu0 %v4624_v43  ;;  %v1917_v47 = vpop.xlane.xlu0 %1916  ;;  %v6493_v28 = vld [vmem:[#allocation2 + $0x30] sm:$0xff]  ;;  %13381 = vst [vmem:[#allocation245_spill] sm:$0xff] %v10731_v29 }
 0x2af   : > { %v1926_v18 = vpop.xlane.xlu1 %1925 }
 0x2b0   : > { %4634 = vadd.xlane.f32.xlu1 %v4633_v61  ;;  %v4392_v33 = vpop.xlane.xlu0 %4391 }
 0x2b1   : > { %v10721_v32 = vadd.f32 %v6491_v49, %v4392_v33 }
 0x2b3   : > { %v10696_v26 = vpop.xlane.xlu1 %4400  ;;  %13378 = vst [vmem:[#allocation237_spill] sm:$0xff] %v10721_v32 }
 0x2b4   : > { %v10694_v24 = vpop.xlane.xlu0 %1934 }
 0x2b7   : > { %v10705_v35 = vpop.xlane.xlu1 %1943 }
 0x2ba   : > { %v4410_v21 = vpop.xlane.xlu0 %4409 }
 0x2bb   : > { %v10729_v43 = vadd.f32 %v6493_v28, %v4410_v21 }
 0x2bd   : > { %13380 = vst [vmem:[#allocation203_spill] sm:$0xff] %v10729_v43 }
 0x2bf   : > { %v10718_v57 = vpop.xlane.xlu0 %1952 }
 0x2c1   : > { %4832 = vperm.xlu1 %5790, %v10698_v17   ;;  %v10725_v51 = vpop.xlane.xlu1 %4418 }
 0x2c2   : > { %2291 = vperm.xlu0 %5789, %v10701_v42  }
 0x2c4   : > { %v4428_v56 = vpop.xlane.xlu0 %4427 }
 0x2c5   : > { %5791 = vset.pattern.permute.xlu1 %v13377_v45  ;;  %v1962_v8 = vpop.xlane.xlu1 %1961  ;;  %v10739_v61 = vadd.f32 %v10736_v53, %v4428_v56 }
 0x2c6   : > { %2296 = vperm.xlu1 %5791, %v10713_v4   ;;  %5792 = vset.pattern.permute.xlu0 %v12689_v31 }
 0x2c7   : > { %4837 = vperm.xlu0 %5792, %v10710_v48   ;;  %13382 = vst [vmem:[#allocation238_spill] sm:$0xff] %v10739_v61 }
 0x2ca   : > { %2301 = vperm.xlu1 %5791, %v10723_v58   ;;  %v10741_v33 = vpop.xlane.xlu0 %1970 }
 0x2cb   : > { %4852 = vperm.xlu0 %5792, %v10721_v32   ;;  %v10743_v32 = vmax.f32 %v6495_v11, %v1908_v27  ;;  %v13386_v27 = vmov 2  }
 0x2cc   : > { %v10745_v21 = vpop.xlane.xlu1 %4436 }
 0x2cd   : > { %13383 = vst [vmem:[#allocation239_spill] sm:$0xff] %v10743_v32 }
 0x2ce   : > { %5793 = vset.pattern.permute.xlu1 %v12689_v31  ;;  %v4446_v46 = vpop.xlane.xlu0 %4445  ;;  %v10753_v31 = vmax.f32 %v10750_v0, %v1962_v8  ;;  %v10768_v8 = vmax.f32 %v6491_v49, %v1917_v47 }
 0x2cf   : > { %4842 = vperm.xlu1 %5793, %v10731_v29   ;;  %4862 = vperm.xlu0 %5792, %v10729_v43   ;;  %v10755_v43 = vadd.f32 %v6495_v11, %v4383_v14  ;;  %v10763_v29 = vld [vmem:[#allocation2 + $0x50] sm:$0xff]  ;;  %v6498_v14 = vld [vmem:[#allocation2 + $0x28] sm:$0xff] }
 0x2d0   : > { %13384 = vst [vmem:[#allocation246_spill] sm:$0xff] %v10753_v31  ;;  %v1980_v56 = vpop.xlane.xlu1 %1979  ;;  %v10766_v17 = vadd.f32 %v10763_v29, %v4446_v46  ;;  %13388 = vst [vmem:[#allocation257_spill] sm:$0xff] %v10768_v8  ;;  %v10776_v11 = vmax.f32 %v6498_v14, %v1926_v18 }
 0x2d1   : > { %13385 = vst [vmem:[#allocation64_spill] sm:$0xff] %v10755_v43 }
 0x2d2   : > { %13387 = vst [vmem:[#allocation218_spill] sm:$0xff] %v10766_v17  ;;  %13389 = vst [vmem:[#allocation226_spill] sm:$0xff] %v10776_v11 }
 0x2d3   : > { %5794 = vset.pattern.permute.xlu1 %v13377_v45  ;;  %4872 = vperm.xlu0 %5792, %v10739_v61  }
 0x2d4   : > { %2306 = vperm.xlu1 %5794, %v10743_v32   ;;  %v10761_v61 = vpop.xlane.xlu0 %1988 }
 0x2d7   : > { %5801 = vset.pattern.permute.xlu0 %v13377_v45  ;;  %v10770_v48 = vpop.xlane.xlu1 %4454 }
 0x2d8   : > { %5795 = vset.pattern.permute.xlu1 %v13386_v27  ;;  %2336 = vperm.xlu0 %5801, %v10753_v31   ;;  %v10789_v31 = vld [vmem:[#allocation2 + $0x60] sm:$0xff] }
 0x2d9   : > { %4847 = vperm.xlu1 %5795, %v10755_v43   ;;  %v10778_v43 = vld [vmem:[#allocation2 + $0x58] sm:$0xff]  ;;  %v4464_v47 = vpop.xlane.xlu0 %4463 }
 0x2da   : > { %v10781_v46 = vmax.f32 %v10778_v43, %v1980_v56  ;;  %v10792_v18 = vadd.f32 %v10789_v31, %v4464_v47 }
 0x2db   : > { %v1998_v49 = vpop.xlane.xlu1 %1997 }
 0x2dc   : > { %5804 = vset.pattern.permute.xlu0 %v13386_v27  ;;  %13390 = vst [vmem:[#allocation255_spill] sm:$0xff] %v10781_v46  ;;  %13392 = vst [vmem:[#allocation259_spill] sm:$0xff] %v10792_v18 }
 0x2dd   : > { %5796 = vset.pattern.permute.xlu1 %v13377_v45  ;;  %4882 = vperm.xlu0 %5804, %v10766_v17   ;;  %v10787_v17 = vadd.f32 %v6498_v14, %v10696_v26  ;;  %v10803_v26 = vmax.f32 %v6493_v28, %v10694_v24  ;;  %v10805_v14 = vld [vmem:[#allocation2 + $0x68] sm:$0xff]  ;;  %v10817_v24 = vld [vmem:[#allocation2 + $0x70] sm:$0xff] }
 0x2de   : > { %2311 = vperm.xlu1 %5796, %v10768_v8   ;;  %v10808_v47 = vmax.f32 %v10805_v14, %v1998_v49 }
 0x2df   : > { %13391 = vst [vmem:[#allocation249_spill] sm:$0xff] %v10787_v17  ;;  %13393 = vst [vmem:[#allocation258_spill] sm:$0xff] %v10803_v26 }
 0x2e0   : > { %13394 = vst [vmem:[#allocation171_spill] sm:$0xff] %v10808_v47 }
 0x2e1   : > { %5805 = vset.pattern.permute.xlu0 %v13377_v45 }
 0x2e2   : > { %2316 = vperm.xlu1 %5796, %v10776_v11   ;;  %2346 = vperm.xlu0 %5805, %v10781_v46   ;;  %v10795_v56 = vpop.xlane.xlu0 %2006  ;;  %v6502_v11 = vld [vmem:[#allocation2 + $0x38] sm:$0xff] }
 0x2e3   : > { %v10799_v8 = vpop.xlane.xlu1 %4472 }
 0x2e6   : > { %5797 = vset.pattern.permute.xlu1 %v13386_v27  ;;  %5808 = vset.pattern.permute.xlu0 %v13386_v27  ;;  %v4482_v46 = vpop.xlane.xlu0 %4481 }
 0x2e7   : > { %4857 = vperm.xlu1 %5797, %v10787_v17   ;;  %4892 = vperm.xlu0 %5808, %v10792_v18   ;;  %v2016_v17 = vpop.xlane.xlu1 %2015  ;;  %v10815_v18 = vmax.f32 %v6502_v11, %v10705_v35  ;;  %v10820_v28 = vadd.f32 %v10817_v24, %v4482_v46  ;;  %v10833_v35 = vld [vmem:[#allocation2 + $0x78] sm:$0xff] }
 0x2e8   : > { %v10836_v46 = vmax.f32 %v10833_v35, %v2016_v17 }
 0x2e9   : > { %13395 = vst [vmem:[#allocation287_spill] sm:$0xff] %v10815_v18  ;;  %13396 = vst [vmem:[#allocation288_spill] sm:$0xff] %v10820_v28 }
 0x2ea   : > { %13398 = vst [vmem:[#allocation290_spill] sm:$0xff] %v10836_v46 }
 0x2eb   : > { %5798 = vset.pattern.permute.xlu1 %v13377_v45  ;;  %5809 = vset.pattern.permute.xlu0 %v13377_v45 }
 0x2ec   : > { %2321 = vperm.xlu1 %5798, %v10803_v26   ;;  %2356 = vperm.xlu0 %5809, %v10808_v47   ;;  %v10828_v47 = vadd.f32 %v6502_v11, %v10725_v51  ;;  %v10843_v51 = vmax.f32 %v10736_v53, %v10718_v57  ;;  %v10846_v11 = vld [vmem:[#allocation2 + $0x80] sm:$0xff]  ;;  %v10860_v57 = vadd.f32 %v10750_v0, %v10745_v21  ;;  %v10863_v53 = vld [vmem:[#allocation2 + $0x88] sm:$0xff]  ;;  %v10876_v21 = vld [vmem:[#allocation2 + $0x90] sm:$0xff] }
 0x2ed   : > { %v10824_v49 = vpop.xlane.xlu0 %2024 }
 0x2ee   : > { %13397 = vst [vmem:[#allocation289_spill] sm:$0xff] %v10828_v47  ;;  %13399 = vst [vmem:[#allocation291_spill] sm:$0xff] %v10843_v51 }
 0x2ef   : > { %v10830_v26 = vpop.xlane.xlu1 %4490  ;;  %13401 = vst [vmem:[#allocation293_spill] sm:$0xff] %v10860_v57 }
 0x2f0   : > { %2326 = vperm.xlu1 %5798, %v10815_v18   ;;  %5812 = vset.pattern.permute.xlu0 %v13386_v27 }
 0x2f1   : > { %4902 = vperm.xlu0 %5812, %v10820_v28  }
 0x2f2   : > { %v4500_v18 = vpop.xlane.xlu0 %4499 }
 0x2f3   : > { %v10849_v42 = vadd.f32 %v10846_v11, %v4500_v18 }
 0x2f4   : > { %5799 = vset.pattern.permute.xlu1 %v13386_v27  ;;  %v2034_v28 = vpop.xlane.xlu1 %2033 }
 0x2f5   : > { %4867 = vperm.xlu1 %5799, %v10828_v47   ;;  %5813 = vset.pattern.permute.xlu0 %v13377_v45  ;;  %13400 = vst [vmem:[#allocation292_spill] sm:$0xff] %v10849_v42  ;;  %v10866_v18 = vmax.f32 %v10863_v53, %v2034_v28 }
 0x2f6   : > { %2366 = vperm.xlu0 %5813, %v10836_v46  }
 0x2f7   : > { %13402 = vst [vmem:[#allocation294_spill] sm:$0xff] %v10866_v18 }
 0x2f8   : > { %v10853_v17 = vpop.xlane.xlu1 %4508  ;;  %v10855_v47 = vpop.xlane.xlu0 %2042 }
 0x2f9   : > { %5800 = vset.pattern.permute.xlu1 %v13377_v45 }
 0x2fa   : > { %2331 = vperm.xlu1 %5800, %v10843_v51   ;;  %5816 = vset.pattern.permute.xlu0 %v13386_v27 }
 0x2fb   : > { %4912 = vperm.xlu0 %5816, %v10849_v42   ;;  %v10873_v42 = vmax.f32 %v10763_v29, %v10741_v33  ;;  %v10890_v29 = vadd.f32 %v10778_v43, %v10770_v48  ;;  %v10893_v33 = vld [vmem:[#allocation2 + $0x98] sm:$0xff]  ;;  %v10906_v48 = vld [vmem:[#allocation2 + $0xa0] sm:$0xff] }
 0x2fc   : > { %v2052_v46 = vpop.xlane.xlu1 %2051 }
 0x2fd   : > { %v4518_v51 = vpop.xlane.xlu0 %4517  ;;  %13403 = vst [vmem:[#allocation295_spill] sm:$0xff] %v10873_v42  ;;  %13405 = vst [vmem:[#allocation297_spill] sm:$0xff] %v10890_v29 }
 0x2fe   : > { %5802 = vset.pattern.permute.xlu1 %v13386_v27  ;;  %v10879_v0 = vadd.f32 %v10876_v21, %v4518_v51  ;;  %v10896_v51 = vmax.f32 %v10893_v33, %v2052_v46 }
 0x2ff   : > { %4877 = vperm.xlu1 %5802, %v10860_v57   ;;  %5817 = vset.pattern.permute.xlu0 %v13377_v45 }
 0x300   : > { %2376 = vperm.xlu0 %5817, %v10866_v18   ;;  %13404 = vst [vmem:[#allocation296_spill] sm:$0xff] %v10879_v0  ;;  %13406 = vst [vmem:[#allocation298_spill] sm:$0xff] %v10896_v51 }
 0x303   : > { %5803 = vset.pattern.permute.xlu1 %v13377_v45  ;;  %v10883_v28 = vpop.xlane.xlu1 %4526  ;;  %v10885_v57 = vpop.xlane.xlu0 %2060 }
 0x304   : > { %2341 = vperm.xlu1 %5803, %v10873_v42   ;;  %5820 = vset.pattern.permute.xlu0 %v13386_v27 }
 0x305   : > { %4922 = vperm.xlu0 %5820, %v10879_v0   ;;  %v10903_v0 = vmax.f32 %v10789_v31, %v10761_v61  ;;  %v10920_v31 = vadd.f32 %v10805_v14, %v10799_v8  ;;  %v10922_v61 = vld [vmem:[#allocation2 + $0xa8] sm:$0xff]  ;;  %v10936_v8 = vld [vmem:[#allocation2 + $0xb0] sm:$0xff] }
 0x307   : > { %v2070_v18 = vpop.xlane.xlu1 %2069  ;;  %13407 = vst [vmem:[#allocation299_spill] sm:$0xff] %v10903_v0  ;;  %13409 = vst [vmem:[#allocation301_spill] sm:$0xff] %v10920_v31 }
 0x308   : > { %5806 = vset.pattern.permute.xlu1 %v13386_v27  ;;  %v4536_v42 = vpop.xlane.xlu0 %4535 }
 0x309   : > { %4887 = vperm.xlu1 %5806, %v10890_v29   ;;  %5821 = vset.pattern.permute.xlu0 %v13377_v45  ;;  %v10909_v43 = vadd.f32 %v10906_v48, %v4536_v42 }
 0x30a   : > { %2386 = vperm.xlu0 %5821, %v10896_v51   ;;  %v10925_v51 = vmax.f32 %v10922_v61, %v2070_v18 }
 0x30b   : > { %13408 = vst [vmem:[#allocation300_spill] sm:$0xff] %v10909_v43 }
 0x30c   : > { %13410 = vst [vmem:[#allocation302_spill] sm:$0xff] %v10925_v51 }
 0x30d   : > { %5807 = vset.pattern.permute.xlu1 %v13377_v45 }
 0x30e   : > { %2351 = vperm.xlu1 %5807, %v10903_v0   ;;  %5824 = vset.pattern.permute.xlu0 %v13386_v27  ;;  %v10913_v46 = vpop.xlane.xlu1 %4544  ;;  %v10915_v29 = vpop.xlane.xlu0 %2078 }
 0x30f   : > { %4932 = vperm.xlu0 %5824, %v10909_v43   ;;  %v10933_v43 = vmax.f32 %v10817_v24, %v10795_v56  ;;  %v10950_v56 = vadd.f32 %v10833_v35, %v10830_v26  ;;  %v10952_v24 = vld [vmem:[#allocation2 + $0xb8] sm:$0xff]  ;;  %v10966_v26 = vld [vmem:[#allocation2 + $0xc0] sm:$0xff] }
 0x311   : > { %13411 = vst [vmem:[#allocation303_spill] sm:$0xff] %v10933_v43  ;;  %13413 = vst [vmem:[#allocation305_spill] sm:$0xff] %v10950_v56 }
 0x312   : > { %5810 = vset.pattern.permute.xlu1 %v13386_v27  ;;  %v2088_v42 = vpop.xlane.xlu1 %2087  ;;  %v4554_v0 = vpop.xlane.xlu0 %4553 }
 0x313   : > { %4897 = vperm.xlu1 %5810, %v10920_v31   ;;  %5825 = vset.pattern.permute.xlu0 %v13377_v45  ;;  %v10939_v14 = vadd.f32 %v10936_v8, %v4554_v0 }
 0x314   : > { %2396 = vperm.xlu0 %5825, %v10925_v51   ;;  %v10955_v51 = vmax.f32 %v10952_v24, %v2088_v42 }
 0x315   : > { %13412 = vst [vmem:[#allocation304_spill] sm:$0xff] %v10939_v14 }
 0x316   : > { %13414 = vst [vmem:[#allocation306_spill] sm:$0xff] %v10955_v51 }
 0x317   : > { %5811 = vset.pattern.permute.xlu1 %v13377_v45 }
 0x318   : > { %2361 = vperm.xlu1 %5811, %v10933_v43   ;;  %5828 = vset.pattern.permute.xlu0 %v13386_v27  ;;  %v10943_v18 = vpop.xlane.xlu1 %4562  ;;  %v10945_v31 = vpop.xlane.xlu0 %2096 }
 0x319   : > { %4942 = vperm.xlu0 %5828, %v10939_v14   ;;  %v10963_v14 = vmax.f32 %v10846_v11, %v10824_v49  ;;  %v10980_v49 = vadd.f32 %v10863_v53, %v10853_v17  ;;  %v10982_v11 = vld [vmem:[#allocation2 + $0xc8] sm:$0xff]  ;;  %v10995_v17 = vld [vmem:[#allocation2 + $0xd0] sm:$0xff]  ;;  %v11093_v58 = vmax.f32 %v10966_v26, %v10945_v31 }
 0x31b   : > { %13415 = vst [vmem:[#allocation307_spill] sm:$0xff] %v10963_v14  ;;  %13417 = vst [vmem:[#allocation309_spill] sm:$0xff] %v10980_v49 }
 0x31c   : > { %5814 = vset.pattern.permute.xlu1 %v13386_v27  ;;  %v2106_v0 = vpop.xlane.xlu1 %2105 }
 0x31d   : > { %4907 = vperm.xlu1 %5814, %v10950_v56   ;;  %v4572_v43 = vpop.xlane.xlu0 %4571  ;;  %5829 = vset.pattern.permute.xlu0 %v13377_v45 }
 0x31e   : > { %2406 = vperm.xlu0 %5829, %v10955_v51   ;;  %v10969_v35 = vadd.f32 %v10966_v26, %v4572_v43  ;;  %v10985_v51 = vmax.f32 %v10982_v11, %v2106_v0 }
 0x320   : > { %13416 = vst [vmem:[#allocation308_spill] sm:$0xff] %v10969_v35  ;;  %13418 = vst [vmem:[#allocation310_spill] sm:$0xff] %v10985_v51 }
 0x321   : > { %5815 = vset.pattern.permute.xlu1 %v13377_v45 }
 0x322   : > { %2371 = vperm.xlu1 %5815, %v10963_v14   ;;  %5832 = vset.pattern.permute.xlu0 %v13386_v27 }
 0x323   : > { %v10973_v42 = vpop.xlane.xlu1 %4580  ;;  %v10975_v56 = vpop.xlane.xlu0 %2114  ;;  %4952 = vperm.xlu0 %5832, %v10969_v35   ;;  %v10993_v35 = vmax.f32 %v10876_v21, %v10855_v47  ;;  %v11010_v47 = vadd.f32 %v10893_v33, %v10883_v28  ;;  %v11012_v21 = vld [vmem:[#allocation2 + $0xd8] sm:$0xff]  ;;  %v11025_v28 = vld [vmem:[#allocation2 + $0xe0] sm:$0xff] }
 0x324   : > { %v11111_v22 = vadd.f32 %v10982_v11, %v10973_v42  ;;  %v13448_v42 = vld [vmem:[#allocation252_spill] sm:$0xff] }
 0x325   : > { %13419 = vst [vmem:[#allocation311_spill] sm:$0xff] %v10993_v35  ;;  %13421 = vst [vmem:[#allocation313_spill] sm:$0xff] %v11010_v47 }
 0x326   : > { %5818 = vset.pattern.permute.xlu1 %v13386_v27 }
 0x327   : > { %4917 = vperm.xlu1 %5818, %v10980_v49   ;;  %v2124_v43 = vpop.xlane.xlu1 %2123  ;;  %v4590_v14 = vpop.xlane.xlu0 %4589  ;;  %5833 = vset.pattern.permute.xlu0 %v13377_v45 }
 0x328   : > { %2416 = vperm.xlu0 %5833, %v10985_v51   ;;  %v10998_v53 = vadd.f32 %v10995_v17, %v4590_v14  ;;  %v11015_v14 = vmax.f32 %v11012_v21, %v2124_v43 }
 0x32a   : > { %13420 = vst [vmem:[#allocation312_spill] sm:$0xff] %v10998_v53  ;;  %13422 = vst [vmem:[#allocation314_spill] sm:$0xff] %v11015_v14 }
 0x32b   : > { %5819 = vset.pattern.permute.xlu1 %v13377_v45 }
 0x32c   : > { %2381 = vperm.xlu1 %5819, %v10993_v35   ;;  %5836 = vset.pattern.permute.xlu0 %v13386_v27 }
 0x32d   : > { %v11003_v0 = vpop.xlane.xlu1 %4598  ;;  %v11005_v49 = vpop.xlane.xlu0 %2132  ;;  %4962 = vperm.xlu0 %5836, %v10998_v53   ;;  %v11023_v53 = vmax.f32 %v10906_v48, %v10885_v57  ;;  %v11040_v57 = vadd.f32 %v10922_v61, %v10913_v46  ;;  %v11055_v46 = vmax.f32 %v10936_v8, %v10915_v29  ;;  %v11057_v61 = vld [vmem:[#allocation2 + $0xf0] sm:$0xff]  ;;  %v11072_v29 = vld [vmem:[#allocation2 + $0xf8] sm:$0xff] }
 0x32f   : > { %13423 = vst [vmem:[#allocation315_spill] sm:$0xff] %v11023_v53  ;;  %13425 = vst [vmem:[#allocation317_spill] sm:$0xff] %v11040_v57 }
 0x330   : > { %5822 = vset.pattern.permute.xlu1 %v13386_v27  ;;  %13427 = vst [vmem:[#allocation319_spill] sm:$0xff] %v11055_v46 }
 0x331   : > { %v2142_v51 = vpop.xlane.xlu1 %2141  ;;  %4927 = vperm.xlu1 %5822, %v11010_v47   ;;  %v4608_v35 = vpop.xlane.xlu0 %4607  ;;  %5837 = vset.pattern.permute.xlu0 %v13377_v45  ;;  %v11042_v47 = vld [vmem:[#allocation2 + $0xe8] sm:$0xff] }
 0x332   : > { %2426 = vperm.xlu0 %5837, %v11015_v14   ;;  %v11028_v33 = vadd.f32 %v11025_v28, %v4608_v35  ;;  %v11045_v35 = vmax.f32 %v11042_v47, %v2142_v51 }
 0x334   : > { %13424 = vst [vmem:[#allocation316_spill] sm:$0xff] %v11028_v33  ;;  %13426 = vst [vmem:[#allocation318_spill] sm:$0xff] %v11045_v35 }
 0x335   : > { %v11030_v43 = vpop.xlane.xlu1 %4616  ;;  %5823 = vset.pattern.permute.xlu1 %v13377_v45  ;;  %v11033_v63 = vpop.xlane.xlu0 %2150 }
 0x336   : > { %2391 = vperm.xlu1 %5823, %v11023_v53   ;;  %5840 = vset.pattern.permute.xlu0 %v13386_v27  ;;  %v13436_v53 = vld [vmem:[#allocation55_spill] sm:$0xff] }
 0x337   : > { %4972 = vperm.xlu0 %5840, %v11028_v33  }
 0x339   : > { %v2160_v48 = vpop.xlane.xlu1 %2159  ;;  %v4626_v14 = vpop.xlane.xlu0 %4625 }
 0x33a   : > { %5826 = vset.pattern.permute.xlu1 %v13386_v27  ;;  %v11060_v51 = vadd.f32 %v11057_v61, %v4626_v14  ;;  %v11075_v8 = vmax.f32 %v11072_v29, %v2160_v48 }
 0x33b   : > { %4937 = vperm.xlu1 %5826, %v11040_v57   ;;  %5841 = vset.pattern.permute.xlu0 %v13377_v45 }
 0x33c   : > { %2436 = vperm.xlu0 %5841, %v11045_v35   ;;  %13428 = vst [vmem:[#allocation320_spill] sm:$0xff] %v11060_v51  ;;  %v11070_v35 = vadd.f32 %v10952_v24, %v10943_v18  ;;  %13431 = vst [vmem:[#allocation323_spill] sm:$0xff] %v11075_v8  ;;  %v13434_v18 = vld [vmem:[#allocation41_spill] sm:$0xff] }
 0x33d   : > { %v11051_v33 = vpop.xlane.xlu1 %4634 }
 0x33e   : > { %13430 = vst [vmem:[#allocation322_spill] sm:$0xff] %v11070_v35 }
 0x33f   : > { %5827 = vset.pattern.permute.xlu1 %v13377_v45 }
 0x340   : > { %2401 = vperm.xlu1 %5827, %v11055_v46   ;;  %5844 = vset.pattern.permute.xlu0 %v13386_v27  ;;  %v13435_v46 = vld [vmem:[#allocation47_spill] sm:$0xff] }
 0x341   : > { %v11065_v57 = vpop.permute.xlu1 %4832  ;;  %4982 = vperm.xlu0 %5844, %v11060_v51   ;;  %v13433_v51 = vld [vmem:[#allocation40_spill] sm:$0xff]  ;;  %13444 = vst [vmem:[#allocation47_spill] sm:$0xff] %v11111_v22 }
 0x342   : > { %13429 = vst [vmem:[#allocation321_spill] sm:$0xff] %v11065_v57  ;;  %13437 = vst [vmem:[#allocation40_spill] sm:$0xff] %v11093_v58 }
 0x344   : > { %5830 = vset.pattern.permute.xlu1 %v13386_v27 }
 0x345   : > { %v11078_v14 = vpop.permute.xlu1 %2296  ;;  %4947 = vperm.xlu1 %5830, %v11070_v35   ;;  %5845 = vset.pattern.permute.xlu0 %v13377_v45  ;;  %v13438_v35 = vld [vmem:[#allocation54_spill] sm:$0xff] }
 0x346   : > { %13432 = vst [vmem:[#allocation324_spill] sm:$0xff] %v11078_v14  ;;  %2446 = vperm.xlu0 %5845, %v11075_v8   ;;  %v2457_v57 = vsub.f32 %v13433_v51, %v11078_v14  ;;  %v2458_v24 = vsub.f32 %v13434_v18, %v11078_v14  ;;  %v2459_v48 = vsub.f32 %v13435_v46, %v11078_v14  ;;  %v13440_v51 = vld [vmem:[#allocation45_spill] sm:$0xff] }
 0x347   : > { %v2460_v5 = vsub.f32 %v13436_v53, %v11078_v14  ;;  %v2461_v60 = vsub.f32 %v13438_v35, %v11078_v14  ;;  %v2462_v18 = vsub.f32 %v13440_v51, %v11078_v14  ;;  %v13441_v53 = vld [vmem:[#allocation48_spill] sm:$0xff]  ;;  %v13442_v35 = vld [vmem:[#allocation49_spill] sm:$0xff]  ;;  %v2464_v11 = vsub.f32 %v13448_v42, %v11078_v14  ;;  %v11139_v42 = vpop.permute.xlu0 %2291 }
 0x348   : > { %v2721_v8 = vmul.f32 1.442695, %v2457_v57  ;;  %v2723_v36 = vmul.f32 1.442695, %v2458_v24  ;;  %v2725_v46 = vmul.f32 1.442695, %v2459_v48 }
 0x349   : > { %v11097_v32 = vpop.permute.xlu1 %2301  ;;  %5831 = vset.pattern.permute.xlu1 %v13377_v45  ;;  %v2727_v26 = vmul.f32 1.442695, %v2460_v5  ;;  %v13443_v24 = vld [vmem:[#allocation56_spill] sm:$0xff]  ;;  %v2729_v7 = vmul.f32 1.442695, %v2461_v60  ;;  %13454 = vst [vmem:[#allocation48_spill] sm:$0xff] %v11139_v42 }
 0x34a   : > { %13439 = vst [vmem:[#allocation41_spill] sm:$0xff] %v11097_v32  ;;  %2411 = vperm.xlu1 %5831, %v11093_v58   ;;  %5849 = vpow2.f32 %v2721_v8  ;;  %v2465_v31 = vsub.f32 %v13441_v53, %v11097_v32  ;;  %v2466_v57 = vsub.f32 %v13442_v35, %v11097_v32  ;;  %v2463_v54 = vsub.f32 %v13443_v24, %v11078_v14  ;;  %v13445_v8 = vld [vmem:[#allocation59_spill] sm:$0xff]  ;;  %v13447_v5 = vld [vmem:[#allocation68_spill] sm:$0xff] }
 0x34b   : > { %5851 = vpow2.f32 %v2723_v36  ;;  %v2731_v48 = vmul.f32 1.442695, %v2462_v18  ;;  %v2467_v51 = vsub.f32 %v13445_v8, %v11097_v32  ;;  %v2468_v60 = vsub.f32 %v13447_v5, %v11097_v32 }
 0x34c   : > { %5853 = vpow2.f32 %v2725_v46  ;;  %v2737_v36 = vmul.f32 1.442695, %v2465_v31  ;;  %v2739_v53 = vmul.f32 1.442695, %v2466_v57  ;;  %v2733_v18 = vmul.f32 1.442695, %v2463_v54 }
 0x34d   : > { %5855 = vpow2.f32 %v2727_v26  ;;  %v13449_v46 = vld [vmem:[#allocation70_spill] sm:$0xff]  ;;  %v2741_v24 = vmul.f32 1.442695, %v2467_v51  ;;  %v11127_v31 = vmax.f32 %v10995_v17, %v10975_v56  ;;  %v2735_v51 = vmul.f32 1.442695, %v2464_v11  ;;  %v13453_v17 = vld [vmem:[#allocation253_spill] sm:$0xff] }
 0x34e   : > { %v11115_v58 = vpop.permute.xlu1 %4842  ;;  %5834 = vset.pattern.permute.xlu1 %v13386_v27  ;;  %5857 = vpow2.f32 %v2729_v7  ;;  %v2469_v35 = vsub.f32 %v13449_v46, %v11097_v32  ;;  %v13452_v57 = vld [vmem:[#allocation250_spill] sm:$0xff]  ;;  %v2743_v7 = vmul.f32 1.442695, %v2468_v60  ;;  %v11143_v60 = vadd.f32 %v11012_v21, %v11003_v0 }
 0x34f   : > { %13446 = vst [vmem:[#allocation55_spill] sm:$0xff] %v11115_v58  ;;  %4957 = vperm.xlu1 %5834, %v11111_v22   ;;  %5859 = vpow2.f32 %v2731_v48  ;;  %13450 = vst [vmem:[#allocation54_spill] sm:$0xff] %v11127_v31  ;;  %v2470_v8 = vsub.f32 %v13452_v57, %v11097_v32  ;;  %v2194_v48 = vsub.f32 %v10707_v40, %v10713_v4  ;;  %v13456_v40 = vld [vmem:[#allocation74_spill] sm:$0xff] }
 0x350   : > { %5861 = vpow2.f32 %v2737_v36  ;;  %v2471_v36 = vsub.f32 %v13453_v17, %v11097_v32  ;;  %v2745_v5 = vmul.f32 1.442695, %v2469_v35  ;;  %13455 = vst [vmem:[#allocation49_spill] sm:$0xff] %v11143_v60  ;;  %v13458_v0 = vld [vmem:[#allocation38_spill] sm:$0xff] }
 0x351   : > { %5863 = vpow2.f32 %v2739_v53  ;;  %v2472_v53 = vsub.f32 %v13456_v40, %v11097_v32  ;;  %v2227_v11 = vmul.f32 1.442695, %v2194_v48  ;;  %v2449_v21 = vsub.f32 %v13458_v0, %v11139_v42 }
 0x352   : > { %5865 = vpow2.f32 %v2733_v18  ;;  %v2747_v18 = vmul.f32 1.442695, %v2470_v8 }
 0x353   : > { %v11129_v26 = vpop.permute.xlu1 %2306  ;;  %5835 = vset.pattern.permute.xlu1 %v13377_v45  ;;  %5867 = vpow2.f32 %v2741_v24  ;;  %v2751_v40 = vmul.f32 1.442695, %v2472_v53 }
 0x354   : > { %13451 = vst [vmem:[#allocation45_spill] sm:$0xff] %v11129_v26  ;;  %v5850_v54 = vpop.eup %5849  ;;  %2421 = vperm.xlu1 %5835, %v11127_v31   ;;  %5869 = vpow2.f32 %v2743_v7 }
 0x355   : > { %v5852_v56 = vpop.eup %5851  ;;  %5871 = vpow2.f32 %v2735_v51  ;;  %v11157_v51 = vmax.f32 %v11025_v28, %v11005_v49  ;;  %v13463_v49 = vld [vmem:[#allocation61_spill] sm:$0xff] }
 0x356   : > { %v3226_v46 = vadd.f32 %v5852_v56, %v5850_v54  ;;  %v5854_v57 = vpop.eup %5853  ;;  %5873 = vpow2.f32 %v2745_v5  ;;  %v2749_v54 = vmul.f32 1.442695, %v2471_v36  ;;  %v13459_v56 = vld [vmem:[#allocation39_spill] sm:$0xff] }
 0x357   : > { %v5856_v24 = vpop.eup %5855  ;;  %v2450_v17 = vsub.f32 %v13459_v56, %v11139_v42  ;;  %5875 = vpow2.f32 %v2747_v18  ;;  %13460 = vst [vmem:[#allocation59_spill] sm:$0xff] %v11157_v51  ;;  %v13464_v56 = vld [vmem:[#allocation62_spill] sm:$0xff] }
 0x358   : > { %v11147_v22 = vpop.permute.xlu1 %4847  ;;  %5838 = vset.pattern.permute.xlu1 %v13386_v27  ;;  %v3227_v35 = vadd.f32 %v5854_v57, %v3226_v46  ;;  %v5858_v7 = vpop.eup %5857  ;;  %5877 = vpow2.f32 %v2227_v11  ;;  %v13462_v57 = vld [vmem:[#allocation42_spill] sm:$0xff] }
 0x359   : > { %13457 = vst [vmem:[#allocation56_spill] sm:$0xff] %v11147_v22  ;;  %4967 = vperm.xlu1 %5838, %v11143_v60   ;;  %v5860_v48 = vpop.eup %5859  ;;  %5879 = vpow2.f32 %v2749_v54  ;;  %v2451_v0 = vsub.f32 %v13462_v57, %v11139_v42  ;;  %v11171_v54 = vadd.f32 %v11042_v47, %v11030_v43  ;;  %v13467_v57 = vld [vmem:[#allocation46_spill] sm:$0xff] }
 0x35a   : > { %v3228_v8 = vadd.f32 %v5856_v24, %v3227_v35  ;;  %v5862_v22 = vpop.eup %5861  ;;  %v2705_v35 = vmul.f32 1.442695, %v2449_v21  ;;  %v2707_v24 = vmul.f32 1.442695, %v2450_v17  ;;  %5881 = vpow2.f32 %v2751_v40  ;;  %v13466_v21 = vld [vmem:[#allocation69_spill] sm:$0xff] }
 0x35b   : > { %v5864_v5 = vpop.eup %5863  ;;  %13465 = vst [vmem:[#allocation252_spill] sm:$0xff] %v11171_v54  ;;  %v2452_v60 = vsub.f32 %v13467_v57, %v11139_v42  ;;  %v2709_v40 = vmul.f32 1.442695, %v2451_v0  ;;  %v13472_v0 = vld [vmem:[#allocation254_spill] sm:$0xff] }
 0x35c   : > { %v3229_v46 = vadd.f32 %v5858_v7, %v3228_v8  ;;  %v5866_v18 = vpop.eup %5865  ;;  %v3235_v11 = vadd.f32 %v5864_v5, %v5862_v22  ;;  %5883 = vpow2.f32 %v2705_v35 }
 0x35d   : > { %v11159_v36 = vpop.permute.xlu1 %2311  ;;  %5839 = vset.pattern.permute.xlu1 %v13377_v45  ;;  %v5868_v8 = vpop.eup %5867  ;;  %5885 = vpow2.f32 %v2707_v24  ;;  %v13474_v24 = vld [vmem:[#allocation52_spill] sm:$0xff] }
 0x35e   : > { %13461 = vst [vmem:[#allocation68_spill] sm:$0xff] %v11159_v36  ;;  %2431 = vperm.xlu1 %5839, %v11157_v51   ;;  %v3230_v53 = vadd.f32 %v5860_v48, %v3229_v46  ;;  %v2481_v28 = vsub.f32 %v13463_v49, %v11159_v36  ;;  %v2482_v7 = vsub.f32 %v13464_v56, %v11159_v36  ;;  %v13468_v46 = vld [vmem:[#allocation76_spill] sm:$0xff]  ;;  %v5870_v32 = vpop.eup %5869 }
 0x35f   : > { %v2483_v17 = vsub.f32 %v13466_v21, %v11159_v36  ;;  %v3236_v22 = vadd.f32 %v5868_v8, %v3235_v11  ;;  %v2484_v5 = vsub.f32 %v13468_v46, %v11159_v36  ;;  %v13469_v49 = vld [vmem:[#allocation248_spill] sm:$0xff]  ;;  %v5872_v14 = vpop.eup %5871  ;;  %v13471_v46 = vld [vmem:[#allocation53_spill] sm:$0xff] }
 0x360   : > { %v3231_v48 = vadd.f32 %v5866_v18, %v3230_v53  ;;  %v2453_v56 = vsub.f32 %v13469_v49, %v11139_v42  ;;  %v2769_v47 = vmul.f32 1.442695, %v2481_v28  ;;  %v2771_v43 = vmul.f32 1.442695, %v2482_v7  ;;  %v13470_v18 = vld [vmem:[#allocation44_spill] sm:$0xff]  ;;  %v5874_v8 = vpop.eup %5873 }
 0x361   : > { %v11181_v58 = vpop.permute.xlu1 %2316  ;;  %v3237_v21 = vadd.f32 %v5870_v32, %v3236_v22  ;;  %v2485_v53 = vsub.f32 %v13470_v18, %v11159_v36  ;;  %v2773_v11 = vmul.f32 1.442695, %v2483_v17  ;;  %v2454_v28 = vsub.f32 %v13471_v46, %v11139_v42  ;;  %v5876_v22 = vpop.eup %5875  ;;  %v13477_v18 = vld [vmem:[#allocation256_spill] sm:$0xff] }
 0x362   : > { %5842 = vset.pattern.permute.xlu1 %v13386_v27  ;;  %v3232_v57 = vadd.f32 %v5872_v14, %v3231_v48  ;;  %5887 = vpow2.f32 %v2769_v47  ;;  %v2711_v7 = vmul.f32 1.442695, %v2452_v60  ;;  %v2486_v49 = vsub.f32 %v13472_v0, %v11159_v36  ;;  %v11197_v47 = vpop.eup %5877 }
 0x363   : > { %4977 = vperm.xlu1 %5842, %v11171_v54   ;;  %v3238_v35 = vadd.f32 %v5874_v8, %v3237_v21  ;;  %5889 = vpow2.f32 %v2771_v43  ;;  %v2775_v32 = vmul.f32 1.442695, %v2484_v5  ;;  %v11193_v17 = vmax.f32 %v11057_v61, %v11033_v63  ;;  %13475 = vst [vmem:[#allocation250_spill] sm:$0xff] %v11197_v47  ;;  %v5880_v8 = vpop.eup %5879  ;;  %v13478_v63 = vld [vmem:[#allocation260_spill] sm:$0xff] }
 0x364   : > { %v2455_v14 = vsub.f32 %v13474_v24, %v11139_v42  ;;  %5891 = vpow2.f32 %v2709_v40  ;;  %v2713_v48 = vmul.f32 1.442695, %v2453_v56  ;;  %v2487_v43 = vsub.f32 %v13477_v18, %v11159_v36  ;;  %v5882_v46 = vpop.eup %5881 }
 0x365   : > { %13473 = vst [vmem:[#allocation70_spill] sm:$0xff] %v11193_v17  ;;  %3233 = vadd.xlane.f32.xlu0 %v3232_v57  ;;  %v3239_v21 = vadd.f32 %v5876_v22, %v3238_v35  ;;  %5893 = vpow2.f32 %v2773_v11  ;;  %v2777_v5 = vmul.f32 1.442695, %v2485_v53  ;;  %v2488_v61 = vsub.f32 %v13478_v63, %v11159_v36  ;;  %v13479_v35 = vld [vmem:[#allocation57_spill] sm:$0xff]  ;;  %v13486_v63 = vld [vmem:[#allocation87_spill] sm:$0xff] }
 0x366   : > { %v11199_v60 = vpop.permute.xlu1 %4857  ;;  %5895 = vpow2.f32 %v2711_v7  ;;  %v2715_v57 = vmul.f32 1.442695, %v2454_v28  ;;  %v2779_v40 = vmul.f32 1.442695, %v2486_v49  ;;  %v2456_v0 = vsub.f32 %v13479_v35, %v11139_v42  ;;  %v5884_v24 = vpop.eup %5883  ;;  %v13482_v49 = vld [vmem:[#allocation50_spill] sm:$0xff] }
 0x367   : > { %13476 = vst [vmem:[#allocation253_spill] sm:$0xff] %v11199_v60  ;;  %5843 = vset.pattern.permute.xlu1 %v13377_v45  ;;  %v3240_v56 = vadd.f32 %v5880_v8, %v3239_v21  ;;  %5897 = vpow2.f32 %v2775_v32  ;;  %v2717_v11 = vmul.f32 1.442695, %v2455_v14  ;;  %v2781_v22 = vmul.f32 1.442695, %v2487_v43  ;;  %v5886_v21 = vpop.eup %5885  ;;  %v13483_v14 = vld [vmem:[#allocation77_spill] sm:$0xff] }
 0x368   : > { %2441 = vperm.xlu1 %5843, %v11193_v17   ;;  %5899 = vpow2.f32 %v2713_v48  ;;  %v11211_v18 = vadd.f32 %v11072_v29, %v11051_v33  ;;  %v2783_v7 = vmul.f32 1.442695, %v2488_v61  ;;  %v2473_v32 = vsub.f32 %v13482_v49, %v11129_v26  ;;  %v13484_v43 = vld [vmem:[#allocation78_spill] sm:$0xff]  ;;  %v11262_v17 = vpop.permute.xlu0 %4837 }
 0x369   : > { %v3241_v53 = vadd.f32 %v5882_v46, %v3240_v56  ;;  %5901 = vpow2.f32 %v2777_v5  ;;  %v13485_v33 = vld [vmem:[#allocation86_spill] sm:$0xff]  ;;  %13499 = vst [vmem:[#allocation42_spill] sm:$0xff] %v11262_v17 }
 0x36a   : > { %13480 = vst [vmem:[#allocation74_spill] sm:$0xff] %v11211_v18  ;;  %5903 = vpow2.f32 %v2715_v57  ;;  %v2719_v57 = vmul.f32 1.442695, %v2456_v0  ;;  %v13489_v0 = vld [vmem:[#allocation51_spill] sm:$0xff] }
 0x36b   : > { %v11213_v28 = vpop.permute.xlu1 %2321  ;;  %3242 = vadd.xlane.f32.xlu0 %v3241_v53  ;;  %5905 = vpow2.f32 %v2779_v40  ;;  %v13487_v40 = vld [vmem:[#allocation261_spill] sm:$0xff] }
 0x36c   : > { %13481 = vst [vmem:[#allocation38_spill] sm:$0xff] %v11213_v28  ;;  %5846 = vset.pattern.permute.xlu1 %v13386_v27  ;;  %v2497_v48 = vsub.f32 %v13483_v14, %v11213_v28  ;;  %v2498_v5 = vsub.f32 %v13484_v43, %v11213_v28  ;;  %v2499_v29 = vsub.f32 %v13485_v33, %v11213_v28  ;;  %v5888_v8 = vpop.eup %5887  ;;  %5907 = vpow2.f32 %v2717_v11  ;;  %v13488_v33 = vld [vmem:[#allocation262_spill] sm:$0xff] }
 0x36d   : > { %4987 = vperm.xlu1 %5846, %v11211_v18   ;;  %v2500_v61 = vsub.f32 %v13486_v63, %v11213_v28  ;;  %v5890_v56 = vpop.eup %5889  ;;  %5909 = vpow2.f32 %v2781_v22  ;;  %v2501_v46 = vsub.f32 %v13487_v40, %v11213_v28  ;;  %v2502_v18 = vsub.f32 %v13488_v33, %v11213_v28 }
 0x36e   : > { %v2801_v35 = vmul.f32 1.442695, %v2497_v48  ;;  %v2803_v53 = vmul.f32 1.442695, %v2498_v5  ;;  %v5892_v49 = vpop.eup %5891  ;;  %5911 = vpow2.f32 %v2783_v7  ;;  %v3253_v43 = vadd.f32 %v5890_v56, %v5888_v8  ;;  %v13490_v48 = vld [vmem:[#allocation63_spill] sm:$0xff] }
 0x36f   : > { %v11229_v14 = vpop.permute.xlu1 %2326  ;;  %v2805_v54 = vmul.f32 1.442695, %v2499_v29  ;;  %v5894_v60 = vpop.eup %5893  ;;  %v2474_v11 = vsub.f32 %v13489_v0, %v11129_v26  ;;  %v2753_v22 = vmul.f32 1.442695, %v2473_v32  ;;  %v2503_v5 = vsub.f32 %v13490_v48, %v11213_v28  ;;  %v13491_v29 = vld [vmem:[#allocation60_spill] sm:$0xff]  ;;  %v13492_v32 = vld [vmem:[#allocation103_spill] sm:$0xff] }
 0x370   : > { %5913 = vpow2.f32 %v2801_v35  ;;  %v5896_v63 = vpop.eup %5895  ;;  %v3254_v42 = vadd.f32 %v5894_v60, %v3253_v43  ;;  %v2807_v40 = vmul.f32 1.442695, %v2500_v61  ;;  %v2809_v8 = vmul.f32 1.442695, %v2501_v46 }
 0x371   : > { %5915 = vpow2.f32 %v2803_v53  ;;  %5847 = vset.pattern.permute.xlu1 %v13377_v45  ;;  %v5898_v7 = vpop.eup %5897  ;;  %v3217_v56 = vadd.f32 %v5886_v21, %v5884_v24  ;;  %v2475_v35 = vsub.f32 %v13491_v29, %v11129_v26  ;;  %v2504_v60 = vsub.f32 %v13492_v32, %v11213_v28  ;;  %v13494_v45 = vld [vmem:[#allocation71_spill] sm:$0xff] }
 0x372   : > { %5917 = vpow2.f32 %v2719_v57  ;;  %v11240_v33 = vpop.eup %5899  ;;  %v3255_v0 = vadd.f32 %v5898_v7, %v3254_v42  ;;  %v2811_v43 = vmul.f32 1.442695, %v2502_v18  ;;  %v2476_v61 = vsub.f32 %v13494_v45, %v11129_v26  ;;  %v13495_v57 = vld [vmem:[#allocation251_spill] sm:$0xff]  ;;  %v13496_v7 = vld [vmem:[#allocation81_spill] sm:$0xff] }
 0x373   : > { %5919 = vpow2.f32 %v2805_v54  ;;  %v5902_v48 = vpop.eup %5901  ;;  %v2477_v24 = vsub.f32 %v13495_v57, %v11129_v26  ;;  %v2755_v21 = vmul.f32 1.442695, %v2474_v11  ;;  %v2813_v42 = vmul.f32 1.442695, %v2503_v5  ;;  %v13497_v32 = vld [vmem:[#allocation43_spill] sm:$0xff] }
 0x374   : > { %v11244_v53 = vpop.permute.xlu1 %4867  ;;  %5921 = vpow2.f32 %v2753_v22  ;;  %v11250_v46 = vpop.eup %5903  ;;  %v3256_v29 = vadd.f32 %v5902_v48, %v3255_v0  ;;  %v2478_v54 = vsub.f32 %v13496_v7, %v11129_v26  ;;  %v2757_v28 = vmul.f32 1.442695, %v2475_v35  ;;  %v13498_v11 = vld [vmem:[#allocation75_spill] sm:$0xff] }
 0x375   : > { %13493 = vst [vmem:[#allocation39_spill] sm:$0xff] %v11244_v53  ;;  %5923 = vpow2.f32 %v2807_v40  ;;  %v5906_v18 = vpop.eup %5905  ;;  %v2479_v53 = vsub.f32 %v13497_v32, %v11129_v26  ;;  %v2815_v22 = vmul.f32 1.442695, %v2504_v60  ;;  %v2480_v57 = vsub.f32 %v13498_v11, %v11129_v26  ;;  %v13500_v60 = vld [vmem:[#allocation90_spill] sm:$0xff] }
 0x376   : > { %5925 = vpow2.f32 %v2809_v8  ;;  %v11256_v45 = vpop.eup %5907  ;;  %v3257_v27 = vadd.f32 %v5906_v18, %v3256_v29  ;;  %v3218_v40 = vadd.f32 %v5892_v49, %v3217_v56  ;;  %v2759_v5 = vmul.f32 1.442695, %v2476_v61  ;;  %v13501_v29 = vld [vmem:[#allocation92_spill] sm:$0xff]  ;;  %v13502_v49 = vld [vmem:[#allocation99_spill] sm:$0xff] }
 0x377   : > { %5927 = vpow2.f32 %v2811_v43  ;;  %v5910_v0 = vpop.eup %5909  ;;  %v2761_v36 = vmul.f32 1.442695, %v2477_v24  ;;  %v2763_v32 = vmul.f32 1.442695, %v2478_v54 }
 0x378   : > { %5929 = vpow2.f32 %v2755_v21  ;;  %v5912_v48 = vpop.eup %5911  ;;  %v3258_v8 = vadd.f32 %v5910_v0, %v3257_v27  ;;  %v2765_v27 = vmul.f32 1.442695, %v2479_v53  ;;  %v3219_v11 = vadd.f32 %v5896_v63, %v3218_v40 }
 0x379   : > { %v11260_v7 = vpop.permute.xlu1 %2331  ;;  %5931 = vpow2.f32 %v2813_v42  ;;  %v2767_v42 = vmul.f32 1.442695, %v2480_v57  ;;  %v13506_v57 = vld [vmem:[#allocation67_spill] sm:$0xff] }
 0x37a   : > { %v5914_v35 = vpop.eup %5913  ;;  %5933 = vpow2.f32 %v2757_v28  ;;  %v2513_v43 = vsub.f32 %v13500_v60, %v11260_v7  ;;  %v2514_v18 = vsub.f32 %v13501_v29, %v11260_v7  ;;  %v2515_v56 = vsub.f32 %v13502_v49, %v11260_v7  ;;  %v13503_v28 = vld [vmem:[#allocation104_spill] sm:$0xff]  ;;  %v13504_v29 = vld [vmem:[#allocation263_spill] sm:$0xff] }
 0x37b   : > { %v5916_v61 = vpop.eup %5915  ;;  %v3259_v21 = vadd.f32 %v5912_v48, %v3258_v8  ;;  %5935 = vpow2.f32 %v2815_v22  ;;  %v2516_v0 = vsub.f32 %v13503_v28, %v11260_v7  ;;  %v2517_v26 = vsub.f32 %v13504_v29, %v11260_v7  ;;  %v11276_v22 = vpop.permute.xlu0 %4852  ;;  %v13507_v8 = vld [vmem:[#allocation65_spill] sm:$0xff] }
 0x37c   : > { %v11270_v24 = vpop.eup %5917  ;;  %v3271_v54 = vadd.f32 %v5916_v61, %v5914_v35  ;;  %5937 = vpow2.f32 %v2759_v5  ;;  %v2833_v49 = vmul.f32 1.442695, %v2513_v43  ;;  %v2835_v17 = vmul.f32 1.442695, %v2514_v18  ;;  %13505 = vst [vmem:[#allocation61_spill] sm:$0xff] %v11276_v22  ;;  %v13509_v43 = vld [vmem:[#allocation72_spill] sm:$0xff] }
 0x37d   : > { %v5920_v60 = vpop.eup %5919  ;;  %3260 = vadd.xlane.f32.xlu0 %v3259_v21  ;;  %5939 = vpow2.f32 %v2761_v36  ;;  %v2518_v63 = vsub.f32 %v13506_v57, %v11260_v7  ;;  %v2837_v40 = vmul.f32 1.442695, %v2515_v56  ;;  %v2489_v35 = vsub.f32 %v13507_v8, %v11181_v58  ;;  %v13508_v36 = vld [vmem:[#allocation66_spill] sm:$0xff]  ;;  %v13511_v56 = vld [vmem:[#allocation111_spill] sm:$0xff]  ;;  %v13512_v8 = vld [vmem:[#allocation84_spill] sm:$0xff] }
 0x37e   : > { %v5922_v48 = vpop.eup %5921  ;;  %v3272_v53 = vadd.f32 %v5920_v60, %v3271_v54  ;;  %5941 = vpow2.f32 %v2763_v32  ;;  %v2490_v61 = vsub.f32 %v13508_v36, %v11181_v58  ;;  %v2491_v18 = vsub.f32 %v13509_v43, %v11181_v58  ;;  %v13510_v32 = vld [vmem:[#allocation79_spill] sm:$0xff] }
 0x37f   : > { %v5924_v5 = vpop.eup %5923  ;;  %5943 = vpow2.f32 %v2833_v49  ;;  %v2839_v54 = vmul.f32 1.442695, %v2516_v0  ;;  %v2492_v60 = vsub.f32 %v13510_v32, %v11181_v58  ;;  %v2519_v49 = vsub.f32 %v13511_v56, %v11260_v7  ;;  %v11292_v51 = vpop.permute.xlu0 %4862 }
 0x380   : > { %v5926_v21 = vpop.eup %5925  ;;  %v3273_v28 = vadd.f32 %v5924_v5, %v3272_v53  ;;  %5945 = vpow2.f32 %v2835_v17  ;;  %v2841_v57 = vmul.f32 1.442695, %v2517_v26  ;;  %v2493_v22 = vsub.f32 %v13512_v8, %v11181_v58  ;;  %13513 = vst [vmem:[#allocation62_spill] sm:$0xff] %v11292_v51  ;;  %v13515_v8 = vld [vmem:[#allocation85_spill] sm:$0xff] }
 0x381   : > { %v5928_v29 = vpop.eup %5927  ;;  %5947 = vpow2.f32 %v2765_v27  ;;  %v3220_v53 = vadd.f32 %v11240_v33, %v3219_v11  ;;  %v2843_v17 = vmul.f32 1.442695, %v2518_v63  ;;  %v13514_v27 = vld [vmem:[#allocation73_spill] sm:$0xff]  ;;  %v2785_v31 = vmul.f32 1.442695, %v2489_v35 }
 0x382   : > { %v5930_v36 = vpop.eup %5929  ;;  %v3274_v43 = vadd.f32 %v5926_v21, %v3273_v28  ;;  %5949 = vpow2.f32 %v2837_v40  ;;  %v2520_v32 = vsub.f32 %v13514_v27, %v11260_v7  ;;  %v2494_v4 = vsub.f32 %v13515_v8, %v11181_v58  ;;  %v11299_v21 = vpop.permute.xlu1 %4877 }
 0x383   : > { %v5932_v0 = vpop.eup %5931  ;;  %5951 = vpow2.f32 %v2767_v42  ;;  %v3244_v5 = vadd.f32 %v5930_v36, %v5922_v48  ;;  %v2787_v47 = vmul.f32 1.442695, %v2490_v61  ;;  %13516 = vst [vmem:[#allocation69_spill] sm:$0xff] %v11299_v21  ;;  %v2845_v11 = vmul.f32 1.442695, %v2519_v49  ;;  %v13517_v42 = vld [vmem:[#allocation96_spill] sm:$0xff]  ;;  %v11303_v40 = vpop.permute.xlu0 %4872 }
 0x384   : > { %v5934_v56 = vpop.eup %5933  ;;  %v3275_v26 = vadd.f32 %v5928_v29, %v3274_v43  ;;  %5953 = vpow2.f32 %v2839_v54  ;;  %v2495_v48 = vsub.f32 %v13517_v42, %v11181_v58  ;;  %v3221_v28 = vadd.f32 %v11250_v46, %v3220_v53  ;;  %v13518_v43 = vld [vmem:[#allocation82_spill] sm:$0xff] }
 0x385   : > { %v5936_v51 = vpop.eup %5935  ;;  %v3245_v33 = vadd.f32 %v5934_v56, %v3244_v5  ;;  %5955 = vpow2.f32 %v2841_v57  ;;  %v2789_v54 = vmul.f32 1.442695, %v2491_v18  ;;  %v2847_v61 = vmul.f32 1.442695, %v2520_v32  ;;  %v13519_v56 = vld [vmem:[#allocation83_spill] sm:$0xff]  ;;  %v13520_v46 = vld [vmem:[#allocation58_spill] sm:$0xff] }
 0x386   : > { %v5938_v63 = vpop.eup %5937  ;;  %v3276_v35 = vadd.f32 %v5932_v0, %v3275_v26  ;;  %5957 = vpow2.f32 %v2843_v17  ;;  %v2505_v5 = vsub.f32 %v13518_v43, %v11229_v14  ;;  %v2791_v27 = vmul.f32 1.442695, %v2492_v60  ;;  %v11315_v26 = vpop.permute.xlu1 %2341 }
 0x387   : > { %v5940_v29 = vpop.eup %5939  ;;  %v3246_v36 = vadd.f32 %v5938_v63, %v3245_v33  ;;  %5959 = vpow2.f32 %v2785_v31  ;;  %v2506_v8 = vsub.f32 %v13519_v56, %v11229_v14  ;;  %v2496_v18 = vsub.f32 %v13520_v46, %v11181_v58 }
 0x388   : > { %v5942_v57 = vpop.eup %5941  ;;  %v3277_v49 = vadd.f32 %v5936_v51, %v3276_v35  ;;  %5961 = vpow2.f32 %v2787_v47  ;;  %v2793_v53 = vmul.f32 1.442695, %v2493_v22  ;;  %v3222_v31 = vadd.f32 %v11256_v45, %v3221_v28  ;;  %v13521_v51 = vld [vmem:[#allocation89_spill] sm:$0xff] }
 0x389   : > { %v5944_v42 = vpop.eup %5943  ;;  %v3247_v0 = vadd.f32 %v5940_v29, %v3246_v36  ;;  %5963 = vpow2.f32 %v2845_v11  ;;  %v2795_v32 = vmul.f32 1.442695, %v2494_v4  ;;  %v2507_v47 = vsub.f32 %v13521_v51, %v11229_v14  ;;  %v11317_v29 = vpop.permute.xlu0 %2336  ;;  %v13523_v36 = vld [vmem:[#allocation98_spill] sm:$0xff] }
 0x38a   : > { %v5946_v17 = vpop.eup %5945  ;;  %3278 = vadd.xlane.f32.xlu0 %v3277_v49  ;;  %5965 = vpow2.f32 %v2789_v54  ;;  %v2817_v11 = vmul.f32 1.442695, %v2505_v5  ;;  %13522 = vst [vmem:[#allocation46_spill] sm:$0xff] %v11317_v29  ;;  %v2797_v22 = vmul.f32 1.442695, %v2495_v48  ;;  %v2508_v45 = vsub.f32 %v13523_v36, %v11229_v14  ;;  %v13524_v49 = vld [vmem:[#allocation91_spill] sm:$0xff] }
 0x38b   : > { %v5948_v60 = vpop.eup %5947  ;;  %v3248_v33 = vadd.f32 %v5942_v57, %v3247_v0  ;;  %5967 = vpow2.f32 %v2847_v61  ;;  %v3289_v63 = vadd.f32 %v5946_v17, %v5944_v42  ;;  %v2819_v28 = vmul.f32 1.442695, %v2506_v8  ;;  %v13525_v61 = vld [vmem:[#allocation95_spill] sm:$0xff] }
 0x38c   : > { %v5950_v35 = vpop.eup %5949  ;;  %5969 = vpow2.f32 %v2791_v27  ;;  %v2799_v43 = vmul.f32 1.442695, %v2496_v18  ;;  %v2509_v56 = vsub.f32 %v13524_v49, %v11229_v14  ;;  %v2510_v5 = vsub.f32 %v13525_v61, %v11229_v14  ;;  %v13526_v27 = vld [vmem:[#allocation101_spill] sm:$0xff]  ;;  %v13527_v18 = vld [vmem:[#allocation110_spill] sm:$0xff] }
 0x38d   : > { %v5952_v4 = vpop.eup %5951  ;;  %v3290_v54 = vadd.f32 %v5950_v35, %v3289_v63  ;;  %5971 = vpow2.f32 %v2793_v53  ;;  %v2821_v42 = vmul.f32 1.442695, %v2507_v47  ;;  %v2529_v48 = vsub.f32 %v13526_v27, %v11315_v26  ;;  %v13529_v49 = vld [vmem:[#allocation113_spill] sm:$0xff] }
 0x38e   : > { %v5954_v57 = vpop.eup %5953  ;;  %5973 = vpow2.f32 %v2795_v32  ;;  %v3223_v46 = vadd.f32 %v11270_v24, %v3222_v31  ;;  %v3249_v8 = vadd.f32 %v5948_v60, %v3248_v33  ;;  %v2511_v51 = vsub.f32 %v13527_v18, %v11229_v14  ;;  %v13528_v32 = vld [vmem:[#allocation102_spill] sm:$0xff]  ;;  %v11334_v60 = vpop.permute.xlu0 %4882 }
 0x38f   : > { %v5956_v0 = vpop.eup %5955  ;;  %v3291_v17 = vadd.f32 %v5954_v57, %v3290_v54  ;;  %5975 = vpow2.f32 %v2817_v11  ;;  %v2823_v63 = vmul.f32 1.442695, %v2508_v45  ;;  %v2530_v35 = vsub.f32 %v13528_v32, %v11315_v26  ;;  %v13530_v11 = vld [vmem:[#allocation106_spill] sm:$0xff] }
 0x390   : > { %v5958_v53 = vpop.eup %5957  ;;  %5977 = vpow2.f32 %v2819_v28  ;;  %v2512_v61 = vsub.f32 %v13529_v49, %v11229_v14  ;;  %v2825_v24 = vmul.f32 1.442695, %v2509_v56  ;;  %v2827_v33 = vmul.f32 1.442695, %v2510_v5  ;;  %v13532_v49 = vld [vmem:[#allocation120_spill] sm:$0xff] }
 0x391   : > { %v5960_v36 = vpop.eup %5959  ;;  %3224 = vadd.xlane.f32.xlu1 %v3223_v46  ;;  %v3292_v47 = vadd.f32 %v5956_v0, %v3291_v17  ;;  %5979 = vpow2.f32 %v2797_v22  ;;  %v2531_v28 = vsub.f32 %v13530_v11, %v11315_v26  ;;  %v2865_v45 = vmul.f32 1.442695, %v2529_v48  ;;  %v13531_v17 = vld [vmem:[#allocation115_spill] sm:$0xff] }
 0x392   : > { %v5962_v31 = vpop.eup %5961  ;;  %5981 = vpow2.f32 %v2821_v42  ;;  %v3250_v57 = vadd.f32 %v5952_v4, %v3249_v8  ;;  %v2829_v22 = vmul.f32 1.442695, %v2511_v51  ;;  %v2532_v56 = vsub.f32 %v13531_v17, %v11315_v26  ;;  %v13533_v4 = vld [vmem:[#allocation80_spill] sm:$0xff] }
 0x393   : > { %v5964_v54 = vpop.eup %5963  ;;  %v3293_v27 = vadd.f32 %v5958_v53, %v3292_v47  ;;  %5983 = vpow2.f32 %v2799_v43  ;;  %v3262_v46 = vadd.f32 %v5962_v31, %v5960_v36  ;;  %v2867_v18 = vmul.f32 1.442695, %v2530_v35  ;;  %v13534_v53 = vld [vmem:[#allocation93_spill] sm:$0xff] }
 0x394   : > { %v5966_v0 = vpop.eup %5965  ;;  %5985 = vpow2.f32 %v2823_v63  ;;  %v2533_v48 = vsub.f32 %v13532_v49, %v11315_v26  ;;  %v2534_v43 = vsub.f32 %v13533_v4, %v11315_v26  ;;  %v2869_v8 = vmul.f32 1.442695, %v2531_v28  ;;  %v13537_v28 = vld [vmem:[#allocation121_spill] sm:$0xff] }
 0x395   : > { %v5968_v32 = vpop.eup %5967  ;;  %3251 = vadd.xlane.f32.xlu1 %v3250_v57  ;;  %v3294_v42 = vadd.f32 %v5964_v54, %v3293_v27  ;;  %v3263_v5 = vadd.f32 %v5966_v0, %v3262_v46  ;;  %5987 = vpow2.f32 %v2825_v24  ;;  %v2521_v51 = vsub.f32 %v13534_v53, %v11317_v29  ;;  %v11346_v54 = vpop.permute.xlu0 %2346  ;;  %v13536_v57 = vld [vmem:[#allocation94_spill] sm:$0xff] }
 0x396   : > { %v5970_v11 = vpop.eup %5969  ;;  %5989 = vpow2.f32 %v2827_v33  ;;  %v2831_v47 = vmul.f32 1.442695, %v2512_v61  ;;  %13535 = vst [vmem:[#allocation76_spill] sm:$0xff] %v11346_v54  ;;  %v2871_v24 = vmul.f32 1.442695, %v2532_v56  ;;  %v2522_v33 = vsub.f32 %v13536_v57, %v11317_v29 }
 0x397   : > { %v5972_v63 = vpop.eup %5971  ;;  %v3295_v36 = vadd.f32 %v5968_v32, %v3294_v42  ;;  %v3264_v35 = vadd.f32 %v5970_v11, %v3263_v5  ;;  %5991 = vpow2.f32 %v2865_v45  ;;  %v2535_v0 = vsub.f32 %v13537_v28, %v11315_v26  ;;  %v13538_v45 = vld [vmem:[#allocation100_spill] sm:$0xff]  ;;  %v13543_v28 = vld [vmem:[#allocation105_spill] sm:$0xff] }
 0x398   : > { %v5974_v31 = vpop.eup %5973  ;;  %5993 = vpow2.f32 %v2867_v18  ;;  %v2873_v17 = vmul.f32 1.442695, %v2533_v48  ;;  %v2875_v61 = vmul.f32 1.442695, %v2534_v43  ;;  %v2523_v42 = vsub.f32 %v13538_v45, %v11317_v29  ;;  %v13539_v11 = vld [vmem:[#allocation116_spill] sm:$0xff] }
 0x399   : > { %v5976_v27 = vpop.eup %5975  ;;  %3296 = vadd.xlane.f32.xlu0 %v3295_v36  ;;  %v3265_v46 = vadd.f32 %v5972_v63, %v3264_v35  ;;  %5995 = vpow2.f32 %v2829_v22  ;;  %v2849_v5 = vmul.f32 1.442695, %v2521_v51  ;;  %v2536_v4 = vsub.f32 %v13539_v11, %v11315_v26  ;;  %v13540_v22 = vld [vmem:[#allocation112_spill] sm:$0xff] }
 0x39a   : > { %v5978_v32 = vpop.eup %5977  ;;  %5997 = vpow2.f32 %v2869_v8  ;;  %v2524_v63 = vsub.f32 %v13540_v22, %v11317_v29  ;;  %v13541_v48 = vld [vmem:[#allocation264_spill] sm:$0xff]  ;;  %v2851_v43 = vmul.f32 1.442695, %v2522_v33  ;;  %v2877_v51 = vmul.f32 1.442695, %v2535_v0 }
 0x39b   : > { %v5980_v18 = vpop.eup %5979  ;;  %v3266_v56 = vadd.f32 %v5974_v31, %v3265_v46  ;;  %5999 = vpow2.f32 %v2831_v47  ;;  %v3280_v49 = vadd.f32 %v5978_v32, %v5976_v27  ;;  %v2525_v8 = vsub.f32 %v13541_v48, %v11317_v29  ;;  %v11360_v47 = vpop.permute.xlu0 %4892  ;;  %v13542_v27 = vld [vmem:[#allocation114_spill] sm:$0xff] }
 0x39c   : > { %v5982_v53 = vpop.eup %5981  ;;  %6001 = vpow2.f32 %v2871_v24  ;;  %v2526_v46 = vsub.f32 %v13542_v27, %v11317_v29  ;;  %v2853_v24 = vmul.f32 1.442695, %v2523_v42  ;;  %v2537_v32 = vsub.f32 %v13543_v28, %v11346_v54 }
 0x39d   : > { %v5984_v36 = vpop.eup %5983  ;;  %v3267_v35 = vadd.f32 %v5980_v18, %v3266_v56  ;;  %v3281_v57 = vadd.f32 %v5982_v53, %v3280_v49  ;;  %6003 = vpow2.f32 %v2873_v17  ;;  %v2879_v33 = vmul.f32 1.442695, %v2536_v4  ;;  %v13544_v17 = vld [vmem:[#allocation265_spill] sm:$0xff] }
 0x39e   : > { %v5986_v31 = vpop.eup %5985  ;;  %6005 = vpow2.f32 %v2875_v61  ;;  %v2527_v0 = vsub.f32 %v13544_v17, %v11317_v29  ;;  %v2855_v56 = vmul.f32 1.442695, %v2524_v63  ;;  %v13545_v61 = vld [vmem:[#allocation108_spill] sm:$0xff]  ;;  %v2857_v48 = vmul.f32 1.442695, %v2525_v8  ;;  %v13547_v4 = vld [vmem:[#allocation117_spill] sm:$0xff] }
 0x39f   : > { %v5988_v45 = vpop.eup %5987  ;;  %v3268_v11 = vadd.f32 %v5984_v36, %v3267_v35  ;;  %v3282_v22 = vadd.f32 %v5986_v31, %v3281_v57  ;;  %6007 = vpow2.f32 %v2849_v5  ;;  %v2538_v49 = vsub.f32 %v13545_v61, %v11346_v54  ;;  %v13546_v36 = vld [vmem:[#allocation266_spill] sm:$0xff]  ;;  %v11374_v61 = vpop.permute.xlu0 %2356 }
 0x3a0   : > { %v5990_v18 = vpop.eup %5989  ;;  %6009 = vpow2.f32 %v2851_v43  ;;  %v2528_v35 = vsub.f32 %v13546_v36, %v11317_v29  ;;  %v2859_v5 = vmul.f32 1.442695, %v2526_v46  ;;  %v2539_v57 = vsub.f32 %v13547_v4, %v11346_v54  ;;  %13548 = vst [vmem:[#allocation248_spill] sm:$0xff] %v11374_v61  ;;  %v13549_v8 = vld [vmem:[#allocation122_spill] sm:$0xff]  ;;  %v13550_v36 = vld [vmem:[#allocation267_spill] sm:$0xff] }
 0x3a1   : > { %v5992_v53 = vpop.eup %5991  ;;  %3269 = vadd.xlane.f32.xlu1 %v3268_v11  ;;  %v3283_v42 = vadd.f32 %v5988_v45, %v3282_v22  ;;  %6011 = vpow2.f32 %v2877_v51  ;;  %v2881_v28 = vmul.f32 1.442695, %v2537_v32  ;;  %v2861_v51 = vmul.f32 1.442695, %v2527_v0 }
 0x3a2   : > { %v5994_v27 = vpop.eup %5993  ;;  %6013 = vpow2.f32 %v2853_v24  ;;  %v2540_v45 = vsub.f32 %v13549_v8, %v11346_v54  ;;  %v2883_v11 = vmul.f32 1.442695, %v2538_v49  ;;  %v2541_v4 = vsub.f32 %v13550_v36, %v11346_v54  ;;  %v13553_v49 = vld [vmem:[#allocation123_spill] sm:$0xff] }
 0x3a3   : > { %v5996_v31 = vpop.eup %5995  ;;  %v3284_v43 = vadd.f32 %v5990_v18, %v3283_v42  ;;  %6015 = vpow2.f32 %v2879_v33  ;;  %v3307_v63 = vadd.f32 %v5994_v27, %v5992_v53  ;;  %v11380_v33 = vpop.permute.xlu1 %4887  ;;  %v2863_v32 = vmul.f32 1.442695, %v2528_v35  ;;  %v13552_v53 = vld [vmem:[#allocation88_spill] sm:$0xff] }
 0x3a4   : > { %v5998_v17 = vpop.eup %5997  ;;  %6017 = vpow2.f32 %v2855_v56  ;;  %13551 = vst [vmem:[#allocation44_spill] sm:$0xff] %v11380_v33  ;;  %v2542_v56 = vsub.f32 %v13552_v53, %v11346_v54  ;;  %v2885_v0 = vmul.f32 1.442695, %v2539_v57  ;;  %v2889_v57 = vmul.f32 1.442695, %v2541_v4  ;;  %v13559_v4 = vld [vmem:[#allocation139_spill] sm:$0xff] }
 0x3a5   : > { %v6000_v22 = vpop.eup %5999  ;;  %v3285_v24 = vadd.f32 %v5996_v31, %v3284_v43  ;;  %v3308_v46 = vadd.f32 %v5998_v17, %v3307_v63  ;;  %6019 = vpow2.f32 %v2857_v48  ;;  %v2553_v31 = vsub.f32 %v13553_v49, %v11374_v61  ;;  %v13554_v43 = vld [vmem:[#allocation133_spill] sm:$0xff]  ;;  %v13558_v49 = vld [vmem:[#allocation135_spill] sm:$0xff] }
 0x3a6   : > { %v6002_v18 = vpop.eup %6001  ;;  %6021 = vpow2.f32 %v2859_v5  ;;  %v2543_v63 = vsub.f32 %v13554_v43, %v11346_v54  ;;  %v2887_v17 = vmul.f32 1.442695, %v2540_v45  ;;  %v13555_v5 = vld [vmem:[#allocation124_spill] sm:$0xff] }
 0x3a7   : > { %v6004_v42 = vpop.eup %6003  ;;  %v3286_v27 = vadd.f32 %v6000_v22, %v3285_v24  ;;  %v3309_v8 = vadd.f32 %v6002_v18, %v3308_v46  ;;  %6023 = vpow2.f32 %v2881_v28  ;;  %v2554_v35 = vsub.f32 %v13555_v5, %v11374_v61  ;;  %v11390_v24 = vpop.permute.xlu0 %4902  ;;  %v13557_v28 = vld [vmem:[#allocation268_spill] sm:$0xff] }
 0x3a8   : > { %v6006_v48 = vpop.eup %6005  ;;  %6025 = vpow2.f32 %v2883_v11  ;;  %13556 = vst [vmem:[#allocation53_spill] sm:$0xff] %v11390_v24  ;;  %v2544_v46 = vsub.f32 %v13557_v28, %v11346_v54  ;;  %v2891_v18 = vmul.f32 1.442695, %v2542_v56  ;;  %v2555_v11 = vsub.f32 %v13558_v49, %v11374_v61  ;;  %v13560_v49 = vld [vmem:[#allocation270_spill] sm:$0xff] }
 0x3a9   : > { %v6008_v36 = vpop.eup %6007  ;;  %3287 = vadd.xlane.f32.xlu1 %v3286_v27  ;;  %v3310_v53 = vadd.f32 %v6004_v42, %v3309_v8  ;;  %6027 = vpow2.f32 %v2861_v51  ;;  %v2913_v33 = vmul.f32 1.442695, %v2553_v31  ;;  %v11396_v42 = vpop.permute.xlu1 %2351  ;;  %v2893_v51 = vmul.f32 1.442695, %v2543_v63  ;;  %v13561_v31 = vld [vmem:[#allocation271_spill] sm:$0xff] }
 0x3aa   : > { %v6010_v22 = vpop.eup %6009  ;;  %6029 = vpow2.f32 %v2885_v0  ;;  %v2556_v8 = vsub.f32 %v13559_v4, %v11374_v61  ;;  %v2915_v29 = vmul.f32 1.442695, %v2554_v35  ;;  %v2557_v54 = vsub.f32 %v13560_v49, %v11374_v61  ;;  %v13562_v35 = vld [vmem:[#allocation118_spill] sm:$0xff] }
 0x3ab   : > { %v6012_v45 = vpop.eup %6011  ;;  %v3311_v43 = vadd.f32 %v6006_v48, %v3310_v53  ;;  %6031 = vpow2.f32 %v2863_v32  ;;  %v3298_v5 = vadd.f32 %v6010_v22, %v6008_v36  ;;  %v2895_v32 = vmul.f32 1.442695, %v2544_v46  ;;  %v13565_v46 = vld [vmem:[#allocation119_spill] sm:$0xff] }
 0x3ac   : > { %v6014_v27 = vpop.eup %6013  ;;  %6033 = vpow2.f32 %v2887_v17  ;;  %v2558_v36 = vsub.f32 %v13561_v31, %v11374_v61  ;;  %v2917_v53 = vmul.f32 1.442695, %v2555_v11  ;;  %v2545_v4 = vsub.f32 %v13562_v35, %v11396_v42  ;;  %v13567_v31 = vld [vmem:[#allocation126_spill] sm:$0xff] }
 0x3ad   : > { %v6016_v28 = vpop.eup %6015  ;;  %v3312_v0 = vadd.f32 %v6012_v45, %v3311_v43  ;;  %v3299_v56 = vadd.f32 %v6014_v27, %v3298_v5  ;;  %6035 = vpow2.f32 %v2889_v57  ;;  %v11406_v43 = vpop.permute.xlu0 %2366  ;;  %v13564_v57 = vld [vmem:[#allocation146_spill] sm:$0xff]  ;;  %v2546_v27 = vsub.f32 %v13565_v46, %v11396_v42 }
 0x3ae   : > { %v6018_v48 = vpop.eup %6017  ;;  %6037 = vpow2.f32 %v2891_v18  ;;  %13563 = vst [vmem:[#allocation254_spill] sm:$0xff] %v11406_v43  ;;  %v2559_v5 = vsub.f32 %v13564_v57, %v11374_v61  ;;  %v2919_v18 = vmul.f32 1.442695, %v2556_v8  ;;  %v2547_v35 = vsub.f32 %v13567_v31, %v11396_v42 }
 0x3af   : > { %v6020_v17 = vpop.eup %6019  ;;  %v3313_v63 = vadd.f32 %v6016_v28, %v3312_v0  ;;  %v3300_v22 = vadd.f32 %v6018_v48, %v3299_v56  ;;  %6039 = vpow2.f32 %v2913_v33  ;;  %v2921_v28 = vmul.f32 1.442695, %v2557_v54  ;;  %v13566_v0 = vld [vmem:[#allocation151_spill] sm:$0xff] }
 0x3b0   : > { %v6022_v45 = vpop.eup %6021  ;;  %6041 = vpow2.f32 %v2915_v29  ;;  %v2560_v56 = vsub.f32 %v13566_v0, %v11374_v61  ;;  %v2923_v48 = vmul.f32 1.442695, %v2558_v36  ;;  %v2897_v21 = vmul.f32 1.442695, %v2545_v4  ;;  %v13569_v36 = vld [vmem:[#allocation129_spill] sm:$0xff] }
 0x3b1   : > { %v6024_v49 = vpop.eup %6023  ;;  %3314 = vadd.xlane.f32.xlu0 %v3313_v63  ;;  %v3301_v11 = vadd.f32 %v6020_v17, %v3300_v22  ;;  %6043 = vpow2.f32 %v2893_v51  ;;  %v2925_v63 = vmul.f32 1.442695, %v2559_v5  ;;  %v13568_v51 = vld [vmem:[#allocation134_spill] sm:$0xff]  ;;  %v2899_v17 = vmul.f32 1.442695, %v2546_v27  ;;  %v11420_v61 = vpop.permute.xlu0 %4912  ;;  %v13571_v4 = vld [vmem:[#allocation269_spill] sm:$0xff] }
 0x3b2   : > { %v6026_v33 = vpop.eup %6025  ;;  %6045 = vpow2.f32 %v2917_v53  ;;  %v2548_v54 = vsub.f32 %v13568_v51, %v11396_v42  ;;  %v2549_v53 = vsub.f32 %v13569_v36, %v11396_v42  ;;  %13570 = vst [vmem:[#allocation52_spill] sm:$0xff] %v11420_v61  ;;  %v2901_v5 = vmul.f32 1.442695, %v2547_v35  ;;  %v13572_v27 = vld [vmem:[#allocation131_spill] sm:$0xff]  ;;  %v13576_v36 = vld [vmem:[#allocation138_spill] sm:$0xff] }
 0x3b3   : > { %v6028_v57 = vpop.eup %6027  ;;  %v3302_v29 = vadd.f32 %v6022_v45, %v3301_v11  ;;  %6047 = vpow2.f32 %v2895_v32  ;;  %v3316_v8 = vadd.f32 %v6026_v33, %v6024_v49  ;;  %v2927_v32 = vmul.f32 1.442695, %v2560_v56 }
 0x3b4   : > { %v6030_v46 = vpop.eup %6029  ;;  %6049 = vpow2.f32 %v2919_v18  ;;  %v2550_v45 = vsub.f32 %v13571_v4, %v11396_v42  ;;  %v2569_v33 = vsub.f32 %v13572_v27, %v11406_v43  ;;  %v2905_v35 = vmul.f32 1.442695, %v2549_v53  ;;  %v13578_v53 = vld [vmem:[#allocation143_spill] sm:$0xff] }
 0x3b5   : > { %v6032_v22 = vpop.eup %6031  ;;  %v3303_v24 = vadd.f32 %v6028_v57, %v3302_v29  ;;  %v3317_v0 = vadd.f32 %v6030_v46, %v3316_v8  ;;  %6051 = vpow2.f32 %v2921_v28  ;;  %v13573_v57 = vld [vmem:[#allocation97_spill] sm:$0xff]  ;;  %v2903_v8 = vmul.f32 1.442695, %v2548_v54 }
 0x3b6   : > { %v6034_v31 = vpop.eup %6033  ;;  %6053 = vpow2.f32 %v2923_v48  ;;  %v2551_v29 = vsub.f32 %v13573_v57, %v11396_v42  ;;  %v13574_v48 = vld [vmem:[#allocation132_spill] sm:$0xff]  ;;  %v2945_v27 = vmul.f32 1.442695, %v2569_v33 }
 0x3b7   : > { %v6036_v18 = vpop.eup %6035  ;;  %v3304_v49 = vadd.f32 %v6032_v22, %v3303_v24  ;;  %v3318_v11 = vadd.f32 %v6034_v31, %v3317_v0  ;;  %6055 = vpow2.f32 %v2897_v21  ;;  %v2570_v56 = vsub.f32 %v13574_v48, %v11406_v43  ;;  %v13575_v21 = vld [vmem:[#allocation272_spill] sm:$0xff]  ;;  %v11434_v48 = vpop.permute.xlu0 %2376 }
 0x3b8   : > { %v6038_v28 = vpop.eup %6037  ;;  %6057 = vpow2.f32 %v2899_v17  ;;  %v2552_v22 = vsub.f32 %v13575_v21, %v11396_v42  ;;  %v2907_v0 = vmul.f32 1.442695, %v2550_v45  ;;  %v2571_v31 = vsub.f32 %v13576_v36, %v11406_v43  ;;  %13577 = vst [vmem:[#allocation256_spill] sm:$0xff] %v11434_v48  ;;  %v13579_v21 = vld [vmem:[#allocation274_spill] sm:$0xff] }
 0x3b9   : > { %v6040_v46 = vpop.eup %6039  ;;  %3305 = vadd.xlane.f32.xlu1 %v3304_v49  ;;  %v3319_v51 = vadd.f32 %v6036_v18, %v3318_v11  ;;  %6059 = vpow2.f32 %v2925_v63  ;;  %v2909_v63 = vmul.f32 1.442695, %v2551_v29  ;;  %v2572_v18 = vsub.f32 %v13578_v53, %v11406_v43 }
 0x3ba   : > { %v6042_v24 = vpop.eup %6041  ;;  %6061 = vpow2.f32 %v2901_v5  ;;  %v2947_v49 = vmul.f32 1.442695, %v2570_v56  ;;  %v2573_v36 = vsub.f32 %v13579_v21, %v11406_v43  ;;  %v2911_v33 = vmul.f32 1.442695, %v2552_v22  ;;  %v13582_v56 = vld [vmem:[#allocation149_spill] sm:$0xff] }
 0x3bb   : > { %v6044_v4 = vpop.eup %6043  ;;  %v3320_v17 = vadd.f32 %v6038_v28, %v3319_v51  ;;  %6063 = vpow2.f32 %v2927_v32  ;;  %v3334_v54 = vadd.f32 %v6042_v24, %v6040_v46  ;;  %v11440_v32 = vpop.permute.xlu1 %4897  ;;  %v13581_v46 = vld [vmem:[#allocation155_spill] sm:$0xff]  ;;  %v2949_v29 = vmul.f32 1.442695, %v2571_v31 }
 0x3bc   : > { %v6046_v57 = vpop.eup %6045  ;;  %6065 = vpow2.f32 %v2903_v8  ;;  %13580 = vst [vmem:[#allocation260_spill] sm:$0xff] %v11440_v32  ;;  %v2574_v8 = vsub.f32 %v13581_v46, %v11406_v43  ;;  %v2953_v31 = vmul.f32 1.442695, %v2573_v36  ;;  %v13588_v36 = vld [vmem:[#allocation164_spill] sm:$0xff] }
 0x3bd   : > { %v6048_v11 = vpop.eup %6047  ;;  %v3321_v5 = vadd.f32 %v6044_v4, %v3320_v17  ;;  %v3335_v45 = vadd.f32 %v6046_v57, %v3334_v54  ;;  %6067 = vpow2.f32 %v2905_v35  ;;  %v2585_v4 = vsub.f32 %v13582_v56, %v11434_v48  ;;  %v13583_v17 = vld [vmem:[#allocation125_spill] sm:$0xff] }
 0x3be   : > { %v6050_v28 = vpop.eup %6049  ;;  %6069 = vpow2.f32 %v2907_v0  ;;  %v2575_v54 = vsub.f32 %v13583_v17, %v11406_v43  ;;  %v2951_v57 = vmul.f32 1.442695, %v2572_v18  ;;  %v13584_v0 = vld [vmem:[#allocation150_spill] sm:$0xff] }
 0x3bf   : > { %v6052_v51 = vpop.eup %6051  ;;  %v3322_v24 = vadd.f32 %v6048_v11, %v3321_v5  ;;  %v3336_v53 = vadd.f32 %v6050_v28, %v3335_v45  ;;  %6071 = vpow2.f32 %v2945_v27  ;;  %v2586_v22 = vsub.f32 %v13584_v0, %v11434_v48  ;;  %v13585_v27 = vld [vmem:[#allocation277_spill] sm:$0xff]  ;;  %v13586_v28 = vld [vmem:[#allocation159_spill] sm:$0xff]  ;;  %v11454_v61 = vpop.permute.xlu1 %2361 }
 0x3c0   : > { %v6054_v35 = vpop.eup %6053  ;;  %6073 = vpow2.f32 %v2947_v49  ;;  %v2576_v5 = vsub.f32 %v13585_v27, %v11406_v43  ;;  %v2955_v45 = vmul.f32 1.442695, %v2574_v8  ;;  %v2587_v56 = vsub.f32 %v13586_v28, %v11434_v48  ;;  %13587 = vst [vmem:[#allocation57_spill] sm:$0xff] %v11454_v61  ;;  %v13589_v27 = vld [vmem:[#allocation156_spill] sm:$0xff] }
 0x3c1   : > { %v6056_v21 = vpop.eup %6055  ;;  %3323 = vadd.xlane.f32.xlu1 %v3322_v24  ;;  %v3337_v46 = vadd.f32 %v6052_v51, %v3336_v53  ;;  %6075 = vpow2.f32 %v2909_v63  ;;  %v2977_v32 = vmul.f32 1.442695, %v2585_v4  ;;  %v2957_v63 = vmul.f32 1.442695, %v2575_v54 }
 0x3c2   : > { %v6058_v11 = vpop.eup %6057  ;;  %6077 = vpow2.f32 %v2949_v29  ;;  %v2588_v51 = vsub.f32 %v13588_v36, %v11434_v48  ;;  %v2979_v24 = vmul.f32 1.442695, %v2586_v22  ;;  %v2589_v28 = vsub.f32 %v13589_v27, %v11434_v48  ;;  %v13592_v22 = vld [vmem:[#allocation127_spill] sm:$0xff] }
 0x3c3   : > { %v6060_v17 = vpop.eup %6059  ;;  %v3338_v49 = vadd.f32 %v6054_v35, %v3337_v46  ;;  %6079 = vpow2.f32 %v2911_v33  ;;  %v3325_v18 = vadd.f32 %v6058_v11, %v6056_v21  ;;  %v11460_v33 = vpop.permute.xlu0 %4922  ;;  %v2959_v4 = vmul.f32 1.442695, %v2576_v5  ;;  %v13591_v21 = vld [vmem:[#allocation160_spill] sm:$0xff] }
 0x3c4   : > { %v6062_v0 = vpop.eup %6061  ;;  %6081 = vpow2.f32 %v2951_v57  ;;  %13590 = vst [vmem:[#allocation50_spill] sm:$0xff] %v11460_v33  ;;  %v2590_v57 = vsub.f32 %v13591_v21, %v11434_v48  ;;  %v2981_v54 = vmul.f32 1.442695, %v2587_v56  ;;  %v2985_v56 = vmul.f32 1.442695, %v2589_v28  ;;  %v13598_v28 = vld [vmem:[#allocation142_spill] sm:$0xff] }
 0x3c5   : > { %v6064_v53 = vpop.eup %6063  ;;  %v3339_v29 = vadd.f32 %v6060_v17, %v3338_v49  ;;  %v3326_v8 = vadd.f32 %v6062_v0, %v3325_v18  ;;  %6083 = vpow2.f32 %v2953_v31  ;;  %v2561_v17 = vsub.f32 %v13592_v22, %v11454_v61  ;;  %v13593_v49 = vld [vmem:[#allocation278_spill] sm:$0xff] }
 0x3c6   : > { %v6066_v35 = vpop.eup %6065  ;;  %6085 = vpow2.f32 %v2955_v45  ;;  %v2591_v18 = vsub.f32 %v13593_v49, %v11434_v48  ;;  %v2983_v0 = vmul.f32 1.442695, %v2588_v51  ;;  %v13594_v45 = vld [vmem:[#allocation130_spill] sm:$0xff] }
 0x3c7   : > { %v6068_v46 = vpop.eup %6067  ;;  %v3340_v11 = vadd.f32 %v6064_v53, %v3339_v29  ;;  %v3327_v36 = vadd.f32 %v6066_v35, %v3326_v8  ;;  %6087 = vpow2.f32 %v2977_v32  ;;  %v2562_v5 = vsub.f32 %v13594_v45, %v11454_v61  ;;  %v13595_v32 = vld [vmem:[#allocation279_spill] sm:$0xff]  ;;  %v13596_v35 = vld [vmem:[#allocation136_spill] sm:$0xff]  ;;  %v11474_v33 = vpop.permute.xlu0 %2386 }
 0x3c8   : > { %v6070_v31 = vpop.eup %6069  ;;  %6089 = vpow2.f32 %v2979_v24  ;;  %v2592_v29 = vsub.f32 %v13595_v32, %v11434_v48  ;;  %v2987_v8 = vmul.f32 1.442695, %v2590_v57  ;;  %v2563_v22 = vsub.f32 %v13596_v35, %v11454_v61  ;;  %13597 = vst [vmem:[#allocation77_spill] sm:$0xff] %v11474_v33  ;;  %v13599_v32 = vld [vmem:[#allocation273_spill] sm:$0xff] }
 0x3c9   : > { %v6072_v27 = vpop.eup %6071  ;;  %3341 = vadd.xlane.f32.xlu1 %v3340_v11  ;;  %v3328_v21 = vadd.f32 %v6068_v46, %v3327_v36  ;;  %6091 = vpow2.f32 %v2957_v63  ;;  %v2929_v43 = vmul.f32 1.442695, %v2561_v17  ;;  %v2989_v63 = vmul.f32 1.442695, %v2591_v18 }
 0x3ca   : > { %v6074_v53 = vpop.eup %6073  ;;  %6093 = vpow2.f32 %v2981_v54  ;;  %v2564_v46 = vsub.f32 %v13598_v28, %v11454_v61  ;;  %v2931_v11 = vmul.f32 1.442695, %v2562_v5  ;;  %v2565_v35 = vsub.f32 %v13599_v32, %v11454_v61  ;;  %v13602_v5 = vld [vmem:[#allocation162_spill] sm:$0xff] }
 0x3cb   : > { %v6076_v49 = vpop.eup %6075  ;;  %v3329_v24 = vadd.f32 %v6070_v31, %v3328_v21  ;;  %6095 = vpow2.f32 %v2959_v4  ;;  %v3352_v51 = vadd.f32 %v6074_v53, %v6072_v27  ;;  %v11480_v4 = vpop.permute.xlu1 %4907  ;;  %v2991_v17 = vmul.f32 1.442695, %v2592_v29  ;;  %v13601_v27 = vld [vmem:[#allocation147_spill] sm:$0xff] }
 0x3cc   : > { %v6078_v45 = vpop.eup %6077  ;;  %6097 = vpow2.f32 %v2983_v0  ;;  %13600 = vst [vmem:[#allocation78_spill] sm:$0xff] %v11480_v4  ;;  %v2566_v0 = vsub.f32 %v13601_v27, %v11454_v61  ;;  %v2933_v18 = vmul.f32 1.442695, %v2563_v22  ;;  %v2937_v22 = vmul.f32 1.442695, %v2565_v35  ;;  %v13608_v35 = vld [vmem:[#allocation173_spill] sm:$0xff] }
 0x3cd   : > { %v6080_v36 = vpop.eup %6079  ;;  %v3330_v54 = vadd.f32 %v6076_v49, %v3329_v24  ;;  %v3353_v57 = vadd.f32 %v6078_v45, %v3352_v51  ;;  %6099 = vpow2.f32 %v2985_v56  ;;  %v2601_v49 = vsub.f32 %v13602_v5, %v11474_v33  ;;  %v13603_v24 = vld [vmem:[#allocation107_spill] sm:$0xff] }
 0x3ce   : > { %v6082_v31 = vpop.eup %6081  ;;  %6101 = vpow2.f32 %v2987_v8  ;;  %v2567_v51 = vsub.f32 %v13603_v24, %v11454_v61  ;;  %v2935_v45 = vmul.f32 1.442695, %v2564_v46  ;;  %v13604_v8 = vld [vmem:[#allocation163_spill] sm:$0xff] }
 0x3cf   : > { %v6084_v21 = vpop.eup %6083  ;;  %v3331_v53 = vadd.f32 %v6080_v36, %v3330_v54  ;;  %v3354_v28 = vadd.f32 %v6082_v31, %v3353_v57  ;;  %6103 = vpow2.f32 %v2929_v43  ;;  %v2602_v29 = vsub.f32 %v13604_v8, %v11474_v33  ;;  %v13605_v43 = vld [vmem:[#allocation275_spill] sm:$0xff]  ;;  %v13606_v31 = vld [vmem:[#allocation168_spill] sm:$0xff]  ;;  %v11494_v4 = vpop.permute.xlu1 %2371 }
 0x3d0   : > { %v6086_v56 = vpop.eup %6085  ;;  %6105 = vpow2.f32 %v2931_v11  ;;  %v2568_v54 = vsub.f32 %v13605_v43, %v11454_v61  ;;  %v2939_v57 = vmul.f32 1.442695, %v2566_v0  ;;  %v2603_v5 = vsub.f32 %v13606_v31, %v11474_v33  ;;  %13607 = vst [vmem:[#allocation86_spill] sm:$0xff] %v11494_v4  ;;  %v13609_v43 = vld [vmem:[#allocation280_spill] sm:$0xff] }
 0x3d1   : > { %v6088_v32 = vpop.eup %6087  ;;  %3332 = vadd.xlane.f32.xlu0 %v3331_v53  ;;  %v3355_v27 = vadd.f32 %v6084_v21, %v3354_v28  ;;  %6107 = vpow2.f32 %v2989_v63  ;;  %v3009_v48 = vmul.f32 1.442695, %v2601_v49  ;;  %v2941_v63 = vmul.f32 1.442695, %v2567_v51 }
 0x3d2   : > { %v6090_v36 = vpop.eup %6089  ;;  %6109 = vpow2.f32 %v2933_v18  ;;  %v2604_v21 = vsub.f32 %v13608_v35, %v11474_v33  ;;  %v3011_v53 = vmul.f32 1.442695, %v2602_v29  ;;  %v2605_v31 = vsub.f32 %v13609_v43, %v11474_v33  ;;  %v13612_v29 = vld [vmem:[#allocation144_spill] sm:$0xff] }
 0x3d3   : > { %v6092_v24 = vpop.eup %6091  ;;  %v3356_v11 = vadd.f32 %v6086_v56, %v3355_v27  ;;  %6111 = vpow2.f32 %v2991_v17  ;;  %v3370_v46 = vadd.f32 %v6090_v36, %v6088_v32  ;;  %v11500_v17 = vpop.permute.xlu0 %4932  ;;  %v2943_v49 = vmul.f32 1.442695, %v2568_v54  ;;  %v13611_v32 = vld [vmem:[#allocation181_spill] sm:$0xff] }
 0x3d4   : > { %v6094_v8 = vpop.eup %6093  ;;  %6113 = vpow2.f32 %v2935_v45  ;;  %13610 = vst [vmem:[#allocation87_spill] sm:$0xff] %v11500_v17  ;;  %v2606_v45 = vsub.f32 %v13611_v32, %v11474_v33  ;;  %v3013_v51 = vmul.f32 1.442695, %v2603_v5  ;;  %v3017_v5 = vmul.f32 1.442695, %v2605_v31  ;;  %v13618_v31 = vld [vmem:[#allocation158_spill] sm:$0xff] }
 0x3d5   : > { %v6096_v28 = vpop.eup %6095  ;;  %v3357_v18 = vadd.f32 %v6092_v24, %v3356_v11  ;;  %v3371_v0 = vadd.f32 %v6094_v8, %v3370_v46  ;;  %6115 = vpow2.f32 %v2937_v22  ;;  %v2577_v24 = vsub.f32 %v13612_v29, %v11494_v4  ;;  %v13613_v11 = vld [vmem:[#allocation178_spill] sm:$0xff] }
 0x3d6   : > { %v6098_v56 = vpop.eup %6097  ;;  %6117 = vpow2.f32 %v2939_v57  ;;  %v2607_v46 = vsub.f32 %v13613_v11, %v11474_v33  ;;  %v3015_v8 = vmul.f32 1.442695, %v2604_v21  ;;  %v13614_v57 = vld [vmem:[#allocation145_spill] sm:$0xff] }
 0x3d7   : > { %v6100_v27 = vpop.eup %6099  ;;  %v3358_v36 = vadd.f32 %v6096_v28, %v3357_v18  ;;  %v3372_v35 = vadd.f32 %v6098_v56, %v3371_v0  ;;  %6119 = vpow2.f32 %v3009_v48  ;;  %v2578_v54 = vsub.f32 %v13614_v57, %v11494_v4  ;;  %v13615_v48 = vld [vmem:[#allocation141_spill] sm:$0xff]  ;;  %v13616_v56 = vld [vmem:[#allocation152_spill] sm:$0xff]  ;;  %v11514_v61 = vpop.permute.xlu0 %2396 }
 0x3d8   : > { %v6102_v22 = vpop.eup %6101  ;;  %6121 = vpow2.f32 %v3011_v53  ;;  %v2608_v18 = vsub.f32 %v13615_v48, %v11474_v33  ;;  %v3019_v0 = vmul.f32 1.442695, %v2606_v45  ;;  %v2579_v29 = vsub.f32 %v13616_v56, %v11494_v4  ;;  %13617 = vst [vmem:[#allocation261_spill] sm:$0xff] %v11514_v61  ;;  %v13619_v48 = vld [vmem:[#allocation276_spill] sm:$0xff] }
 0x3d9   : > { %v6104_v43 = vpop.eup %6103  ;;  %3359 = vadd.xlane.f32.xlu1 %v3358_v36  ;;  %v3373_v32 = vadd.f32 %v6100_v27, %v3372_v35  ;;  %6123 = vpow2.f32 %v2941_v63  ;;  %v2961_v17 = vmul.f32 1.442695, %v2577_v24  ;;  %v3021_v63 = vmul.f32 1.442695, %v2607_v46 }
 0x3da   : > { %v6106_v28 = vpop.eup %6105  ;;  %6125 = vpow2.f32 %v3013_v51  ;;  %v2580_v27 = vsub.f32 %v13618_v31, %v11494_v4  ;;  %v2963_v36 = vmul.f32 1.442695, %v2578_v54  ;;  %v2581_v56 = vsub.f32 %v13619_v48, %v11494_v4  ;;  %v13622_v54 = vld [vmem:[#allocation174_spill] sm:$0xff] }
 0x3db   : > { %v6108_v11 = vpop.eup %6107  ;;  %v3374_v53 = vadd.f32 %v6102_v22, %v3373_v32  ;;  %6127 = vpow2.f32 %v2943_v49  ;;  %v3343_v21 = vadd.f32 %v6106_v28, %v6104_v43  ;;  %v11520_v49 = vpop.permute.xlu1 %4917  ;;  %v3023_v24 = vmul.f32 1.442695, %v2608_v18  ;;  %v13621_v43 = vld [vmem:[#allocation109_spill] sm:$0xff] }
 0x3dc   : > { %v6110_v57 = vpop.eup %6109  ;;  %6129 = vpow2.f32 %v3015_v8  ;;  %13620 = vst [vmem:[#allocation262_spill] sm:$0xff] %v11520_v49  ;;  %v2582_v8 = vsub.f32 %v13621_v43, %v11494_v4  ;;  %v2965_v46 = vmul.f32 1.442695, %v2579_v29  ;;  %v2969_v29 = vmul.f32 1.442695, %v2581_v56  ;;  %v13627_v56 = vld [vmem:[#allocation186_spill] sm:$0xff] }
 0x3dd   : > { %v6112_v35 = vpop.eup %6111  ;;  %v3375_v51 = vadd.f32 %v6108_v11, %v3374_v53  ;;  %v3344_v45 = vadd.f32 %v6110_v57, %v3343_v21  ;;  %6131 = vpow2.f32 %v3017_v5  ;;  %v2617_v11 = vsub.f32 %v13622_v54, %v11514_v61  ;;  %v13623_v53 = vld [vmem:[#allocation148_spill] sm:$0xff] }
 0x3de   : > { %v6114_v22 = vpop.eup %6113  ;;  %6133 = vpow2.f32 %v3019_v0  ;;  %v2583_v21 = vsub.f32 %v13623_v53, %v11494_v4  ;;  %v2967_v57 = vmul.f32 1.442695, %v2580_v27  ;;  %v13624_v0 = vld [vmem:[#allocation176_spill] sm:$0xff] }
 0x3df   : > { %v6116_v32 = vpop.eup %6115  ;;  %v3376_v28 = vadd.f32 %v6112_v35, %v3375_v51  ;;  %v3345_v31 = vadd.f32 %v6114_v22, %v3344_v45  ;;  %6135 = vpow2.f32 %v2961_v17  ;;  %v2618_v18 = vsub.f32 %v13624_v0, %v11514_v61  ;;  %v13625_v17 = vld [vmem:[#allocation128_spill] sm:$0xff]  ;;  %v13626_v22 = vld [vmem:[#allocation182_spill] sm:$0xff]  ;;  %v11534_v49 = vpop.permute.xlu1 %2381 }
 0x3e0   : > { %v6118_v5 = vpop.eup %6117  ;;  %6137 = vpow2.f32 %v2963_v36  ;;  %v2584_v51 = vsub.f32 %v13625_v17, %v11494_v4  ;;  %v2971_v45 = vmul.f32 1.442695, %v2582_v8  ;;  %v2619_v54 = vsub.f32 %v13626_v22, %v11514_v61  ;;  %v13628_v17 = vld [vmem:[#allocation281_spill] sm:$0xff] }
 0x3e1   : > { %v6120_v48 = vpop.eup %6119  ;;  %3377 = vadd.xlane.f32.xlu1 %v3376_v28  ;;  %v3346_v43 = vadd.f32 %v6116_v32, %v3345_v31  ;;  %6139 = vpow2.f32 %v3021_v63  ;;  %v3041_v33 = vmul.f32 1.442695, %v2617_v11  ;;  %v2973_v63 = vmul.f32 1.442695, %v2583_v21 }
 0x3e2   : > { %v6122_v35 = vpop.eup %6121  ;;  %6141 = vpow2.f32 %v2965_v46  ;;  %v2620_v32 = vsub.f32 %v13627_v56, %v11514_v61  ;;  %v3043_v28 = vmul.f32 1.442695, %v2618_v18  ;;  %v2621_v22 = vsub.f32 %v13628_v17, %v11514_v61  ;;  %v13631_v18 = vld [vmem:[#allocation153_spill] sm:$0xff] }
 0x3e3   : > { %v6124_v53 = vpop.eup %6123  ;;  %v3347_v36 = vadd.f32 %v6118_v5, %v3346_v43  ;;  %6143 = vpow2.f32 %v3023_v24  ;;  %v3388_v27 = vadd.f32 %v6122_v35, %v6120_v48  ;;  %v11540_v24 = vpop.permute.xlu0 %4942  ;;  %v2975_v11 = vmul.f32 1.442695, %v2584_v51  ;;  %v13630_v48 = vld [vmem:[#allocation157_spill] sm:$0xff] }
 0x3e4   : > { %v6126_v0 = vpop.eup %6125  ;;  %6145 = vpow2.f32 %v2967_v57  ;;  %13629 = vst [vmem:[#allocation51_spill] sm:$0xff] %v11540_v24  ;;  %v2622_v57 = vsub.f32 %v13630_v48, %v11514_v61  ;;  %v3045_v21 = vmul.f32 1.442695, %v2619_v54  ;;  %v3049_v54 = vmul.f32 1.442695, %v2621_v22  ;;  %v13637_v22 = vld [vmem:[#allocation167_spill] sm:$0xff] }
 0x3e5   : > { %v6128_v31 = vpop.eup %6127  ;;  %v3348_v46 = vadd.f32 %v6124_v53, %v3347_v36  ;;  %v3389_v8 = vadd.f32 %v6126_v0, %v3388_v27  ;;  %6147 = vpow2.f32 %v2969_v29  ;;  %v2593_v53 = vsub.f32 %v13631_v18, %v11534_v49  ;;  %v13632_v36 = vld [vmem:[#allocation195_spill] sm:$0xff] }
 0x3e6   : > { %v6130_v5 = vpop.eup %6129  ;;  %6149 = vpow2.f32 %v2971_v45  ;;  %v2623_v27 = vsub.f32 %v13632_v36, %v11514_v61  ;;  %v3047_v0 = vmul.f32 1.442695, %v2620_v32  ;;  %v13633_v45 = vld [vmem:[#allocation154_spill] sm:$0xff] }
 0x3e7   : > { %v6132_v43 = vpop.eup %6131  ;;  %v3349_v35 = vadd.f32 %v6128_v31, %v3348_v46  ;;  %v3390_v56 = vadd.f32 %v6130_v5, %v3389_v8  ;;  %6151 = vpow2.f32 %v3041_v33  ;;  %v2594_v51 = vsub.f32 %v13633_v45, %v11534_v49  ;;  %v13634_v33 = vld [vmem:[#allocation284_spill] sm:$0xff]  ;;  %v13635_v5 = vld [vmem:[#allocation161_spill] sm:$0xff]  ;;  %v11554_v4 = vpop.permute.xlu0 %2406 }
 0x3e8   : > { %v6134_v29 = vpop.eup %6133  ;;  %6153 = vpow2.f32 %v3043_v28  ;;  %v2624_v46 = vsub.f32 %v13634_v33, %v11514_v61  ;;  %v3051_v8 = vmul.f32 1.442695, %v2622_v57  ;;  %v2595_v18 = vsub.f32 %v13635_v5, %v11534_v49  ;;  %13636 = vst [vmem:[#allocation63_spill] sm:$0xff] %v11554_v4  ;;  %v13638_v33 = vld [vmem:[#allocation175_spill] sm:$0xff] }
 0x3e9   : > { %v6136_v17 = vpop.eup %6135  ;;  %3350 = vadd.xlane.f32.xlu0 %v3349_v35  ;;  %v3391_v48 = vadd.f32 %v6132_v43, %v3390_v56  ;;  %6155 = vpow2.f32 %v2973_v63  ;;  %v2993_v24 = vmul.f32 1.442695, %v2593_v53  ;;  %v3053_v63 = vmul.f32 1.442695, %v2623_v27 }
 0x3ea   : > { %v6138_v31 = vpop.eup %6137  ;;  %6157 = vpow2.f32 %v3045_v21  ;;  %v2596_v43 = vsub.f32 %v13637_v22, %v11534_v49  ;;  %v2995_v35 = vmul.f32 1.442695, %v2594_v51  ;;  %v2597_v5 = vsub.f32 %v13638_v33, %v11534_v49  ;;  %v13641_v51 = vld [vmem:[#allocation188_spill] sm:$0xff] }
 0x3eb   : > { %v6140_v36 = vpop.eup %6139  ;;  %v3392_v28 = vadd.f32 %v6134_v29, %v3391_v48  ;;  %6159 = vpow2.f32 %v2975_v11  ;;  %v3361_v32 = vadd.f32 %v6138_v31, %v6136_v17  ;;  %v11560_v11 = vpop.permute.xlu1 %4927  ;;  %v3055_v53 = vmul.f32 1.442695, %v2624_v46  ;;  %v13640_v17 = vld [vmem:[#allocation137_spill] sm:$0xff] }
 0x3ec   : > { %v6142_v45 = vpop.eup %6141  ;;  %6161 = vpow2.f32 %v3047_v0  ;;  %13639 = vst [vmem:[#allocation60_spill] sm:$0xff] %v11560_v11  ;;  %v2598_v0 = vsub.f32 %v13640_v17, %v11534_v49  ;;  %v2997_v27 = vmul.f32 1.442695, %v2595_v18  ;;  %v3001_v18 = vmul.f32 1.442695, %v2597_v5  ;;  %v13646_v5 = vld [vmem:[#allocation204_spill] sm:$0xff] }
 0x3ed   : > { %v6144_v56 = vpop.eup %6143  ;;  %v3393_v21 = vadd.f32 %v6140_v36, %v3392_v28  ;;  %v3362_v57 = vadd.f32 %v6142_v45, %v3361_v32  ;;  %6163 = vpow2.f32 %v3049_v54  ;;  %v2633_v36 = vsub.f32 %v13641_v51, %v11554_v4  ;;  %v13642_v28 = vld [vmem:[#allocation177_spill] sm:$0xff] }
 0x3ee   : > { %v6146_v29 = vpop.eup %6145  ;;  %6165 = vpow2.f32 %v3051_v8  ;;  %v2599_v32 = vsub.f32 %v13642_v28, %v11534_v49  ;;  %v2999_v45 = vmul.f32 1.442695, %v2596_v43  ;;  %v13643_v8 = vld [vmem:[#allocation189_spill] sm:$0xff] }
 0x3ef   : > { %v6148_v48 = vpop.eup %6147  ;;  %v3394_v31 = vadd.f32 %v6144_v56, %v3393_v21  ;;  %v3363_v22 = vadd.f32 %v6146_v29, %v3362_v57  ;;  %6167 = vpow2.f32 %v2993_v24  ;;  %v2634_v46 = vsub.f32 %v13643_v8, %v11554_v4  ;;  %v13644_v24 = vld [vmem:[#allocation190_spill] sm:$0xff]  ;;  %v13645_v29 = vld [vmem:[#allocation197_spill] sm:$0xff]  ;;  %v11574_v11 = vpop.permute.xlu1 %2391 }
 0x3f0   : > { %v6150_v54 = vpop.eup %6149  ;;  %6169 = vpow2.f32 %v2995_v35  ;;  %v2600_v21 = vsub.f32 %v13644_v24, %v11534_v49  ;;  %v3003_v57 = vmul.f32 1.442695, %v2598_v0  ;;  %v2635_v51 = vsub.f32 %v13645_v29, %v11554_v4  ;;  %v13647_v24 = vld [vmem:[#allocation207_spill] sm:$0xff] }
 0x3f1   : > { %v6152_v33 = vpop.eup %6151  ;;  %3395 = vadd.xlane.f32.xlu1 %v3394_v31  ;;  %v3364_v17 = vadd.f32 %v6148_v48, %v3363_v22  ;;  %6171 = vpow2.f32 %v3053_v63  ;;  %v3073_v61 = vmul.f32 1.442695, %v2633_v36  ;;  %v3005_v63 = vmul.f32 1.442695, %v2599_v32 }
 0x3f2   : > { %v6154_v56 = vpop.eup %6153  ;;  %6173 = vpow2.f32 %v2997_v27  ;;  %v2636_v48 = vsub.f32 %v13646_v5, %v11554_v4  ;;  %v3075_v31 = vmul.f32 1.442695, %v2634_v46  ;;  %v2637_v29 = vsub.f32 %v13647_v24, %v11554_v4  ;;  %v13650_v46 = vld [vmem:[#allocation165_spill] sm:$0xff] }
 0x3f3   : > { %v6156_v28 = vpop.eup %6155  ;;  %v3365_v35 = vadd.f32 %v6150_v54, %v3364_v17  ;;  %6175 = vpow2.f32 %v3055_v53  ;;  %v3406_v43 = vadd.f32 %v6154_v56, %v6152_v33  ;;  %v11580_v53 = vpop.permute.xlu0 %4952  ;;  %v3007_v36 = vmul.f32 1.442695, %v2600_v21  ;;  %v13649_v33 = vld [vmem:[#allocation169_spill] sm:$0xff] }
 0x3f4   : > { %v6158_v8 = vpop.eup %6157  ;;  %6177 = vpow2.f32 %v2999_v45  ;;  %13648 = vst [vmem:[#allocation103_spill] sm:$0xff] %v11580_v53  ;;  %v2638_v45 = vsub.f32 %v13649_v33, %v11554_v4  ;;  %v3077_v32 = vmul.f32 1.442695, %v2635_v51  ;;  %v3081_v51 = vmul.f32 1.442695, %v2637_v29  ;;  %v13653_v29 = vld [vmem:[#allocation179_spill] sm:$0xff] }
 0x3f5   : > { %v6160_v22 = vpop.eup %6159  ;;  %v3366_v27 = vadd.f32 %v6156_v28, %v3365_v35  ;;  %v3407_v0 = vadd.f32 %v6158_v8, %v3406_v43  ;;  %6179 = vpow2.f32 %v3001_v18  ;;  %v2609_v28 = vsub.f32 %v13650_v46, %v11574_v11 }
 0x3f6   : > { %v6162_v54 = vpop.eup %6161  ;;  %6181 = vpow2.f32 %v3003_v57  ;;  %v2639_v35 = vsub.f32 %v10329_v23, %v11554_v4  ;;  %v3079_v43 = vmul.f32 1.442695, %v2636_v48  ;;  %v13651_v57 = vld [vmem:[#allocation166_spill] sm:$0xff] }
 0x3f7   : > { %v6164_v17 = vpop.eup %6163  ;;  %v3367_v56 = vadd.f32 %v6160_v22, %v3366_v27  ;;  %v3408_v5 = vadd.f32 %v6162_v54, %v3407_v0  ;;  %6183 = vpow2.f32 %v3073_v61  ;;  %v2610_v21 = vsub.f32 %v13651_v57, %v11574_v11  ;;  %v13652_v0 = vld [vmem:[#allocation172_spill] sm:$0xff]  ;;  %v11594_v57 = vpop.permute.xlu0 %2416 }
 0x3f8   : > { %v6166_v18 = vpop.eup %6165  ;;  %6185 = vpow2.f32 %v3075_v31  ;;  %v2640_v61 = vsub.f32 %v10374_v50, %v11554_v4  ;;  %v3083_v27 = vmul.f32 1.442695, %v2638_v45  ;;  %v2611_v54 = vsub.f32 %v13652_v0, %v11574_v11 }
 0x3f9   : > { %v6168_v8 = vpop.eup %6167  ;;  %3368 = vadd.xlane.f32.xlu0 %v3367_v56  ;;  %v3409_v24 = vadd.f32 %v6164_v17, %v3408_v5  ;;  %6187 = vpow2.f32 %v3005_v63  ;;  %v3025_v33 = vmul.f32 1.442695, %v2609_v28  ;;  %v3085_v63 = vmul.f32 1.442695, %v2639_v35  ;;  %v13654_v5 = vld [vmem:[#allocation140_spill] sm:$0xff] }
 0x3fa   : > { %v6170_v22 = vpop.eup %6169  ;;  %6189 = vpow2.f32 %v3077_v32  ;;  %v2612_v17 = vsub.f32 %v13653_v29, %v11574_v11  ;;  %v3027_v56 = vmul.f32 1.442695, %v2610_v21  ;;  %v2613_v0 = vsub.f32 %v13654_v5, %v11574_v11  ;;  %v13656_v21 = vld [vmem:[#allocation199_spill] sm:$0xff] }
 0x3fb   : > { %v6172_v23 = vpop.eup %6171  ;;  %v3410_v31 = vadd.f32 %v6166_v18, %v3409_v24  ;;  %6191 = vpow2.f32 %v3007_v36  ;;  %v3379_v48 = vadd.f32 %v6170_v22, %v6168_v8  ;;  %v11600_v36 = vpop.permute.xlu1 %4937  ;;  %v3087_v28 = vmul.f32 1.442695, %v2640_v61  ;;  %v13655_v8 = vld [vmem:[#allocation194_spill] sm:$0xff] }
 0x3fc   : > { %v6174_v46 = vpop.eup %6173  ;;  %6193 = vpow2.f32 %v3079_v43  ;;  %v2614_v43 = vsub.f32 %v13655_v8, %v11574_v11  ;;  %v3029_v35 = vmul.f32 1.442695, %v2611_v54  ;;  %v3033_v54 = vmul.f32 1.442695, %v2613_v0 }
 0x3fd   : > { %v6176_v50 = vpop.eup %6175  ;;  %v3411_v32 = vadd.f32 %v6172_v23, %v3410_v31  ;;  %v3380_v45 = vadd.f32 %v6174_v46, %v3379_v48  ;;  %6195 = vpow2.f32 %v3081_v51  ;;  %v2649_v23 = vsub.f32 %v13656_v21, %v11594_v57  ;;  %v13657_v31 = vld [vmem:[#allocation185_spill] sm:$0xff] }
 0x3fe   : > { %v6178_v18 = vpop.eup %6177  ;;  %6197 = vpow2.f32 %v3083_v27  ;;  %v2615_v48 = vsub.f32 %v13657_v31, %v11574_v11  ;;  %v3031_v46 = vmul.f32 1.442695, %v2612_v17  ;;  %v13658_v27 = vld [vmem:[#allocation200_spill] sm:$0xff]  ;;  %v2652_v0 = vsub.f32 %v13329_v10, %v11594_v57 }
 0x3ff   : > { %v6180_v24 = vpop.eup %6179  ;;  %v3412_v22 = vadd.f32 %v6176_v50, %v3411_v32  ;;  %v3381_v29 = vadd.f32 %v6178_v18, %v3380_v45  ;;  %6199 = vpow2.f32 %v3025_v33  ;;  %v2650_v61 = vsub.f32 %v13658_v27, %v11594_v57  ;;  %v13659_v33 = vld [vmem:[#allocation283_spill] sm:$0xff]  ;;  %v13660_v18 = vld [vmem:[#allocation206_spill] sm:$0xff]  ;;  %v11614_v53 = vpop.permute.xlu1 %2401 }
 0x400   : > { %v6182_v51 = vpop.eup %6181  ;;  %6201 = vpow2.f32 %v3027_v56  ;;  %v2616_v32 = vsub.f32 %v13659_v33, %v11574_v11  ;;  %v3035_v45 = vmul.f32 1.442695, %v2614_v43  ;;  %v2651_v21 = vsub.f32 %v13660_v18, %v11594_v57 }
 0x401   : > { %v6184_v5 = vpop.eup %6183  ;;  %3413 = vadd.xlane.f32.xlu1 %v3412_v22  ;;  %v3382_v8 = vadd.f32 %v6180_v24, %v3381_v29  ;;  %6203 = vpow2.f32 %v3085_v63  ;;  %v3105_v4 = vmul.f32 1.442695, %v2649_v23  ;;  %v3037_v63 = vmul.f32 1.442695, %v2615_v48  ;;  %v13661_v29 = vld [vmem:[#allocation215_spill] sm:$0xff] }
 0x402   : > { %v6186_v50 = vpop.eup %6185  ;;  %6205 = vpow2.f32 %v3029_v35  ;;  %v3107_v24 = vmul.f32 1.442695, %v2650_v61  ;;  %v2653_v33 = vsub.f32 %v13661_v29, %v11594_v57  ;;  %v3039_v23 = vmul.f32 1.442695, %v2616_v32  ;;  %v13662_v61 = vld [vmem:[#allocation183_spill] sm:$0xff] }
 0x403   : > { %v6188_v31 = vpop.eup %6187  ;;  %v3383_v56 = vadd.f32 %v6182_v51, %v3382_v8  ;;  %6207 = vpow2.f32 %v3087_v28  ;;  %v3424_v17 = vadd.f32 %v6186_v50, %v6184_v5  ;;  %v11620_v28 = vpop.permute.xlu0 %4962  ;;  %v3109_v48 = vmul.f32 1.442695, %v2651_v21 }
 0x404   : > { %v6190_v27 = vpop.eup %6189  ;;  %6209 = vpow2.f32 %v3031_v46  ;;  %v2654_v46 = vsub.f32 %v10404_v59, %v11594_v57  ;;  %v2625_v50 = vsub.f32 %v13662_v61, %v11614_v53  ;;  %v2655_v18 = vsub.f32 %v10425_v2, %v11594_v57 }
 0x405   : > { %v6192_v22 = vpop.eup %6191  ;;  %v3384_v35 = vadd.f32 %v6188_v31, %v3383_v56  ;;  %v3425_v43 = vadd.f32 %v6190_v27, %v3424_v17  ;;  %6211 = vpow2.f32 %v3033_v54  ;;  %v3111_v31 = vmul.f32 1.442695, %v2652_v0 }
 0x406   : > { %v6194_v51 = vpop.eup %6193  ;;  %6213 = vpow2.f32 %v3035_v45  ;;  %v13663_v45 = vld [vmem:[#allocation184_spill] sm:$0xff]  ;;  %v3113_v21 = vmul.f32 1.442695, %v2653_v33  ;;  %v3115_v27 = vmul.f32 1.442695, %v2654_v46  ;;  %v13665_v33 = vld [vmem:[#allocation202_spill] sm:$0xff] }
 0x407   : > { %v6196_v5 = vpop.eup %6195  ;;  %v3385_v8 = vadd.f32 %v6192_v22, %v3384_v35  ;;  %v3426_v10 = vadd.f32 %v6194_v51, %v3425_v43  ;;  %6215 = vpow2.f32 %v3105_v4  ;;  %v2626_v32 = vsub.f32 %v13663_v45, %v11614_v53  ;;  %v13664_v22 = vld [vmem:[#allocation193_spill] sm:$0xff]  ;;  %v11634_v51 = vpop.permute.xlu0 %2426 }
 0x408   : > { %v6198_v54 = vpop.eup %6197  ;;  %6217 = vpow2.f32 %v3107_v24  ;;  %v2656_v4 = vsub.f32 %v10456_v39, %v11594_v57  ;;  %v2627_v35 = vsub.f32 %v13664_v22, %v11614_v53  ;;  %v3057_v43 = vmul.f32 1.442695, %v2625_v50  ;;  %v13667_v45 = vld [vmem:[#allocation213_spill] sm:$0xff] }
 0x409   : > { %v6200_v56 = vpop.eup %6199  ;;  %3386 = vadd.xlane.f32.xlu0 %v3385_v8  ;;  %v3427_v59 = vadd.f32 %v6196_v5, %v3426_v10  ;;  %6219 = vpow2.f32 %v3037_v63  ;;  %v3117_v63 = vmul.f32 1.442695, %v2655_v18  ;;  %v2628_v5 = vsub.f32 %v13665_v33, %v11614_v53  ;;  %v13666_v10 = vld [vmem:[#allocation282_spill] sm:$0xff] }
 0x40a   : > { %v6202_v17 = vpop.eup %6201  ;;  %6221 = vpow2.f32 %v3109_v48  ;;  %v3059_v8 = vmul.f32 1.442695, %v2626_v32  ;;  %v2629_v61 = vsub.f32 %v13666_v10, %v11614_v53  ;;  %v3119_v50 = vmul.f32 1.442695, %v2656_v4  ;;  %v13668_v32 = vld [vmem:[#allocation216_spill] sm:$0xff] }
 0x40b   : > { %v6204_v2 = vpop.eup %6203  ;;  %v3428_v24 = vadd.f32 %v6198_v54, %v3427_v59  ;;  %6223 = vpow2.f32 %v3039_v23  ;;  %v3397_v0 = vadd.f32 %v6202_v17, %v6200_v56  ;;  %v11640_v23 = vpop.permute.xlu1 %4947  ;;  %v3061_v18 = vmul.f32 1.442695, %v2627_v35  ;;  %v13672_v10 = vld [vmem:[#allocation224_spill] sm:$0xff] }
 0x40c   : > { %v6206_v29 = vpop.eup %6205  ;;  %6225 = vpow2.f32 %v3111_v31  ;;  %v2630_v31 = vsub.f32 %v13667_v45, %v11614_v53  ;;  %v2665_v22 = vsub.f32 %v13668_v32, %v11634_v51  ;;  %v3065_v35 = vmul.f32 1.442695, %v2629_v61 }
 0x40d   : > { %v6208_v39 = vpop.eup %6207  ;;  %v3429_v48 = vadd.f32 %v6204_v2, %v3428_v24  ;;  %v3398_v46 = vadd.f32 %v6206_v29, %v3397_v0  ;;  %6227 = vpow2.f32 %v3113_v21  ;;  %v13669_v2 = vld [vmem:[#allocation285_spill] sm:$0xff]  ;;  %v3063_v0 = vmul.f32 1.442695, %v2628_v5 }
 0x40e   : > { %v6210_v54 = vpop.eup %6209  ;;  %6229 = vpow2.f32 %v3115_v27  ;;  %v2631_v24 = vsub.f32 %v13669_v2, %v11614_v53  ;;  %v13670_v27 = vld [vmem:[#allocation217_spill] sm:$0xff]  ;;  %v3137_v32 = vmul.f32 1.442695, %v2665_v22  ;;  %v2668_v61 = vsub.f32 %v13341_v62, %v11634_v51 }
 0x40f   : > { %v6212_v56 = vpop.eup %6211  ;;  %v3430_v59 = vadd.f32 %v6208_v39, %v3429_v48  ;;  %v3399_v17 = vadd.f32 %v6210_v54, %v3398_v46  ;;  %6231 = vpow2.f32 %v3057_v43  ;;  %v2666_v4 = vsub.f32 %v13670_v27, %v11634_v51  ;;  %v13671_v43 = vld [vmem:[#allocation208_spill] sm:$0xff]  ;;  %v11654_v27 = vpop.permute.xlu1 %2411 }
 0x410   : > { %v6214_v21 = vpop.eup %6213  ;;  %6233 = vpow2.f32 %v3059_v8  ;;  %v2632_v48 = vsub.f32 %v13671_v43, %v11614_v53  ;;  %v3067_v46 = vmul.f32 1.442695, %v2630_v31  ;;  %v2667_v54 = vsub.f32 %v13672_v10, %v11634_v51 }
 0x411   : > { %v6216_v29 = vpop.eup %6215  ;;  %3431 = vadd.xlane.f32.xlu1 %v3430_v59  ;;  %v3400_v33 = vadd.f32 %v6212_v56, %v3399_v17  ;;  %6235 = vpow2.f32 %v3117_v63  ;;  %v3069_v63 = vmul.f32 1.442695, %v2631_v24  ;;  %v3139_v56 = vmul.f32 1.442695, %v2666_v4  ;;  %v13673_v4 = vld [vmem:[#allocation191_spill] sm:$0xff] }
 0x412   : > { %v6218_v39 = vpop.eup %6217  ;;  %6237 = vpow2.f32 %v3061_v18  ;;  %v2669_v17 = vsub.f32 %v10451_v13, %v11634_v51  ;;  %v3071_v22 = vmul.f32 1.442695, %v2632_v48  ;;  %v3141_v24 = vmul.f32 1.442695, %v2667_v54 }
 0x413   : > { %v6220_v45 = vpop.eup %6219  ;;  %v3401_v8 = vadd.f32 %v6214_v21, %v3400_v33  ;;  %6239 = vpow2.f32 %v3119_v50  ;;  %v3442_v5 = vadd.f32 %v6218_v39, %v6216_v29  ;;  %v11660_v50 = vpop.permute.xlu0 %4972  ;;  %v2641_v39 = vsub.f32 %v13673_v4, %v11654_v27 }
 0x414   : > { %v6222_v2 = vpop.eup %6221  ;;  %6241 = vpow2.f32 %v3063_v0  ;;  %v2670_v0 = vsub.f32 %v10478_v52, %v11634_v51  ;;  %v2671_v13 = vsub.f32 %v10503_v9, %v11634_v51  ;;  %v3143_v43 = vmul.f32 1.442695, %v2668_v61 }
 0x415   : > { %v6224_v59 = vpop.eup %6223  ;;  %v3402_v18 = vadd.f32 %v6220_v45, %v3401_v8  ;;  %v3443_v31 = vadd.f32 %v6222_v2, %v3442_v5  ;;  %6243 = vpow2.f32 %v3065_v35  ;;  %v3145_v54 = vmul.f32 1.442695, %v2669_v17  ;;  %v13676_v17 = vld [vmem:[#allocation205_spill] sm:$0xff] }
 0x416   : > { %v6226_v21 = vpop.eup %6225  ;;  %6245 = vpow2.f32 %v3067_v46  ;;  %v13674_v46 = vld [vmem:[#allocation192_spill] sm:$0xff]  ;;  %v2672_v8 = vsub.f32 %v10528_v6, %v11634_v51  ;;  %v3147_v5 = vmul.f32 1.442695, %v2670_v0 }
 0x417   : > { %v6228_v29 = vpop.eup %6227  ;;  %v3403_v33 = vadd.f32 %v6224_v59, %v3402_v18  ;;  %v3444_v62 = vadd.f32 %v6226_v21, %v3443_v31  ;;  %6247 = vpow2.f32 %v3137_v32  ;;  %v2642_v48 = vsub.f32 %v13674_v46, %v11654_v27  ;;  %v13675_v32 = vld [vmem:[#allocation198_spill] sm:$0xff]  ;;  %v11674_v31 = vpop.permute.xlu0 %2436 }
 0x418   : > { %v6230_v35 = vpop.eup %6229  ;;  %6249 = vpow2.f32 %v3139_v56  ;;  %v2643_v2 = vsub.f32 %v13675_v32, %v11654_v27  ;;  %v3089_v59 = vmul.f32 1.442695, %v2641_v39  ;;  %v2644_v21 = vsub.f32 %v13676_v17, %v11654_v27 }
 0x419   : > { %v6232_v10 = vpop.eup %6231  ;;  %3404 = vadd.xlane.f32.xlu0 %v3403_v33  ;;  %v3445_v52 = vadd.f32 %v6228_v29, %v3444_v62  ;;  %6251 = vpow2.f32 %v3069_v63  ;;  %v3149_v63 = vmul.f32 1.442695, %v2671_v13  ;;  %v3091_v29 = vmul.f32 1.442695, %v2642_v48  ;;  %v13677_v33 = vld [vmem:[#allocation286_spill] sm:$0xff]  ;;  %v13679_v48 = vld [vmem:[#allocation223_spill] sm:$0xff] }
 0x41a   : > { %v6234_v45 = vpop.eup %6233  ;;  %6253 = vpow2.f32 %v3141_v24  ;;  %v2645_v62 = vsub.f32 %v13677_v33, %v11654_v27  ;;  %v3151_v39 = vmul.f32 1.442695, %v2672_v8  ;;  %v3093_v13 = vmul.f32 1.442695, %v2643_v2 }
 0x41b   : > { %v6236_v9 = vpop.eup %6235  ;;  %v3446_v56 = vadd.f32 %v6230_v35, %v3445_v52  ;;  %6255 = vpow2.f32 %v3071_v22  ;;  %v3415_v61 = vadd.f32 %v6234_v45, %v6232_v10  ;;  %v11680_v22 = vpop.permute.xlu1 %4957  ;;  %v13678_v35 = vld [vmem:[#allocation170_spill] sm:$0xff]  ;;  %v2681_v45 = vsub.f32 %v13679_v48, %v11674_v31 }
 0x41c   : > { %v6238_v18 = vpop.eup %6237  ;;  %6257 = vpow2.f32 %v3143_v43  ;;  %v2646_v43 = vsub.f32 %v13678_v35, %v11654_v27  ;;  %v2647_v32 = vsub.f32 %v10362_v37, %v11654_v27  ;;  %v3097_v2 = vmul.f32 1.442695, %v2645_v62 }
 0x41d   : > { %v6240_v6 = vpop.eup %6239  ;;  %v3447_v24 = vadd.f32 %v6236_v9, %v3446_v56  ;;  %v3416_v0 = vadd.f32 %v6238_v18, %v3415_v61  ;;  %6259 = vpow2.f32 %v3145_v54  ;;  %v3095_v9 = vmul.f32 1.442695, %v2644_v21 }
 0x41e   : > { %v6242_v4 = vpop.eup %6241  ;;  %6261 = vpow2.f32 %v3147_v5  ;;  %v13680_v5 = vld [vmem:[#allocation225_spill] sm:$0xff]  ;;  %v3099_v17 = vmul.f32 1.442695, %v2646_v43  ;;  %v2684_v62 = vsub.f32 %v13355_v16, %v11674_v31  ;;  %v2686_v48 = vsub.f32 %v10556_v55, %v11674_v31 }
 0x41f   : > { %v6244_v46 = vpop.eup %6243  ;;  %v3448_v10 = vadd.f32 %v6240_v6, %v3447_v24  ;;  %v3417_v52 = vadd.f32 %v6242_v4, %v3416_v0  ;;  %6263 = vpow2.f32 %v3089_v59  ;;  %v2682_v8 = vsub.f32 %v13680_v5, %v11674_v31  ;;  %v13681_v6 = vld [vmem:[#allocation228_spill] sm:$0xff]  ;;  %v11694_v4 = vpop.permute.xlu1 %2421 }
 0x420   : > { %v6246_v54 = vpop.eup %6245  ;;  %6265 = vpow2.f32 %v3091_v29  ;;  %v2648_v59 = vsub.f32 %v10442_v1, %v11654_v27  ;;  %v2683_v24 = vsub.f32 %v13681_v6, %v11674_v31  ;;  %v3169_v0 = vmul.f32 1.442695, %v2681_v45 }
 0x421   : > { %v6248_v56 = vpop.eup %6247  ;;  %3449 = vadd.xlane.f32.xlu1 %v3448_v10  ;;  %v3418_v61 = vadd.f32 %v6244_v46, %v3417_v52  ;;  %6267 = vpow2.f32 %v3149_v63  ;;  %v3101_v63 = vmul.f32 1.442695, %v2647_v32  ;;  %v3171_v35 = vmul.f32 1.442695, %v2682_v8 }
 0x422   : > { %v6250_v18 = vpop.eup %6249  ;;  %6269 = vpow2.f32 %v3093_v13  ;;  %v2685_v46 = vsub.f32 %v10532_v34, %v11674_v31  ;;  %v3103_v52 = vmul.f32 1.442695, %v2648_v59  ;;  %v3173_v45 = vmul.f32 1.442695, %v2683_v24 }
 0x423   : > { %v6252_v37 = vpop.eup %6251  ;;  %v3419_v29 = vadd.f32 %v6246_v54, %v3418_v61  ;;  %6271 = vpow2.f32 %v3151_v39  ;;  %v3460_v21 = vadd.f32 %v6250_v18, %v6248_v56  ;;  %v11700_v39 = vpop.permute.xlu0 %4982  ;;  %v2687_v34 = vsub.f32 %v10603_v38, %v11674_v31  ;;  %v13684_v61 = vld [vmem:[#allocation212_spill] sm:$0xff] }
 0x424   : > { %v6254_v33 = vpop.eup %6253  ;;  %6273 = vpow2.f32 %v3095_v9  ;;  %13682 = vst [vmem:[#allocation71_spill] sm:$0xff] %v11700_v39  ;;  %v13683_v9 = vld [vmem:[#allocation211_spill] sm:$0xff]  ;;  %v3175_v56 = vmul.f32 1.442695, %v2684_v62  ;;  %v3177_v59 = vmul.f32 1.442695, %v2685_v46  ;;  %v2688_v6 = vsub.f32 %v10652_v20, %v11674_v31 }
 0x425   : > { %v6256_v1 = vpop.eup %6255  ;;  %v3420_v13 = vadd.f32 %v6252_v37, %v3419_v29  ;;  %v3461_v43 = vadd.f32 %v6254_v33, %v3460_v21  ;;  %6275 = vpow2.f32 %v3097_v2  ;;  %v2657_v5 = vsub.f32 %v13683_v9, %v11694_v4  ;;  %v13685_v37 = vld [vmem:[#allocation222_spill] sm:$0xff]  ;;  %v11714_v21 = vpop.permute.xlu1 %4967 }
 0x426   : > { %v6258_v10 = vpop.eup %6257  ;;  %6277 = vpow2.f32 %v3099_v17  ;;  %v2658_v2 = vsub.f32 %v13684_v61, %v11694_v4  ;;  %v3179_v24 = vmul.f32 1.442695, %v2686_v48  ;;  %v2659_v29 = vsub.f32 %v13685_v37, %v11694_v4 }
 0x427   : > { %v6260_v54 = vpop.eup %6259  ;;  %v3421_v32 = vadd.f32 %v6256_v1, %v3420_v13  ;;  %v3462_v16 = vadd.f32 %v6258_v10, %v3461_v43  ;;  %6279 = vpow2.f32 %v3169_v0  ;;  %v3121_v62 = vmul.f32 1.442695, %v2657_v5  ;;  %v11716_v1 = vpop.permute.xlu0 %2446  ;;  %v13687_v13 = vld [vmem:[#allocation230_spill] sm:$0xff] }
 0x428   : > { %v6262_v8 = vpop.eup %6261  ;;  %6281 = vpow2.f32 %v3171_v35  ;;  %13686 = vst [vmem:[#allocation251_spill] sm:$0xff] %v11716_v1  ;;  %v2660_v20 = vsub.f32 %v13687_v13, %v11694_v4  ;;  %v3123_v43 = vmul.f32 1.442695, %v2658_v2  ;;  %v3125_v9 = vmul.f32 1.442695, %v2659_v29 }
 0x429   : > { %v6264_v18 = vpop.eup %6263  ;;  %3422 = vadd.xlane.f32.xlu0 %v3421_v32  ;;  %v3463_v55 = vadd.f32 %v6260_v54, %v3462_v16  ;;  %6283 = vpow2.f32 %v3101_v63  ;;  %v3181_v63 = vmul.f32 1.442695, %v2687_v34  ;;  %v2662_v16 = vsub.f32 %v10472_v41, %v11694_v4  ;;  %v11730_v37 = vpop.permute.xlu1 %2431 }
 0x42a   : > { %v6266_v17 = vpop.eup %6265  ;;  %6285 = vpow2.f32 %v3173_v45  ;;  %v13688_v45 = vld [vmem:[#allocation209_spill] sm:$0xff]  ;;  %13692 = vst [vmem:[#allocation81_spill] sm:$0xff] %v11730_v37 }
 0x42b   : > { %v6268_v38 = vpop.eup %6267  ;;  %v3464_v0 = vadd.f32 %v6262_v8, %v3463_v55  ;;  %6287 = vpow2.f32 %v3103_v52  ;;  %v3433_v33 = vadd.f32 %v6266_v17, %v6264_v18  ;;  %v2661_v54 = vsub.f32 %v13688_v45, %v11694_v4  ;;  %v13690_v18 = vld [vmem:[#allocation219_spill] sm:$0xff] }
 0x42c   : > { %v6270_v35 = vpop.eup %6269  ;;  %6289 = vpow2.f32 %v3175_v56  ;;  %v3183_v52 = vmul.f32 1.442695, %v2688_v6  ;;  %v13689_v56 = vld [vmem:[#allocation241_spill] sm:$0xff]  ;;  %v2663_v55 = vsub.f32 %v13690_v18, %v11694_v4  ;;  %v13691_v17 = vld [vmem:[#allocation247_spill] sm:$0xff] }
 0x42d   : > { %v6272_v46 = vpop.eup %6271  ;;  %v3465_v10 = vadd.f32 %v6268_v38, %v3464_v0  ;;  %v3434_v48 = vadd.f32 %v6270_v35, %v3433_v33  ;;  %6291 = vpow2.f32 %v3177_v59  ;;  %v2697_v61 = vsub.f32 %v13689_v56, %v11716_v1  ;;  %v11742_v56 = vpop.permute.xlu1 %4977 }
 0x42e   : > { %v6274_v32 = vpop.eup %6273  ;;  %6293 = vpow2.f32 %v3179_v24  ;;  %v3127_v59 = vmul.f32 1.442695, %v2660_v20  ;;  %v2698_v6 = vsub.f32 %v13691_v17, %v11716_v1  ;;  %v3129_v29 = vmul.f32 1.442695, %v2661_v54 }
 0x42f   : > { %v6276_v5 = vpop.eup %6275  ;;  %v3466_v8 = vadd.f32 %v6272_v46, %v3465_v10  ;;  %v3435_v34 = vadd.f32 %v6274_v32, %v3434_v48  ;;  %6295 = vpow2.f32 %v3121_v62  ;;  %v2664_v0 = vsub.f32 %v10519_v25, %v11694_v4  ;;  %v13693_v62 = vld [vmem:[#allocation37_spill] sm:$0xff] }
 0x430   : > { %v6278_v2 = vpop.eup %6277  ;;  %6297 = vpow2.f32 %v3123_v43  ;;  %v3131_v33 = vmul.f32 1.442695, %v2662_v16  ;;  %v2699_v35 = vsub.f32 %v13693_v62, %v11716_v1  ;;  %v3201_v46 = vmul.f32 1.442695, %v2697_v61 }
 0x431   : > { %v6280_v24 = vpop.eup %6279  ;;  %3467 = vadd.xlane.f32.xlu1 %v3466_v8  ;;  %v3436_v41 = vadd.f32 %v6276_v5, %v3435_v34  ;;  %6299 = vpow2.f32 %v3181_v63  ;;  %v3133_v48 = vmul.f32 1.442695, %v2663_v55  ;;  %v2700_v63 = vsub.f32 %v13367_v30, %v11716_v1 }
 0x432   : > { %v6282_v38 = vpop.eup %6281  ;;  %6301 = vpow2.f32 %v3125_v9  ;;  %v3203_v45 = vmul.f32 1.442695, %v2698_v6  ;;  %v2701_v16 = vsub.f32 %v10609_v3, %v11716_v1  ;;  %v3135_v5 = vmul.f32 1.442695, %v2664_v0  ;;  %v13695_v3 = vld [vmem:[#allocation221_spill] sm:$0xff] }
 0x433   : > { %v6284_v13 = vpop.eup %6283  ;;  %v3437_v20 = vadd.f32 %v6278_v2, %v3436_v41  ;;  %6303 = vpow2.f32 %v3183_v52  ;;  %v3478_v43 = vadd.f32 %v6282_v38, %v6280_v24  ;;  %v2702_v52 = vsub.f32 %v10637_v19, %v11716_v1  ;;  %v13694_v2 = vld [vmem:[#allocation220_spill] sm:$0xff] }
 0x434   : > { %v6286_v10 = vpop.eup %6285  ;;  %6305 = vpow2.f32 %v3127_v59  ;;  %v3205_v8 = vmul.f32 1.442695, %v2699_v35  ;;  %v2673_v18 = vsub.f32 %v13694_v2, %v11730_v37  ;;  %v3207_v59 = vmul.f32 1.442695, %v2700_v63 }
 0x435   : > { %v6288_v54 = vpop.eup %6287  ;;  %v3438_v32 = vadd.f32 %v6284_v13, %v3437_v20  ;;  %v3479_v25 = vadd.f32 %v6286_v10, %v3478_v43  ;;  %6307 = vpow2.f32 %v3129_v29  ;;  %v2674_v17 = vsub.f32 %v13695_v3, %v11730_v37  ;;  %v13697_v10 = vld [vmem:[#allocation232_spill] sm:$0xff] }
 0x436   : > { %v6290_v9 = vpop.eup %6289  ;;  %6309 = vpow2.f32 %v3131_v33  ;;  %v2703_v19 = vsub.f32 %v10672_v44, %v11716_v1  ;;  %v3209_v41 = vmul.f32 1.442695, %v2701_v16  ;;  %v2704_v38 = vsub.f32 %v10684_v15, %v11716_v1  ;;  %v13696_v33 = vld [vmem:[#allocation227_spill] sm:$0xff]  ;;  %v13699_v16 = vld [vmem:[#allocation180_spill] sm:$0xff] }
 0x437   : > { %v6292_v34 = vpop.eup %6291  ;;  %v3439_v61 = vadd.f32 %v6288_v54, %v3438_v32  ;;  %v3480_v30 = vadd.f32 %v6290_v9, %v3479_v25  ;;  %6311 = vpow2.f32 %v3201_v46  ;;  %v3211_v0 = vmul.f32 1.442695, %v2702_v52 }
 0x438   : > { %v6294_v55 = vpop.eup %6293  ;;  %6313 = vpow2.f32 %v3203_v45  ;;  %v2675_v62 = vsub.f32 %v13696_v33, %v11730_v37  ;;  %v3153_v43 = vmul.f32 1.442695, %v2673_v18  ;;  %v2676_v44 = vsub.f32 %v13697_v10, %v11730_v37  ;;  %v11756_v45 = vpop.permute.xlu1 %2441 }
 0x439   : > { %v6296_v6 = vpop.eup %6295  ;;  %3440 = vadd.xlane.f32.xlu0 %v3439_v61  ;;  %v3481_v24 = vadd.f32 %v6292_v34, %v3480_v30  ;;  %6315 = vpow2.f32 %v3133_v48  ;;  %v3155_v48 = vmul.f32 1.442695, %v2674_v17  ;;  %13698 = vst [vmem:[#allocation43_spill] sm:$0xff] %v11756_v45  ;;  %v3213_v32 = vmul.f32 1.442695, %v2703_v19  ;;  %v13702_v19 = vld [vmem:[#allocation214_spill] sm:$0xff] }
 0x43a   : > { %v6298_v29 = vpop.eup %6297  ;;  %6317 = vpow2.f32 %v3205_v8  ;;  %v2677_v9 = vsub.f32 %v13699_v16, %v11730_v37  ;;  %v3157_v52 = vmul.f32 1.442695, %v2675_v62  ;;  %v3215_v30 = vmul.f32 1.442695, %v2704_v38  ;;  %v6521_v16 = vld [vmem:[#allocation2 + $0x18] sm:$0xff] }
 0x43b   : > { %v6300_v35 = vpop.eup %6299  ;;  %v3482_v13 = vadd.f32 %v6294_v55, %v3481_v24  ;;  %6319 = vpow2.f32 %v3135_v5  ;;  %v3451_v20 = vadd.f32 %v6298_v29, %v6296_v6  ;;  %v2678_v5 = vsub.f32 %v10550_v12, %v11730_v37  ;;  %v13700_v55 = vld [vmem:[#allocation235_spill] sm:$0xff]  ;;  %v13701_v6 = vld [vmem:[#allocation236_spill] sm:$0xff] }
 0x43c   : > { %v6302_v46 = vpop.eup %6301  ;;  %6321 = vpow2.f32 %v3207_v59  ;;  %v3159_v18 = vmul.f32 1.442695, %v2676_v44  ;;  %v2689_v59 = vsub.f32 %v13700_v55, %v11756_v45  ;;  %v2690_v24 = vsub.f32 %v13701_v6, %v11756_v45  ;;  %v13708_v6 = vld [vmem:[#allocation187_spill] sm:$0xff] }
 0x43d   : > { %v6304_v63 = vpop.eup %6303  ;;  %v3483_v15 = vadd.f32 %v6300_v35, %v3482_v13  ;;  %v3452_v54 = vadd.f32 %v6302_v46, %v3451_v20  ;;  %6323 = vpow2.f32 %v3209_v41  ;;  %v2679_v41 = vsub.f32 %v13702_v19, %v11730_v37  ;;  %v13703_v35 = vld [vmem:[#allocation242_spill] sm:$0xff] }
 0x43e   : > { %v6306_v25 = vpop.eup %6305  ;;  %6325 = vpow2.f32 %v3211_v0  ;;  %v3161_v29 = vmul.f32 1.442695, %v2677_v9  ;;  %v3163_v38 = vmul.f32 1.442695, %v2678_v5  ;;  %v2691_v13 = vsub.f32 %v13703_v35, %v11756_v45  ;;  %v13706_v9 = vld [vmem:[#allocation239_spill] sm:$0xff] }
 0x43f   : > { %v6308_v8 = vpop.eup %6307  ;;  %v3484_v34 = vadd.f32 %v6304_v63, %v3483_v15  ;;  %v3453_v61 = vadd.f32 %v6306_v25, %v3452_v54  ;;  %6327 = vpow2.f32 %v3153_v43  ;;  %v13704_v43 = vld [vmem:[#allocation233_spill] sm:$0xff]  ;;  %v3185_v10 = vmul.f32 1.442695, %v2689_v59  ;;  %v13705_v15 = vld [vmem:[#allocation244_spill] sm:$0xff] }
 0x440   : > { %v6310_v2 = vpop.eup %6309  ;;  %6329 = vpow2.f32 %v3155_v48  ;;  %v2680_v46 = vsub.f32 %v13704_v43, %v11730_v37  ;;  %v2692_v54 = vsub.f32 %v13705_v15, %v11756_v45  ;;  %v2196_v5 = vsub.f32 %v6521_v16, %v13706_v9  ;;  %v13712_v16 = vld [vmem:[#allocation234_spill] sm:$0xff] }
 0x441   : > { %v6312_v3 = vpop.eup %6311  ;;  %3485 = vadd.xlane.f32.xlu1 %v3484_v34  ;;  %v3454_v17 = vadd.f32 %v6308_v8, %v3453_v61  ;;  %6331 = vpow2.f32 %v3213_v32  ;;  %v3187_v32 = vmul.f32 1.442695, %v2690_v24  ;;  %v13707_v8 = vld [vmem:[#allocation210_spill] sm:$0xff]  ;;  %v2694_v24 = vsub.f32 %v13708_v6, %v11756_v45  ;;  %v11787_v6 = vpop.permute.xlu1 %4987 }
 0x442   : > { %v6314_v12 = vpop.eup %6313  ;;  %6333 = vpow2.f32 %v3157_v52  ;;  %v3165_v52 = vmul.f32 1.442695, %v2679_v41  ;;  %v2693_v34 = vsub.f32 %v13707_v8, %v11756_v45  ;;  %v3167_v59 = vmul.f32 1.442695, %v2680_v46  ;;  %v6522_v41 = vld [vmem:[#allocation2 + $0x10] sm:$0xff]  ;;  %v6524_v8 = vld [vmem:[#allocation2 + $0x20] sm:$0xff] }
 0x443   : > { %v6316_v0 = vpop.eup %6315  ;;  %v3455_v33 = vadd.f32 %v6310_v2, %v3454_v17  ;;  %6335 = vpow2.f32 %v3215_v30  ;;  %v3496_v62 = vadd.f32 %v6314_v12, %v6312_v3  ;;  %v3191_v12 = vmul.f32 1.442695, %v2692_v54  ;;  %13715 = vst [vmem:[#allocation75_spill] sm:$0xff] %v11787_v6 }
 0x444   : > { %v6318_v20 = vpop.eup %6317  ;;  %6337 = vpow2.f32 %v3159_v18  ;;  %v3189_v18 = vmul.f32 1.442695, %v2691_v13  ;;  %v3193_v43 = vmul.f32 1.442695, %v2693_v34  ;;  %v3195_v54 = vmul.f32 1.442695, %v2694_v24 }
 0x445   : > { %v6320_v44 = vpop.eup %6319  ;;  %v3456_v48 = vadd.f32 %v6316_v0, %v3455_v33  ;;  %v3497_v63 = vadd.f32 %v6318_v20, %v3496_v62  ;;  %6339 = vpow2.f32 %v3161_v29  ;;  %v13709_v29 = vld [vmem:[#allocation201_spill] sm:$0xff]  ;;  %v2231_v33 = vmul.f32 1.442695, %v2196_v5 }
 0x446   : > { %v6322_v25 = vpop.eup %6321  ;;  %6341 = vpow2.f32 %v3163_v38  ;;  %v2195_v0 = vsub.f32 %v6522_v41, %v13709_v29  ;;  %v13710_v38 = vld [vmem:[#allocation229_spill] sm:$0xff] }
 0x447   : > { %v6324_v61 = vpop.eup %6323  ;;  %v3457_v30 = vadd.f32 %v6320_v44, %v3456_v48  ;;  %v3498_v2 = vadd.f32 %v6322_v25, %v3497_v63  ;;  %6343 = vpow2.f32 %v3185_v10  ;;  %v2695_v62 = vsub.f32 %v13710_v38, %v11756_v45  ;;  %v13711_v10 = vld [vmem:[#allocation196_spill] sm:$0xff] }
 0x448   : > { %v6326_v55 = vpop.eup %6325  ;;  %6345 = vpow2.f32 %v3187_v32  ;;  %v2696_v44 = vsub.f32 %v13711_v10, %v11756_v45  ;;  %v6523_v25 = vld [vmem:[#allocation2] sm:$0xff]  ;;  %v13733_v45 = vld [vmem:[#allocation299_spill] sm:$0xff] }
 0x449   : > { %v6328_v3 = vpop.eup %6327  ;;  %3458 = vadd.xlane.f32.xlu0 %v3457_v30  ;;  %v3499_v17 = vadd.f32 %v6324_v61, %v3498_v2  ;;  %6347 = vpow2.f32 %v3165_v52  ;;  %v2193_v5 = vsub.f32 %v6523_v25, %v13712_v16  ;;  %v2229_v52 = vmul.f32 1.442695, %v2195_v0  ;;  %v13713_v61 = vld [vmem:[#allocation257_spill] sm:$0xff] }
 0x44a   : > { %v6330_v19 = vpop.eup %6329  ;;  %6349 = vpow2.f32 %v3189_v18  ;;  %v2197_v30 = vsub.f32 %v6524_v8, %v13713_v61  ;;  %v3197_v18 = vmul.f32 1.442695, %v2695_v62  ;;  %v13717_v62 = vld [vmem:[#allocation250_spill] sm:$0xff] }
 0x44b   : > { %v6332_v35 = vpop.eup %6331  ;;  %v3500_v13 = vadd.f32 %v6326_v55, %v3499_v17  ;;  %v3469_v20 = vadd.f32 %v6330_v19, %v6328_v3  ;;  %6351 = vpow2.f32 %v3167_v59  ;;  %v6525_v59 = vld [vmem:[#allocation2 + $0x28] sm:$0xff]  ;;  %v13714_v3 = vld [vmem:[#allocation226_spill] sm:$0xff]  ;;  %v3199_v19 = vmul.f32 1.442695, %v2696_v44 }
 0x44c   : > { %v6334_v46 = vpop.eup %6333  ;;  %6353 = vpow2.f32 %v3191_v12  ;;  %v2198_v17 = vsub.f32 %v6525_v59, %v13714_v3  ;;  %v2225_v0 = vmul.f32 1.442695, %v2193_v5  ;;  %v13718_v8 = vld [vmem:[#allocation258_spill] sm:$0xff] }
 0x44d   : > { %v6336_v48 = vpop.eup %6335  ;;  %v3501_v63 = vadd.f32 %v6332_v35, %v3500_v13  ;;  %v3470_v15 = vadd.f32 %v6334_v46, %v3469_v20  ;;  %6355 = vpow2.f32 %v2231_v33  ;;  %v3234_v33 = vpop.xlane.xlu0 %3233  ;;  %v2233_v35 = vmul.f32 1.442695, %v2197_v30  ;;  %v13716_v20 = vld [vmem:[#allocation14_spill] sm:$0xff] }
 0x44e   : > { %v6338_v32 = vpop.eup %6337  ;;  %6357 = vpow2.f32 %v3193_v43  ;;  %v3634_v43 = vmul.f32 %v13717_v62, %v13716_v20  ;;  %v2235_v10 = vmul.f32 1.442695, %v2198_v17 }
 0x44f   : > { %v3502_v34 = vadd.f32 %v6336_v48, %v3501_v63  ;;  %v3471_v2 = vadd.f32 %v6338_v32, %v3470_v15  ;;  %v6340_v55 = vpop.eup %6339  ;;  %6359 = vpow2.f32 %v3195_v54  ;;  %v3225_v63 = vpop.xlane.xlu1 %3224 }
 0x450   : > { %v6342_v24 = vpop.eup %6341  ;;  %6361 = vpow2.f32 %v2229_v52  ;;  %v3666_v25 = vadd.f32 %v3634_v43, %v3234_v33  ;;  %v6526_v52 = vld [vmem:[#allocation2 + $0x30] sm:$0xff]  ;;  %v13720_v33 = vld [vmem:[#allocation5_spill] sm:$0xff] }
 0x451   : > { %3503 = vadd.xlane.f32.xlu1 %v3502_v34  ;;  %v3472_v12 = vadd.f32 %v6340_v55, %v3471_v2  ;;  %v6344_v41 = vpop.eup %6343  ;;  %6363 = vpow2.f32 %v3197_v18  ;;  %v2199_v30 = vsub.f32 %v6526_v52, %v13718_v8  ;;  %v6527_v18 = vld [vmem:[#allocation2 + $0x38] sm:$0xff]  ;;  %v3243_v43 = vpop.xlane.xlu0 %3242  ;;  %v13722_v52 = vld [vmem:[#allocation16_spill] sm:$0xff] }
 0x452   : > { %v6346_v38 = vpop.eup %6345  ;;  %6365 = vpow2.f32 %v3199_v19  ;;  %v13719_v55 = vld [vmem:[#allocation287_spill] sm:$0xff] }
 0x453   : > { %v3473_v13 = vadd.f32 %v6342_v24, %v3472_v12  ;;  %v6348_v46 = vpop.eup %6347  ;;  %v3487_v48 = vadd.f32 %v6346_v38, %v6344_v41  ;;  %6367 = vpow2.f32 %v2225_v0  ;;  %v2200_v59 = vsub.f32 %v6527_v18, %v13719_v55  ;;  %v3252_v19 = vpop.xlane.xlu1 %3251  ;;  %v13723_v18 = vld [vmem:[#allocation291_spill] sm:$0xff] }
 0x454   : > { %v6350_v15 = vpop.eup %6349  ;;  %6369 = vpow2.f32 %v2233_v35  ;;  %v2237_v0 = vmul.f32 1.442695, %v2199_v30 }
 0x455   : > { %v3474_v32 = vadd.f32 %v6348_v46, %v3473_v13  ;;  %v6352_v44 = vpop.eup %6351  ;;  %v3488_v54 = vadd.f32 %v6350_v15, %v3487_v48  ;;  %6371 = vpow2.f32 %v2235_v10  ;;  %v2239_v13 = vmul.f32 1.442695, %v2200_v59 }
 0x456   : > { %v6354_v5 = vpop.eup %6353  ;;  %6373 = vlog2.f32 %v3666_v25 }
 0x457   : > { %v3475_v34 = vadd.f32 %v6352_v44, %v3474_v32  ;;  %v6356_v2 = vpop.eup %6355  ;;  %v3489_v17 = vadd.f32 %v6354_v5, %v3488_v54  ;;  %6375 = vpow2.f32 %v2237_v0  ;;  %v6528_v32 = vld [vmem:[#allocation2 + $0x48] sm:$0xff]  ;;  %v13721_v44 = vld [vmem:[#allocation246_spill] sm:$0xff]  ;;  %v13724_v0 = vld [vmem:[#allocation4_spill] sm:$0xff] }
 0x458   : > { %v6358_v24 = vpop.eup %6357  ;;  %v3636_v38 = vmul.f32 %v6356_v2, %v13720_v33  ;;  %6377 = vpow2.f32 %v2239_v13  ;;  %v2202_v54 = vsub.f32 %v6528_v32, %v13721_v44  ;;  %v6529_v2 = vld [vmem:[#allocation2 + $0x40] sm:$0xff] }
 0x459   : > { %3476 = vadd.xlane.f32.xlu0 %v3475_v34  ;;  %v3490_v12 = vadd.f32 %v6358_v24, %v3489_v17  ;;  %v6360_v41 = vpop.eup %6359  ;;  %v2201_v59 = vsub.f32 %v6529_v2, %v13723_v18 }
 0x45a   : > { %v6362_v35 = vpop.eup %6361  ;;  %v11794_v46 = vadd.f32 %v3636_v38, %v3252_v19  ;;  %v3261_v19 = vpop.xlane.xlu0 %3260  ;;  %v13725_v38 = vld [vmem:[#allocation15_spill] sm:$0xff] }
 0x45b   : > { %v3491_v20 = vadd.f32 %v6360_v41, %v3490_v12  ;;  %v6364_v62 = vpop.eup %6363  ;;  %v3635_v30 = vmul.f32 %v6362_v35, %v13722_v52  ;;  %v2243_v41 = vmul.f32 1.442695, %v2202_v54  ;;  %v13726_v35 = vld [vmem:[#allocation17_spill] sm:$0xff] }
 0x45c   : > { %v6366_v48 = vpop.eup %6365  ;;  %6379 = vlog2.f32 %v11794_v46 }
 0x45d   : > { %v3492_v10 = vadd.f32 %v6364_v62, %v3491_v20  ;;  %v6368_v15 = vpop.eup %6367  ;;  %v3667_v24 = vadd.f32 %v3635_v30, %v3243_v43  ;;  %v3270_v20 = vpop.xlane.xlu1 %3269  ;;  %v2241_v62 = vmul.f32 1.442695, %v2201_v59  ;;  %6381 = vpow2.f32 %v2243_v41  ;;  %v13727_v43 = vld [vmem:[#allocation255_spill] sm:$0xff]  ;;  %v6531_v30 = vld [vmem:[#allocation2 + $0x50] sm:$0xff] }
 0x45e   : > { %v6370_v34 = vpop.eup %6369  ;;  %v3633_v13 = vmul.f32 %v6368_v15, %v13725_v38  ;;  %v13729_v59 = vld [vmem:[#allocation243_spill] sm:$0xff]  ;;  %v13730_v41 = vld [vmem:[#allocation18_spill] sm:$0xff] }
 0x45f   : > { %v3493_v5 = vadd.f32 %v6366_v48, %v3492_v10  ;;  %v6372_v17 = vpop.eup %6371  ;;  %v3637_v33 = vmul.f32 %v6370_v34, %v13724_v0  ;;  %6383 = vpow2.f32 %v2241_v62  ;;  %v13728_v34 = vld [vmem:[#allocation295_spill] sm:$0xff] }
 0x460   : > { %v6374_v12 = vpop.eup %6373  ;;  %v3638_v10 = vmul.f32 %v6372_v17, %v13726_v35  ;;  %v3665_v52 = vadd.f32 %v3633_v13, %v3225_v63  ;;  %v2203_v15 = vsub.f32 %v6531_v30, %v13728_v34 }
 0x461   : > { %3494 = vadd.xlane.f32.xlu0 %v3493_v5  ;;  %v5090_v48 = vmul.f32 0.6931472, %v6374_v12  ;;  %v11803_v32 = vadd.f32 %v3637_v33, %v3261_v19  ;;  %v6376_v54 = vpop.eup %6375  ;;  %v3279_v19 = vpop.xlane.xlu0 %3278 }
 0x462   : > { %4677 = vperm.xlu1 %5847, %v3666_v25   ;;  %v11805_v2 = vadd.f32 %v3638_v10, %v3270_v20  ;;  %v6530_v25 = vld [vmem:[#allocation2 + $0x58] sm:$0xff]  ;;  %v6378_v0 = vpop.eup %6377  ;;  %6385 = vlog2.f32 %v3665_v52  ;;  %v3639_v33 = vmul.f32 %v6376_v54, %v13730_v41  ;;  %v3288_v38 = vpop.xlane.xlu1 %3287  ;;  %v2245_v13 = vmul.f32 1.442695, %v2203_v15 }
 0x463   : > { %v2204_v5 = vsub.f32 %v6530_v25, %v13727_v43  ;;  %v5152_v17 = vadd.f32 %v5090_v48, %v13729_v59  ;;  %v13731_v20 = vld [vmem:[#allocation19_spill] sm:$0xff]  ;;  %v6532_v25 = vld [vmem:[#allocation2 + $0x68] sm:$0xff] }
 0x464   : > { %6387 = vlog2.f32 %v11805_v2  ;;  %v3640_v62 = vmul.f32 %v6378_v0, %v13731_v20  ;;  %v11815_v35 = vadd.f32 %v3639_v33, %v3279_v19  ;;  %v13732_v48 = vld [vmem:[#allocation171_spill] sm:$0xff] }
 0x465   : > { %v2247_v63 = vmul.f32 1.442695, %v2204_v5  ;;  %v2206_v30 = vsub.f32 %v6532_v25, %v13732_v48  ;;  %v6533_v5 = vld [vmem:[#allocation2 + $0x60] sm:$0xff] }
 0x466   : > { %4682 = vperm.xlu1 %5847, %v3667_v24   ;;  %v6380_v12 = vpop.eup %6379  ;;  %v11818_v59 = vadd.f32 %v3640_v62, %v3288_v38  ;;  %v2205_v54 = vsub.f32 %v6533_v5, %v13733_v45  ;;  %v3306_v19 = vpop.xlane.xlu1 %3305  ;;  %v13735_v62 = vld [vmem:[#allocation20_spill] sm:$0xff] }
 0x467   : > { %v5094_v10 = vmul.f32 0.6931472, %v6380_v12  ;;  %6389 = vpow2.f32 %v2247_v63  ;;  %v6382_v41 = vpop.eup %6381  ;;  %v3297_v38 = vpop.xlane.xlu0 %3296  ;;  %v13734_v63 = vld [vmem:[#allocation7_spill] sm:$0xff] }
 0x468   : > { %6391 = vpow2.f32 %v2245_v13  ;;  %v2249_v20 = vmul.f32 1.442695, %v2205_v54  ;;  %v3642_v13 = vmul.f32 %v6382_v41, %v13734_v63  ;;  %v13737_v54 = vld [vmem:[#allocation303_spill] sm:$0xff] }
 0x469   : > { %v5154_v15 = vadd.f32 %v5094_v10, %v13706_v9  ;;  %v6384_v0 = vpop.eup %6383  ;;  %6393 = vlog2.f32 %v11818_v59  ;;  %v6534_v9 = vld [vmem:[#allocation2 + $0x78] sm:$0xff]  ;;  %v13736_v10 = vld [vmem:[#allocation290_spill] sm:$0xff] }
 0x46a   : > { %4692 = vperm.xlu1 %5847, %v11803_v32   ;;  %6395 = vlog2.f32 %v3667_v24  ;;  %v3641_v25 = vmul.f32 %v6384_v0, %v13735_v62  ;;  %v11827_v5 = vadd.f32 %v3642_v13, %v3306_v19  ;;  %v6535_v24 = vld [vmem:[#allocation2 + $0x70] sm:$0xff] }
 0x46b   : > { %v2207_v37 = vsub.f32 %v6535_v24, %v13737_v54  ;;  %v13739_v13 = vld [vmem:[#allocation6_spill] sm:$0xff] }
 0x46c   : > { %v6386_v12 = vpop.eup %6385  ;;  %v11830_v1 = vadd.f32 %v3641_v25, %v3297_v38  ;;  %v13738_v38 = vld [vmem:[#allocation21_spill] sm:$0xff] }
 0x46d   : > { %v5088_v39 = vmul.f32 0.6931472, %v6386_v12  ;;  %v3324_v12 = vpop.xlane.xlu1 %3323 }
 0x46e   : > { %5217 = vrot.lane.b32.xlu1 %v5152_v17, %s6612_s11  ;;  %v2251_v17 = vmul.f32 1.442695, %v2206_v30  ;;  %v6388_v33 = vpop.eup %6387  ;;  %v2208_v30 = vsub.f32 %v6534_v9, %v13736_v10 }
 0x46f   : > { %v5098_v6 = vmul.f32 0.6931472, %v6388_v33  ;;  %v2253_v33 = vmul.f32 1.442695, %v2207_v37 }
 0x470   : > { %6397 = vpow2.f32 %v2251_v17  ;;  %v5151_v17 = vadd.f32 %v5088_v39, %v13712_v16  ;;  %v13740_v39 = vld [vmem:[#allocation294_spill] sm:$0xff] }
 0x471   : > { %6399 = vpow2.f32 %v2249_v20  ;;  %v6390_v41 = vpop.eup %6389  ;;  %v3315_v20 = vpop.xlane.xlu0 %3314 }
 0x472   : > { %4702 = vperm.xlu1 %5847, %v11815_v35   ;;  %v6392_v0 = vpop.eup %6391  ;;  %6401 = vlog2.f32 %v11827_v5  ;;  %v3644_v63 = vmul.f32 %v6390_v41, %v13738_v38 }
 0x473   : > { %v6394_v19 = vpop.eup %6393  ;;  %6403 = vlog2.f32 %v11803_v32  ;;  %v3643_v62 = vmul.f32 %v6392_v0, %v13739_v13  ;;  %v13741_v32 = vld [vmem:[#allocation307_spill] sm:$0xff]  ;;  %v13743_v13 = vld [vmem:[#allocation22_spill] sm:$0xff] }
 0x474   : > { %v6396_v25 = vpop.eup %6395  ;;  %v11842_v9 = vadd.f32 %v3644_v63, %v3324_v12  ;;  %v3342_v12 = vpop.xlane.xlu1 %3341 }
 0x475   : > { %v5092_v41 = vmul.f32 0.6931472, %v6396_v25  ;;  %v3333_v38 = vpop.xlane.xlu0 %3332 }
 0x476   : > { %5221 = vrot.lane.b32.xlu1 %v5154_v15, %s6612_s11  ;;  %v2255_v15 = vmul.f32 1.442695, %v2208_v30  ;;  %v5102_v30 = vmul.f32 0.6931472, %v6394_v19 }
 0x477   : > { %4672 = vperm.xlu0 %5845, %v3665_v52   ;;  %v5156_v52 = vadd.f32 %v5098_v6, %v13714_v3  ;;  %v11845_v3 = vadd.f32 %v3643_v62, %v3315_v20  ;;  %v6537_v6 = vld [vmem:[#allocation2 + $0x80] sm:$0xff]  ;;  %v5153_v63 = vadd.f32 %v5092_v41, %v13709_v29 }
 0x478   : > { %6405 = vpow2.f32 %v2255_v15  ;;  %v2209_v24 = vsub.f32 %v6537_v6, %v13741_v32 }
 0x479   : > { %6407 = vpow2.f32 %v2253_v33 }
 0x47a   : > { %4712 = vperm.xlu1 %5847, %v11830_v1   ;;  %v6398_v37 = vpop.eup %6397  ;;  %6409 = vlog2.f32 %v11842_v9  ;;  %v2257_v20 = vmul.f32 1.442695, %v2209_v24  ;;  %v3360_v24 = vpop.xlane.xlu1 %3359 }
 0x47b   : > { %4687 = vperm.xlu0 %5845, %v11794_v46   ;;  %v6536_v46 = vld [vmem:[#allocation2 + $0x88] sm:$0xff]  ;;  %v6400_v0 = vpop.eup %6399  ;;  %6411 = vlog2.f32 %v11815_v35  ;;  %v13744_v35 = vld [vmem:[#allocation311_spill] sm:$0xff] }
 0x47c   : > { %v2210_v16 = vsub.f32 %v6536_v46, %v13740_v39  ;;  %v6402_v19 = vpop.eup %6401  ;;  %v3645_v62 = vmul.f32 %v6400_v0, %v13743_v13  ;;  %v13747_v13 = vld [vmem:[#allocation298_spill] sm:$0xff] }
 0x47d   : > { %v6404_v25 = vpop.eup %6403 }
 0x47e   : > { %5225 = vrot.lane.b32.xlu1 %v5156_v52, %s6612_s11  ;;  %v2259_v15 = vmul.f32 1.442695, %v2210_v16  ;;  %v5158_v52 = vadd.f32 %v5102_v30, %v13719_v55  ;;  %v3677_v55 = vadd.f32 %v3645_v62, %v3333_v38  ;;  %v6538_v16 = vld [vmem:[#allocation2 + $0x90] sm:$0xff]  ;;  %v5096_v6 = vmul.f32 0.6931472, %v6404_v25 }
 0x47f   : > { %5215 = vrot.lane.b32.xlu0 %v5151_v17, %s6612_s11  ;;  %v13742_v17 = vld [vmem:[#allocation23_spill] sm:$0xff]  ;;  %v2211_v30 = vsub.f32 %v6538_v16, %v13744_v35 }
 0x480   : > { %v3646_v33 = vmul.f32 %v6398_v37, %v13742_v17  ;;  %6413 = vpow2.f32 %v2259_v15  ;;  %v13746_v17 = vld [vmem:[#allocation24_spill] sm:$0xff] }
 0x481   : > { %6415 = vpow2.f32 %v2257_v20  ;;  %v2261_v15 = vmul.f32 1.442695, %v2211_v30  ;;  %v5155_v20 = vadd.f32 %v5096_v6, %v13713_v61 }
 0x482   : > { %4722 = vperm.xlu1 %5847, %v11845_v3   ;;  %v11858_v46 = vadd.f32 %v3646_v33, %v3342_v12  ;;  %v6406_v37 = vpop.eup %6405  ;;  %v13745_v12 = vld [vmem:[#allocation9_spill] sm:$0xff] }
 0x483   : > { %4697 = vperm.xlu0 %5845, %v11805_v2   ;;  %v5106_v2 = vmul.f32 0.6931472, %v6402_v19  ;;  %v6408_v29 = vpop.eup %6407  ;;  %v3351_v19 = vpop.xlane.xlu0 %3350 }
 0x484   : > { %6417 = vlog2.f32 %v11858_v46  ;;  %v6410_v0 = vpop.eup %6409  ;;  %v3647_v33 = vmul.f32 %v6408_v29, %v13746_v17  ;;  %v3378_v29 = vpop.xlane.xlu1 %3377 }
 0x485   : > { %v5160_v41 = vadd.f32 %v5106_v2, %v13721_v44  ;;  %6419 = vlog2.f32 %v11830_v1  ;;  %v6412_v38 = vpop.eup %6411  ;;  %v5110_v44 = vmul.f32 0.6931472, %v6410_v0  ;;  %v6540_v1 = vld [vmem:[#allocation2 + $0xa0] sm:$0xff]  ;;  %v13748_v2 = vld [vmem:[#allocation315_spill] sm:$0xff] }
 0x486   : > { %5229 = vrot.lane.b32.xlu1 %v5158_v52, %s6612_s11  ;;  %v3648_v52 = vmul.f32 %v6406_v37, %v13745_v12  ;;  %v3679_v25 = vadd.f32 %v3647_v33, %v3351_v19  ;;  %6421 = vpow2.f32 %v2261_v15  ;;  %v2213_v16 = vsub.f32 %v6540_v1, %v13748_v2  ;;  %v13749_v15 = vld [vmem:[#allocation25_spill] sm:$0xff] }
 0x487   : > { %5219 = vrot.lane.b32.xlu0 %v5153_v63, %s6612_s11  ;;  %v6539_v63 = vld [vmem:[#allocation2 + $0x98] sm:$0xff]  ;;  %v5100_v61 = vmul.f32 0.6931472, %v6412_v38 }
 0x488   : > { %v2212_v62 = vsub.f32 %v6539_v63, %v13747_v13  ;;  %v2265_v0 = vmul.f32 1.442695, %v2213_v16  ;;  %v13751_v16 = vld [vmem:[#allocation26_spill] sm:$0xff] }
 0x489   : > { %v5157_v19 = vadd.f32 %v5100_v61, %v13718_v8 }
 0x48a   : > { %4732 = vperm.xlu1 %5847, %v3677_v55   ;;  %v6414_v30 = vpop.eup %6413  ;;  %v2263_v6 = vmul.f32 1.442695, %v2212_v62 }
 0x48b   : > { %4707 = vperm.xlu0 %5845, %v11818_v59   ;;  %v11871_v59 = vadd.f32 %v3648_v52, %v3360_v24  ;;  %v6416_v37 = vpop.eup %6415  ;;  %v5162_v24 = vadd.f32 %v5110_v44, %v13727_v43  ;;  %v3650_v12 = vmul.f32 %v6414_v30, %v13749_v15  ;;  %v3369_v52 = vpop.xlane.xlu0 %3368 }
 0x48d   : > { %6423 = vlog2.f32 %v11871_v59  ;;  %v11883_v38 = vadd.f32 %v3650_v12, %v3378_v29 }
 0x48e   : > { %5233 = vrot.lane.b32.xlu1 %v5160_v41, %s6612_s11  ;;  %v6418_v41 = vpop.eup %6417  ;;  %6425 = vlog2.f32 %v11845_v3 }
 0x48f   : > { %5223 = vrot.lane.b32.xlu0 %v5155_v20, %s6612_s11  ;;  %v13750_v20 = vld [vmem:[#allocation8_spill] sm:$0xff]  ;;  %v6420_v33 = vpop.eup %6419  ;;  %6427 = vpow2.f32 %v2263_v6  ;;  %v13752_v6 = vld [vmem:[#allocation302_spill] sm:$0xff] }
 0x490   : > { %v3649_v17 = vmul.f32 %v6416_v37, %v13750_v20  ;;  %6429 = vpow2.f32 %v2265_v0  ;;  %v5104_v63 = vmul.f32 0.6931472, %v6420_v33  ;;  %v6422_v3 = vpop.eup %6421  ;;  %v6541_v37 = vld [vmem:[#allocation2 + $0xa8] sm:$0xff]  ;;  %v13754_v20 = vld [vmem:[#allocation27_spill] sm:$0xff] }
 0x491   : > { %6431 = vlog2.f32 %v11883_v38  ;;  %v3651_v30 = vmul.f32 %v6422_v3, %v13751_v16  ;;  %v2214_v29 = vsub.f32 %v6541_v37, %v13752_v6  ;;  %v13756_v37 = vld [vmem:[#allocation306_spill] sm:$0xff] }
 0x492   : > { %4742 = vperm.xlu1 %5847, %v3679_v25   ;;  %v3681_v43 = vadd.f32 %v3649_v17, %v3369_v52  ;;  %6433 = vlog2.f32 %v3677_v55  ;;  %v5159_v1 = vadd.f32 %v5104_v63, %v13723_v18  ;;  %v3396_v52 = vpop.xlane.xlu1 %3395 }
 0x493   : > { %4717 = vperm.xlu0 %5845, %v11827_v5   ;;  %v5114_v5 = vmul.f32 0.6931472, %v6418_v41  ;;  %v13753_v41 = vld [vmem:[#allocation319_spill] sm:$0xff]  ;;  %v2267_v18 = vmul.f32 1.442695, %v2214_v29  ;;  %6435 = vlog2.f32 %v3679_v25 }
 0x495   : > { %v5164_v8 = vadd.f32 %v5114_v5, %v13732_v48  ;;  %6437 = vpow2.f32 %v2267_v18 }
 0x496   : > { %5237 = vrot.lane.b32.xlu1 %v5162_v24, %s6612_s11  ;;  %v3387_v44 = vpop.xlane.xlu0 %3386  ;;  %v6542_v24 = vld [vmem:[#allocation2 + $0xb0] sm:$0xff]  ;;  %v3414_v18 = vpop.xlane.xlu1 %3413 }
 0x497   : > { %5227 = vrot.lane.b32.xlu0 %v5157_v19, %s6612_s11  ;;  %v6424_v62 = vpop.eup %6423  ;;  %v2215_v0 = vsub.f32 %v6542_v24, %v13753_v41  ;;  %v3683_v48 = vadd.f32 %v3651_v30, %v3387_v44  ;;  %v6544_v24 = vld [vmem:[#allocation2 + $0xc0] sm:$0xff] }
 0x498   : > { %v6426_v61 = vpop.eup %6425  ;;  %v5118_v15 = vmul.f32 0.6931472, %v6424_v62 }
 0x499   : > { %v5108_v55 = vmul.f32 0.6931472, %v6426_v61  ;;  %v2269_v19 = vmul.f32 1.442695, %v2215_v0  ;;  %v6543_v61 = vld [vmem:[#allocation2 + $0xb8] sm:$0xff]  ;;  %v13757_v0 = vld [vmem:[#allocation40_spill] sm:$0xff] }
 0x49a   : > { %4752 = vperm.xlu1 %5847, %v3681_v43   ;;  %v5166_v33 = vadd.f32 %v5118_v15, %v13736_v10  ;;  %v2216_v29 = vsub.f32 %v6543_v61, %v13756_v37  ;;  %v2217_v15 = vsub.f32 %v6544_v24, %v13757_v0 }
 0x49b   : > { %4727 = vperm.xlu0 %5845, %v11842_v9   ;;  %v6428_v9 = vpop.eup %6427  ;;  %v5161_v3 = vadd.f32 %v5108_v55, %v13728_v34  ;;  %6439 = vpow2.f32 %v2269_v19  ;;  %v13759_v19 = vld [vmem:[#allocation13_spill] sm:$0xff] }
 0x49c   : > { %v6430_v12 = vpop.eup %6429  ;;  %v3652_v17 = vmul.f32 %v6428_v9, %v13754_v20 }
 0x49d   : > { %v6432_v5 = vpop.eup %6431 }
 0x49e   : > { %5241 = vrot.lane.b32.xlu1 %v5164_v8, %s6612_s11  ;;  %v3684_v63 = vadd.f32 %v3652_v17, %v3396_v52  ;;  %v13755_v8 = vld [vmem:[#allocation11_spill] sm:$0xff]  ;;  %v5122_v16 = vmul.f32 0.6931472, %v6432_v5  ;;  %v13758_v52 = vld [vmem:[#allocation10_spill] sm:$0xff] }
 0x49f   : > { %5231 = vrot.lane.b32.xlu0 %v5159_v1, %s6612_s11  ;;  %v3653_v62 = vmul.f32 %v6430_v12, %v13755_v8  ;;  %v6434_v1 = vpop.eup %6433 }
 0x4a0   : > { %6441 = vlog2.f32 %v3684_v63  ;;  %v5168_v10 = vadd.f32 %v5122_v16, %v13740_v39  ;;  %v6436_v25 = vpop.eup %6435  ;;  %v13760_v16 = vld [vmem:[#allocation310_spill] sm:$0xff] }
 0x4a1   : > { %6443 = vlog2.f32 %v3681_v43  ;;  %v6438_v9 = vpop.eup %6437  ;;  %v5116_v12 = vmul.f32 0.6931472, %v6436_v25  ;;  %v2273_v43 = vmul.f32 1.442695, %v2217_v15  ;;  %v13761_v25 = vld [vmem:[#allocation54_spill] sm:$0xff] }
 0x4a2   : > { %4762 = vperm.xlu1 %5847, %v3683_v48   ;;  %6445 = vlog2.f32 %v3683_v48 }
 0x4a3   : > { %4737 = vperm.xlu0 %5845, %v11858_v46   ;;  %v5112_v46 = vmul.f32 0.6931472, %v6434_v1  ;;  %v6545_v1 = vld [vmem:[#allocation2 + $0xc8] sm:$0xff] }
 0x4a5   : > { %v5163_v34 = vadd.f32 %v5112_v46, %v13733_v45  ;;  %v6440_v55 = vpop.eup %6439  ;;  %v3654_v45 = vmul.f32 %v6438_v9, %v13758_v52  ;;  %v6547_v9 = vld [vmem:[#allocation2 + $0xd8] sm:$0xff] }
 0x4a6   : > { %v3405_v44 = vpop.xlane.xlu0 %3404  ;;  %5245 = vrot.lane.b32.xlu1 %v5166_v33, %s6612_s11  ;;  %v3655_v20 = vmul.f32 %v6440_v55, %v13759_v19  ;;  %v5165_v33 = vadd.f32 %v5116_v12, %v13737_v54  ;;  %v13762_v55 = vld [vmem:[#allocation314_spill] sm:$0xff] }
 0x4a7   : > { %5235 = vrot.lane.b32.xlu0 %v5161_v3, %s6612_s11  ;;  %v3685_v30 = vadd.f32 %v3653_v62, %v3405_v44  ;;  %v3686_v17 = vadd.f32 %v3654_v45, %v3414_v18 }
 0x4aa   : > { %4772 = vperm.xlu1 %5847, %v3685_v30   ;;  %v6442_v39 = vpop.eup %6441 }
 0x4ab   : > { %4747 = vperm.xlu0 %5845, %v11871_v59   ;;  %v2271_v59 = vmul.f32 1.442695, %v2216_v29  ;;  %v6444_v3 = vpop.eup %6443  ;;  %v5126_v8 = vmul.f32 0.6931472, %v6442_v39 }
 0x4ac   : > { %v5120_v44 = vmul.f32 0.6931472, %v6444_v3  ;;  %v6446_v46 = vpop.eup %6445 }
 0x4ad   : > { %6447 = vpow2.f32 %v2271_v59  ;;  %v5170_v48 = vadd.f32 %v5126_v8, %v13747_v13  ;;  %v5124_v15 = vmul.f32 0.6931472, %v6446_v46  ;;  %v2220_v13 = vsub.f32 %v6547_v9, %v13762_v55  ;;  %v13763_v59 = vld [vmem:[#allocation12_spill] sm:$0xff]  ;;  %v6548_v8 = vld [vmem:[#allocation2 + $0xe8] sm:$0xff]  ;;  %v6550_v9 = vld [vmem:[#allocation2 + $0xf8] sm:$0xff] }
 0x4ae   : > { %5249 = vrot.lane.b32.xlu1 %v5168_v10, %s6612_s11  ;;  %6449 = vpow2.f32 %v2273_v43  ;;  %v5167_v54 = vadd.f32 %v5120_v44, %v13741_v32  ;;  %v13764_v32 = vld [vmem:[#allocation28_spill] sm:$0xff] }
 0x4af   : > { %5239 = vrot.lane.b32.xlu0 %v5163_v34, %s6612_s11  ;;  %6451 = vlog2.f32 %v3686_v17  ;;  %v6546_v34 = vld [vmem:[#allocation2 + $0xd0] sm:$0xff]  ;;  %v5169_v45 = vadd.f32 %v5124_v15, %v13744_v35  ;;  %v6549_v46 = vld [vmem:[#allocation2 + $0xe0] sm:$0xff] }
 0x4b0   : > { %6453 = vlog2.f32 %v3685_v30  ;;  %v2219_v61 = vsub.f32 %v6546_v34, %v13761_v25 }
 0x4b2   : > { %v2277_v12 = vmul.f32 1.442695, %v2219_v61  ;;  %v13767_v61 = vld [vmem:[#allocation29_spill] sm:$0xff] }
 0x4b3   : > { %4757 = vperm.xlu0 %5845, %v11883_v38   ;;  %v2218_v38 = vsub.f32 %v6545_v1, %v13760_v16 }
 0x4b5   : > { %v2275_v10 = vmul.f32 1.442695, %v2218_v38 }
 0x4b6   : > { %v3423_v5 = vpop.xlane.xlu0 %3422 }
 0x4b7   : > { %v3687_v62 = vadd.f32 %v3655_v20, %v3423_v5  ;;  %5243 = vrot.lane.b32.xlu0 %v5165_v33, %s6612_s11  ;;  %v6448_v29 = vpop.eup %6447  ;;  %6455 = vpow2.f32 %v2275_v10  ;;  %v2279_v20 = vmul.f32 1.442695, %v2220_v13  ;;  %v13766_v10 = vld [vmem:[#allocation59_spill] sm:$0xff] }
 0x4b8   : > { %v6450_v24 = vpop.eup %6449  ;;  %v3656_v18 = vmul.f32 %v6448_v29, %v13763_v59  ;;  %v2221_v34 = vsub.f32 %v6549_v46, %v13766_v10  ;;  %v13768_v13 = vld [vmem:[#allocation323_spill] sm:$0xff]  ;;  %v13769_v59 = vld [vmem:[#allocation30_spill] sm:$0xff] }
 0x4b9   : > { %4782 = vperm.xlu1 %5847, %v3687_v62   ;;  %v6452_v30 = vpop.eup %6451  ;;  %6457 = vlog2.f32 %v3687_v62  ;;  %v3657_v39 = vmul.f32 %v6450_v24, %v13764_v32 }
 0x4ba   : > { %v6454_v19 = vpop.eup %6453  ;;  %v5130_v33 = vmul.f32 0.6931472, %v6452_v30  ;;  %6459 = vpow2.f32 %v2277_v12  ;;  %v2281_v12 = vmul.f32 1.442695, %v2221_v34  ;;  %v13772_v34 = vld [vmem:[#allocation33_spill] sm:$0xff] }
 0x4bb   : > { %4767 = vperm.xlu0 %5845, %v3684_v63   ;;  %v3432_v63 = vpop.xlane.xlu1 %3431  ;;  %v5128_v3 = vmul.f32 0.6931472, %v6454_v19 }
 0x4bc   : > { %v3688_v43 = vadd.f32 %v3656_v18, %v3432_v63  ;;  %v5172_v44 = vadd.f32 %v5130_v33, %v13752_v6  ;;  %v2224_v63 = vsub.f32 %v6550_v9, %v13768_v13  ;;  %v13770_v33 = vld [vmem:[#allocation31_spill] sm:$0xff]  ;;  %v13774_v9 = vld [vmem:[#allocation42_spill] sm:$0xff] }
 0x4bd   : > { %5253 = vrot.lane.b32.xlu1 %v5170_v48, %s6612_s11  ;;  %v5171_v35 = vadd.f32 %v5128_v3, %v13748_v2  ;;  %v6551_v3 = vld [vmem:[#allocation2 + $0xf0] sm:$0xff] }
 0x4be   : > { %6461 = vlog2.f32 %v3688_v43 }
 0x4bf   : > { %5247 = vrot.lane.b32.xlu0 %v5167_v54, %s6612_s11  ;;  %6463 = vpow2.f32 %v2279_v20  ;;  %v3450_v54 = vpop.xlane.xlu1 %3449 }
 0x4c1   : > { %v6456_v1 = vpop.eup %6455 }
 0x4c2   : > { %v3658_v29 = vmul.f32 %v6456_v1, %v13767_v61 }
 0x4c3   : > { %4777 = vperm.xlu0 %5845, %v3686_v17   ;;  %v13765_v17 = vld [vmem:[#allocation318_spill] sm:$0xff]  ;;  %v6458_v38 = vpop.eup %6457  ;;  %v3468_v32 = vpop.xlane.xlu1 %3467 }
 0x4c4   : > { %v2222_v62 = vsub.f32 %v6548_v8, %v13765_v17  ;;  %v6460_v24 = vpop.eup %6459  ;;  %v3690_v15 = vadd.f32 %v3658_v29, %v3450_v54  ;;  %v5132_v6 = vmul.f32 0.6931472, %v6458_v38  ;;  %v13771_v8 = vld [vmem:[#allocation70_spill] sm:$0xff]  ;;  %v13773_v29 = vld [vmem:[#allocation36_spill] sm:$0xff] }
 0x4c5   : > { %v3659_v18 = vmul.f32 %v6460_v24, %v13769_v59  ;;  %vm4669_vm2 = vcmp.eq.s32.totalorder %v13773_v29, 1  ;;  %vm4668_vm3 = vcmp.eq.s32.totalorder %v13773_v29, 0 }
 0x4c6   : > { %v3441_v52 = vpop.xlane.xlu0 %3440  ;;  %v2283_v48 = vmul.f32 1.442695, %v2222_v62  ;;  %v2223_v62 = vsub.f32 %v6551_v3, %v13771_v8 }
 0x4c7   : > { %v3689_v5 = vadd.f32 %v3657_v39, %v3441_v52  ;;  %5251 = vrot.lane.b32.xlu0 %v5169_v45, %s6612_s11  ;;  %v2287_v45 = vmul.f32 1.442695, %v2224_v63 }
 0x4c8   : > { %v6462_v30 = vpop.eup %6461 }
 0x4c9   : > { %4792 = vperm.xlu1 %5847, %v3689_v5   ;;  %6465 = vlog2.f32 %v3689_v5  ;;  %v6464_v2 = vpop.eup %6463  ;;  %v5134_v19 = vmul.f32 0.6931472, %v6462_v30 }
 0x4ca   : > { %6467 = vpow2.f32 %v2283_v48  ;;  %v3660_v5 = vmul.f32 %v6464_v2, %v13770_v33  ;;  %v2285_v48 = vmul.f32 1.442695, %v2223_v62  ;;  %v13779_v62 = vld [vmem:[#allocation41_spill] sm:$0xff] }
 0x4cb   : > { %4787 = vperm.xlu0 %5845, %v3688_v43   ;;  %v5173_v43 = vadd.f32 %v5132_v6, %v13753_v41  ;;  %6469 = vpow2.f32 %v2281_v12  ;;  %v5174_v41 = vadd.f32 %v5134_v19, %v13756_v37  ;;  %v13775_v12 = vld [vmem:[#allocation324_spill] sm:$0xff] }
 0x4cd   : > { %5257 = vrot.lane.b32.xlu1 %v5172_v44, %s6612_s11  ;;  %v3692_v44 = vadd.f32 %v3660_v5, %v3468_v32  ;;  %v13778_v5 = vld [vmem:[#allocation35_spill] sm:$0xff] }
 0x4cf   : > { %5255 = vrot.lane.b32.xlu0 %v5171_v35, %s6612_s11  ;;  %v3486_v35 = vpop.xlane.xlu1 %3485 }
 0x4d3   : > { %4797 = vperm.xlu0 %5845, %v3690_v15   ;;  %v6466_v52 = vpop.eup %6465 }
 0x4d4   : > { %v5136_v1 = vmul.f32 0.6931472, %v6466_v52  ;;  %v6468_v38 = vpop.eup %6467 }
 0x4d5   : > { %v3662_v61 = vmul.f32 %v6468_v38, %v13772_v34  ;;  %v6470_v24 = vpop.eup %6469 }
 0x4d6   : > { %v3459_v39 = vpop.xlane.xlu0 %3458  ;;  %v5175_v46 = vadd.f32 %v5136_v1, %v13757_v0 }
 0x4d7   : > { %v3691_v20 = vadd.f32 %v3659_v18, %v3459_v39  ;;  %5259 = vrot.lane.b32.xlu0 %v5173_v43, %s6612_s11  ;;  %v13776_v18 = vld [vmem:[#allocation32_spill] sm:$0xff] }
 0x4d8   : > { %v3661_v32 = vmul.f32 %v6470_v24, %v13776_v18 }
 0x4d9   : > { %6471 = vlog2.f32 %v3691_v20  ;;  %4802 = vperm.xlu1 %5847, %v3691_v20   ;;  %v13777_v20 = vld [vmem:[#allocation55_spill] sm:$0xff] }
 0x4da   : > { %6473 = vlog2.f32 %v3690_v15  ;;  %v3694_v15 = vadd.f32 %v3662_v61, %v3486_v35 }
 0x4db   : > { %6475 = vpow2.f32 %v2287_v45  ;;  %4807 = vperm.xlu0 %5845, %v3692_v44  }
 0x4dc   : > { %6477 = vpow2.f32 %v2285_v48 }
 0x4dd   : > { %5261 = vrot.lane.b32.xlu1 %v5174_v41, %s6612_s11  ;;  %6479 = vlog2.f32 %v3692_v44  ;;  %v13780_v41 = vld [vmem:[#allocation61_spill] sm:$0xff] }
 0x4de   : > { %v3504_v54 = vpop.xlane.xlu1 %3503  ;;  %6481 = vlog2.f32 %v3694_v15 }
 0x4df   : > { %5263 = vrot.lane.b32.xlu0 %v5175_v46, %s6612_s11  ;;  %v13781_v46 = vld [vmem:[#allocation68_spill] sm:$0xff] }
 0x4e2   : > { %v4678_v37 = vpop.permute.xlu1 %4677 }
 0x4e3   : > { %v6472_v6 = vpop.eup %6471  ;;  %v4991_v63 = vsel %vm4669_vm2, %v4678_v37, %v13774_v9  ;;  %4817 = vperm.xlu0 %5845, %v3694_v15  }
 0x4e4   : > { %v6474_v0 = vpop.eup %6473  ;;  %v5140_v30 = vmul.f32 0.6931472, %v6472_v6  ;;  %v5023_v2 = vsel %vm4668_vm3, %v13775_v12, %v4991_v63  ;;  %v13783_v63 = vmov 2   ;;  %v13784_v12 = vld [vmem:[#allocation62_spill] sm:$0xff] }
 0x4e5   : > { %v6476_v59 = vpop.eup %6475  ;;  %5056 = vst.msk [vmem:[#allocation2 + $0x8] sm:$0xff] %vm5054_vm4, %v5023_v2  ;;  %v5138_v45 = vmul.f32 0.6931472, %v6474_v0 }
 0x4e6   : > { %v3477_v39 = vpop.xlane.xlu0 %3476  ;;  %v4683_v43 = vpop.permute.xlu1 %4682  ;;  %v5177_v52 = vadd.f32 %v5140_v30, %v13761_v25  ;;  %v3664_v3 = vmul.f32 %v6476_v59, %v13778_v5 }
 0x4e7   : > { %v3693_v19 = vadd.f32 %v3661_v32, %v3477_v39  ;;  %v4992_v33 = vsel %vm4669_vm2, %v4683_v43, %v13777_v20  ;;  %v6478_v35 = vpop.eup %6477  ;;  %v5176_v48 = vadd.f32 %v5138_v45, %v13760_v16  ;;  %v13785_v32 = vld [vmem:[#allocation38_spill] sm:$0xff] }
 0x4e8   : > { %v5024_v44 = vsel %vm4668_vm3, %v13779_v62, %v4992_v33  ;;  %5267 = vrot.lane.b32.xlu0 %v5177_v52, %s6612_s11  ;;  %v3696_v25 = vadd.f32 %v3664_v3, %v3504_v54  ;;  %v6480_v61 = vpop.eup %6479  ;;  %v13782_v54 = vld [vmem:[#allocation34_spill] sm:$0xff]  ;;  %v13786_v33 = vld [vmem:[#allocation321_spill] sm:$0xff]  ;;  %v13787_v62 = vld [vmem:[#allocation48_spill] sm:$0xff] }
 0x4e9   : > { %6483 = vlog2.f32 %v3693_v19  ;;  %5057 = vst.msk [vmem:[#allocation2 + $0x10] sm:$0xff] %vm5054_vm4, %v5024_v44  ;;  %4812 = vperm.xlu1 %5847, %v3693_v19   ;;  %v3663_v15 = vmul.f32 %v6478_v35, %v13782_v54  ;;  %v5142_v6 = vmul.f32 0.6931472, %v6480_v61  ;;  %v6482_v16 = vpop.eup %6481 }
 0x4ea   : > { %v4693_v1 = vpop.permute.xlu1 %4692  ;;  %6485 = vlog2.f32 %v3696_v25  ;;  %v5146_v59 = vmul.f32 0.6931472, %v6482_v16 }
 0x4eb   : > { %v4994_v38 = vsel %vm4669_vm2, %v4693_v1, %v13780_v41  ;;  %v5178_v43 = vadd.f32 %v5142_v6, %v13762_v55  ;;  %v13788_v1 = vld [vmem:[#allocation231_spill] sm:$0xff]  ;;  %v13789_v41 = vld [vmem:[#allocation56_spill] sm:$0xff] }
 0x4ec   : > { %v5026_v34 = vsel %vm4668_vm3, %v13781_v46, %v4994_v38  ;;  %4827 = vperm.xlu0 %5845, %v3696_v25   ;;  %v5180_v20 = vadd.f32 %v5146_v59, %v13765_v17 }
 0x4ed   : > { %5059 = vst.msk [vmem:[#allocation2 + $0x20] sm:$0xff] %vm5054_vm4, %v5026_v34  ;;  %5265 = vrot.lane.b32.xlu1 %v5176_v48, %s6612_s11  ;;  %v13790_v34 = vld [vmem:[#allocation45_spill] sm:$0xff] }
 0x4ee   : > { %v5218_v24 = vpop.permute.xlu1 %5217  ;;  %v3495_v37 = vpop.xlane.xlu0 %3494 }
 0x4ef   : > { %v3695_v9 = vadd.f32 %v3663_v15, %v3495_v37  ;;  %v5312_v35 = vsub.f32 %v13788_v1, %v5218_v24  ;;  %v13791_v37 = vld [vmem:[#allocation240_spill] sm:$0xff]  ;;  %v13800_v1 = vld [vmem:[#allocation53_spill] sm:$0xff] }
 0x4f0   : > { %5848 = vset.pattern.permute.xlu0 %v13783_v63 }
 0x4f1   : > { %4822 = vperm.xlu1 %5847, %v3695_v9   ;;  %6487 = vlog2.f32 %v3695_v9 }
 0x4f2   : > { %v4703_v0 = vpop.permute.xlu1 %4702 }
 0x4f3   : > { %v6484_v30 = vpop.eup %6483  ;;  %v4996_v2 = vsel %vm4669_vm2, %v4703_v0, %v13784_v12  ;;  %v13793_v12 = vld [vmem:[#allocation253_spill] sm:$0xff] }
 0x4f4   : > { %v5144_v18 = vmul.f32 0.6931472, %v6484_v30  ;;  %v5028_v39 = vsel %vm4668_vm3, %v13785_v32, %v4996_v2  ;;  %v6486_v3 = vpop.eup %6485 }
 0x4f5   : > { %5061 = vst.msk [vmem:[#allocation2 + $0x30] sm:$0xff] %vm5054_vm4, %v5028_v39  ;;  %5269 = vrot.lane.b32.xlu1 %v5178_v43, %s6612_s11  ;;  %v5150_v25 = vmul.f32 0.6931472, %v6486_v3  ;;  %v13795_v39 = vld [vmem:[#allocation245_spill] sm:$0xff] }
 0x4f6   : > { %v5179_v52 = vadd.f32 %v5144_v18, %v13766_v10  ;;  %v5222_v45 = vpop.permute.xlu1 %5221  ;;  %v4673_v19 = vpop.permute.xlu0 %4672 }
 0x4f7   : > { %v4990_v5 = vsel %vm4669_vm2, %v4673_v19, %v13786_v33  ;;  %v5182_v54 = vadd.f32 %v5150_v25, %v13768_v13 }
 0x4f8   : > { %5271 = vrot.lane.b32.xlu0 %v5179_v52, %s6612_s11  ;;  %v5022_v55 = vsel %vm4668_vm3, %v13787_v62, %v4990_v5 }
 0x4f9   : > { %5273 = vrot.lane.b32.xlu1 %v5180_v20, %s6612_s11  ;;  %5055 = vst.msk [vmem:[#allocation2] sm:$0xff] %vm5054_vm4, %v5022_v55  ;;  %v13797_v20 = vld [vmem:[#allocation39_spill] sm:$0xff]  ;;  %v13798_v55 = vld [vmem:[#allocation293_spill] sm:$0xff] }
 0x4fa   : > { %v4713_v10 = vpop.permute.xlu1 %4712  ;;  %v4688_v44 = vpop.permute.xlu0 %4687 }
 0x4fb   : > { %v4998_v17 = vsel %vm4669_vm2, %v4713_v10, %v11303_v40  ;;  %v4993_v38 = vsel %vm4669_vm2, %v4688_v44, %v13789_v41  ;;  %v6488_v46 = vpop.eup %6487  ;;  %v13799_v44 = vld [vmem:[#allocation237_spill] sm:$0xff] }
 0x4fc   : > { %v5030_v48 = vsel %vm4668_vm3, %v11260_v7, %v4998_v17  ;;  %v5025_v61 = vsel %vm4668_vm3, %v13790_v34, %v4993_v38  ;;  %v5148_v15 = vmul.f32 0.6931472, %v6488_v46  ;;  %v13792_v7 = vld [vmem:[#allocation64_spill] sm:$0xff]  ;;  %v13802_v38 = vld [vmem:[#allocation57_spill] sm:$0xff]  ;;  %v13803_v46 = vld [vmem:[#allocation46_spill] sm:$0xff] }
 0x4fd   : > { %5063 = vst.msk [vmem:[#allocation2 + $0x40] sm:$0xff] %vm5054_vm4, %v5030_v48  ;;  %5377 = vrot.lane.b32.xlu1 %v5312_v35, %s6613_s13  ;;  %5058 = vst.msk [vmem:[#allocation2 + $0x18] sm:$0xff] %vm5054_vm4, %v5025_v61  ;;  %v5314_v9 = vsub.f32 %v13792_v7, %v5222_v45  ;;  %v13801_v35 = vld [vmem:[#allocation69_spill] sm:$0xff] }
 0x4fe   : > { %v5226_v40 = vpop.permute.xlu1 %5225  ;;  %v5216_v24 = vpop.permute.xlu0 %5215  ;;  %v5181_v30 = vadd.f32 %v5148_v15, %v13771_v8  ;;  %v13805_v15 = vld [vmem:[#allocation203_spill] sm:$0xff] }
 0x4ff   : > { %v5311_v6 = vsub.f32 %v13791_v37, %v5216_v24  ;;  %v13804_v24 = vld [vmem:[#allocation297_spill] sm:$0xff] }
 0x501   : > { %5277 = vrot.lane.b32.xlu1 %v5182_v54, %s6612_s11  ;;  %5375 = vrot.lane.b32.xlu0 %v5311_v6, %s6613_s13 }
 0x502   : > { %v4723_v63 = vpop.permute.xlu1 %4722  ;;  %v4698_v16 = vpop.permute.xlu0 %4697 }
 0x503   : > { %v5000_v0 = vsel %vm4669_vm2, %v4723_v63, %v11334_v60  ;;  %v4995_v13 = vsel %vm4669_vm2, %v4698_v16, %v13793_v12  ;;  %v13794_v60 = vld [vmem:[#allocation249_spill] sm:$0xff]  ;;  %v13807_v16 = vld [vmem:[#allocation44_spill] sm:$0xff] }
 0x504   : > { %v5032_v2 = vsel %vm4668_vm3, %v11315_v26, %v5000_v0  ;;  %v5027_v59 = vsel %vm4668_vm3, %v11181_v58, %v4995_v13  ;;  %v5316_v8 = vsub.f32 %v13794_v60, %v5226_v40  ;;  %v13796_v26 = vld [vmem:[#allocation289_spill] sm:$0xff]  ;;  %v13809_v13 = vld [vmem:[#allocation76_spill] sm:$0xff] }
 0x505   : > { %5065 = vst.msk [vmem:[#allocation2 + $0x50] sm:$0xff] %vm5054_vm4, %v5032_v2  ;;  %5381 = vrot.lane.b32.xlu1 %v5314_v9, %s6613_s13  ;;  %5275 = vrot.lane.b32.xlu0 %v5181_v30, %s6612_s11  ;;  %5060 = vst.msk [vmem:[#allocation2 + $0x28] sm:$0xff] %vm5054_vm4, %v5027_v59  ;;  %v13806_v9 = vld [vmem:[#allocation52_spill] sm:$0xff]  ;;  %v13808_v30 = vld [vmem:[#allocation86_spill] sm:$0xff] }
 0x506   : > { %v5230_v18 = vpop.permute.xlu1 %5229  ;;  %v5220_v32 = vpop.permute.xlu0 %5219 }
 0x507   : > { %v5313_v43 = vsub.f32 %v13795_v39, %v5220_v32  ;;  %v5318_v58 = vsub.f32 %v13796_v26, %v5230_v18  ;;  %v13811_v32 = vld [vmem:[#allocation238_spill] sm:$0xff] }
 0x509   : > { %5379 = vrot.lane.b32.xlu0 %v5313_v43, %s6613_s13  ;;  %5385 = vrot.lane.b32.xlu1 %v5316_v8, %s6613_s13  ;;  %v13810_v8 = vld [vmem:[#allocation301_spill] sm:$0xff] }
 0x50a   : > { %v4733_v52 = vpop.permute.xlu1 %4732  ;;  %v4708_v45 = vpop.permute.xlu0 %4707 }
 0x50b   : > { %v5002_v19 = vsel %vm4669_vm2, %v4733_v52, %v11360_v47  ;;  %v4997_v33 = vsel %vm4669_vm2, %v4708_v45, %v13797_v20  ;;  %v13813_v45 = vld [vmem:[#allocation260_spill] sm:$0xff] }
 0x50c   : > { %v5034_v5 = vsel %vm4668_vm3, %v11396_v42, %v5002_v19  ;;  %v5029_v3 = vsel %vm4668_vm3, %v11229_v14, %v4997_v33  ;;  %v13814_v33 = vld [vmem:[#allocation248_spill] sm:$0xff] }
 0x50d   : > { %5067 = vst.msk [vmem:[#allocation2 + $0x60] sm:$0xff] %vm5054_vm4, %v5034_v5  ;;  %5062 = vst.msk [vmem:[#allocation2 + $0x38] sm:$0xff] %vm5054_vm4, %v5029_v3  ;;  %5389 = vrot.lane.b32.xlu1 %v5318_v58, %s6613_s13  ;;  %v13812_v58 = vld [vmem:[#allocation50_spill] sm:$0xff] }
 0x50e   : > { %v5234_v62 = vpop.permute.xlu1 %5233  ;;  %v5224_v47 = vpop.permute.xlu0 %5223 }
 0x50f   : > { %v5320_v10 = vsub.f32 %v13798_v55, %v5234_v62  ;;  %v5315_v17 = vsub.f32 %v13799_v44, %v5224_v47  ;;  %v13815_v47 = vld [vmem:[#allocation305_spill] sm:$0xff] }
 0x511   : > { %5383 = vrot.lane.b32.xlu0 %v5315_v17, %s6613_s13  ;;  %5393 = vrot.lane.b32.xlu1 %v5320_v10, %s6613_s13  ;;  %v13816_v10 = vld [vmem:[#allocation218_spill] sm:$0xff] }
 0x512   : > { %v4743_v42 = vpop.permute.xlu1 %4742  ;;  %v4718_v25 = vpop.permute.xlu0 %4717 }
 0x513   : > { %v5004_v14 = vsel %vm4669_vm2, %v4743_v42, %v13800_v1  ;;  %v4999_v41 = vsel %vm4669_vm2, %v4718_v25, %v13801_v35  ;;  %v13817_v42 = vld [vmem:[#allocation87_spill] sm:$0xff]  ;;  %v13818_v1 = vld [vmem:[#allocation78_spill] sm:$0xff] }
 0x514   : > { %v5036_v48 = vsel %vm4668_vm3, %v13802_v38, %v5004_v14  ;;  %v5031_v34 = vsel %vm4668_vm3, %v13803_v46, %v4999_v41  ;;  %v13819_v41 = vld [vmem:[#allocation254_spill] sm:$0xff] }
 0x515   : > { %5069 = vst.msk [vmem:[#allocation2 + $0x70] sm:$0xff] %vm5054_vm4, %v5036_v48  ;;  %5064 = vst.msk [vmem:[#allocation2 + $0x48] sm:$0xff] %vm5054_vm4, %v5031_v34  ;;  %v13820_v34 = vld [vmem:[#allocation309_spill] sm:$0xff] }
 0x516   : > { %v5238_v61 = vpop.permute.xlu1 %5237  ;;  %v5228_v40 = vpop.permute.xlu0 %5227 }
 0x517   : > { %v5322_v54 = vsub.f32 %v13804_v24, %v5238_v61  ;;  %v5317_v37 = vsub.f32 %v13805_v15, %v5228_v40  ;;  %v13821_v40 = vld [vmem:[#allocation259_spill] sm:$0xff] }
 0x519   : > { %5397 = vrot.lane.b32.xlu1 %v5322_v54, %s6613_s13  ;;  %5387 = vrot.lane.b32.xlu0 %v5317_v37, %s6613_s13  ;;  %v13823_v37 = vld [vmem:[#allocation256_spill] sm:$0xff] }
 0x51a   : > { %v4753_v6 = vpop.permute.xlu1 %4752  ;;  %v4728_v7 = vpop.permute.xlu0 %4727 }
 0x51b   : > { %v5006_v63 = vsel %vm4669_vm2, %v4753_v6, %v13806_v9  ;;  %v5001_v0 = vsel %vm4669_vm2, %v4728_v7, %v13807_v16  ;;  %v13824_v9 = vld [vmem:[#allocation288_spill] sm:$0xff] }
 0x51c   : > { %v5038_v12 = vsel %vm4668_vm3, %v13808_v30, %v5006_v63  ;;  %v5033_v2 = vsel %vm4668_vm3, %v13809_v13, %v5001_v0  ;;  %v13825_v0 = vld [vmem:[#allocation51_spill] sm:$0xff] }
 0x51d   : > { %5071 = vst.msk [vmem:[#allocation2 + $0x80] sm:$0xff] %vm5054_vm4, %v5038_v12  ;;  %5066 = vst.msk [vmem:[#allocation2 + $0x58] sm:$0xff] %vm5054_vm4, %v5033_v2  ;;  %v13826_v2 = vld [vmem:[#allocation60_spill] sm:$0xff] }
 0x51e   : > { %v5242_v59 = vpop.permute.xlu1 %5241  ;;  %v5232_v60 = vpop.permute.xlu0 %5231 }
 0x51f   : > { %v5324_v18 = vsub.f32 %v13810_v8, %v5242_v59  ;;  %v5319_v39 = vsub.f32 %v13811_v32, %v5232_v60  ;;  %v13827_v8 = vld [vmem:[#allocation77_spill] sm:$0xff] }
 0x520   : > { %v13828_v32 = vld [vmem:[#allocation313_spill] sm:$0xff] }
 0x521   : > { %5401 = vrot.lane.b32.xlu1 %v5324_v18, %s6613_s13  ;;  %5391 = vrot.lane.b32.xlu0 %v5319_v39, %s6613_s13 }
 0x522   : > { %v4763_v43 = vpop.permute.xlu1 %4762  ;;  %v4738_v26 = vpop.permute.xlu0 %4737 }
 0x523   : > { %v5008_v52 = vsel %vm4669_vm2, %v4763_v43, %v13812_v58  ;;  %v5003_v19 = vsel %vm4669_vm2, %v4738_v26, %v13813_v45  ;;  %v13830_v45 = vld [vmem:[#allocation261_spill] sm:$0xff] }
 0x524   : > { %v5040_v20 = vsel %vm4668_vm3, %v11534_v49, %v5008_v52  ;;  %v5035_v5 = vsel %vm4668_vm3, %v13814_v33, %v5003_v19 }
 0x525   : > { %5073 = vst.msk [vmem:[#allocation2 + $0x90] sm:$0xff] %vm5054_vm4, %v5040_v20  ;;  %5068 = vst.msk [vmem:[#allocation2 + $0x68] sm:$0xff] %vm5054_vm4, %v5035_v5  ;;  %v13831_v5 = vld [vmem:[#allocation296_spill] sm:$0xff] }
 0x526   : > { %v5246_v3 = vpop.permute.xlu1 %5245  ;;  %v5236_v62 = vpop.permute.xlu0 %5235 }
 0x527   : > { %v5326_v55 = vsub.f32 %v13815_v47, %v5246_v3  ;;  %v5321_v44 = vsub.f32 %v13816_v10, %v5236_v62  ;;  %v13832_v62 = vld [vmem:[#allocation103_spill] sm:$0xff] }
 0x529   : > { %5405 = vrot.lane.b32.xlu1 %v5326_v55, %s6613_s13  ;;  %5395 = vrot.lane.b32.xlu0 %v5321_v44, %s6613_s13 }
 0x52a   : > { %v4773_v17 = vpop.permute.xlu1 %4772  ;;  %v4748_v49 = vpop.permute.xlu0 %4747 }
 0x52b   : > { %v5010_v25 = vsel %vm4669_vm2, %v4773_v17, %v13817_v42  ;;  %v5005_v14 = vsel %vm4669_vm2, %v4748_v49, %v13818_v1  ;;  %v13833_v17 = vld [vmem:[#allocation317_spill] sm:$0xff]  ;;  %v13834_v42 = vld [vmem:[#allocation63_spill] sm:$0xff]  ;;  %v13835_v1 = vld [vmem:[#allocation300_spill] sm:$0xff] }
 0x52c   : > { %v5042_v35 = vsel %vm4668_vm3, %v11574_v11, %v5010_v25  ;;  %v5037_v38 = vsel %vm4668_vm3, %v13819_v41, %v5005_v14  ;;  %v13822_v11 = vld [vmem:[#allocation262_spill] sm:$0xff] }
 0x52d   : > { %5075 = vst.msk [vmem:[#allocation2 + $0xa0] sm:$0xff] %vm5054_vm4, %v5042_v35  ;;  %5070 = vst.msk [vmem:[#allocation2 + $0x78] sm:$0xff] %vm5054_vm4, %v5037_v38 }
 0x52e   : > { %v5250_v48 = vpop.permute.xlu1 %5249  ;;  %v5240_v46 = vpop.permute.xlu0 %5239 }
 0x52f   : > { %v5328_v61 = vsub.f32 %v13820_v34, %v5250_v48  ;;  %v5323_v24 = vsub.f32 %v13821_v40, %v5240_v46  ;;  %v13836_v46 = vld [vmem:[#allocation304_spill] sm:$0xff] }
 0x531   : > { %5409 = vrot.lane.b32.xlu1 %v5328_v61, %s6613_s13  ;;  %5399 = vrot.lane.b32.xlu0 %v5323_v24, %s6613_s13 }
 0x532   : > { %v4758_v54 = vpop.permute.xlu0 %4757 }
 0x533   : > { %v5007_v15 = vsel %vm4669_vm2, %v4758_v54, %v13822_v11  ;;  %v13837_v54 = vld [vmem:[#allocation322_spill] sm:$0xff] }
 0x534   : > { %v5039_v6 = vsel %vm4668_vm3, %v13823_v37, %v5007_v15  ;;  %v13838_v15 = vld [vmem:[#allocation308_spill] sm:$0xff] }
 0x535   : > { %5072 = vst.msk [vmem:[#allocation2 + $0x88] sm:$0xff] %vm5054_vm4, %v5039_v6 }
 0x536   : > { %v5244_v7 = vpop.permute.xlu0 %5243 }
 0x537   : > { %v5325_v63 = vsub.f32 %v13824_v9, %v5244_v7 }
 0x538   : > { %v4783_v16 = vpop.permute.xlu1 %4782 }
 0x539   : > { %v5012_v30 = vsel %vm4669_vm2, %v4783_v16, %v13825_v0  ;;  %5403 = vrot.lane.b32.xlu0 %v5325_v63, %s6613_s13  ;;  %v13839_v63 = vld [vmem:[#allocation312_spill] sm:$0xff] }
 0x53a   : > { %v5044_v12 = vsel %vm4668_vm3, %v11614_v53, %v5012_v30  ;;  %v4768_v13 = vpop.permute.xlu0 %4767  ;;  %v13829_v53 = vld [vmem:[#allocation292_spill] sm:$0xff]  ;;  %v13840_v30 = vld [vmem:[#allocation81_spill] sm:$0xff] }
 0x53b   : > { %5077 = vst.msk [vmem:[#allocation2 + $0xb0] sm:$0xff] %vm5054_vm4, %v5044_v12  ;;  %v5009_v59 = vsel %vm4669_vm2, %v4768_v13, %v13826_v2  ;;  %v13841_v13 = vld [vmem:[#allocation75_spill] sm:$0xff] }
 0x53c   : > { %v5254_v60 = vpop.permute.xlu1 %5253  ;;  %v5041_v18 = vsel %vm4668_vm3, %v13827_v8, %v5009_v59  ;;  %v13842_v59 = vld [vmem:[#allocation47_spill] sm:$0xff] }
 0x53d   : > { %v5330_v39 = vsub.f32 %v13828_v32, %v5254_v60  ;;  %5074 = vst.msk [vmem:[#allocation2 + $0x98] sm:$0xff] %vm5054_vm4, %v5041_v18  ;;  %v13843_v8 = vld [vmem:[#allocation251_spill] sm:$0xff]  ;;  %v13844_v32 = vld [vmem:[#allocation316_spill] sm:$0xff] }
 0x53e   : > { %v5248_v43 = vpop.permute.xlu0 %5247 }
 0x53f   : > { %5413 = vrot.lane.b32.xlu1 %v5330_v39, %s6613_s13  ;;  %v5327_v26 = vsub.f32 %v13829_v53, %v5248_v43  ;;  %v13845_v53 = vld [vmem:[#allocation71_spill] sm:$0xff] }
 0x541   : > { %5407 = vrot.lane.b32.xlu0 %v5327_v26, %s6613_s13 }
 0x542   : > { %v4778_v58 = vpop.permute.xlu0 %4777 }
 0x543   : > { %v5011_v52 = vsel %vm4669_vm2, %v4778_v58, %v11600_v36  ;;  %v13846_v58 = vld [vmem:[#allocation43_spill] sm:$0xff] }
 0x544   : > { %v5043_v19 = vsel %vm4668_vm3, %v13830_v45, %v5011_v52 }
 0x545   : > { %5076 = vst.msk [vmem:[#allocation2 + $0xa8] sm:$0xff] %vm5054_vm4, %v5043_v19 }
 0x546   : > { %v5252_v20 = vpop.permute.xlu0 %5251 }
 0x547   : > { %v5329_v3 = vsub.f32 %v13831_v5, %v5252_v20  ;;  %v13847_v20 = vld [vmem:[#allocation49_spill] sm:$0xff] }
 0x548   : > { %v4793_v33 = vpop.permute.xlu1 %4792 }
 0x549   : > { %v5014_v47 = vsel %vm4669_vm2, %v4793_v33, %v13832_v62  ;;  %5411 = vrot.lane.b32.xlu0 %v5329_v3, %s6613_s13  ;;  %v13848_v62 = vld [vmem:[#allocation320_spill] sm:$0xff] }
 0x54a   : > { %v5046_v55 = vsel %vm4668_vm3, %v11654_v27, %v5014_v47  ;;  %v4788_v36 = vpop.permute.xlu0 %4787  ;;  %v13849_v47 = vld [vmem:[#allocation252_spill] sm:$0xff] }
 0x54b   : > { %5079 = vst.msk [vmem:[#allocation2 + $0xc0] sm:$0xff] %vm5054_vm4, %v5046_v55  ;;  %v5013_v44 = vsel %vm4669_vm2, %v4788_v36, %v11640_v23 }
 0x54c   : > { %v5258_v10 = vpop.permute.xlu1 %5257  ;;  %v5045_v25 = vsel %vm4668_vm3, %v13834_v42, %v5013_v44 }
 0x54d   : > { %v5332_v49 = vsub.f32 %v13833_v17, %v5258_v10  ;;  %5078 = vst.msk [vmem:[#allocation2 + $0xb8] sm:$0xff] %vm5054_vm4, %v5045_v25  ;;  %v13850_v17 = vld [vmem:[#allocation74_spill] sm:$0xff] }
 0x54e   : > { %v5256_v27 = vpop.permute.xlu0 %5255 }
 0x54f   : > { %5417 = vrot.lane.b32.xlu1 %v5332_v49, %s6613_s13  ;;  %v5331_v14 = vsub.f32 %v13835_v1, %v5256_v27 }
 0x551   : > { %5415 = vrot.lane.b32.xlu0 %v5331_v14, %s6613_s13 }
 0x552   : > { %v4798_v35 = vpop.permute.xlu0 %4797 }
 0x553   : > { %v5015_v23 = vsel %vm4669_vm2, %v4798_v35, %v11680_v22 }
 0x554   : > { %v5047_v41 = vsel %vm4668_vm3, %v11594_v57, %v5015_v23 }
 0x555   : > { %5080 = vst.msk [vmem:[#allocation2 + $0xc8] sm:$0xff] %vm5054_vm4, %v5047_v41 }
 0x556   : > { %v5260_v38 = vpop.permute.xlu0 %5259 }
 0x557   : > { %v5333_v34 = vsub.f32 %v13836_v46, %v5260_v38 }
 0x558   : > { %v4803_v48 = vpop.permute.xlu1 %4802 }
 0x559   : > { %v5016_v61 = vsel %vm4669_vm2, %v4803_v48, %v11620_v28  ;;  %5419 = vrot.lane.b32.xlu0 %v5333_v34, %s6613_s13 }
 0x55a   : > { %v5048_v40 = vsel %vm4668_vm3, %v11694_v4, %v5016_v61  ;;  %v4808_v22 = vpop.permute.xlu0 %4807 }
 0x55b   : > { %5081 = vst.msk [vmem:[#allocation2 + $0xd0] sm:$0xff] %vm5054_vm4, %v5048_v40  ;;  %v5017_v24 = vsel %vm4669_vm2, %v4808_v22, %v11714_v21 }
 0x55c   : > { %v5262_v57 = vpop.permute.xlu1 %5261  ;;  %v5049_v28 = vsel %vm4668_vm3, %v11634_v51, %v5017_v24 }
 0x55d   : > { %v5334_v11 = vsub.f32 %v13837_v54, %v5262_v57  ;;  %5082 = vst.msk [vmem:[#allocation2 + $0xd8] sm:$0xff] %vm5054_vm4, %v5049_v28 }
 0x55e   : > { %v5264_v4 = vpop.permute.xlu0 %5263 }
 0x55f   : > { %5421 = vrot.lane.b32.xlu1 %v5334_v11, %s6613_s13  ;;  %v5335_v37 = vsub.f32 %v13838_v15, %v5264_v4 }
 0x561   : > { %5423 = vrot.lane.b32.xlu0 %v5335_v37, %s6613_s13 }
 0x562   : > { %v4818_v6 = vpop.permute.xlu0 %4817 }
 0x563   : > { %v5019_v21 = vsel %vm4669_vm2, %v4818_v6, %v11742_v56 }
 0x564   : > { %v5051_v7 = vsel %vm4668_vm3, %v11674_v31, %v5019_v21 }
 0x565   : > { %5084 = vst.msk [vmem:[#allocation2 + $0xe8] sm:$0xff] %vm5054_vm4, %v5051_v7 }
 0x566   : > { %v5268_v51 = vpop.permute.xlu0 %5267 }
 0x567   : > { %v5337_v16 = vsub.f32 %v13839_v63, %v5268_v51 }
 0x568   : > { %v4813_v9 = vpop.permute.xlu1 %4812 }
 0x569   : > { %v5018_v0 = vsel %vm4669_vm2, %v4813_v9, %v11660_v50  ;;  %5427 = vrot.lane.b32.xlu0 %v5337_v16, %s6613_s13 }
 0x56a   : > { %v5050_v12 = vsel %vm4668_vm3, %v13840_v30, %v5018_v0 }
 0x56b   : > { %5083 = vst.msk [vmem:[#allocation2 + $0xe0] sm:$0xff] %vm5054_vm4, %v5050_v12  ;;  %v4828_v56 = vpop.permute.xlu0 %4827 }
 0x56c   : > { %v5266_v31 = vpop.permute.xlu1 %5265  ;;  %v5021_v2 = vsel %vm4669_vm2, %v4828_v56, %v13841_v13 }
 0x56d   : > { %v5336_v60 = vsub.f32 %v13842_v59, %v5266_v31  ;;  %v5053_v50 = vsel %vm4668_vm3, %v13843_v8, %v5021_v2 }
 0x56e   : > { %5086 = vst.msk [vmem:[#allocation2 + $0xf8] sm:$0xff] %vm5054_vm4, %v5053_v50 }
 0x56f   : > { %5425 = vrot.lane.b32.xlu1 %v5336_v60, %s6613_s13  ;;  %v5272_v18 = vpop.permute.xlu0 %5271 }
 0x570   : > { %v5339_v39 = vsub.f32 %v13844_v32, %v5272_v18  ;;  %v4823_v43 = vpop.permute.xlu1 %4822 }
 0x571   : > { %v5020_v26 = vsel %vm4669_vm2, %v4823_v43, %v13845_v53 }
 0x572   : > { %5431 = vrot.lane.b32.xlu0 %v5339_v39, %s6613_s13  ;;  %v5052_v52 = vsel %vm4668_vm3, %v13846_v58, %v5020_v26 }
 0x573   : > { %5085 = vst.msk [vmem:[#allocation2 + $0xf0] sm:$0xff] %vm5054_vm4, %v5052_v52  ;;  %v5376_v45 = vpop.permute.xlu0 %5375 }
 0x574   : > { %v5270_v19 = vpop.permute.xlu1 %5269  ;;  %5472 = vst.msk [vmem:[%s6859_s30] sm:$0xff] %vm5471_vm5, %v5376_v45 }
 0x575   : > { %v5338_v33 = vsub.f32 %v13847_v20, %v5270_v19 }
 0x577   : > { %5429 = vrot.lane.b32.xlu1 %v5338_v33, %s6613_s13  ;;  %v5276_v5 = vpop.permute.xlu0 %5275 }
 0x578   : > { %v5274_v3 = vpop.permute.xlu1 %5273  ;;  %v5341_v29 = vsub.f32 %v13848_v62, %v5276_v5 }
 0x579   : > { %v5340_v55 = vsub.f32 %v13849_v47, %v5274_v3 }
 0x57a   : > { %5435 = vrot.lane.b32.xlu0 %v5341_v29, %s6613_s13 }
 0x57b   : > { %5433 = vrot.lane.b32.xlu1 %v5340_v55, %s6613_s13  ;;  %v5380_v36 = vpop.permute.xlu0 %5379 }
 0x57c   : > { %v5378_v10 = vpop.permute.xlu1 %5377  ;;  %5474 = vst.msk [vmem:[%s6859_s30 + $0x10] sm:$0xff] %vm5471_vm5, %v5380_v36 }
 0x57d   : > { %5473 = vst.msk [vmem:[%s6859_s30 + $0x8] sm:$0xff] %vm5471_vm5, %v5378_v10 }
 0x580   : > { %v5278_v44 = vpop.permute.xlu1 %5277 }
 0x581   : > { %v5342_v49 = vsub.f32 %v13850_v17, %v5278_v44 }
 0x583   : > { %5437 = vrot.lane.b32.xlu1 %v5342_v49, %s6613_s13  ;;  %v5384_v42 = vpop.permute.xlu0 %5383 }
 0x584   : > { %v5382_v25 = vpop.permute.xlu1 %5381  ;;  %5476 = vst.msk [vmem:[%s6859_s30 + $0x20] sm:$0xff] %vm5471_vm5, %v5384_v42 }
 0x585   : > { %5475 = vst.msk [vmem:[%s6859_s30 + $0x18] sm:$0xff] %vm5471_vm5, %v5382_v25 }
 0x588   : > { %v5386_v27 = vpop.permute.xlu1 %5385 }
 0x589   : > { %5477 = vst.msk [vmem:[%s6859_s30 + $0x28] sm:$0xff] %vm5471_vm5, %v5386_v27 }
 0x58b   : > { %v5388_v1 = vpop.permute.xlu0 %5387 }
 0x58c   : > { %v5390_v14 = vpop.permute.xlu1 %5389  ;;  %5478 = vst.msk [vmem:[%s6859_s30 + $0x30] sm:$0xff] %vm5471_vm5, %v5388_v1 }
 0x58d   : > { %5479 = vst.msk [vmem:[%s6859_s30 + $0x38] sm:$0xff] %vm5471_vm5, %v5390_v14 }
 0x590   : > { %v5394_v35 = vpop.permute.xlu1 %5393 }
 0x591   : > { %5481 = vst.msk [vmem:[%s6859_s30 + $0x48] sm:$0xff] %vm5471_vm5, %v5394_v35 }
 0x593   : > { %v5392_v23 = vpop.permute.xlu0 %5391 }
 0x594   : > { %5480 = vst.msk [vmem:[%s6859_s30 + $0x40] sm:$0xff] %vm5471_vm5, %v5392_v23  ;;  %v5398_v41 = vpop.permute.xlu1 %5397 }
 0x595   : > { %5483 = vst.msk [vmem:[%s6859_s30 + $0x58] sm:$0xff] %vm5471_vm5, %v5398_v41 }
 0x598   : > { %v5402_v38 = vpop.permute.xlu1 %5401 }
 0x599   : > { %5485 = vst.msk [vmem:[%s6859_s30 + $0x68] sm:$0xff] %vm5471_vm5, %v5402_v38 }
 0x59b   : > { %v5396_v48 = vpop.permute.xlu0 %5395 }
 0x59c   : > { %5482 = vst.msk [vmem:[%s6859_s30 + $0x50] sm:$0xff] %vm5471_vm5, %v5396_v48  ;;  %v5406_v46 = vpop.permute.xlu1 %5405 }
 0x59d   : > { %5487 = vst.msk [vmem:[%s6859_s30 + $0x78] sm:$0xff] %vm5471_vm5, %v5406_v46 }
 0x5a3   : > { %v5410_v34 = vpop.permute.xlu1 %5409  ;;  %v5400_v61 = vpop.permute.xlu0 %5399 }
 0x5a4   : > { %5489 = vst.msk [vmem:[%s6859_s30 + $0x88] sm:$0xff] %vm5471_vm5, %v5410_v34  ;;  %5484 = vst.msk [vmem:[%s6859_s30 + $0x60] sm:$0xff] %vm5471_vm5, %v5400_v61 }
 0x5ab   : > { %v5404_v40 = vpop.permute.xlu0 %5403 }
 0x5ac   : > { %5486 = vst.msk [vmem:[%s6859_s30 + $0x70] sm:$0xff] %vm5471_vm5, %v5404_v40 }
 0x5b1   : > { %v5414_v22 = vpop.permute.xlu1 %5413 }
 0x5b2   : > { %5491 = vst.msk [vmem:[%s6859_s30 + $0x98] sm:$0xff] %vm5471_vm5, %v5414_v22 }
 0x5b3   : > { %v5408_v57 = vpop.permute.xlu0 %5407 }
 0x5b4   : > { %5488 = vst.msk [vmem:[%s6859_s30 + $0x80] sm:$0xff] %vm5471_vm5, %v5408_v57 }
 0x5bb   : > { %v5412_v24 = vpop.permute.xlu0 %5411 }
 0x5bc   : > { %5490 = vst.msk [vmem:[%s6859_s30 + $0x90] sm:$0xff] %vm5471_vm5, %v5412_v24 }
 0x5c1   : > { %v5418_v54 = vpop.permute.xlu1 %5417 }
 0x5c2   : > { %5493 = vst.msk [vmem:[%s6859_s30 + $0xa8] sm:$0xff] %vm5471_vm5, %v5418_v54 }
 0x5c3   : > { %v5416_v11 = vpop.permute.xlu0 %5415 }
 0x5c4   : > { %5492 = vst.msk [vmem:[%s6859_s30 + $0xa0] sm:$0xff] %vm5471_vm5, %v5416_v11 }
 0x5cb   : > { %v5420_v28 = vpop.permute.xlu0 %5419 }
 0x5cc   : > { %5494 = vst.msk [vmem:[%s6859_s30 + $0xb0] sm:$0xff] %vm5471_vm5, %v5420_v28 }
 0x5d1   : > { %v5422_v4 = vpop.permute.xlu1 %5421 }
 0x5d2   : > { %5495 = vst.msk [vmem:[%s6859_s30 + $0xb8] sm:$0xff] %vm5471_vm5, %v5422_v4 }
 0x5d3   : > { %v5424_v15 = vpop.permute.xlu0 %5423 }
 0x5d4   : > { %5496 = vst.msk [vmem:[%s6859_s30 + $0xc0] sm:$0xff] %vm5471_vm5, %v5424_v15 }
 0x5db   : > { %v5428_v37 = vpop.permute.xlu0 %5427 }
 0x5dc   : > { %5498 = vst.msk [vmem:[%s6859_s30 + $0xd0] sm:$0xff] %vm5471_vm5, %v5428_v37 }
 0x5e1   : > { %v5426_v6 = vpop.permute.xlu1 %5425 }
 0x5e2   : > { %5497 = vst.msk [vmem:[%s6859_s30 + $0xc8] sm:$0xff] %vm5471_vm5, %v5426_v6 }
 0x5e4   : > { %v5432_v21 = vpop.permute.xlu0 %5431 }
 0x5e5   : > { %5500 = vst.msk [vmem:[%s6859_s30 + $0xe0] sm:$0xff] %vm5471_vm5, %v5432_v21 }
 0x5e9   : > { %v5430_v7 = vpop.permute.xlu1 %5429 }
 0x5ea   : > { %5499 = vst.msk [vmem:[%s6859_s30 + $0xd8] sm:$0xff] %vm5471_vm5, %v5430_v7 }
 0x5ec   : > { %v5436_v51 = vpop.permute.xlu0 %5435 }
 0x5ed   : > { %v5434_v9 = vpop.permute.xlu1 %5433  ;;  %5502 = vst.msk [vmem:[%s6859_s30 + $0xf0] sm:$0xff] %vm5471_vm5, %v5436_v51 }
 0x5ee   : > { %5501 = vst.msk [vmem:[%s6859_s30 + $0xe8] sm:$0xff] %vm5471_vm5, %v5434_v9 }
 0x5f5   : > { %v5438_v63 = vpop.permute.xlu1 %5437 }
 0x5f6   : > { %5503 = vst.msk [vmem:[%s6859_s30 + $0xf8] sm:$0xff] %vm5471_vm5, %v5438_v63 }
 0x5f7 PF: > { %s14_s21 = sadd.s32 1, %s6606_s21   ;;  %s13851_s15 = smov %s6586_s16 }
 0x5f8   : > { %p11_p13 = scmp.ge.s32.totalorder %s14_s21, 6   ;;  %s13852_s16 = smov %s6688_s26 }
 0x5f9   : > { %s13853_s17 = smov %s6598_s19  ;;  %s13854_s18 = smov %s6602_s20 }
 0x5fa   : > { %s13855_s19 = smov %s13858_s22  ;;  %s13856_s20 = smov %s13862_s23 }
 0x5fb   :  { %13 = sbr.rel (!%p11_p13) target bundleno = 4 (0x4), region = 111 }

</bundles_post_ra>
